<compile_context>
chip_gen: v5e
topology: v5e:2x2
jax: 0.10.0
libtpu: 0.0.40
codegen_flags: <defaults>
</compile_context>

<pallas_src>
import functools

import jax
import jax.numpy as jnp
import numpy as np
from jax.experimental import pallas as pl
from jax.experimental.pallas import tpu as pltpu

EPS = 1e-5
LANE = 128   # TPU lane width; channels are padded to a multiple of this.


def _round_up(x, m):
    return (x + m - 1) // m * m


# ----------------------------------------------------------------------------
# Fused ResBlock kernel (one batch element per grid step)
# ----------------------------------------------------------------------------
def _resblock_kernel(*refs, downsample, Ho, Wo, C):
    """relu(conv_bn2(relu(conv_bn1(x))) + shortcut(x)), whole block fused.

    downsample=True : x_ref holds the 4 stride-2 spatial phases of the haloed
                      input stacked along dim 1 -> block (1, 4*(Ho+1), Ho+1, C).
    downsample=False: x_ref holds the pre-haloed input (1, Ho+2, Wo+2, C).
    Conv weights carry the folded BN scale, reshaped (9*C, C) bf16; biases f32.
    Output is written pre-haloed: (1, Ho+2, Wo+2, C) with a zero 1-px border.
    """
    if downsample:
        (x_ref, w1_ref, b1_ref, w2_ref, b2_ref,
         wsc_ref, bsc_ref, o_ref, xb_ref, im_ref, hb_ref) = refs
    else:
        (x_ref, w1_ref, b1_ref, w2_ref, b2_ref,
         o_ref, xb_ref, im_ref, hb_ref) = refs

    M = Ho * Wo
    PH = Ho + 1                                    # rows per stride-2 phase

    # ---- cast the whole input block to bf16 ONCE ----------------------------
    xb_ref[...] = x_ref[0].astype(jnp.bfloat16)

    # ---- conv1: build (M, 9C) im2col slab, then ONE K=9C MXU dot -------------
    for kh in range(3):
        for kw in range(3):
            t = kh * 3 + kw
            if downsample:
                p = (kh % 2) * 2 + (kw % 2)        # spatial phase index
                dh, dw = kh // 2, kw // 2
                slab = xb_ref[p * PH + dh: p * PH + dh + Ho, dw: dw + Wo, :]
            else:
                slab = xb_ref[kh: kh + Ho, kw: kw + Wo, :]
            im_ref[:, t * C:(t + 1) * C] = slab.reshape(M, C)
    acc = jnp.dot(im_ref[...], w1_ref[...], preferred_element_type=jnp.float32)
    h = jnp.maximum(acc + b1_ref[...], 0.0)        # folded-BN bias + ReLU (f32)

    # ---- park h (bf16) in a haloed scratch; zero ONLY the 1-px border --------
    zrow = jnp.zeros((1, Wo + 2, C), jnp.bfloat16)
    zcol = jnp.zeros((Ho, 1, C), jnp.bfloat16)
    hb_ref[0:1, :, :] = zrow
    hb_ref[Ho + 1:Ho + 2, :, :] = zrow
    hb_ref[1:Ho + 1, 0:1, :] = zcol
    hb_ref[1:Ho + 1, Wo + 1:Wo + 2, :] = zcol
    hb_ref[1:Ho + 1, 1:Wo + 1, :] = h.astype(jnp.bfloat16).reshape(Ho, Wo, C)

    # ---- shortcut / residual --------------------------------------------------
    if downsample:
        # 1x1 stride-2 conv + BN: its input rows are exactly phase (1,1) of the
        # already-resident bf16 copy -- no extra gather or kernel launch.
        xs = xb_ref[3 * PH: 3 * PH + Ho, 0:Wo, :].reshape(M, C)
        residual = jnp.dot(xs, wsc_ref[...],
                           preferred_element_type=jnp.float32) + bsc_ref[...]
    else:
        residual = x_ref[0, 1:Ho + 1, 1:Wo + 1, :].reshape(M, C)   # exact f32

    # ---- conv2: rebuild im2col from hb, ONE dot, fused epilogue ---------------
    for kh in range(3):
        for kw in range(3):
            t = kh * 3 + kw
            slab = hb_ref[kh: kh + Ho, kw: kw + Wo, :]
            im_ref[:, t * C:(t + 1) * C] = slab.reshape(M, C)
    acc2 = jnp.dot(im_ref[...], w2_ref[...], preferred_element_type=jnp.float32)
    out = jnp.maximum(acc2 + b2_ref[...] + residual, 0.0)

    # ---- write PRE-HALOED output: zero border + interior store ----------------
    ozrow = jnp.zeros((1, Wo + 2, C), jnp.float32)
    ozcol = jnp.zeros((Ho, 1, C), jnp.float32)
    o_ref[0, 0:1, :, :] = ozrow
    o_ref[0, Ho + 1:Ho + 2, :, :] = ozrow
    o_ref[0, 1:Ho + 1, 0:1, :] = ozcol
    o_ref[0, 1:Ho + 1, Wo + 1:Wo + 2, :] = ozcol
    o_ref[0, 1:Ho + 1, 1:Wo + 1, :] = out.reshape(Ho, Wo, C).astype(o_ref.dtype)


# ----------------------------------------------------------------------------
# Parameter prep: fold BN scale into weights, pad channels to the lane width
# ----------------------------------------------------------------------------
def _fold_bn(gamma, beta, mean, var):
    scale = gamma / jnp.sqrt(var + EPS)
    bias = beta - mean * scale
    return scale, bias


def _prep_conv3x3(w_pt, bn, cpad):
    """[Cout,Cin,3,3] + BN -> scale-folded (9*cpad, cpad) bf16, (1, cpad) f32 bias."""
    cout, cin = w_pt.shape[0], w_pt.shape[1]
    scale, bias = _fold_bn(*bn)
    w = jnp.transpose(w_pt, (2, 3, 1, 0)).reshape(9, cin, cout) * scale.reshape(1, 1, cout)
    wp = jnp.zeros((9, cpad, cpad), jnp.float32).at[:, :cin, :cout].set(w)
    bp = jnp.zeros((1, cpad), jnp.float32).at[0, :cout].set(bias)
    return wp.reshape(9 * cpad, cpad).astype(jnp.bfloat16), bp


def _prep_conv1x1(w_pt, bn, cpad):
    cout, cin = w_pt.shape[0], w_pt.shape[1]
    scale, bias = _fold_bn(*bn)
    w = w_pt.reshape(cout, cin).T * scale.reshape(1, cout)
    wp = jnp.zeros((cpad, cpad), jnp.float32).at[:cin, :cout].set(w)
    bp = jnp.zeros((1, cpad), jnp.float32).at[0, :cout].set(bias)
    return wp.astype(jnp.bfloat16), bp


# ----------------------------------------------------------------------------
# Wrapper: one pallas_call per ResBlock; activations travel pre-haloed
# ----------------------------------------------------------------------------
def res_block_pallas(x_haloed, params, cpad):
    """x_haloed: (N, H+2, W+2, cpad) f32 NHWC with a zero 1-px spatial halo.
    Returns the pre-haloed block output (N, Ho+2, Wo+2, cpad) f32."""
    N, Hp, Wp, _ = x_haloed.shape
    H, W = Hp - 2, Wp - 2
    downsample = "wsc" in params
    stride = 2 if downsample else 1
    Ho, Wo = H // stride, W // stride
    PH = Ho + 1

    w1, b1 = _prep_conv3x3(params["w1"], params["bn1"], cpad)
    w2, b2 = _prep_conv3x3(params["w2"], params["bn2"], cpad)

    if downsample:
        # Pre-split the haloed input into its 4 stride-2 spatial phases (same
        # total bytes): every in-kernel tap becomes a contiguous static slice
        # and the 1x1-stride-2 shortcut input is exactly phase (1,1).
        phases = [x_haloed[:, ph::2, pw::2, :] for ph in (0, 1) for pw in (0, 1)]
        xin = jnp.concatenate(phases, axis=1)                  # (N, 4*PH, PH, cpad)
        x_spec = pl.BlockSpec((1, 4 * PH, PH, cpad), lambda n: (n, 0, 0, 0))
        xb_shape = (4 * PH, PH, cpad)
    else:
        xin = x_haloed                                         # (N, Ho+2, Wo+2, cpad)
        x_spec = pl.BlockSpec((1, Ho + 2, Wo + 2, cpad), lambda n: (n, 0, 0, 0))
        xb_shape = (Ho + 2, Wo + 2, cpad)

    # TODO(synk): at realistic channel widths, single-buffer these resident
    # weight/bias specs (pipeline_mode=pl.Buffered(1)) to save VMEM on v7x.
    w_spec = pl.BlockSpec((9 * cpad, cpad), lambda n: (0, 0))
    b_spec = pl.BlockSpec((1, cpad), lambda n: (0, 0))

    in_specs = [x_spec, w_spec, b_spec, w_spec, b_spec]
    args = [xin, w1, b1, w2, b2]
    if downsample:
        wsc, bsc = _prep_conv1x1(params["wsc"], params["bnsc"], cpad)
        in_specs += [pl.BlockSpec((cpad, cpad), lambda n: (0, 0)), b_spec]
        args += [wsc, bsc]

    # VMEM budget from the actual per-step footprint (double-buffered blocks +
    # resident weights + scratches) with 3x headroom; no hard 32 MiB constant.
    in_blk = 4 * int(np.prod(xin.shape[1:]))
    out_blk = 4 * (Ho + 2) * (Wo + 2) * cpad
    consts = 2 * (int(w1.size) + int(w2.size)) + 4 * 2 * cpad
    if downsample:
        consts += 2 * cpad * cpad + 4 * cpad
    scratch = 2 * (int(np.prod(xb_shape)) + Ho * Wo * 9 * cpad
                   + (Ho + 2) * (Wo + 2) * cpad)
    est = 2 * (in_blk + out_blk) + 2 * consts + scratch
    vmem_limit = int(min(48 * 1024 * 1024, max(16 * 1024 * 1024, 3 * est)))

    kernel = functools.partial(_resblock_kernel, downsample=downsample,
                               Ho=Ho, Wo=Wo, C=cpad)
    return pl.pallas_call(
        kernel,
        out_shape=jax.ShapeDtypeStruct((N, Ho + 2, Wo + 2, cpad), jnp.float32),
        grid=(N,),
        in_specs=in_specs,
        out_specs=pl.BlockSpec((1, Ho + 2, Wo + 2, cpad), lambda n: (n, 0, 0, 0)),
        scratch_shapes=[
            pltpu.VMEM(xb_shape, jnp.bfloat16),                # bf16 input copy
            pltpu.VMEM((Ho * Wo, 9 * cpad), jnp.bfloat16),     # im2col slab (both convs)
            pltpu.VMEM((Ho + 2, Wo + 2, cpad), jnp.bfloat16),  # haloed h
        ],
        compiler_params=pltpu.CompilerParams(
            dimension_semantics=("parallel",),    # shard batch over TCs (v7x)
            vmem_limit_bytes=vmem_limit,
        ),
    )(*args)


def resnet_layer_pallas(x_nchw, blocks_params):
    x = jnp.transpose(x_nchw, (0, 2, 3, 1))                    # NCHW -> NHWC
    in_c = x.shape[-1]
    out_c = blocks_params[0]["w1"].shape[0]
    cpad = _round_up(max(in_c, out_c, LANE), LANE)              # lane-dense channels
    # Single halo + lane pad at layer entry; blocks exchange pre-haloed tensors.
    x = jnp.pad(x, ((0, 0), (1, 1), (1, 1), (0, cpad - in_c)))
    for p in blocks_params:
        x = res_block_pallas(x, p, cpad)
    x = x[:, 1:-1, 1:-1, :out_c]                                # strip halo + channel pad
    return jnp.transpose(x, (0, 3, 1, 2))                       # NHWC -> NCHW


# ----------------------------------------------------------------------------
# Parameter initialisation (matches the PyTorch module, BN in eval mode)
# ----------------------------------------------------------------------------
def init_bn(key, c):
    k1, k2, k3, k4 = jax.random.split(key, 4)
    gamma = 1.0 + 0.1 * jax.random.normal(k1, (c,), jnp.float32)
    beta = 0.1 * jax.random.normal(k2, (c,), jnp.float32)
    mean = 0.1 * jax.random.normal(k3, (c,), jnp.float32)
    var = 1.0 + 0.5 * jax.random.uniform(k4, (c,), jnp.float32)
    return gamma, beta, mean, var


def init_conv(key, cout, cin, kh, kw):
    fan_in = cin * kh * kw
    return jax.random.normal(key, (cout, cin, kh, kw), jnp.float32) / np.sqrt(fan_in)


def init_resblock(key, in_c, out_c):
    ks = jax.random.split(key, 6)
    p = {
        "w1": init_conv(ks[0], out_c, in_c, 3, 3),    # conv_bn #1 (stride s)
        "bn1": init_bn(ks[1], out_c),
        "w2": init_conv(ks[2], out_c, out_c, 3, 3),   # conv_bn #2 (stride 1)
        "bn2": init_bn(ks[3], out_c),
    }
    if in_c != out_c:
        p["wsc"] = init_conv(ks[4], out_c, in_c, 1, 1)    # 1x1, stride 2
        p["bnsc"] = init_bn(ks[5], out_c)
    return p


# ----------------------------------------------------------------------------
# Pure-JAX reference (lax.conv, f32) for correctness checking
# ----------------------------------------------------------------------------
def _conv_ref(x, w_pt, stride, pad):
    w = jnp.transpose(w_pt, (2, 3, 1, 0))             # OIHW -> HWIO
    return jax.lax.conv_general_dilated(
        x, w, (stride, stride), ((pad, pad), (pad, pad)),
        dimension_numbers=("NHWC", "HWIO", "NHWC"))


def _bn_ref(x, bn):
    gamma, beta, mean, var = bn
    return (x - mean) / jnp.sqrt(var + EPS) * gamma + beta


def res_block_ref(x, params):
    in_c = x.shape[-1]
    out_c = params["w1"].shape[0]
    stride = 2 if in_c != out_c else 1
    if in_c != out_c:
        residual = _bn_ref(_conv_ref(x, params["wsc"], 2, 0), params["bnsc"])
    else:
        residual = x
    h = jax.nn.relu(_bn_ref(_conv_ref(x, params["w1"], stride, 1), params["bn1"]))
    h = _bn_ref(_conv_ref(h, params["w2"], 1, 1), params["bn2"])
    return jax.nn.relu(h + residual)


def resnet_layer_ref(x_nchw, blocks_params):
    x = jnp.transpose(x_nchw, (0, 2, 3, 1))
    for p in blocks_params:
        x = res_block_ref(x, p)
    return jnp.transpose(x, (0, 3, 1, 2))


# ----------------------------------------------------------------------------
if __name__ == "__main__":
    # ResNetLayer(in_channels=4, out_channels=8, num_blocks=2)
    batch, in_channels, out_channels, spatial, num_blocks = 2, 4, 8, 16, 2

    key = jax.random.PRNGKey(0)
    kx, kp = jax.random.split(key)
    x = jax.random.normal(kx, (batch, in_channels, spatial, spatial), jnp.float32)

    block_keys = jax.random.split(kp, num_blocks)
    blocks_params = [init_resblock(block_keys[0], in_channels, out_channels)]
    for i in range(1, num_blocks):
        blocks_params.append(init_resblock(block_keys[i], out_channels, out_channels))

    out = jax.jit(lambda x_: resnet_layer_pallas(x_, blocks_params))(x)
    out = jax.block_until_ready(out)

    ref = jax.block_until_ready(resnet_layer_ref(x, blocks_params))
    # bf16 MXU operands (f32 accumulation) -> loosened tolerance vs f32 reference.
    np.testing.assert_allclose(np.asarray(out), np.asarray(ref), rtol=5e-2, atol=5e-2)

    assert out.shape == (batch, out_channels, spatial // 2, spatial // 2)
    print("KERNEL_OK")
</pallas_src>

<mosaic_0001>
module attributes {stable_mosaic.version = 11 : i64} {
  func.func @_resblock_kernel(%arg0: i32, %arg1: memref<1x10x10x128xf32, #tpu.memory_space<vmem>>, %arg2: memref<1152x128xbf16, #tpu.memory_space<vmem>>, %arg3: memref<1x128xf32, #tpu.memory_space<vmem>>, %arg4: memref<1152x128xbf16, #tpu.memory_space<vmem>>, %arg5: memref<1x128xf32, #tpu.memory_space<vmem>>, %arg6: memref<1x10x10x128xf32, #tpu.memory_space<vmem>>, %arg7: memref<10x10x128xbf16, #tpu.memory_space<vmem>>, %arg8: memref<64x1152xbf16, #tpu.memory_space<vmem>>, %arg9: memref<10x10x128xbf16, #tpu.memory_space<vmem>>) attributes {dimension_semantics = [#tpu.dimension_semantics<parallel>], iteration_bounds = array<i64: 2>, scalar_prefetch = 0 : i64, scratch_operands = 3 : i64, tpu.core_type = #tpu.core_type<tc>, window_params = [{transform_indices = @transform_0, window_bounds = array<i64: 1, 10, 10, 128>}, {pipeline_mode = #tpu.pipeline_mode<synchronous>, transform_indices = @transform_1, window_bounds = array<i64: 1152, 128>}, {pipeline_mode = #tpu.pipeline_mode<synchronous>, transform_indices = @transform_2, window_bounds = array<i64: 1, 128>}, {pipeline_mode = #tpu.pipeline_mode<synchronous>, transform_indices = @transform_3, window_bounds = array<i64: 1152, 128>}, {pipeline_mode = #tpu.pipeline_mode<synchronous>, transform_indices = @transform_4, window_bounds = array<i64: 1, 128>}, {transform_indices = @transform_5, window_bounds = array<i64: 1, 10, 10, 128>}]} {
    %c0 = arith.constant 0 : index
    %c0_0 = arith.constant 0 : index
    %c0_1 = arith.constant 0 : index
    %c0_2 = arith.constant 0 : index
    %0 = vector.load %arg1[%c0, %c0_0, %c0_1, %c0_2] : memref<1x10x10x128xf32, #tpu.memory_space<vmem>>, vector<1x10x10x128xf32>
    %1 = vector.shape_cast %0 : vector<1x10x10x128xf32> to vector<10x10x128xf32>
    %2 = arith.truncf %1 : vector<10x10x128xf32> to vector<10x10x128xbf16>
    %c0_3 = arith.constant 0 : index
    %c0_4 = arith.constant 0 : index
    %c0_5 = arith.constant 0 : index
    %3 = vector.load %arg7[%c0_3, %c0_4, %c0_5] : memref<10x10x128xbf16, #tpu.memory_space<vmem>>, vector<10x10x128xbf16>
    tpu.vector_store %arg7[%c0_3, %c0_4, %c0_5], %2 {strides = array<i32>} : memref<10x10x128xbf16, #tpu.memory_space<vmem>>, vector<10x10x128xbf16>,
    %c0_6 = arith.constant 0 : index
    %c0_7 = arith.constant 0 : index
    %c0_8 = arith.constant 0 : index
    %4 = vector.load %arg7[%c0_6, %c0_7, %c0_8] : memref<10x10x128xbf16, #tpu.memory_space<vmem>>, vector<8x8x128xbf16>
    %5 = vector.shape_cast %4 : vector<8x8x128xbf16> to vector<64x128xbf16>
    %c0_9 = arith.constant 0 : index
    %c0_10 = arith.constant 0 : index
    %6 = vector.load %arg8[%c0_9, %c0_10] : memref<64x1152xbf16, #tpu.memory_space<vmem>>, vector<64x128xbf16>
    tpu.vector_store %arg8[%c0_9, %c0_10], %5 {strides = array<i32>} : memref<64x1152xbf16, #tpu.memory_space<vmem>>, vector<64x128xbf16>,
    %c0_11 = arith.constant 0 : index
    %c1 = arith.constant 1 : index
    %c0_12 = arith.constant 0 : index
    %7 = vector.load %arg7[%c0_11, %c1, %c0_12] : memref<10x10x128xbf16, #tpu.memory_space<vmem>>, vector<8x8x128xbf16>
    %8 = vector.shape_cast %7 : vector<8x8x128xbf16> to vector<64x128xbf16>
    %c0_13 = arith.constant 0 : index
    %c128 = arith.constant 128 : index
    %9 = vector.load %arg8[%c0_13, %c128] : memref<64x1152xbf16, #tpu.memory_space<vmem>>, vector<64x128xbf16>
    tpu.vector_store %arg8[%c0_13, %c128], %8 {strides = array<i32>} : memref<64x1152xbf16, #tpu.memory_space<vmem>>, vector<64x128xbf16>,
    %c0_14 = arith.constant 0 : index
    %c2 = arith.constant 2 : index
    %c0_15 = arith.constant 0 : index
    %10 = vector.load %arg7[%c0_14, %c2, %c0_15] : memref<10x10x128xbf16, #tpu.memory_space<vmem>>, vector<8x8x128xbf16>
    %11 = vector.shape_cast %10 : vector<8x8x128xbf16> to vector<64x128xbf16>
    %c0_16 = arith.constant 0 : index
    %c256 = arith.constant 256 : index
    %12 = vector.load %arg8[%c0_16, %c256] : memref<64x1152xbf16, #tpu.memory_space<vmem>>, vector<64x128xbf16>
    tpu.vector_store %arg8[%c0_16, %c256], %11 {strides = array<i32>} : memref<64x1152xbf16, #tpu.memory_space<vmem>>, vector<64x128xbf16>,
    %c1_17 = arith.constant 1 : index
    %c0_18 = arith.constant 0 : index
    %c0_19 = arith.constant 0 : index
    %13 = vector.load %arg7[%c1_17, %c0_18, %c0_19] : memref<10x10x128xbf16, #tpu.memory_space<vmem>>, vector<8x8x128xbf16>
    %14 = vector.shape_cast %13 : vector<8x8x128xbf16> to vector<64x128xbf16>
    %c0_20 = arith.constant 0 : index
    %c384 = arith.constant 384 : index
    %15 = vector.load %arg8[%c0_20, %c384] : memref<64x1152xbf16, #tpu.memory_space<vmem>>, vector<64x128xbf16>
    tpu.vector_store %arg8[%c0_20, %c384], %14 {strides = array<i32>} : memref<64x1152xbf16, #tpu.memory_space<vmem>>, vector<64x128xbf16>,
    %c1_21 = arith.constant 1 : index
    %c1_22 = arith.constant 1 : index
    %c0_23 = arith.constant 0 : index
    %16 = vector.load %arg7[%c1_21, %c1_22, %c0_23] : memref<10x10x128xbf16, #tpu.memory_space<vmem>>, vector<8x8x128xbf16>
    %17 = vector.shape_cast %16 : vector<8x8x128xbf16> to vector<64x128xbf16>
    %c0_24 = arith.constant 0 : index
    %c512 = arith.constant 512 : index
    %18 = vector.load %arg8[%c0_24, %c512] : memref<64x1152xbf16, #tpu.memory_space<vmem>>, vector<64x128xbf16>
    tpu.vector_store %arg8[%c0_24, %c512], %17 {strides = array<i32>} : memref<64x1152xbf16, #tpu.memory_space<vmem>>, vector<64x128xbf16>,
    %c1_25 = arith.constant 1 : index
    %c2_26 = arith.constant 2 : index
    %c0_27 = arith.constant 0 : index
    %19 = vector.load %arg7[%c1_25, %c2_26, %c0_27] : memref<10x10x128xbf16, #tpu.memory_space<vmem>>, vector<8x8x128xbf16>
    %20 = vector.shape_cast %19 : vector<8x8x128xbf16> to vector<64x128xbf16>
    %c0_28 = arith.constant 0 : index
    %c640 = arith.constant 640 : index
    %21 = vector.load %arg8[%c0_28, %c640] : memref<64x1152xbf16, #tpu.memory_space<vmem>>, vector<64x128xbf16>
    tpu.vector_store %arg8[%c0_28, %c640], %20 {strides = array<i32>} : memref<64x1152xbf16, #tpu.memory_space<vmem>>, vector<64x128xbf16>,
    %c2_29 = arith.constant 2 : index
    %c0_30 = arith.constant 0 : index
    %c0_31 = arith.constant 0 : index
    %22 = vector.load %arg7[%c2_29, %c0_30, %c0_31] : memref<10x10x128xbf16, #tpu.memory_space<vmem>>, vector<8x8x128xbf16>
    %23 = vector.shape_cast %22 : vector<8x8x128xbf16> to vector<64x128xbf16>
    %c0_32 = arith.constant 0 : index
    %c768 = arith.constant 768 : index
    %24 = vector.load %arg8[%c0_32, %c768] : memref<64x1152xbf16, #tpu.memory_space<vmem>>, vector<64x128xbf16>
    tpu.vector_store %arg8[%c0_32, %c768], %23 {strides = array<i32>} : memref<64x1152xbf16, #tpu.memory_space<vmem>>, vector<64x128xbf16>,
    %c2_33 = arith.constant 2 : index
    %c1_34 = arith.constant 1 : index
    %c0_35 = arith.constant 0 : index
    %25 = vector.load %arg7[%c2_33, %c1_34, %c0_35] : memref<10x10x128xbf16, #tpu.memory_space<vmem>>, vector<8x8x128xbf16>
    %26 = vector.shape_cast %25 : vector<8x8x128xbf16> to vector<64x128xbf16>
    %c0_36 = arith.constant 0 : index
    %c896 = arith.constant 896 : index
    %27 = vector.load %arg8[%c0_36, %c896] : memref<64x1152xbf16, #tpu.memory_space<vmem>>, vector<64x128xbf16>
    tpu.vector_store %arg8[%c0_36, %c896], %26 {strides = array<i32>} : memref<64x1152xbf16, #tpu.memory_space<vmem>>, vector<64x128xbf16>,
    %c2_37 = arith.constant 2 : index
    %c2_38 = arith.constant 2 : index
    %c0_39 = arith.constant 0 : index
    %28 = vector.load %arg7[%c2_37, %c2_38, %c0_39] : memref<10x10x128xbf16, #tpu.memory_space<vmem>>, vector<8x8x128xbf16>
    %29 = vector.shape_cast %28 : vector<8x8x128xbf16> to vector<64x128xbf16>
    %c0_40 = arith.constant 0 : index
    %c1024 = arith.constant 1024 : index
    %30 = vector.load %arg8[%c0_40, %c1024] : memref<64x1152xbf16, #tpu.memory_space<vmem>>, vector<64x128xbf16>
    tpu.vector_store %arg8[%c0_40, %c1024], %29 {strides = array<i32>} : memref<64x1152xbf16, #tpu.memory_space<vmem>>, vector<64x128xbf16>,
    %c0_41 = arith.constant 0 : index
    %c0_42 = arith.constant 0 : index
    %31 = vector.load %arg8[%c0_41, %c0_42] : memref<64x1152xbf16, #tpu.memory_space<vmem>>, vector<64x1152xbf16>
    %c0_43 = arith.constant 0 : index
    %c0_44 = arith.constant 0 : index
    %32 = vector.load %arg2[%c0_43, %c0_44] : memref<1152x128xbf16, #tpu.memory_space<vmem>>, vector<1152x128xbf16>
    %cst = arith.constant dense<0.000000e+00> : vector<64x128xf32>
    %33 = tpu.matmul %31, %32, %cst {dimension_numbers = #tpu.dot_dimension_numbers<[1], [0], [0], [1], [0, 0, 1, 1], [], []>} : vector<64x1152xbf16>, vector<1152x128xbf16>, vector<64x128xf32> -> vector<64x128xf32>
    %c0_45 = arith.constant 0 : index
    %c0_46 = arith.constant 0 : index
    %34 = vector.load %arg3[%c0_45, %c0_46] : memref<1x128xf32, #tpu.memory_space<vmem>>, vector<1x128xf32>
    %35 = vector.broadcast %34 : vector<1x128xf32> to vector<64x128xf32>
    %36 = arith.addf %33, %35 : vector<64x128xf32>
    %cst_47 = arith.constant 0.000000e+00 : f32
    %37 = vector.broadcast %cst_47 : f32 to vector<64x128xf32>
    %38 = arith.maximumf %36, %37 : vector<64x128xf32>
    %cst_48 = arith.constant 0.000000e+00 : bf16
    %39 = vector.broadcast %cst_48 : bf16 to vector<1x10x128xbf16>
    %cst_49 = arith.constant 0.000000e+00 : bf16
    %40 = vector.broadcast %cst_49 : bf16 to vector<8x1x128xbf16>
    %c0_50 = arith.constant 0 : index
    %c0_51 = arith.constant 0 : index
    %c0_52 = arith.constant 0 : index
    %41 = vector.load %arg9[%c0_50, %c0_51, %c0_52] : memref<10x10x128xbf16, #tpu.memory_space<vmem>>, vector<1x10x128xbf16>
    tpu.vector_store %arg9[%c0_50, %c0_51, %c0_52], %39 {strides = array<i32>} : memref<10x10x128xbf16, #tpu.memory_space<vmem>>, vector<1x10x128xbf16>,
    %c9 = arith.constant 9 : index
    %c0_53 = arith.constant 0 : index
    %c0_54 = arith.constant 0 : index
    %42 = vector.load %arg9[%c9, %c0_53, %c0_54] : memref<10x10x128xbf16, #tpu.memory_space<vmem>>, vector<1x10x128xbf16>
    tpu.vector_store %arg9[%c9, %c0_53, %c0_54], %39 {strides = array<i32>} : memref<10x10x128xbf16, #tpu.memory_space<vmem>>, vector<1x10x128xbf16>,
    %c1_55 = arith.constant 1 : index
    %c0_56 = arith.constant 0 : index
    %c0_57 = arith.constant 0 : index
    %43 = vector.load %arg9[%c1_55, %c0_56, %c0_57] : memref<10x10x128xbf16, #tpu.memory_space<vmem>>, vector<8x1x128xbf16>
    tpu.vector_store %arg9[%c1_55, %c0_56, %c0_57], %40 {strides = array<i32>} : memref<10x10x128xbf16, #tpu.memory_space<vmem>>, vector<8x1x128xbf16>,
    %c1_58 = arith.constant 1 : index
    %c9_59 = arith.constant 9 : index
    %c0_60 = arith.constant 0 : index
    %44 = vector.load %arg9[%c1_58, %c9_59, %c0_60] : memref<10x10x128xbf16, #tpu.memory_space<vmem>>, vector<8x1x128xbf16>
    tpu.vector_store %arg9[%c1_58, %c9_59, %c0_60], %40 {strides = array<i32>} : memref<10x10x128xbf16, #tpu.memory_space<vmem>>, vector<8x1x128xbf16>,
    %45 = arith.truncf %38 : vector<64x128xf32> to vector<64x128xbf16>
    %46 = vector.shape_cast %45 : vector<64x128xbf16> to vector<8x8x128xbf16>
    %c1_61 = arith.constant 1 : index
    %c1_62 = arith.constant 1 : index
    %c0_63 = arith.constant 0 : index
    %47 = vector.load %arg9[%c1_61, %c1_62, %c0_63] : memref<10x10x128xbf16, #tpu.memory_space<vmem>>, vector<8x8x128xbf16>
    tpu.vector_store %arg9[%c1_61, %c1_62, %c0_63], %46 {strides = array<i32>} : memref<10x10x128xbf16, #tpu.memory_space<vmem>>, vector<8x8x128xbf16>,
    %c0_64 = arith.constant 0 : index
    %c1_65 = arith.constant 1 : index
    %c1_66 = arith.constant 1 : index
    %c0_67 = arith.constant 0 : index
    %48 = vector.load %arg1[%c0_64, %c1_65, %c1_66, %c0_67] : memref<1x10x10x128xf32, #tpu.memory_space<vmem>>, vector<1x8x8x128xf32>
    %49 = vector.shape_cast %48 : vector<1x8x8x128xf32> to vector<8x8x128xf32>
    %50 = vector.shape_cast %49 : vector<8x8x128xf32> to vector<64x128xf32>
    %c0_68 = arith.constant 0 : index
    %c0_69 = arith.constant 0 : index
    %c0_70 = arith.constant 0 : index
    %51 = vector.load %arg9[%c0_68, %c0_69, %c0_70] : memref<10x10x128xbf16, #tpu.memory_space<vmem>>, vector<8x8x128xbf16>
    %52 = vector.shape_cast %51 : vector<8x8x128xbf16> to vector<64x128xbf16>
    %c0_71 = arith.constant 0 : index
    %c0_72 = arith.constant 0 : index
    %53 = vector.load %arg8[%c0_71, %c0_72] : memref<64x1152xbf16, #tpu.memory_space<vmem>>, vector<64x128xbf16>
    tpu.vector_store %arg8[%c0_71, %c0_72], %52 {strides = array<i32>} : memref<64x1152xbf16, #tpu.memory_space<vmem>>, vector<64x128xbf16>,
    %c0_73 = arith.constant 0 : index
    %c1_74 = arith.constant 1 : index
    %c0_75 = arith.constant 0 : index
    %54 = vector.load %arg9[%c0_73, %c1_74, %c0_75] : memref<10x10x128xbf16, #tpu.memory_space<vmem>>, vector<8x8x128xbf16>
    %55 = vector.shape_cast %54 : vector<8x8x128xbf16> to vector<64x128xbf16>
    %c0_76 = arith.constant 0 : index
    %c128_77 = arith.constant 128 : index
    %56 = vector.load %arg8[%c0_76, %c128_77] : memref<64x1152xbf16, #tpu.memory_space<vmem>>, vector<64x128xbf16>
    tpu.vector_store %arg8[%c0_76, %c128_77], %55 {strides = array<i32>} : memref<64x1152xbf16, #tpu.memory_space<vmem>>, vector<64x128xbf16>,
    %c0_78 = arith.constant 0 : index
    %c2_79 = arith.constant 2 : index
    %c0_80 = arith.constant 0 : index
    %57 = vector.load %arg9[%c0_78, %c2_79, %c0_80] : memref<10x10x128xbf16, #tpu.memory_space<vmem>>, vector<8x8x128xbf16>
    %58 = vector.shape_cast %57 : vector<8x8x128xbf16> to vector<64x128xbf16>
    %c0_81 = arith.constant 0 : index
    %c256_82 = arith.constant 256 : index
    %59 = vector.load %arg8[%c0_81, %c256_82] : memref<64x1152xbf16, #tpu.memory_space<vmem>>, vector<64x128xbf16>
    tpu.vector_store %arg8[%c0_81, %c256_82], %58 {strides = array<i32>} : memref<64x1152xbf16, #tpu.memory_space<vmem>>, vector<64x128xbf16>,
    %c1_83 = arith.constant 1 : index
    %c0_84 = arith.constant 0 : index
    %c0_85 = arith.constant 0 : index
    %60 = vector.load %arg9[%c1_83, %c0_84, %c0_85] : memref<10x10x128xbf16, #tpu.memory_space<vmem>>, vector<8x8x128xbf16>
    %61 = vector.shape_cast %60 : vector<8x8x128xbf16> to vector<64x128xbf16>
    %c0_86 = arith.constant 0 : index
    %c384_87 = arith.constant 384 : index
    %62 = vector.load %arg8[%c0_86, %c384_87] : memref<64x1152xbf16, #tpu.memory_space<vmem>>, vector<64x128xbf16>
    tpu.vector_store %arg8[%c0_86, %c384_87], %61 {strides = array<i32>} : memref<64x1152xbf16, #tpu.memory_space<vmem>>, vector<64x128xbf16>,
    %c1_88 = arith.constant 1 : index
    %c1_89 = arith.constant 1 : index
    %c0_90 = arith.constant 0 : index
    %63 = vector.load %arg9[%c1_88, %c1_89, %c0_90] : memref<10x10x128xbf16, #tpu.memory_space<vmem>>, vector<8x8x128xbf16>
    %64 = vector.shape_cast %63 : vector<8x8x128xbf16> to vector<64x128xbf16>
    %c0_91 = arith.constant 0 : index
    %c512_92 = arith.constant 512 : index
    %65 = vector.load %arg8[%c0_91, %c512_92] : memref<64x1152xbf16, #tpu.memory_space<vmem>>, vector<64x128xbf16>
    tpu.vector_store %arg8[%c0_91, %c512_92], %64 {strides = array<i32>} : memref<64x1152xbf16, #tpu.memory_space<vmem>>, vector<64x128xbf16>,
    %c1_93 = arith.constant 1 : index
    %c2_94 = arith.constant 2 : index
    %c0_95 = arith.constant 0 : index
    %66 = vector.load %arg9[%c1_93, %c2_94, %c0_95] : memref<10x10x128xbf16, #tpu.memory_space<vmem>>, vector<8x8x128xbf16>
    %67 = vector.shape_cast %66 : vector<8x8x128xbf16> to vector<64x128xbf16>
    %c0_96 = arith.constant 0 : index
    %c640_97 = arith.constant 640 : index
    %68 = vector.load %arg8[%c0_96, %c640_97] : memref<64x1152xbf16, #tpu.memory_space<vmem>>, vector<64x128xbf16>
    tpu.vector_store %arg8[%c0_96, %c640_97], %67 {strides = array<i32>} : memref<64x1152xbf16, #tpu.memory_space<vmem>>, vector<64x128xbf16>,
    %c2_98 = arith.constant 2 : index
    %c0_99 = arith.constant 0 : index
    %c0_100 = arith.constant 0 : index
    %69 = vector.load %arg9[%c2_98, %c0_99, %c0_100] : memref<10x10x128xbf16, #tpu.memory_space<vmem>>, vector<8x8x128xbf16>
    %70 = vector.shape_cast %69 : vector<8x8x128xbf16> to vector<64x128xbf16>
    %c0_101 = arith.constant 0 : index
    %c768_102 = arith.constant 768 : index
    %71 = vector.load %arg8[%c0_101, %c768_102] : memref<64x1152xbf16, #tpu.memory_space<vmem>>, vector<64x128xbf16>
    tpu.vector_store %arg8[%c0_101, %c768_102], %70 {strides = array<i32>} : memref<64x1152xbf16, #tpu.memory_space<vmem>>, vector<64x128xbf16>,
    %c2_103 = arith.constant 2 : index
    %c1_104 = arith.constant 1 : index
    %c0_105 = arith.constant 0 : index
    %72 = vector.load %arg9[%c2_103, %c1_104, %c0_105] : memref<10x10x128xbf16, #tpu.memory_space<vmem>>, vector<8x8x128xbf16>
    %73 = vector.shape_cast %72 : vector<8x8x128xbf16> to vector<64x128xbf16>
    %c0_106 = arith.constant 0 : index
    %c896_107 = arith.constant 896 : index
    %74 = vector.load %arg8[%c0_106, %c896_107] : memref<64x1152xbf16, #tpu.memory_space<vmem>>, vector<64x128xbf16>
    tpu.vector_store %arg8[%c0_106, %c896_107], %73 {strides = array<i32>} : memref<64x1152xbf16, #tpu.memory_space<vmem>>, vector<64x128xbf16>,
    %c2_108 = arith.constant 2 : index
    %c2_109 = arith.constant 2 : index
    %c0_110 = arith.constant 0 : index
    %75 = vector.load %arg9[%c2_108, %c2_109, %c0_110] : memref<10x10x128xbf16, #tpu.memory_space<vmem>>, vector<8x8x128xbf16>
    %76 = vector.shape_cast %75 : vector<8x8x128xbf16> to vector<64x128xbf16>
    %c0_111 = arith.constant 0 : index
    %c1024_112 = arith.constant 1024 : index
    %77 = vector.load %arg8[%c0_111, %c1024_112] : memref<64x1152xbf16, #tpu.memory_space<vmem>>, vector<64x128xbf16>
    tpu.vector_store %arg8[%c0_111, %c1024_112], %76 {strides = array<i32>} : memref<64x1152xbf16, #tpu.memory_space<vmem>>, vector<64x128xbf16>,
    %c0_113 = arith.constant 0 : index
    %c0_114 = arith.constant 0 : index
    %78 = vector.load %arg8[%c0_113, %c0_114] : memref<64x1152xbf16, #tpu.memory_space<vmem>>, vector<64x1152xbf16>
    %c0_115 = arith.constant 0 : index
    %c0_116 = arith.constant 0 : index
    %79 = vector.load %arg4[%c0_115, %c0_116] : memref<1152x128xbf16, #tpu.memory_space<vmem>>, vector<1152x128xbf16>
    %cst_117 = arith.constant dense<0.000000e+00> : vector<64x128xf32>
    %80 = tpu.matmul %78, %79, %cst_117 {dimension_numbers = #tpu.dot_dimension_numbers<[1], [0], [0], [1], [0, 0, 1, 1], [], []>} : vector<64x1152xbf16>, vector<1152x128xbf16>, vector<64x128xf32> -> vector<64x128xf32>
    %c0_118 = arith.constant 0 : index
    %c0_119 = arith.constant 0 : index
    %81 = vector.load %arg5[%c0_118, %c0_119] : memref<1x128xf32, #tpu.memory_space<vmem>>, vector<1x128xf32>
    %82 = vector.broadcast %81 : vector<1x128xf32> to vector<64x128xf32>
    %83 = arith.addf %80, %82 : vector<64x128xf32>
    %84 = arith.addf %83, %50 : vector<64x128xf32>
    %cst_120 = arith.constant 0.000000e+00 : f32
    %85 = vector.broadcast %cst_120 : f32 to vector<64x128xf32>
    %86 = arith.maximumf %84, %85 : vector<64x128xf32>
    %cst_121 = arith.constant 0.000000e+00 : f32
    %87 = vector.broadcast %cst_121 : f32 to vector<1x10x128xf32>
    %cst_122 = arith.constant 0.000000e+00 : f32
    %88 = vector.broadcast %cst_122 : f32 to vector<8x1x128xf32>
    %c0_123 = arith.constant 0 : index
    %c0_124 = arith.constant 0 : index
    %c0_125 = arith.constant 0 : index
    %c0_126 = arith.constant 0 : index
    %89 = vector.load %arg6[%c0_123, %c0_124, %c0_125, %c0_126] : memref<1x10x10x128xf32, #tpu.memory_space<vmem>>, vector<1x1x10x128xf32>
    %90 = vector.shape_cast %89 : vector<1x1x10x128xf32> to vector<1x10x128xf32>
    %91 = vector.shape_cast %87 : vector<1x10x128xf32> to vector<1x1x10x128xf32>
    tpu.vector_store %arg6[%c0_123, %c0_124, %c0_125, %c0_126], %91 {strides = array<i32>} : memref<1x10x10x128xf32, #tpu.memory_space<vmem>>, vector<1x1x10x128xf32>,
    %c0_127 = arith.constant 0 : index
    %c9_128 = arith.constant 9 : index
    %c0_129 = arith.constant 0 : index
    %c0_130 = arith.constant 0 : index
    %92 = vector.load %arg6[%c0_127, %c9_128, %c0_129, %c0_130] : memref<1x10x10x128xf32, #tpu.memory_space<vmem>>, vector<1x1x10x128xf32>
    %93 = vector.shape_cast %92 : vector<1x1x10x128xf32> to vector<1x10x128xf32>
    %94 = vector.shape_cast %87 : vector<1x10x128xf32> to vector<1x1x10x128xf32>
    tpu.vector_store %arg6[%c0_127, %c9_128, %c0_129, %c0_130], %94 {strides = array<i32>} : memref<1x10x10x128xf32, #tpu.memory_space<vmem>>, vector<1x1x10x128xf32>,
    %c0_131 = arith.constant 0 : index
    %c1_132 = arith.constant 1 : index
    %c0_133 = arith.constant 0 : index
    %c0_134 = arith.constant 0 : index
    %95 = vector.load %arg6[%c0_131, %c1_132, %c0_133, %c0_134] : memref<1x10x10x128xf32, #tpu.memory_space<vmem>>, vector<1x8x1x128xf32>
    %96 = vector.shape_cast %95 : vector<1x8x1x128xf32> to vector<8x1x128xf32>
    %97 = vector.shape_cast %88 : vector<8x1x128xf32> to vector<1x8x1x128xf32>
    tpu.vector_store %arg6[%c0_131, %c1_132, %c0_133, %c0_134], %97 {strides = array<i32>} : memref<1x10x10x128xf32, #tpu.memory_space<vmem>>, vector<1x8x1x128xf32>,
    %c0_135 = arith.constant 0 : index
    %c1_136 = arith.constant 1 : index
    %c9_137 = arith.constant 9 : index
    %c0_138 = arith.constant 0 : index
    %98 = vector.load %arg6[%c0_135, %c1_136, %c9_137, %c0_138] : memref<1x10x10x128xf32, #tpu.memory_space<vmem>>, vector<1x8x1x128xf32>
    %99 = vector.shape_cast %98 : vector<1x8x1x128xf32> to vector<8x1x128xf32>
    %100 = vector.shape_cast %88 : vector<8x1x128xf32> to vector<1x8x1x128xf32>
    tpu.vector_store %arg6[%c0_135, %c1_136, %c9_137, %c0_138], %100 {strides = array<i32>} : memref<1x10x10x128xf32, #tpu.memory_space<vmem>>, vector<1x8x1x128xf32>,
    %101 = vector.shape_cast %86 : vector<64x128xf32> to vector<8x8x128xf32>
    %c0_139 = arith.constant 0 : index
    %c1_140 = arith.constant 1 : index
    %c1_141 = arith.constant 1 : index
    %c0_142 = arith.constant 0 : index
    %102 = vector.load %arg6[%c0_139, %c1_140, %c1_141, %c0_142] : memref<1x10x10x128xf32, #tpu.memory_space<vmem>>, vector<1x8x8x128xf32>
    %103 = vector.shape_cast %102 : vector<1x8x8x128xf32> to vector<8x8x128xf32>
    %104 = vector.shape_cast %101 : vector<8x8x128xf32> to vector<1x8x8x128xf32>
    tpu.vector_store %arg6[%c0_139, %c1_140, %c1_141, %c0_142], %104 {strides = array<i32>} : memref<1x10x10x128xf32, #tpu.memory_space<vmem>>, vector<1x8x8x128xf32>,
    return
  }
  func.func @transform_0(%arg0: i32) -> (i32, i32, i32, i32) {
    %c0_i32 = arith.constant 0 : i32
    %c0_i32_0 = arith.constant 0 : i32
    %c0_i32_1 = arith.constant 0 : i32
    %c0_i32_2 = arith.constant 0 : i32
    return %arg0, %c0_i32, %c0_i32_0, %c0_i32_1 : i32, i32, i32, i32
  }
  func.func @transform_1(%arg0: i32) -> (i32, i32) {
    %c0_i32 = arith.constant 0 : i32
    %c0_i32_0 = arith.constant 0 : i32
    %c0_i32_1 = arith.constant 0 : i32
    return %c0_i32, %c0_i32_0 : i32, i32
  }
  func.func @transform_2(%arg0: i32) -> (i32, i32) {
    %c0_i32 = arith.constant 0 : i32
    %c0_i32_0 = arith.constant 0 : i32
    %c0_i32_1 = arith.constant 0 : i32
    return %c0_i32, %c0_i32_0 : i32, i32
  }
  func.func @transform_3(%arg0: i32) -> (i32, i32) {
    %c0_i32 = arith.constant 0 : i32
    %c0_i32_0 = arith.constant 0 : i32
    %c0_i32_1 = arith.constant 0 : i32
    return %c0_i32, %c0_i32_0 : i32, i32
  }
  func.func @transform_4(%arg0: i32) -> (i32, i32) {
    %c0_i32 = arith.constant 0 : i32
    %c0_i32_0 = arith.constant 0 : i32
    %c0_i32_1 = arith.constant 0 : i32
    return %c0_i32, %c0_i32_0 : i32, i32
  }
  func.func @transform_5(%arg0: i32) -> (i32, i32, i32, i32) {
    %c0_i32 = arith.constant 0 : i32
    %c0_i32_0 = arith.constant 0 : i32
    %c0_i32_1 = arith.constant 0 : i32
    %c0_i32_2 = arith.constant 0 : i32
    return %arg0, %c0_i32, %c0_i32_0, %c0_i32_1 : i32, i32, i32, i32
  }
}

module attributes {stable_mosaic.version = 11 : i64} {
  func.func @_resblock_kernel(%arg0: i32, %arg1: memref<1x36x9x128xf32, #tpu.memory_space<vmem>>, %arg2: memref<1152x128xbf16, #tpu.memory_space<vmem>>, %arg3: memref<1x128xf32, #tpu.memory_space<vmem>>, %arg4: memref<1152x128xbf16, #tpu.memory_space<vmem>>, %arg5: memref<1x128xf32, #tpu.memory_space<vmem>>, %arg6: memref<128x128xbf16, #tpu.memory_space<vmem>>, %arg7: memref<1x128xf32, #tpu.memory_space<vmem>>, %arg8: memref<1x10x10x128xf32, #tpu.memory_space<vmem>>, %arg9: memref<36x9x128xbf16, #tpu.memory_space<vmem>>, %arg10: memref<64x1152xbf16, #tpu.memory_space<vmem>>, %arg11: memref<10x10x128xbf16, #tpu.memory_space<vmem>>) attributes {dimension_semantics = [#tpu.dimension_semantics<parallel>], iteration_bounds = array<i64: 2>, scalar_prefetch = 0 : i64, scratch_operands = 3 : i64, tpu.core_type = #tpu.core_type<tc>, window_params = [{transform_indices = @transform_0, window_bounds = array<i64: 1, 36, 9, 128>}, {pipeline_mode = #tpu.pipeline_mode<synchronous>, transform_indices = @transform_1, window_bounds = array<i64: 1152, 128>}, {pipeline_mode = #tpu.pipeline_mode<synchronous>, transform_indices = @transform_2, window_bounds = array<i64: 1, 128>}, {pipeline_mode = #tpu.pipeline_mode<synchronous>, transform_indices = @transform_3, window_bounds = array<i64: 1152, 128>}, {pipeline_mode = #tpu.pipeline_mode<synchronous>, transform_indices = @transform_4, window_bounds = array<i64: 1, 128>}, {pipeline_mode = #tpu.pipeline_mode<synchronous>, transform_indices = @transform_5, window_bounds = array<i64: 128, 128>}, {pipeline_mode = #tpu.pipeline_mode<synchronous>, transform_indices = @transform_6, window_bounds = array<i64: 1, 128>}, {transform_indices = @transform_7, window_bounds = array<i64: 1, 10, 10, 128>}]} {
    %c0 = arith.constant 0 : index
    %c0_0 = arith.constant 0 : index
    %c0_1 = arith.constant 0 : index
    %c0_2 = arith.constant 0 : index
    %0 = vector.load %arg1[%c0, %c0_0, %c0_1, %c0_2] : memref<1x36x9x128xf32, #tpu.memory_space<vmem>>, vector<1x36x9x128xf32>
    %1 = vector.shape_cast %0 : vector<1x36x9x128xf32> to vector<36x9x128xf32>
    %2 = arith.truncf %1 : vector<36x9x128xf32> to vector<36x9x128xbf16>
    %c0_3 = arith.constant 0 : index
    %c0_4 = arith.constant 0 : index
    %c0_5 = arith.constant 0 : index
    %3 = vector.load %arg9[%c0_3, %c0_4, %c0_5] : memref<36x9x128xbf16, #tpu.memory_space<vmem>>, vector<36x9x128xbf16>
    tpu.vector_store %arg9[%c0_3, %c0_4, %c0_5], %2 {strides = array<i32>} : memref<36x9x128xbf16, #tpu.memory_space<vmem>>, vector<36x9x128xbf16>,
    %c0_6 = arith.constant 0 : index
    %c0_7 = arith.constant 0 : index
    %c0_8 = arith.constant 0 : index
    %4 = vector.load %arg9[%c0_6, %c0_7, %c0_8] : memref<36x9x128xbf16, #tpu.memory_space<vmem>>, vector<8x8x128xbf16>
    %5 = vector.shape_cast %4 : vector<8x8x128xbf16> to vector<64x128xbf16>
    %c0_9 = arith.constant 0 : index
    %c0_10 = arith.constant 0 : index
    %6 = vector.load %arg10[%c0_9, %c0_10] : memref<64x1152xbf16, #tpu.memory_space<vmem>>, vector<64x128xbf16>
    tpu.vector_store %arg10[%c0_9, %c0_10], %5 {strides = array<i32>} : memref<64x1152xbf16, #tpu.memory_space<vmem>>, vector<64x128xbf16>,
    %c9 = arith.constant 9 : index
    %c0_11 = arith.constant 0 : index
    %c0_12 = arith.constant 0 : index
    %7 = vector.load %arg9[%c9, %c0_11, %c0_12] : memref<36x9x128xbf16, #tpu.memory_space<vmem>>, vector<8x8x128xbf16>
    %8 = vector.shape_cast %7 : vector<8x8x128xbf16> to vector<64x128xbf16>
    %c0_13 = arith.constant 0 : index
    %c128 = arith.constant 128 : index
    %9 = vector.load %arg10[%c0_13, %c128] : memref<64x1152xbf16, #tpu.memory_space<vmem>>, vector<64x128xbf16>
    tpu.vector_store %arg10[%c0_13, %c128], %8 {strides = array<i32>} : memref<64x1152xbf16, #tpu.memory_space<vmem>>, vector<64x128xbf16>,
    %c0_14 = arith.constant 0 : index
    %c1 = arith.constant 1 : index
    %c0_15 = arith.constant 0 : index
    %10 = vector.load %arg9[%c0_14, %c1, %c0_15] : memref<36x9x128xbf16, #tpu.memory_space<vmem>>, vector<8x8x128xbf16>
    %11 = vector.shape_cast %10 : vector<8x8x128xbf16> to vector<64x128xbf16>
    %c0_16 = arith.constant 0 : index
    %c256 = arith.constant 256 : index
    %12 = vector.load %arg10[%c0_16, %c256] : memref<64x1152xbf16, #tpu.memory_space<vmem>>, vector<64x128xbf16>
    tpu.vector_store %arg10[%c0_16, %c256], %11 {strides = array<i32>} : memref<64x1152xbf16, #tpu.memory_space<vmem>>, vector<64x128xbf16>,
    %c18 = arith.constant 18 : index
    %c0_17 = arith.constant 0 : index
    %c0_18 = arith.constant 0 : index
    %13 = vector.load %arg9[%c18, %c0_17, %c0_18] : memref<36x9x128xbf16, #tpu.memory_space<vmem>>, vector<8x8x128xbf16>
    %14 = vector.shape_cast %13 : vector<8x8x128xbf16> to vector<64x128xbf16>
    %c0_19 = arith.constant 0 : index
    %c384 = arith.constant 384 : index
    %15 = vector.load %arg10[%c0_19, %c384] : memref<64x1152xbf16, #tpu.memory_space<vmem>>, vector<64x128xbf16>
    tpu.vector_store %arg10[%c0_19, %c384], %14 {strides = array<i32>} : memref<64x1152xbf16, #tpu.memory_space<vmem>>, vector<64x128xbf16>,
    %c27 = arith.constant 27 : index
    %c0_20 = arith.constant 0 : index
    %c0_21 = arith.constant 0 : index
    %16 = vector.load %arg9[%c27, %c0_20, %c0_21] : memref<36x9x128xbf16, #tpu.memory_space<vmem>>, vector<8x8x128xbf16>
    %17 = vector.shape_cast %16 : vector<8x8x128xbf16> to vector<64x128xbf16>
    %c0_22 = arith.constant 0 : index
    %c512 = arith.constant 512 : index
    %18 = vector.load %arg10[%c0_22, %c512] : memref<64x1152xbf16, #tpu.memory_space<vmem>>, vector<64x128xbf16>
    tpu.vector_store %arg10[%c0_22, %c512], %17 {strides = array<i32>} : memref<64x1152xbf16, #tpu.memory_space<vmem>>, vector<64x128xbf16>,
    %c18_23 = arith.constant 18 : index
    %c1_24 = arith.constant 1 : index
    %c0_25 = arith.constant 0 : index
    %19 = vector.load %arg9[%c18_23, %c1_24, %c0_25] : memref<36x9x128xbf16, #tpu.memory_space<vmem>>, vector<8x8x128xbf16>
    %20 = vector.shape_cast %19 : vector<8x8x128xbf16> to vector<64x128xbf16>
    %c0_26 = arith.constant 0 : index
    %c640 = arith.constant 640 : index
    %21 = vector.load %arg10[%c0_26, %c640] : memref<64x1152xbf16, #tpu.memory_space<vmem>>, vector<64x128xbf16>
    tpu.vector_store %arg10[%c0_26, %c640], %20 {strides = array<i32>} : memref<64x1152xbf16, #tpu.memory_space<vmem>>, vector<64x128xbf16>,
    %c1_27 = arith.constant 1 : index
    %c0_28 = arith.constant 0 : index
    %c0_29 = arith.constant 0 : index
    %22 = vector.load %arg9[%c1_27, %c0_28, %c0_29] : memref<36x9x128xbf16, #tpu.memory_space<vmem>>, vector<8x8x128xbf16>
    %23 = vector.shape_cast %22 : vector<8x8x128xbf16> to vector<64x128xbf16>
    %c0_30 = arith.constant 0 : index
    %c768 = arith.constant 768 : index
    %24 = vector.load %arg10[%c0_30, %c768] : memref<64x1152xbf16, #tpu.memory_space<vmem>>, vector<64x128xbf16>
    tpu.vector_store %arg10[%c0_30, %c768], %23 {strides = array<i32>} : memref<64x1152xbf16, #tpu.memory_space<vmem>>, vector<64x128xbf16>,
    %c10 = arith.constant 10 : index
    %c0_31 = arith.constant 0 : index
    %c0_32 = arith.constant 0 : index
    %25 = vector.load %arg9[%c10, %c0_31, %c0_32] : memref<36x9x128xbf16, #tpu.memory_space<vmem>>, vector<8x8x128xbf16>
    %26 = vector.shape_cast %25 : vector<8x8x128xbf16> to vector<64x128xbf16>
    %c0_33 = arith.constant 0 : index
    %c896 = arith.constant 896 : index
    %27 = vector.load %arg10[%c0_33, %c896] : memref<64x1152xbf16, #tpu.memory_space<vmem>>, vector<64x128xbf16>
    tpu.vector_store %arg10[%c0_33, %c896], %26 {strides = array<i32>} : memref<64x1152xbf16, #tpu.memory_space<vmem>>, vector<64x128xbf16>,
    %c1_34 = arith.constant 1 : index
    %c1_35 = arith.constant 1 : index
    %c0_36 = arith.constant 0 : index
    %28 = vector.load %arg9[%c1_34, %c1_35, %c0_36] : memref<36x9x128xbf16, #tpu.memory_space<vmem>>, vector<8x8x128xbf16>
    %29 = vector.shape_cast %28 : vector<8x8x128xbf16> to vector<64x128xbf16>
    %c0_37 = arith.constant 0 : index
    %c1024 = arith.constant 1024 : index
    %30 = vector.load %arg10[%c0_37, %c1024] : memref<64x1152xbf16, #tpu.memory_space<vmem>>, vector<64x128xbf16>
    tpu.vector_store %arg10[%c0_37, %c1024], %29 {strides = array<i32>} : memref<64x1152xbf16, #tpu.memory_space<vmem>>, vector<64x128xbf16>,
    %c0_38 = arith.constant 0 : index
    %c0_39 = arith.constant 0 : index
    %31 = vector.load %arg10[%c0_38, %c0_39] : memref<64x1152xbf16, #tpu.memory_space<vmem>>, vector<64x1152xbf16>
    %c0_40 = arith.constant 0 : index
    %c0_41 = arith.constant 0 : index
    %32 = vector.load %arg2[%c0_40, %c0_41] : memref<1152x128xbf16, #tpu.memory_space<vmem>>, vector<1152x128xbf16>
    %cst = arith.constant dense<0.000000e+00> : vector<64x128xf32>
    %33 = tpu.matmul %31, %32, %cst {dimension_numbers = #tpu.dot_dimension_numbers<[1], [0], [0], [1], [0, 0, 1, 1], [], []>} : vector<64x1152xbf16>, vector<1152x128xbf16>, vector<64x128xf32> -> vector<64x128xf32>
    %c0_42 = arith.constant 0 : index
    %c0_43 = arith.constant 0 : index
    %34 = vector.load %arg3[%c0_42, %c0_43] : memref<1x128xf32, #tpu.memory_space<vmem>>, vector<1x128xf32>
    %35 = vector.broadcast %34 : vector<1x128xf32> to vector<64x128xf32>
    %36 = arith.addf %33, %35 : vector<64x128xf32>
    %cst_44 = arith.constant 0.000000e+00 : f32
    %37 = vector.broadcast %cst_44 : f32 to vector<64x128xf32>
    %38 = arith.maximumf %36, %37 : vector<64x128xf32>
    %cst_45 = arith.constant 0.000000e+00 : bf16
    %39 = vector.broadcast %cst_45 : bf16 to vector<1x10x128xbf16>
    %cst_46 = arith.constant 0.000000e+00 : bf16
    %40 = vector.broadcast %cst_46 : bf16 to vector<8x1x128xbf16>
    %c0_47 = arith.constant 0 : index
    %c0_48 = arith.constant 0 : index
    %c0_49 = arith.constant 0 : index
    %41 = vector.load %arg11[%c0_47, %c0_48, %c0_49] : memref<10x10x128xbf16, #tpu.memory_space<vmem>>, vector<1x10x128xbf16>
    tpu.vector_store %arg11[%c0_47, %c0_48, %c0_49], %39 {strides = array<i32>} : memref<10x10x128xbf16, #tpu.memory_space<vmem>>, vector<1x10x128xbf16>,
    %c9_50 = arith.constant 9 : index
    %c0_51 = arith.constant 0 : index
    %c0_52 = arith.constant 0 : index
    %42 = vector.load %arg11[%c9_50, %c0_51, %c0_52] : memref<10x10x128xbf16, #tpu.memory_space<vmem>>, vector<1x10x128xbf16>
    tpu.vector_store %arg11[%c9_50, %c0_51, %c0_52], %39 {strides = array<i32>} : memref<10x10x128xbf16, #tpu.memory_space<vmem>>, vector<1x10x128xbf16>,
    %c1_53 = arith.constant 1 : index
    %c0_54 = arith.constant 0 : index
    %c0_55 = arith.constant 0 : index
    %43 = vector.load %arg11[%c1_53, %c0_54, %c0_55] : memref<10x10x128xbf16, #tpu.memory_space<vmem>>, vector<8x1x128xbf16>
    tpu.vector_store %arg11[%c1_53, %c0_54, %c0_55], %40 {strides = array<i32>} : memref<10x10x128xbf16, #tpu.memory_space<vmem>>, vector<8x1x128xbf16>,
    %c1_56 = arith.constant 1 : index
    %c9_57 = arith.constant 9 : index
    %c0_58 = arith.constant 0 : index
    %44 = vector.load %arg11[%c1_56, %c9_57, %c0_58] : memref<10x10x128xbf16, #tpu.memory_space<vmem>>, vector<8x1x128xbf16>
    tpu.vector_store %arg11[%c1_56, %c9_57, %c0_58], %40 {strides = array<i32>} : memref<10x10x128xbf16, #tpu.memory_space<vmem>>, vector<8x1x128xbf16>,
    %45 = arith.truncf %38 : vector<64x128xf32> to vector<64x128xbf16>
    %46 = vector.shape_cast %45 : vector<64x128xbf16> to vector<8x8x128xbf16>
    %c1_59 = arith.constant 1 : index
    %c1_60 = arith.constant 1 : index
    %c0_61 = arith.constant 0 : index
    %47 = vector.load %arg11[%c1_59, %c1_60, %c0_61] : memref<10x10x128xbf16, #tpu.memory_space<vmem>>, vector<8x8x128xbf16>
    tpu.vector_store %arg11[%c1_59, %c1_60, %c0_61], %46 {strides = array<i32>} : memref<10x10x128xbf16, #tpu.memory_space<vmem>>, vector<8x8x128xbf16>,
    %c27_62 = arith.constant 27 : index
    %c0_63 = arith.constant 0 : index
    %c0_64 = arith.constant 0 : index
    %48 = vector.load %arg9[%c27_62, %c0_63, %c0_64] : memref<36x9x128xbf16, #tpu.memory_space<vmem>>, vector<8x8x128xbf16>
    %49 = vector.shape_cast %48 : vector<8x8x128xbf16> to vector<64x128xbf16>
    %c0_65 = arith.constant 0 : index
    %c0_66 = arith.constant 0 : index
    %50 = vector.load %arg6[%c0_65, %c0_66] : memref<128x128xbf16, #tpu.memory_space<vmem>>, vector<128x128xbf16>
    %cst_67 = arith.constant dense<0.000000e+00> : vector<64x128xf32>
    %51 = tpu.matmul %49, %50, %cst_67 {dimension_numbers = #tpu.dot_dimension_numbers<[1], [0], [0], [1], [0, 0, 1, 1], [], []>} : vector<64x128xbf16>, vector<128x128xbf16>, vector<64x128xf32> -> vector<64x128xf32>
    %c0_68 = arith.constant 0 : index
    %c0_69 = arith.constant 0 : index
    %52 = vector.load %arg7[%c0_68, %c0_69] : memref<1x128xf32, #tpu.memory_space<vmem>>, vector<1x128xf32>
    %53 = vector.broadcast %52 : vector<1x128xf32> to vector<64x128xf32>
    %54 = arith.addf %51, %53 : vector<64x128xf32>
    %c0_70 = arith.constant 0 : index
    %c0_71 = arith.constant 0 : index
    %c0_72 = arith.constant 0 : index
    %55 = vector.load %arg11[%c0_70, %c0_71, %c0_72] : memref<10x10x128xbf16, #tpu.memory_space<vmem>>, vector<8x8x128xbf16>
    %56 = vector.shape_cast %55 : vector<8x8x128xbf16> to vector<64x128xbf16>
    %c0_73 = arith.constant 0 : index
    %c0_74 = arith.constant 0 : index
    %57 = vector.load %arg10[%c0_73, %c0_74] : memref<64x1152xbf16, #tpu.memory_space<vmem>>, vector<64x128xbf16>
    tpu.vector_store %arg10[%c0_73, %c0_74], %56 {strides = array<i32>} : memref<64x1152xbf16, #tpu.memory_space<vmem>>, vector<64x128xbf16>,
    %c0_75 = arith.constant 0 : index
    %c1_76 = arith.constant 1 : index
    %c0_77 = arith.constant 0 : index
    %58 = vector.load %arg11[%c0_75, %c1_76, %c0_77] : memref<10x10x128xbf16, #tpu.memory_space<vmem>>, vector<8x8x128xbf16>
    %59 = vector.shape_cast %58 : vector<8x8x128xbf16> to vector<64x128xbf16>
    %c0_78 = arith.constant 0 : index
    %c128_79 = arith.constant 128 : index
    %60 = vector.load %arg10[%c0_78, %c128_79] : memref<64x1152xbf16, #tpu.memory_space<vmem>>, vector<64x128xbf16>
    tpu.vector_store %arg10[%c0_78, %c128_79], %59 {strides = array<i32>} : memref<64x1152xbf16, #tpu.memory_space<vmem>>, vector<64x128xbf16>,
    %c0_80 = arith.constant 0 : index
    %c2 = arith.constant 2 : index
    %c0_81 = arith.constant 0 : index
    %61 = vector.load %arg11[%c0_80, %c2, %c0_81] : memref<10x10x128xbf16, #tpu.memory_space<vmem>>, vector<8x8x128xbf16>
    %62 = vector.shape_cast %61 : vector<8x8x128xbf16> to vector<64x128xbf16>
    %c0_82 = arith.constant 0 : index
    %c256_83 = arith.constant 256 : index
    %63 = vector.load %arg10[%c0_82, %c256_83] : memref<64x1152xbf16, #tpu.memory_space<vmem>>, vector<64x128xbf16>
    tpu.vector_store %arg10[%c0_82, %c256_83], %62 {strides = array<i32>} : memref<64x1152xbf16, #tpu.memory_space<vmem>>, vector<64x128xbf16>,
    %c1_84 = arith.constant 1 : index
    %c0_85 = arith.constant 0 : index
    %c0_86 = arith.constant 0 : index
    %64 = vector.load %arg11[%c1_84, %c0_85, %c0_86] : memref<10x10x128xbf16, #tpu.memory_space<vmem>>, vector<8x8x128xbf16>
    %65 = vector.shape_cast %64 : vector<8x8x128xbf16> to vector<64x128xbf16>
    %c0_87 = arith.constant 0 : index
    %c384_88 = arith.constant 384 : index
    %66 = vector.load %arg10[%c0_87, %c384_88] : memref<64x1152xbf16, #tpu.memory_space<vmem>>, vector<64x128xbf16>
    tpu.vector_store %arg10[%c0_87, %c384_88], %65 {strides = array<i32>} : memref<64x1152xbf16, #tpu.memory_space<vmem>>, vector<64x128xbf16>,
    %c1_89 = arith.constant 1 : index
    %c1_90 = arith.constant 1 : index
    %c0_91 = arith.constant 0 : index
    %67 = vector.load %arg11[%c1_89, %c1_90, %c0_91] : memref<10x10x128xbf16, #tpu.memory_space<vmem>>, vector<8x8x128xbf16>
    %68 = vector.shape_cast %67 : vector<8x8x128xbf16> to vector<64x128xbf16>
    %c0_92 = arith.constant 0 : index
    %c512_93 = arith.constant 512 : index
    %69 = vector.load %arg10[%c0_92, %c512_93] : memref<64x1152xbf16, #tpu.memory_space<vmem>>, vector<64x128xbf16>
    tpu.vector_store %arg10[%c0_92, %c512_93], %68 {strides = array<i32>} : memref<64x1152xbf16, #tpu.memory_space<vmem>>, vector<64x128xbf16>,
    %c1_94 = arith.constant 1 : index
    %c2_95 = arith.constant 2 : index
    %c0_96 = arith.constant 0 : index
    %70 = vector.load %arg11[%c1_94, %c2_95, %c0_96] : memref<10x10x128xbf16, #tpu.memory_space<vmem>>, vector<8x8x128xbf16>
    %71 = vector.shape_cast %70 : vector<8x8x128xbf16> to vector<64x128xbf16>
    %c0_97 = arith.constant 0 : index
    %c640_98 = arith.constant 640 : index
    %72 = vector.load %arg10[%c0_97, %c640_98] : memref<64x1152xbf16, #tpu.memory_space<vmem>>, vector<64x128xbf16>
    tpu.vector_store %arg10[%c0_97, %c640_98], %71 {strides = array<i32>} : memref<64x1152xbf16, #tpu.memory_space<vmem>>, vector<64x128xbf16>,
    %c2_99 = arith.constant 2 : index
    %c0_100 = arith.constant 0 : index
    %c0_101 = arith.constant 0 : index
    %73 = vector.load %arg11[%c2_99, %c0_100, %c0_101] : memref<10x10x128xbf16, #tpu.memory_space<vmem>>, vector<8x8x128xbf16>
    %74 = vector.shape_cast %73 : vector<8x8x128xbf16> to vector<64x128xbf16>
    %c0_102 = arith.constant 0 : index
    %c768_103 = arith.constant 768 : index
    %75 = vector.load %arg10[%c0_102, %c768_103] : memref<64x1152xbf16, #tpu.memory_space<vmem>>, vector<64x128xbf16>
    tpu.vector_store %arg10[%c0_102, %c768_103], %74 {strides = array<i32>} : memref<64x1152xbf16, #tpu.memory_space<vmem>>, vector<64x128xbf16>,
    %c2_104 = arith.constant 2 : index
    %c1_105 = arith.constant 1 : index
    %c0_106 = arith.constant 0 : index
    %76 = vector.load %arg11[%c2_104, %c1_105, %c0_106] : memref<10x10x128xbf16, #tpu.memory_space<vmem>>, vector<8x8x128xbf16>
    %77 = vector.shape_cast %76 : vector<8x8x128xbf16> to vector<64x128xbf16>
    %c0_107 = arith.constant 0 : index
    %c896_108 = arith.constant 896 : index
    %78 = vector.load %arg10[%c0_107, %c896_108] : memref<64x1152xbf16, #tpu.memory_space<vmem>>, vector<64x128xbf16>
    tpu.vector_store %arg10[%c0_107, %c896_108], %77 {strides = array<i32>} : memref<64x1152xbf16, #tpu.memory_space<vmem>>, vector<64x128xbf16>,
    %c2_109 = arith.constant 2 : index
    %c2_110 = arith.constant 2 : index
    %c0_111 = arith.constant 0 : index
    %79 = vector.load %arg11[%c2_109, %c2_110, %c0_111] : memref<10x10x128xbf16, #tpu.memory_space<vmem>>, vector<8x8x128xbf16>
    %80 = vector.shape_cast %79 : vector<8x8x128xbf16> to vector<64x128xbf16>
    %c0_112 = arith.constant 0 : index
    %c1024_113 = arith.constant 1024 : index
    %81 = vector.load %arg10[%c0_112, %c1024_113] : memref<64x1152xbf16, #tpu.memory_space<vmem>>, vector<64x128xbf16>
    tpu.vector_store %arg10[%c0_112, %c1024_113], %80 {strides = array<i32>} : memref<64x1152xbf16, #tpu.memory_space<vmem>>, vector<64x128xbf16>,
    %c0_114 = arith.constant 0 : index
    %c0_115 = arith.constant 0 : index
    %82 = vector.load %arg10[%c0_114, %c0_115] : memref<64x1152xbf16, #tpu.memory_space<vmem>>, vector<64x1152xbf16>
    %c0_116 = arith.constant 0 : index
    %c0_117 = arith.constant 0 : index
    %83 = vector.load %arg4[%c0_116, %c0_117] : memref<1152x128xbf16, #tpu.memory_space<vmem>>, vector<1152x128xbf16>
    %cst_118 = arith.constant dense<0.000000e+00> : vector<64x128xf32>
    %84 = tpu.matmul %82, %83, %cst_118 {dimension_numbers = #tpu.dot_dimension_numbers<[1], [0], [0], [1], [0, 0, 1, 1], [], []>} : vector<64x1152xbf16>, vector<1152x128xbf16>, vector<64x128xf32> -> vector<64x128xf32>
    %c0_119 = arith.constant 0 : index
    %c0_120 = arith.constant 0 : index
    %85 = vector.load %arg5[%c0_119, %c0_120] : memref<1x128xf32, #tpu.memory_space<vmem>>, vector<1x128xf32>
    %86 = vector.broadcast %85 : vector<1x128xf32> to vector<64x128xf32>
    %87 = arith.addf %84, %86 : vector<64x128xf32>
    %88 = arith.addf %87, %54 : vector<64x128xf32>
    %cst_121 = arith.constant 0.000000e+00 : f32
    %89 = vector.broadcast %cst_121 : f32 to vector<64x128xf32>
    %90 = arith.maximumf %88, %89 : vector<64x128xf32>
    %cst_122 = arith.constant 0.000000e+00 : f32
    %91 = vector.broadcast %cst_122 : f32 to vector<1x10x128xf32>
    %cst_123 = arith.constant 0.000000e+00 : f32
    %92 = vector.broadcast %cst_123 : f32 to vector<8x1x128xf32>
    %c0_124 = arith.constant 0 : index
    %c0_125 = arith.constant 0 : index
    %c0_126 = arith.constant 0 : index
    %c0_127 = arith.constant 0 : index
    %93 = vector.load %arg8[%c0_124, %c0_125, %c0_126, %c0_127] : memref<1x10x10x128xf32, #tpu.memory_space<vmem>>, vector<1x1x10x128xf32>
    %94 = vector.shape_cast %93 : vector<1x1x10x128xf32> to vector<1x10x128xf32>
    %95 = vector.shape_cast %91 : vector<1x10x128xf32> to vector<1x1x10x128xf32>
    tpu.vector_store %arg8[%c0_124, %c0_125, %c0_126, %c0_127], %95 {strides = array<i32>} : memref<1x10x10x128xf32, #tpu.memory_space<vmem>>, vector<1x1x10x128xf32>,
    %c0_128 = arith.constant 0 : index
    %c9_129 = arith.constant 9 : index
    %c0_130 = arith.constant 0 : index
    %c0_131 = arith.constant 0 : index
    %96 = vector.load %arg8[%c0_128, %c9_129, %c0_130, %c0_131] : memref<1x10x10x128xf32, #tpu.memory_space<vmem>>, vector<1x1x10x128xf32>
    %97 = vector.shape_cast %96 : vector<1x1x10x128xf32> to vector<1x10x128xf32>
    %98 = vector.shape_cast %91 : vector<1x10x128xf32> to vector<1x1x10x128xf32>
    tpu.vector_store %arg8[%c0_128, %c9_129, %c0_130, %c0_131], %98 {strides = array<i32>} : memref<1x10x10x128xf32, #tpu.memory_space<vmem>>, vector<1x1x10x128xf32>,
    %c0_132 = arith.constant 0 : index
    %c1_133 = arith.constant 1 : index
    %c0_134 = arith.constant 0 : index
    %c0_135 = arith.constant 0 : index
    %99 = vector.load %arg8[%c0_132, %c1_133, %c0_134, %c0_135] : memref<1x10x10x128xf32, #tpu.memory_space<vmem>>, vector<1x8x1x128xf32>
    %100 = vector.shape_cast %99 : vector<1x8x1x128xf32> to vector<8x1x128xf32>
    %101 = vector.shape_cast %92 : vector<8x1x128xf32> to vector<1x8x1x128xf32>
    tpu.vector_store %arg8[%c0_132, %c1_133, %c0_134, %c0_135], %101 {strides = array<i32>} : memref<1x10x10x128xf32, #tpu.memory_space<vmem>>, vector<1x8x1x128xf32>,
    %c0_136 = arith.constant 0 : index
    %c1_137 = arith.constant 1 : index
    %c9_138 = arith.constant 9 : index
    %c0_139 = arith.constant 0 : index
    %102 = vector.load %arg8[%c0_136, %c1_137, %c9_138, %c0_139] : memref<1x10x10x128xf32, #tpu.memory_space<vmem>>, vector<1x8x1x128xf32>
    %103 = vector.shape_cast %102 : vector<1x8x1x128xf32> to vector<8x1x128xf32>
    %104 = vector.shape_cast %92 : vector<8x1x128xf32> to vector<1x8x1x128xf32>
    tpu.vector_store %arg8[%c0_136, %c1_137, %c9_138, %c0_139], %104 {strides = array<i32>} : memref<1x10x10x128xf32, #tpu.memory_space<vmem>>, vector<1x8x1x128xf32>,
    %105 = vector.shape_cast %90 : vector<64x128xf32> to vector<8x8x128xf32>
    %c0_140 = arith.constant 0 : index
    %c1_141 = arith.constant 1 : index
    %c1_142 = arith.constant 1 : index
    %c0_143 = arith.constant 0 : index
    %106 = vector.load %arg8[%c0_140, %c1_141, %c1_142, %c0_143] : memref<1x10x10x128xf32, #tpu.memory_space<vmem>>, vector<1x8x8x128xf32>
    %107 = vector.shape_cast %106 : vector<1x8x8x128xf32> to vector<8x8x128xf32>
    %108 = vector.shape_cast %105 : vector<8x8x128xf32> to vector<1x8x8x128xf32>
    tpu.vector_store %arg8[%c0_140, %c1_141, %c1_142, %c0_143], %108 {strides = array<i32>} : memref<1x10x10x128xf32, #tpu.memory_space<vmem>>, vector<1x8x8x128xf32>,
    return
  }
  func.func @transform_0(%arg0: i32) -> (i32, i32, i32, i32) {
    %c0_i32 = arith.constant 0 : i32
    %c0_i32_0 = arith.constant 0 : i32
    %c0_i32_1 = arith.constant 0 : i32
    %c0_i32_2 = arith.constant 0 : i32
    return %arg0, %c0_i32, %c0_i32_0, %c0_i32_1 : i32, i32, i32, i32
  }
  func.func @transform_1(%arg0: i32) -> (i32, i32) {
    %c0_i32 = arith.constant 0 : i32
    %c0_i32_0 = arith.constant 0 : i32
    %c0_i32_1 = arith.constant 0 : i32
    return %c0_i32, %c0_i32_0 : i32, i32
  }
  func.func @transform_2(%arg0: i32) -> (i32, i32) {
    %c0_i32 = arith.constant 0 : i32
    %c0_i32_0 = arith.constant 0 : i32
    %c0_i32_1 = arith.constant 0 : i32
    return %c0_i32, %c0_i32_0 : i32, i32
  }
  func.func @transform_3(%arg0: i32) -> (i32, i32) {
    %c0_i32 = arith.constant 0 : i32
    %c0_i32_0 = arith.constant 0 : i32
    %c0_i32_1 = arith.constant 0 : i32
    return %c0_i32, %c0_i32_0 : i32, i32
  }
  func.func @transform_4(%arg0: i32) -> (i32, i32) {
    %c0_i32 = arith.constant 0 : i32
    %c0_i32_0 = arith.constant 0 : i32
    %c0_i32_1 = arith.constant 0 : i32
    return %c0_i32, %c0_i32_0 : i32, i32
  }
  func.func @transform_5(%arg0: i32) -> (i32, i32) {
    %c0_i32 = arith.constant 0 : i32
    %c0_i32_0 = arith.constant 0 : i32
    %c0_i32_1 = arith.constant 0 : i32
    return %c0_i32, %c0_i32_0 : i32, i32
  }
  func.func @transform_6(%arg0: i32) -> (i32, i32) {
    %c0_i32 = arith.constant 0 : i32
    %c0_i32_0 = arith.constant 0 : i32
    %c0_i32_1 = arith.constant 0 : i32
    return %c0_i32, %c0_i32_0 : i32, i32
  }
  func.func @transform_7(%arg0: i32) -> (i32, i32, i32, i32) {
    %c0_i32 = arith.constant 0 : i32
    %c0_i32_0 = arith.constant 0 : i32
    %c0_i32_1 = arith.constant 0 : i32
    %c0_i32_2 = arith.constant 0 : i32
    return %arg0, %c0_i32, %c0_i32_0, %c0_i32_1 : i32, i32, i32, i32
  }
}

</mosaic_0001>

<bundles_post_ra>
// kernel: _lambda_.3
= control target key start
LH: loop header
LB: loop body
LE: loop exit
PB: predicated region body
PF: predicated region fallthrough
CT: control target
= control target key end

     0   :  { %s5420_s18 = smov 0   ;;  %s6570_s0 = inlined_call_operand.vmem [shape: f32[2,10,10,128], index: 0, kind: input, shape index: {}]   ;;  %s6571_s1 = inlined_call_operand.vmem [shape: bf16[1152,128], index: 1, kind: input, shape index: {}]   ;;  %s6572_s2 = inlined_call_operand.vmem [shape: f32[1,128], index: 2, kind: input, shape index: {}]   ;;  %s6573_s3 = inlined_call_operand.vmem [shape: bf16[1152,128], index: 3, kind: input, shape index: {}]   ;;  %s6574_s4 = inlined_call_operand.vmem [shape: f32[1,128], index: 4, kind: input, shape index: {}]   ;;  %s6575_s5 = inlined_call_operand.vmem [shape: f32[2,10,10,128], index: 5, kind: output, shape index: {}]  }
   0x1 LB: > { %s4180_s19 = sadd.s32 4294967295, %s5386_s18   ;;  %p4184_p0 = scmp.ge.s32.totalorder %s5386_s18, 1  ;;  %s5386_s18 = sphi %s5420_s18, %s15_s18  }
   0x2   : > { %p187_p1 = scmp.lt.s32.totalorder %s5386_s18, 3 }
   0x4   : > { %p188_p2 = pnand %p4184_p0, %p187_p1 }
   0x5   : > { %p215_p3 = scmp.lt.s32.totalorder (!%p188_p2), %s4180_s19, 1 }
   0x6   : > { %191 = sbr.rel (%p188_p2) target bundleno = 649 (0x289), region = 40 }
   0xb   : > { %v5178_v0 = vld [vmem:[%s6571_s1 + $0x38] sm:$0xff]  ;;  %v5177_v2 = vld [vmem:[%s6571_s1 + $0x30] sm:$0xff]  ;;  %s6587_s19 = smov (!%p215_p3, %s4180_s19), 1  ;;  %v5388_v3 = vmov 0   ;;  %v5176_v5 = vld [vmem:[%s6571_s1 + $0x28] sm:$0xff]  ;;  %vm481_vm3 = vcmask 1042432  }
   0xc   : > { %v5186_v1 = vld [vmem:[%s6571_s1 + $0x78] sm:$0xff]  ;;  %5351 = vmatpush.bf16.msra.mxu2 %v5178_v0  ;;  %1818 = vmatpush.bf16.msra.mxu0 %v5178_v0  ;;  %2087 = vst [vmem:[#allocation4] sm:$0xf] %v5388_v3  ;;  %v5185_v4 = vld [vmem:[%s6571_s1 + $0x70] sm:$0xff]  ;;  %s5367_s28 = smul.u32 160, %s6587_s19  ;;  %v5184_v6 = vld [vmem:[%s6571_s1 + $0x68] sm:$0xff] }
   0xd   : > { %5359 = vmatpush.bf16.msra.mxu3 %v5186_v1  ;;  %1847 = vmatpush.bf16.msra.mxu1 %v5186_v1  ;;  %2088 = vst [vmem:[#allocation4 + $0x4] sm:$0x1] %v5388_v3  ;;  %v5175_v16 = vld [vmem:[%s6571_s1 + $0x20] sm:$0xff]  ;;  %v5174_v25 = vld [vmem:[%s6571_s1 + $0x18] sm:$0xff]  ;;  %vm318_vm0 = vsmask.f32 3328 }
   0xe   : > { %2090 = vst [vmem:[#allocation4 + $0x48] sm:$0xf] %v5388_v3  ;;  %s5454_s10 = scalar_lea.vmem %s6570_s0, %s5367_s28  ;;  %v5183_v21 = vld [vmem:[%s6571_s1 + $0x60] sm:$0xff]  ;;  %v5182_v26 = vld [vmem:[%s6571_s1 + $0x58] sm:$0xff]  ;;  %v5173_v27 = vld [vmem:[%s6571_s1 + $0x10] sm:$0xff]  ;;  %vm482_vm4 = vcmask 1046532   ;;  %s6486_s22 = scalar_lea.vmem %s6575_s5, %s5367_s28 }
   0xf   : > { %2091 = vst [vmem:[#allocation4 + $0x4c] sm:$0x1] %v5388_v3  ;;  %v234_v7 = vld [vmem:[%s5454_s10 + $0x40] sm:$0xff]  ;;  %v236_v8 = vld [vmem:[%s5454_s10 + $0x50] sm:$0xff]  ;;  %v235_v14 = vld [vmem:[%s5454_s10 + $0x48] sm:$0x3] }
  0x10   : > { %5352 = vmatpush.bf16.msra.mxu2 %v5177_v2  ;;  %1819 = vmatpush.bf16.msra.mxu0 %v5177_v2  ;;  %v226_v9 = vld [vmem:[%s5454_s10] sm:$0xff]  ;;  %v254_v10 = vpack.c.bf16 %v234_v7, %v234_v7  ;;  %v256_v11 = vpack.c.bf16 %v236_v8, %v236_v8  ;;  %v228_v12 = vld [vmem:[%s5454_s10 + $0x10] sm:$0xff]  ;;  %v237_v15 = vld [vmem:[%s5454_s10 + $0x58] sm:$0x3]  ;;  %v255_v18 = vpack.c.bf16 %v235_v14, %v235_v14  ;;  %vm319_vm1 = vsmask.f32 7440 }
  0x11   : > { %5360 = vmatpush.bf16.msra.mxu3 %v5185_v4  ;;  %1848 = vmatpush.bf16.msra.mxu1 %v5185_v4  ;;  %v246_v13 = vpack.c.bf16 %v226_v9, %v226_v9  ;;  %v248_v17 = vpack.c.bf16 %v228_v12, %v228_v12  ;;  %v227_v19 = vld [vmem:[%s5454_s10 + $0x8] sm:$0x3]  ;;  %v229_v20 = vld [vmem:[%s5454_s10 + $0x18] sm:$0x3]  ;;  %v257_v22 = vpack.c.bf16 %v237_v15, %v237_v15  ;;  %v5480_v28 = vld [vmem:[%s5454_s10 + $0x60] sm:$0xff]  ;;  %vm2093_vm6 = vcmask 1040384  }
  0x12   : > { %274 = vst [vmem:[#allocation2 + $0x20] sm:$0xf] %v254_v10  ;;  %v247_v23 = vpack.c.bf16 %v227_v19, %v227_v19  ;;  %v249_v24 = vpack.c.bf16 %v229_v20, %v229_v20  ;;  %v5181_v29 = vld [vmem:[%s6571_s1 + $0x50] sm:$0xff]  ;;  %v5491_v39 = vld [vmem:[%s5454_s10 + $0x20] sm:$0xff]  ;;  %v5172_v40 = vld [vmem:[%s6571_s1 + $0x8] sm:$0xff]  ;;  %v258_v48 = vpack.c.bf16 %v5480_v28, %v5480_v28  ;;  %vm2234_vm11 = vcmask 1043456  }
  0x13   : > { %276 = vst [vmem:[#allocation2 + $0x28] sm:$0xf] %v256_v11  ;;  %v5485_v32 = vld [vmem:[#allocation4] sm:$0xf]  ;;  %v5180_v44 = vld [vmem:[%s6571_s1 + $0x48] sm:$0xff]  ;;  %v5171_v61 = vld [vmem:[%s6571_s1] sm:$0xff]  ;;  %v250_v4 = vpack.c.bf16 %v5491_v39, %v5491_v39 }
  0x14   : > { %5353 = vmatpush.bf16.msra.mxu2 %v5176_v5  ;;  %1820 = vmatpush.bf16.msra.mxu0 %v5176_v5  ;;  %266 = vst [vmem:[#allocation2] sm:$0xf] %v246_v13  ;;  %v5488_v35 = vld [vmem:[%s5454_s10 + $0x70] sm:$0xff]  ;;  %v2326_v53 = vshrl.u32 %v5485_v32, 16  ;;  %v2329_v59 = vshll.u32 %v5485_v32, 16  ;;  %vm5510_vm2 = vmor %vm318_vm0, %vm319_vm1  ;;  %v5194_v7 = vld [vmem:[%s6571_s1 + $0xb8] sm:$0xff] }
  0x15   : > { %5361 = vmatpush.bf16.msra.mxu3 %v5184_v6  ;;  %1849 = vmatpush.bf16.msra.mxu1 %v5184_v6  ;;  %268 = vst [vmem:[#allocation2 + $0x8] sm:$0xf] %v248_v17  ;;  %v2293_v54 = vld [vmem:[#allocation4] sm:$0xf]  ;;  %v260_v60 = vpack.c.bf16 %v5488_v35, %v5488_v35  ;;  %v5179_v6 = vld [vmem:[%s6571_s1 + $0x40] sm:$0xff]  ;;  %v5202_v20 = vld [vmem:[%s6571_s1 + $0xf8] sm:$0xff] }
  0x16   : > { %275 = vst [vmem:[#allocation2 + $0x24] sm:$0x1] %v255_v18  ;;  %v5522_v12 = vld [vmem:[#allocation4 + $0x4] sm:$0x1]  ;;  %vm5608_vm5 = vmor %vm481_vm3, %vm482_vm4  ;;  %vm2094_vm7 = vsmask.f32 256 }
  0x17   : > { %277 = vst [vmem:[#allocation2 + $0x2c] sm:$0x1] %v257_v22  ;;  %v2328_v22 = vrot.slane %v2326_v53, 4  ;;  %v2335_v39 = vshll.u32 %v5522_v12, 16  ;;  %v5209_v35 = vld [vmem:[%s6571_s1 + $0x130] sm:$0xff]  ;;  %vm5892_vm8 = vmand %vm2093_vm6, %vm2094_vm7 }
  0x18   : > { %5354 = vmatpush.bf16.msra.mxu2 %v5175_v16  ;;  %1821 = vmatpush.bf16.msra.mxu0 %v5175_v16  ;;  %267 = vst [vmem:[#allocation2 + $0x4] sm:$0x1] %v247_v23  ;;  %v2331_v23 = vrot.slane %v2329_v59, 5  ;;  %v5208_v59 = vld [vmem:[%s6571_s1 + $0x128] sm:$0xff]  ;;  %vm2120_vm9 = vsmask.f32 7938 }
  0x19   : > { %5362 = vmatpush.bf16.msra.mxu3 %v5183_v21  ;;  %1850 = vmatpush.bf16.msra.mxu1 %v5183_v21  ;;  %v290_v30 = vld [vmem:[#allocation2 + $0x20] sm:$0xf]  ;;  %269 = vst [vmem:[#allocation2 + $0xc] sm:$0x1] %v249_v24  ;;  %vm5901_vm10 = vmand %vm2093_vm6, %vm2120_vm9 }
  0x1a   : > { %v310_v31 = vld [vmem:[#allocation2 + $0x20] sm:$0xf]  ;;  %v291_v33 = vld [vmem:[#allocation2 + $0x28] sm:$0xf]  ;;  %298 = vst [vmem:[#allocation3 + $0x90] sm:$0xf] %v290_v30  ;;  %vm6035_vm12 = vmand %vm2234_vm11, %vm2120_vm9 }
  0x1b   : > { %v312_v34 = vld [vmem:[#allocation2 + $0x28] sm:$0xf]  ;;  %299 = vst [vmem:[#allocation3 + $0xb4] sm:$0xf] %v291_v33  ;;  %v286_v36 = vld [vmem:[#allocation2] sm:$0xf] }
  0x1c   : > { %5355 = vmatpush.bf16.msra.mxu2 %v5174_v25  ;;  %1822 = vmatpush.bf16.msra.mxu0 %v5174_v25  ;;  %v378_v37 = vshrl.u32 %v310_v31, 16  ;;  %v381_v38 = vshll.u32 %v310_v31, 16  ;;  %v287_v41 = vld [vmem:[#allocation2 + $0x8] sm:$0xf]  ;;  %294 = vst [vmem:[#allocation3] sm:$0xf] %v286_v36 }
  0x1d   : > { %5363 = vmatpush.bf16.msra.mxu3 %v5182_v26  ;;  %1851 = vmatpush.bf16.msra.mxu1 %v5182_v26  ;;  %v392_v42 = vshrl.u32 %v312_v34, 16  ;;  %v395_v43 = vshll.u32 %v312_v34, 16  ;;  %295 = vst [vmem:[#allocation3 + $0x24] sm:$0xf] %v287_v41  ;;  %v311_v45 = vld [vmem:[#allocation2 + $0x24] sm:$0x1] }
  0x1e   : > { %v380_v46 = vrot.slane %v378_v37, 4  ;;  %v383_v47 = vrot.slane %v381_v38, 5  ;;  %v313_v49 = vld [vmem:[#allocation2 + $0x2c] sm:$0x1]  ;;  %v387_v50 = vshll.u32 %v311_v45, 16  ;;  %v5193_v36 = vld [vmem:[%s6571_s1 + $0xb0] sm:$0xff] }
  0x1f   : > { %v394_v51 = vrot.slane %v392_v42, 4  ;;  %v397_v52 = vrot.slane %v395_v43, 5  ;;  %v401_v56 = vshll.u32 %v313_v49, 16  ;;  %v302_v57 = vld [vmem:[#allocation2] sm:$0xf]  ;;  %v232_v37 = vld [vmem:[%s5454_s10 + $0x30] sm:$0xff] }
  0x20   : > { %5356 = vmatpush.bf16.msra.mxu2 %v5173_v27  ;;  %1823 = vmatpush.bf16.msra.mxu0 %v5173_v27  ;;  %v384_v55 = vor.u32 %v383_v47, %v380_v46  ;;  %v303_v58 = vld [vmem:[#allocation2 + $0x4] sm:$0x1]  ;;  %v389_v63 = vrot.slane %v387_v50, 5  ;;  %v304_v1 = vld [vmem:[#allocation2 + $0x8] sm:$0xf]  ;;  %v322_v3 = vshrl.u32 %v302_v57, 16  ;;  %v252_v49 = vpack.c.bf16 %v232_v37, %v232_v37 }
  0x21   : > { %5364 = vmatpush.bf16.msra.mxu3 %v5181_v29  ;;  %1852 = vmatpush.bf16.msra.mxu1 %v5181_v29  ;;  %v398_v0 = vor.u32 %v397_v52, %v394_v51  ;;  %v305_v2 = vld [vmem:[#allocation2 + $0xc] sm:$0x1]  ;;  %v4285_v5 = vld [vmem:[#allocation3 + $0x90] sm:$0xf]  ;;  %v403_v9 = vrot.slane %v401_v56, 5  ;;  %v325_v10 = vshll.u32 %v302_v57, 16 }
  0x22   : > { %v385_v8 = vrot.slane %v384_v55, 4  ;;  %v331_v11 = vshll.u32 %v303_v58, 16  ;;  %v5157_v13 = vld [vmem:[#allocation3 + $0xb0] sm:$0xf0]  ;;  %v324_v15 = vrot.slane %v322_v3, 4  ;;  %v336_v16 = vshrl.u32 %v304_v1, 16 }
  0x23   : > { %v399_v14 = vrot.slane %v398_v0, 4  ;;  %v339_v17 = vshll.u32 %v304_v1, 16  ;;  %v4213_v18 = vld [vmem:[#allocation3] sm:$0xf]  ;;  %v327_v21 = vrot.slane %v325_v10, 5  ;;  %v4286_v24 = vor.u32 %v5157_v13, %v4285_v5  ;;  %v5210_v27 = vld [vmem:[%s6571_s1 + $0x138] sm:$0xff] }
  0x24   : > { %5357 = vmatpush.bf16.msra.mxu2 %v5172_v40  ;;  %1824 = vmatpush.bf16.msra.mxu0 %v5172_v40  ;;  %v390_v19 = vsel %vm5510_vm2, %v385_v8, %v389_v63  ;;  %v5139_v25 = vld [vmem:[#allocation3 + $0x20] sm:$0xf0]  ;;  %2301 = vst [vmem:[#allocation3] sm:$0xf] %v2293_v54  ;;  %v338_v29 = vrot.slane %v336_v16, 4  ;;  %v333_v33 = vrot.slane %v331_v11, 5 }
  0x25   : > { %5365 = vmatpush.bf16.msra.mxu3 %v5180_v44  ;;  %1853 = vmatpush.bf16.msra.mxu1 %v5180_v44  ;;  %v404_v26 = vsel %vm5510_vm2, %v399_v14, %v403_v9  ;;  %v341_v30 = vrot.slane %v339_v17, 5  ;;  %v4214_v31 = vor.u32 %v5139_v25, %v4213_v18  ;;  %445 = vst [vmem:[#allocation3 + $0x94] sm:$0xf] %v390_v19  ;;  %v345_v34 = vshll.u32 %v305_v2, 16  ;;  %v5218_v40 = vld [vmem:[%s6571_s1 + $0x178] sm:$0xff]  ;;  %v5201_v47 = vld [vmem:[%s6571_s1 + $0xf0] sm:$0xff] }
  0x26   : > { %v328_v32 = vor.u32 %v327_v21, %v324_v15  ;;  %446 = vst [vmem:[#allocation3 + $0xb8] sm:$0xf] %v404_v26  ;;  %v239_v41 = vld [vmem:[%s5454_s10 + $0x68] sm:$0x3]  ;;  %v2332_v44 = vor.u32 %v2331_v23, %v2328_v22  ;;  %v241_v45 = vld [vmem:[%s5454_s10 + $0x78] sm:$0x3] }
  0x27   : > { %v342_v38 = vor.u32 %v341_v30, %v338_v29  ;;  %v347_v43 = vrot.slane %v345_v34, 5  ;;  %278 = vst [vmem:[#allocation2 + $0x30] sm:$0xf] %v258_v48  ;;  %v259_v28 = vpack.c.bf16 %v239_v41, %v239_v41  ;;  %v5192_v51 = vld [vmem:[%s6571_s1 + $0xa8] sm:$0xff]  ;;  %v5217_v52 = vld [vmem:[%s6571_s1 + $0x170] sm:$0xff]  ;;  %v261_v53 = vpack.c.bf16 %v241_v45, %v241_v45  ;;  %v5191_v63 = vld [vmem:[%s6571_s1 + $0xa0] sm:$0xff] }
  0x28   : > { %5358 = vmatpush.bf16.msra.mxu2 %v5171_v61  ;;  %1825 = vmatpush.bf16.msra.mxu0 %v5171_v61  ;;  %v329_v42 = vrot.slane %v328_v32, 4  ;;  %280 = vst [vmem:[#allocation2 + $0x38] sm:$0xf] %v260_v60  ;;  %v2333_v54 = vrot.slane %v2332_v44, 4  ;;  %v2337_v55 = vrot.slane %v2335_v39, 5  ;;  %v5200_v56 = vld [vmem:[%s6571_s1 + $0xe8] sm:$0xff] }
  0x29   : > { %5366 = vmatpush.bf16.msra.mxu3 %v5179_v6  ;;  %1854 = vmatpush.bf16.msra.mxu1 %v5179_v6  ;;  %v343_v46 = vrot.slane %v342_v38, 4  ;;  %270 = vst [vmem:[#allocation2 + $0x10] sm:$0xf] %v250_v4  ;;  %v231_v57 = vld [vmem:[%s5454_s10 + $0x28] sm:$0x3]  ;;  %v5199_v5 = vld [vmem:[%s6571_s1 + $0xe0] sm:$0xff] }
  0x2a   : > { %v334_v50 = vsel %vm5510_vm2, %v329_v42, %v333_v33  ;;  %272 = vst [vmem:[#allocation2 + $0x18] sm:$0xf] %v252_v49  ;;  %v233_v60 = vld [vmem:[%s5454_s10 + $0x38] sm:$0x3]  ;;  %v5216_v0 = vld [vmem:[%s6571_s1 + $0x168] sm:$0xff]  ;;  %v2338_v4 = vsel %vm5510_vm2, %v2333_v54, %v2337_v55  ;;  %v251_v8 = vpack.c.bf16 %v231_v57, %v231_v57  ;;  %v5207_v9 = vld [vmem:[%s6571_s1 + $0x120] sm:$0xff] }
  0x2b   : > { %1836 = vmatmul.bf16.vlgmr.msra.gmra.mxu2 %v4286_v24  ;;  %1826 = vmatmul.bf16.vlgmr.msra.gmra.mxu0 %v4214_v31  ;;  %v348_v48 = vsel %vm5510_vm2, %v343_v46, %v347_v43  ;;  %441 = vst [vmem:[#allocation3 + $0x4] sm:$0xf] %v334_v50  ;;  %v5215_v13 = vld [vmem:[%s6571_s1 + $0x160] sm:$0xff]  ;;  %v5190_v15 = vld [vmem:[%s6571_s1 + $0x98] sm:$0xff]  ;;  %v253_v18 = vpack.c.bf16 %v233_v60, %v233_v60  ;;  %v5189_v39 = vld [vmem:[%s6571_s1 + $0x90] sm:$0xff] }
  0x2c   : > { %1876 = vmatpush.bf16.msrb.mxu2 %v5194_v7  ;;  %1934 = vmatpush.bf16.msrb.mxu0 %v5210_v27  ;;  %442 = vst [vmem:[#allocation3 + $0x28] sm:$0xf] %v348_v48  ;;  %v5153_v58 = vld [vmem:[#allocation3 + $0x94] sm:$0xf]  ;;  %v5198_v26 = vld [vmem:[%s6571_s1 + $0xd8] sm:$0xff] }
  0x2d   : > { %1905 = vmatpush.bf16.msrb.mxu3 %v5202_v20  ;;  %1963 = vmatpush.bf16.msrb.mxu1 %v5218_v40  ;;  %v4287_v61 = vld [vmem:[#allocation3 + $0xb4] sm:$0xf0]  ;;  %279 = vst [vmem:[#allocation2 + $0x34] sm:$0x1] %v259_v28  ;;  %v5206_v30 = vld [vmem:[%s6571_s1 + $0x118] sm:$0xff] }
  0x2e   : > { %v4290_v1 = vor.u32 %v5153_v58, %v4287_v61  ;;  %v292_v2 = vld [vmem:[#allocation2 + $0x30] sm:$0xf]  ;;  %281 = vst [vmem:[#allocation2 + $0x3c] sm:$0x1] %v261_v53  ;;  %v449_v32 = vld [vmem:[#allocation2] sm:$0xe] }
  0x2f   : > { %v314_v3 = vld [vmem:[#allocation2 + $0x30] sm:$0xf]  ;;  %v293_v6 = vld [vmem:[#allocation2 + $0x38] sm:$0xf]  ;;  %300 = vst [vmem:[#allocation3 + $0xd8] sm:$0xf] %v292_v2 }
  0x30   : > { %1877 = vmatpush.bf16.msrb.mxu2 %v5193_v36  ;;  %1935 = vmatpush.bf16.msrb.mxu0 %v5209_v35  ;;  %v316_v7 = vld [vmem:[#allocation2 + $0x38] sm:$0xf]  ;;  %301 = vst [vmem:[#allocation3 + $0xfc] sm:$0xf] %v293_v6  ;;  %v288_v10 = vld [vmem:[#allocation2 + $0x10] sm:$0xf] }
  0x31   : > { %1906 = vmatpush.bf16.msrb.mxu3 %v5201_v47  ;;  %1964 = vmatpush.bf16.msrb.mxu1 %v5217_v52  ;;  %v406_v11 = vshrl.u32 %v314_v3, 16  ;;  %v409_v12 = vshll.u32 %v314_v3, 16  ;;  %296 = vst [vmem:[#allocation3 + $0x48] sm:$0xf] %v288_v10  ;;  %v420_v16 = vshrl.u32 %v316_v7, 16  ;;  %v423_v17 = vshll.u32 %v316_v7, 16 }
  0x32   : > { %1865 = vmatmul.bf16.vlgmr.msra.gmra.mxu3 %v4290_v1  ;;  %v5135_v14 = vld [vmem:[#allocation3 + $0x4] sm:$0xf]  ;;  %v289_v23 = vld [vmem:[#allocation2 + $0x18] sm:$0xf]  ;;  %271 = vst [vmem:[#allocation2 + $0x14] sm:$0x1] %v251_v8 }
  0x33   : > { %v4215_v19 = vld [vmem:[#allocation3 + $0x24] sm:$0xf0]  ;;  %2445 = vst [vmem:[#allocation3 + $0x4] sm:$0xf] %v2338_v4  ;;  %v408_v20 = vrot.slane %v406_v11, 4  ;;  %v411_v21 = vrot.slane %v409_v12, 5 }
  0x34   : > { %1878 = vmatpush.bf16.msrb.mxu2 %v5192_v51  ;;  %1936 = vmatpush.bf16.msrb.mxu0 %v5208_v59  ;;  %v4218_v22 = vor.u32 %v5135_v14, %v4215_v19  ;;  %v422_v24 = vrot.slane %v420_v16, 4  ;;  %v425_v25 = vrot.slane %v423_v17, 5  ;;  %297 = vst [vmem:[#allocation3 + $0x6c] sm:$0xf] %v289_v23  ;;  %v315_v27 = vld [vmem:[#allocation2 + $0x34] sm:$0x1] }
  0x35   : > { %1907 = vmatpush.bf16.msrb.mxu3 %v5200_v56  ;;  %1965 = vmatpush.bf16.msrb.mxu1 %v5216_v0  ;;  %v412_v29 = vor.u32 %v411_v21, %v408_v20  ;;  %v306_v31 = vld [vmem:[#allocation2 + $0x10] sm:$0xf]  ;;  %v450_v33 = vld [vmem:[#allocation2 + $0x4] sm:$0x1]  ;;  %v317_v34 = vld [vmem:[#allocation2 + $0x3c] sm:$0x1] }
  0x36   : > { %1855 = vmatmul.bf16.vlgmr.msra.gmra.mxu1 %v4218_v22  ;;  %v415_v36 = vshll.u32 %v315_v27, 16  ;;  %v426_v37 = vor.u32 %v425_v25, %v422_v24  ;;  %273 = vst [vmem:[#allocation2 + $0x1c] sm:$0x1] %v253_v18  ;;  %v350_v38 = vshrl.u32 %v306_v31, 16  ;;  %v4321_v40 = vld [vmem:[#allocation3 + $0xd8] sm:$0xf] }
  0x37   : > { %v413_v41 = vrot.slane %v412_v29, 4  ;;  %v429_v42 = vshll.u32 %v317_v34, 16  ;;  %v308_v43 = vld [vmem:[#allocation2 + $0x18] sm:$0xf]  ;;  %v5166_v44 = vld [vmem:[#allocation3 + $0xf8] sm:$0xf0] }
  0x38   : > { %1879 = vmatpush.bf16.msrb.mxu2 %v5191_v63  ;;  %1937 = vmatpush.bf16.msrb.mxu0 %v5207_v9  ;;  %v417_v45 = vrot.slane %v415_v36, 5  ;;  %v427_v46 = vrot.slane %v426_v37, 4  ;;  %v352_v47 = vrot.slane %v350_v38, 4  ;;  %v353_v49 = vshll.u32 %v306_v31, 16  ;;  %v451_v50 = vld [vmem:[#allocation2 + $0x8] sm:$0xe] }
  0x39   : > { %1908 = vmatpush.bf16.msrb.mxu3 %v5199_v5  ;;  %1966 = vmatpush.bf16.msrb.mxu1 %v5215_v13  ;;  %v4322_v28 = vor.u32 %v5166_v44, %v4321_v40  ;;  %v431_v48 = vrot.slane %v429_v42, 5  ;;  %v364_v35 = vshrl.u32 %v308_v43, 16  ;;  %v367_v51 = vshll.u32 %v308_v43, 16  ;;  %v5197_v52 = vld [vmem:[%s6571_s1 + $0xd0] sm:$0xff]  ;;  %v452_v53 = vld [vmem:[#allocation2 + $0xc] sm:$0x1] }
  0x3a   : > { %v4249_v55 = vld [vmem:[#allocation3 + $0x48] sm:$0xf]  ;;  %v418_v56 = vsel %vm5510_vm2, %v413_v41, %v417_v45  ;;  %v355_v57 = vrot.slane %v353_v49, 5  ;;  %v5205_v58 = vld [vmem:[%s6571_s1 + $0x110] sm:$0xff]  ;;  %v5188_v59 = vld [vmem:[%s6571_s1 + $0x88] sm:$0xff]  ;;  %v4187_v61 = vrot.slane %v449_v32, 9 }
  0x3b   : > { %v5214_v60 = vld [vmem:[%s6571_s1 + $0x158] sm:$0xff]  ;;  %v486_v63 = vrot.slane %v450_v33, 5  ;;  %1841 = vmatmul.bf16.gmra.mxu2 %v4322_v28  ;;  %v432_v0 = vsel %vm5510_vm2, %v427_v46, %v431_v48  ;;  %447 = vst [vmem:[#allocation3 + $0xdc] sm:$0xf] %v418_v56  ;;  %v307_v1 = vld [vmem:[#allocation2 + $0x14] sm:$0x1] }
  0x3c   : > { %1880 = vmatpush.bf16.msrb.mxu2 %v5190_v15  ;;  %1938 = vmatpush.bf16.msrb.mxu0 %v5206_v30  ;;  %v366_v2 = vrot.slane %v364_v35, 4  ;;  %v369_v3 = vrot.slane %v367_v51, 5  ;;  %v5148_v4 = vld [vmem:[#allocation3 + $0x68] sm:$0xf0]  ;;  %448 = vst [vmem:[#allocation3 + $0x100] sm:$0xf] %v432_v0  ;;  %v356_v5 = vor.u32 %v355_v57, %v352_v47 }
  0x3d   : > { %1909 = vmatpush.bf16.msrb.mxu3 %v5198_v26  ;;  %v359_v6 = vshll.u32 %v307_v1, 16  ;;  %v5196_v7 = vld [vmem:[%s6571_s1 + $0xc8] sm:$0xff]  ;;  %1967 = vmatpush.bf16.msrb.mxu1 %v5214_v60  ;;  %v487_v8 = vsel %vm5608_vm5, %v4187_v61, %v486_v63  ;;  %v4250_v9 = vor.u32 %v5148_v4, %v4249_v55  ;;  %v309_v10 = vld [vmem:[#allocation2 + $0x1c] sm:$0x1]  ;;  %v4188_v12 = vrot.slane %v451_v50, 9  ;;  %v5187_v18 = vld [vmem:[%s6571_s1 + $0x80] sm:$0xff] }
  0x3e   : > { %v370_v11 = vor.u32 %v369_v3, %v366_v2  ;;  %v490_v13 = vrot.slane %v452_v53, 5  ;;  %524 = vst [vmem:[#allocation3 + $0x8] sm:$0xf] %v487_v8  ;;  %v357_v14 = vrot.slane %v356_v5, 4  ;;  %v373_v16 = vshll.u32 %v309_v10, 16  ;;  %v5204_v17 = vld [vmem:[%s6571_s1 + $0x108] sm:$0xff] }
  0x3f   : > { %v361_v15 = vrot.slane %v359_v6, 5  ;;  %v2453_v19 = vld [vmem:[#allocation4] sm:$0xe]  ;;  %1831 = vmatmul.bf16.gmra.mxu0 %v4250_v9  ;;  %v2454_v22 = vld [vmem:[#allocation4 + $0x4] sm:$0x1]  ;;  %v5226_v24 = vld [vmem:[%s6571_s1 + $0x1b8] sm:$0xff] }
  0x40   : > { %1881 = vmatpush.bf16.msrb.mxu2 %v5189_v39  ;;  %v371_v20 = vrot.slane %v370_v11, 4  ;;  %v491_v21 = vsel %vm5608_vm5, %v4188_v12, %v490_v13  ;;  %v4651_v23 = vrot.slane %v2453_v19, 9  ;;  %v5213_v25 = vld [vmem:[%s6571_s1 + $0x150] sm:$0xff]  ;;  %v375_v27 = vrot.slane %v373_v16, 5  ;;  %1939 = vmatpush.bf16.msrb.mxu0 %v5205_v58  ;;  %v533_v30 = vld [vmem:[#allocation2 + $0x8] sm:$0xf] }
  0x41   : > { %1910 = vmatpush.bf16.msrb.mxu3 %v5197_v52  ;;  %v362_v26 = vsel %vm5510_vm2, %v357_v14, %v361_v15  ;;  %525 = vst [vmem:[#allocation3 + $0x2c] sm:$0xf] %v491_v21  ;;  %v2487_v29 = vrot.slane %v2454_v22, 5  ;;  %v5195_v31 = vld [vmem:[%s6571_s1 + $0xc0] sm:$0xff]  ;;  %1968 = vmatpush.bf16.msrb.mxu1 %v5213_v25  ;;  %v534_v32 = vld [vmem:[#allocation2 + $0x10] sm:$0xf] }
  0x42   : > { %443 = vst [vmem:[#allocation3 + $0x4c] sm:$0xf] %v362_v26  ;;  %v549_v33 = vld [vmem:[#allocation2 + $0x8] sm:$0xf]  ;;  %v5162_v34 = vld [vmem:[#allocation3 + $0xdc] sm:$0xf]  ;;  %v376_v36 = vsel %vm5510_vm2, %v371_v20, %v375_v27 }
  0x43   : > { %v2488_v37 = vsel %vm5608_vm5, %v4651_v23, %v2487_v29  ;;  %v5203_v38 = vld [vmem:[%s6571_s1 + $0x100] sm:$0xff]  ;;  %541 = vst [vmem:[#allocation3 + $0xc] sm:$0xf] %v533_v30  ;;  %v550_v39 = vld [vmem:[#allocation2 + $0xc] sm:$0x1]  ;;  %v566_v45 = vshrl.u32 %v549_v33, 16 }
  0x44   : > { %1882 = vmatpush.bf16.msrb.mxu2 %v5188_v59  ;;  %v4323_v40 = vld [vmem:[#allocation3 + $0xfc] sm:$0xf0]  ;;  %444 = vst [vmem:[#allocation3 + $0x70] sm:$0xf] %v376_v36  ;;  %1940 = vmatpush.bf16.msrb.mxu0 %v5204_v17  ;;  %v552_v44 = vld [vmem:[#allocation2 + $0x14] sm:$0x1] }
  0x45   : > { %1911 = vmatpush.bf16.msrb.mxu3 %v5196_v7  ;;  %v551_v41 = vld [vmem:[#allocation2 + $0x10] sm:$0xf]  ;;  %v4326_v42 = vor.u32 %v5162_v34, %v4323_v40  ;;  %v4221_v43 = vld [vmem:[#allocation3 + $0x8] sm:$0xf]  ;;  %542 = vst [vmem:[#allocation3 + $0x30] sm:$0xf] %v534_v32 }
  0x46   : > { %2525 = vst [vmem:[#allocation3 + $0x8] sm:$0xf] %v2488_v37  ;;  %v569_v46 = vshll.u32 %v549_v33, 16  ;;  %v575_v47 = vshll.u32 %v550_v39, 16  ;;  %v580_v49 = vshrl.u32 %v551_v41, 16  ;;  %v583_v50 = vshll.u32 %v551_v41, 16 }
  0x47   : > { %1870 = vmatmul.bf16.gmra.mxu3 %v4326_v42  ;;  %v589_v28 = vshll.u32 %v552_v44, 16  ;;  %v5234_v48 = vld [vmem:[%s6571_s1 + $0x1f8] sm:$0xff]  ;;  %v5212_v35 = vld [vmem:[%s6571_s1 + $0x148] sm:$0xff]  ;;  %v5225_v51 = vld [vmem:[%s6571_s1 + $0x1b0] sm:$0xff]  ;;  %v568_v53 = vrot.slane %v566_v45, 4 }
  0x48   : > { %1883 = vmatpush.bf16.msrb.mxu2 %v5187_v18  ;;  %v5140_v52 = vld [vmem:[#allocation3 + $0x28] sm:$0xf0]  ;;  %v571_v55 = vrot.slane %v569_v46, 5  ;;  %v582_v56 = vrot.slane %v580_v49, 4  ;;  %1941 = vmatpush.bf16.msrb.mxu0 %v5203_v38  ;;  %v585_v59 = vrot.slane %v583_v50, 5  ;;  %v5233_v60 = vld [vmem:[%s6571_s1 + $0x1f0] sm:$0xff] }
  0x49   : > { %1912 = vmatpush.bf16.msrb.mxu3 %v5195_v31  ;;  %v5144_v57 = vld [vmem:[#allocation3 + $0x4c] sm:$0xf]  ;;  %v4222_v58 = vor.u32 %v5140_v52, %v4221_v43  ;;  %v577_v63 = vrot.slane %v575_v47, 5  ;;  %v591_v0 = vrot.slane %v589_v28, 5  ;;  %1969 = vmatpush.bf16.msrb.mxu1 %v5212_v35  ;;  %v5211_v1 = vld [vmem:[%s6571_s1 + $0x140] sm:$0xff]  ;;  %v5224_v16 = vld [vmem:[%s6571_s1 + $0x1a8] sm:$0xff] }
  0x4a   : > { %v572_v61 = vor.u32 %v571_v55, %v568_v53  ;;  %v5242_v2 = vld [vmem:[%s6571_s1 + $0x238] sm:$0xff]  ;;  %v693_v3 = vld [vmem:[#allocation2 + $0x8] sm:$0xe]  ;;  %v586_v5 = vor.u32 %v585_v59, %v582_v56  ;;  %v694_v6 = vld [vmem:[#allocation2 + $0xc] sm:$0x1] }
  0x4b   : > { %v4251_v4 = vld [vmem:[#allocation3 + $0x6c] sm:$0xf0]  ;;  %v695_v7 = vld [vmem:[#allocation2 + $0x10] sm:$0xe]  ;;  %1884 = vmatmul.bf16.vlgmr.msrb.gmra.mxu2 %v4222_v58  ;;  %v696_v10 = vld [vmem:[#allocation2 + $0x14] sm:$0x1] }
  0x4c   : > { %1992 = vmatpush.bf16.msra.mxu2 %v5226_v24  ;;  %v4254_v8 = vor.u32 %v5144_v57, %v4251_v4  ;;  %v573_v9 = vrot.slane %v572_v61, 4  ;;  %2050 = vmatpush.bf16.msra.mxu0 %v5242_v2  ;;  %v4195_v11 = vrot.slane %v693_v3, 9  ;;  %v587_v12 = vrot.slane %v586_v5, 4  ;;  %v453_v15 = vld [vmem:[#allocation2 + $0x10] sm:$0xe]  ;;  %v5232_v33 = vld [vmem:[%s6571_s1 + $0x1e8] sm:$0xff] }
  0x4d   : > { %2021 = vmatpush.bf16.msra.mxu3 %v5234_v48  ;;  %v727_v13 = vrot.slane %v694_v6, 5  ;;  %v4196_v14 = vrot.slane %v695_v7, 9  ;;  %v5136_v17 = vld [vmem:[#allocation3 + $0xc] sm:$0xf]  ;;  %v4223_v18 = vld [vmem:[#allocation3 + $0x2c] sm:$0xf0]  ;;  %1970 = vmatpush.bf16.msrb.mxu1 %v5211_v1 }
  0x4e   : > { %1860 = vmatmul.bf16.gmra.mxu1 %v4254_v8  ;;  %v578_v19 = vsel %vm5510_vm2, %v573_v9, %v577_v63  ;;  %v731_v20 = vrot.slane %v696_v10, 5  ;;  %v454_v21 = vld [vmem:[#allocation2 + $0x14] sm:$0x1]  ;;  %v455_v22 = vld [vmem:[#allocation2 + $0x18] sm:$0xe]  ;;  %v4189_v23 = vrot.slane %v453_v15, 9  ;;  %v592_v24 = vsel %vm5510_vm2, %v587_v12, %v591_v0 }
  0x4f   : > { %685 = vst [vmem:[#allocation3 + $0x10] sm:$0xf] %v578_v19  ;;  %v728_v25 = vsel %vm5608_vm5, %v4195_v11, %v727_v13  ;;  %v456_v26 = vld [vmem:[#allocation2 + $0x1c] sm:$0x1]  ;;  %v494_v27 = vrot.slane %v454_v21, 5  ;;  %v4190_v29 = vrot.slane %v455_v22, 9  ;;  %v4226_v41 = vor.u32 %v5136_v17, %v4223_v18 }
  0x50   : > { %1993 = vmatpush.bf16.msra.mxu2 %v5225_v51  ;;  %686 = vst [vmem:[#allocation3 + $0x34] sm:$0xf] %v592_v24  ;;  %v732_v30 = vsel %vm5608_vm5, %v4196_v14, %v731_v20  ;;  %v498_v31 = vrot.slane %v456_v26, 5  ;;  %v535_v32 = vld [vmem:[#allocation2 + $0x18] sm:$0xf]  ;;  %v5241_v48 = vld [vmem:[%s6571_s1 + $0x230] sm:$0xff] }
  0x51   : > { %2022 = vmatpush.bf16.msra.mxu3 %v5233_v60  ;;  %765 = vst [vmem:[#allocation3 + $0x14] sm:$0xf] %v728_v25  ;;  %v495_v34 = vsel %vm5608_vm5, %v4189_v23, %v494_v27  ;;  %v536_v36 = vld [vmem:[#allocation2 + $0x20] sm:$0xf]  ;;  %v553_v37 = vld [vmem:[#allocation2 + $0x18] sm:$0xf]  ;;  %2051 = vmatpush.bf16.msra.mxu0 %v5241_v48 }
  0x52   : > { %766 = vst [vmem:[#allocation3 + $0x38] sm:$0xf] %v732_v30  ;;  %v499_v38 = vsel %vm5608_vm5, %v4190_v29, %v498_v31  ;;  %v554_v39 = vld [vmem:[#allocation2 + $0x1c] sm:$0x1]  ;;  %v555_v40 = vld [vmem:[#allocation2 + $0x20] sm:$0xf] }
  0x53   : > { %526 = vst [vmem:[#allocation3 + $0x50] sm:$0xf] %v495_v34  ;;  %v556_v42 = vld [vmem:[#allocation2 + $0x24] sm:$0x1]  ;;  %v594_v43 = vshrl.u32 %v553_v37, 16  ;;  %v597_v44 = vshll.u32 %v553_v37, 16 }
  0x54   : > { %1994 = vmatpush.bf16.msra.mxu2 %v5224_v16  ;;  %527 = vst [vmem:[#allocation3 + $0x74] sm:$0xf] %v499_v38  ;;  %v603_v45 = vshll.u32 %v554_v39, 16  ;;  %v608_v46 = vshrl.u32 %v555_v40, 16  ;;  %v611_v47 = vshll.u32 %v555_v40, 16  ;;  %v617_v49 = vshll.u32 %v556_v42, 16 }
  0x55   : > { %2023 = vmatpush.bf16.msra.mxu3 %v5232_v33  ;;  %543 = vst [vmem:[#allocation3 + $0x54] sm:$0xf] %v535_v32  ;;  %v596_v50 = vrot.slane %v594_v43, 4  ;;  %v599_v28 = vrot.slane %v597_v44, 5  ;;  %v5223_v35 = vld [vmem:[%s6571_s1 + $0x1a0] sm:$0xff]  ;;  %v5240_v60 = vld [vmem:[%s6571_s1 + $0x228] sm:$0xff] }
  0x56   : > { %v4229_v51 = vld [vmem:[#allocation3 + $0x10] sm:$0xf]  ;;  %544 = vst [vmem:[#allocation3 + $0x78] sm:$0xf] %v536_v36  ;;  %v605_v52 = vrot.slane %v603_v45, 5  ;;  %v610_v53 = vrot.slane %v608_v46, 4  ;;  %2052 = vmatpush.bf16.msra.mxu0 %v5240_v60 }
  0x57   : > { %1913 = vmatmul.bf16.vlgmr.msrb.gmra.mxu3 %v4226_v41  ;;  %v5141_v55 = vld [vmem:[#allocation3 + $0x30] sm:$0xf0]  ;;  %v600_v56 = vor.u32 %v599_v28, %v596_v50  ;;  %v613_v57 = vrot.slane %v611_v47, 5  ;;  %v619_v58 = vrot.slane %v617_v49, 5  ;;  %v697_v0 = vld [vmem:[#allocation2 + $0x18] sm:$0xe] }
  0x58   : > { %v5231_v59 = vld [vmem:[%s6571_s1 + $0x1e0] sm:$0xff]  ;;  %v4230_v61 = vor.u32 %v5141_v55, %v4229_v51  ;;  %1995 = vmatpush.bf16.msra.mxu2 %v5223_v35  ;;  %v698_v1 = vld [vmem:[#allocation2 + $0x1c] sm:$0x1]  ;;  %v4197_v6 = vrot.slane %v697_v0, 9  ;;  %v459_v22 = vld [vmem:[#allocation2 + $0x28] sm:$0xe] }
  0x59   : > { %v5137_v63 = vld [vmem:[#allocation3 + $0x14] sm:$0xf]  ;;  %v4231_v2 = vld [vmem:[#allocation3 + $0x34] sm:$0xf0]  ;;  %v601_v3 = vrot.slane %v600_v56, 4  ;;  %v614_v4 = vor.u32 %v613_v57, %v610_v53  ;;  %2024 = vmatpush.bf16.msra.mxu3 %v5231_v59  ;;  %v735_v10 = vrot.slane %v698_v1, 5 }
  0x5a   : > { %v699_v5 = vld [vmem:[#allocation2 + $0x20] sm:$0xe]  ;;  %1942 = vmatmul.bf16.vlgmr.msrb.gmra.mxu0 %v4230_v61  ;;  %v4234_v7 = vor.u32 %v5137_v63, %v4231_v2  ;;  %v700_v9 = vld [vmem:[#allocation2 + $0x24] sm:$0x1]  ;;  %v460_v25 = vld [vmem:[#allocation2 + $0x2c] sm:$0x1] }
  0x5b   : > { %v4257_v8 = vld [vmem:[#allocation3 + $0x50] sm:$0xf]  ;;  %v4198_v11 = vrot.slane %v699_v5, 9  ;;  %v5149_v12 = vld [vmem:[#allocation3 + $0x70] sm:$0xf0]  ;;  %v606_v13 = vsel %vm5510_vm2, %v601_v3, %v605_v52  ;;  %v615_v14 = vrot.slane %v614_v4, 4  ;;  %v736_v18 = vsel %vm5608_vm5, %v4197_v6, %v735_v10 }
  0x5c   : > { %v739_v15 = vrot.slane %v700_v9, 5  ;;  %v457_v16 = vld [vmem:[#allocation2 + $0x20] sm:$0xe]  ;;  %v4258_v17 = vor.u32 %v5149_v12, %v4257_v8  ;;  %687 = vst [vmem:[#allocation3 + $0x58] sm:$0xf] %v606_v13  ;;  %v4192_v29 = vrot.slane %v459_v22, 9 }
  0x5d   : > { %v458_v19 = vld [vmem:[#allocation2 + $0x24] sm:$0x1]  ;;  %v620_v20 = vsel %vm5510_vm2, %v615_v14, %v619_v58  ;;  %767 = vst [vmem:[#allocation3 + $0x5c] sm:$0xf] %v736_v18  ;;  %v4259_v24 = vld [vmem:[#allocation3 + $0x74] sm:$0xf0] }
  0x5e   : > { %v740_v21 = vsel %vm5608_vm5, %v4198_v11, %v739_v15  ;;  %1971 = vmatmul.bf16.vlgmr.msrb.gmra.mxu1 %v4234_v7  ;;  %1889 = vmatmul.bf16.gmra.mxu2 %v4258_v17  ;;  %v5145_v23 = vld [vmem:[#allocation3 + $0x54] sm:$0xf]  ;;  %688 = vst [vmem:[#allocation3 + $0x7c] sm:$0xf] %v620_v20  ;;  %v4191_v26 = vrot.slane %v457_v16, 9  ;;  %v502_v27 = vrot.slane %v458_v19, 5 }
  0x5f   : > { %768 = vst [vmem:[#allocation3 + $0x80] sm:$0xf] %v740_v21  ;;  %v506_v30 = vrot.slane %v460_v25, 5  ;;  %v5222_v31 = vld [vmem:[%s6571_s1 + $0x198] sm:$0xff]  ;;  %v537_v34 = vld [vmem:[#allocation2 + $0x28] sm:$0xf]  ;;  %v4262_v44 = vor.u32 %v5145_v23, %v4259_v24 }
  0x60   : > { %v5230_v32 = vld [vmem:[%s6571_s1 + $0x1d8] sm:$0xff]  ;;  %v503_v33 = vsel %vm5608_vm5, %v4191_v26, %v502_v27  ;;  %v538_v36 = vld [vmem:[#allocation2 + $0x30] sm:$0xf]  ;;  %v557_v37 = vld [vmem:[#allocation2 + $0x28] sm:$0xf]  ;;  %1996 = vmatpush.bf16.msra.mxu2 %v5222_v31 }
  0x61   : > { %v507_v38 = vsel %vm5608_vm5, %v4192_v29, %v506_v30  ;;  %528 = vst [vmem:[#allocation3 + $0x98] sm:$0xf] %v503_v33  ;;  %v558_v39 = vld [vmem:[#allocation2 + $0x2c] sm:$0x1]  ;;  %v559_v40 = vld [vmem:[#allocation2 + $0x30] sm:$0xf]  ;;  %2025 = vmatpush.bf16.msra.mxu3 %v5230_v32 }
  0x62   : > { %529 = vst [vmem:[#allocation3 + $0xbc] sm:$0xf] %v507_v38  ;;  %v560_v41 = vld [vmem:[#allocation2 + $0x34] sm:$0x1]  ;;  %v622_v42 = vshrl.u32 %v557_v37, 16  ;;  %v625_v43 = vshll.u32 %v557_v37, 16 }
  0x63   : > { %v4265_v45 = vld [vmem:[#allocation3 + $0x58] sm:$0xf]  ;;  %545 = vst [vmem:[#allocation3 + $0x9c] sm:$0xf] %v537_v34  ;;  %v631_v46 = vshll.u32 %v558_v39, 16  ;;  %v636_v47 = vshrl.u32 %v559_v40, 16 }
  0x64   : > { %v5146_v49 = vld [vmem:[#allocation3 + $0x5c] sm:$0xf]  ;;  %546 = vst [vmem:[#allocation3 + $0xc0] sm:$0xf] %v538_v36  ;;  %v624_v50 = vrot.slane %v622_v42, 4  ;;  %v627_v28 = vrot.slane %v625_v43, 5 }
  0x65   : > { %v5150_v48 = vld [vmem:[#allocation3 + $0x78] sm:$0xf0]  ;;  %v638_v35 = vrot.slane %v636_v47, 4  ;;  %v639_v51 = vshll.u32 %v559_v40, 16  ;;  %v645_v52 = vshll.u32 %v560_v41, 16  ;;  %v633_v57 = vrot.slane %v631_v46, 5 }
  0x66   : > { %v4266_v53 = vor.u32 %v5150_v48, %v4265_v45  ;;  %v4267_v55 = vld [vmem:[#allocation3 + $0x7c] sm:$0xf0]  ;;  %v628_v56 = vor.u32 %v627_v28, %v624_v50  ;;  %v5239_v58 = vld [vmem:[%s6571_s1 + $0x220] sm:$0xff]  ;;  %v5238_v0 = vld [vmem:[%s6571_s1 + $0x218] sm:$0xff] }
  0x67   : > { %v5221_v59 = vld [vmem:[%s6571_s1 + $0x190] sm:$0xff]  ;;  %1918 = vmatmul.bf16.gmra.mxu3 %v4262_v44  ;;  %v641_v60 = vrot.slane %v639_v51, 5  ;;  %v647_v61 = vrot.slane %v645_v52, 5  ;;  %v701_v1 = vld [vmem:[#allocation2 + $0x28] sm:$0xe]  ;;  %2053 = vmatpush.bf16.msra.mxu0 %v5239_v58  ;;  %v4270_v6 = vor.u32 %v5146_v49, %v4267_v55  ;;  %v242_v27 = vld [vmem:[%s5454_s10 + $0x80] sm:$0xff] }
  0x68   : > { %v5229_v63 = vld [vmem:[%s6571_s1 + $0x1d0] sm:$0xff]  ;;  %v4293_v2 = vld [vmem:[#allocation3 + $0x98] sm:$0xf]  ;;  %v629_v3 = vrot.slane %v628_v56, 4  ;;  %1997 = vmatpush.bf16.msra.mxu2 %v5221_v59  ;;  %v702_v4 = vld [vmem:[#allocation2 + $0x2c] sm:$0x1]  ;;  %v262_v33 = vpack.c.bf16 %v242_v27, %v242_v27 }
  0x69   : > { %v4199_v5 = vrot.slane %v701_v1, 9  ;;  %v5158_v7 = vld [vmem:[#allocation3 + $0xb8] sm:$0xf0]  ;;  %v642_v8 = vor.u32 %v641_v60, %v638_v35  ;;  %2026 = vmatpush.bf16.msra.mxu3 %v5229_v63  ;;  %v703_v9 = vld [vmem:[#allocation2 + $0x30] sm:$0xe]  ;;  %v743_v13 = vrot.slane %v702_v4, 5 }
  0x6a   : > { %v704_v10 = vld [vmem:[#allocation2 + $0x34] sm:$0x1]  ;;  %1947 = vmatmul.bf16.gmra.mxu0 %v4266_v53  ;;  %v4294_v11 = vor.u32 %v5158_v7, %v4293_v2  ;;  %v634_v12 = vsel %vm5510_vm2, %v629_v3, %v633_v57  ;;  %v4200_v14 = vrot.slane %v703_v9, 9  ;;  %v461_v15 = vld [vmem:[#allocation2 + $0x30] sm:$0xe]  ;;  %v5220_v26 = vld [vmem:[%s6571_s1 + $0x188] sm:$0xff] }
  0x6b   : > { %v643_v16 = vrot.slane %v642_v8, 4  ;;  %689 = vst [vmem:[#allocation3 + $0xa0] sm:$0xf] %v634_v12  ;;  %v747_v17 = vrot.slane %v704_v10, 5  ;;  %2054 = vmatpush.bf16.msra.mxu0 %v5238_v0  ;;  %v744_v18 = vsel %vm5608_vm5, %v4199_v5, %v743_v13  ;;  %v462_v19 = vld [vmem:[#allocation2 + $0x34] sm:$0x1] }
  0x6c   : > { %v463_v20 = vld [vmem:[#allocation2 + $0x38] sm:$0xe]  ;;  %v464_v21 = vld [vmem:[#allocation2 + $0x3c] sm:$0x1]  ;;  %769 = vst [vmem:[#allocation3 + $0xa4] sm:$0xf] %v744_v18  ;;  %1998 = vmatpush.bf16.msra.mxu2 %v5220_v26 }
  0x6d   : > { %v648_v22 = vsel %vm5510_vm2, %v643_v16, %v647_v61  ;;  %v748_v23 = vsel %vm5608_vm5, %v4200_v14, %v747_v17  ;;  %v4193_v24 = vrot.slane %v461_v15, 9  ;;  %v510_v25 = vrot.slane %v462_v19, 5  ;;  %v5154_v29 = vld [vmem:[#allocation3 + $0x9c] sm:$0xf]  ;;  %v4295_v30 = vld [vmem:[#allocation3 + $0xbc] sm:$0xf0] }
  0x6e   : > { %1976 = vmatmul.bf16.gmra.mxu1 %v4270_v6  ;;  %1894 = vmatmul.bf16.gmra.mxu2 %v4294_v11  ;;  %690 = vst [vmem:[#allocation3 + $0xc4] sm:$0xf] %v648_v22  ;;  %v4194_v31 = vrot.slane %v463_v20, 9  ;;  %v514_v32 = vrot.slane %v464_v21, 5  ;;  %v539_v34 = vld [vmem:[#allocation2 + $0x38] sm:$0xf]  ;;  %v4298_v28 = vor.u32 %v5154_v29, %v4295_v30 }
  0x6f   : > { %770 = vst [vmem:[#allocation3 + $0xc8] sm:$0xf] %v748_v23  ;;  %v511_v36 = vsel %vm5608_vm5, %v4193_v24, %v510_v25  ;;  %v243_v37 = vld [vmem:[%s5454_s10 + $0x88] sm:$0x3]  ;;  %v561_v38 = vld [vmem:[#allocation2 + $0x38] sm:$0xf] }
  0x70   : > { %v515_v39 = vsel %vm5608_vm5, %v4194_v31, %v514_v32  ;;  %530 = vst [vmem:[#allocation3 + $0xe0] sm:$0xf] %v511_v36  ;;  %v263_v40 = vpack.c.bf16 %v243_v37, %v243_v37  ;;  %v562_v41 = vld [vmem:[#allocation2 + $0x3c] sm:$0x1]  ;;  %v650_v42 = vshrl.u32 %v561_v38, 16  ;;  %v653_v43 = vshll.u32 %v561_v38, 16 }
  0x71   : > { %531 = vst [vmem:[#allocation3 + $0x104] sm:$0xf] %v515_v39  ;;  %v659_v44 = vshll.u32 %v562_v41, 16  ;;  %v5228_v45 = vld [vmem:[%s6571_s1 + $0x1c8] sm:$0xff]  ;;  %v5237_v46 = vld [vmem:[%s6571_s1 + $0x210] sm:$0xff]  ;;  %v5219_v47 = vld [vmem:[%s6571_s1 + $0x180] sm:$0xff] }
  0x72   : > { %282 = vst [vmem:[#allocation2 + $0x40] sm:$0xf] %v262_v33  ;;  %v652_v49 = vrot.slane %v650_v42, 4  ;;  %v655_v50 = vrot.slane %v653_v43, 5  ;;  %v4301_v48 = vld [vmem:[#allocation3 + $0xa0] sm:$0xf]  ;;  %2027 = vmatpush.bf16.msra.mxu3 %v5228_v45  ;;  %2055 = vmatpush.bf16.msra.mxu0 %v5237_v46 }
  0x73   : > { %547 = vst [vmem:[#allocation3 + $0xe4] sm:$0xf] %v539_v34  ;;  %v5236_v35 = vld [vmem:[%s6571_s1 + $0x208] sm:$0xff]  ;;  %v661_v52 = vrot.slane %v659_v44, 5  ;;  %1999 = vmatpush.bf16.msra.mxu2 %v5219_v47  ;;  %v5227_v53 = vld [vmem:[%s6571_s1 + $0x1c0] sm:$0xff] }
  0x74   : > { %283 = vst [vmem:[#allocation2 + $0x44] sm:$0x1] %v263_v40  ;;  %v656_v51 = vor.u32 %v655_v50, %v652_v49  ;;  %v705_v55 = vld [vmem:[#allocation2 + $0x38] sm:$0xe]  ;;  %v5155_v57 = vld [vmem:[#allocation3 + $0xa4] sm:$0xf] }
  0x75   : > { %v5159_v56 = vld [vmem:[#allocation3 + $0xc0] sm:$0xf0]  ;;  %v706_v58 = vld [vmem:[#allocation2 + $0x3c] sm:$0x1]  ;;  %v4201_v59 = vrot.slane %v705_v55, 9  ;;  %v5235_v60 = vld [vmem:[%s6571_s1 + $0x200] sm:$0xff] }
  0x76   : > { %v4302_v61 = vor.u32 %v5159_v56, %v4301_v48  ;;  %v4303_v63 = vld [vmem:[#allocation3 + $0xc4] sm:$0xf0]  ;;  %v657_v0 = vrot.slane %v656_v51, 4  ;;  %v751_v1 = vrot.slane %v706_v58, 5  ;;  %v774_v2 = vld [vmem:[#allocation2 + $0x10] sm:$0xf]  ;;  %2056 = vmatpush.bf16.msra.mxu0 %v5236_v35  ;;  %2028 = vmatpush.bf16.msra.mxu3 %v5227_v53 }
  0x77   : > { %1923 = vmatmul.bf16.gmra.mxu3 %v4298_v28  ;;  %v4329_v3 = vld [vmem:[#allocation3 + $0xe0] sm:$0xf]  ;;  %v775_v4 = vld [vmem:[#allocation2 + $0x18] sm:$0xf]  ;;  %782 = vst [vmem:[#allocation3 + $0x18] sm:$0xf] %v774_v2  ;;  %v4306_v10 = vor.u32 %v5155_v57, %v4303_v63 }
  0x78   : > { %v5167_v5 = vld [vmem:[#allocation3 + $0x100] sm:$0xf0]  ;;  %v662_v6 = vsel %vm5510_vm2, %v657_v0, %v661_v52  ;;  %783 = vst [vmem:[#allocation3 + $0x3c] sm:$0xf] %v775_v4  ;;  %v752_v9 = vsel %vm5608_vm5, %v4201_v59, %v751_v1  ;;  %v790_v14 = vld [vmem:[#allocation2 + $0x10] sm:$0xf] }
  0x79   : > { %v540_v7 = vld [vmem:[#allocation2 + $0x40] sm:$0xf]  ;;  %691 = vst [vmem:[#allocation3 + $0xe8] sm:$0xf] %v662_v6  ;;  %v4330_v11 = vor.u32 %v5167_v5, %v4329_v3  ;;  %v791_v23 = vld [vmem:[#allocation2 + $0x14] sm:$0x1] }
  0x7a   : > { %v563_v8 = vld [vmem:[#allocation2 + $0x40] sm:$0xf]  ;;  %1952 = vmatmul.bf16.gmra.mxu0 %v4302_v61  ;;  %548 = vst [vmem:[#allocation3 + $0x108] sm:$0xf] %v540_v7  ;;  %v792_v24 = vld [vmem:[#allocation2 + $0x18] sm:$0xf] }
  0x7b   : > { %v664_v12 = vshrl.u32 %v563_v8, 16  ;;  %v667_v13 = vshll.u32 %v563_v8, 16  ;;  %v564_v15 = vld [vmem:[#allocation2 + $0x44] sm:$0x1]  ;;  %v707_v16 = vld [vmem:[#allocation2 + $0x40] sm:$0xe]  ;;  %2057 = vmatpush.bf16.msra.mxu0 %v5235_v60 }
  0x7c   : > { %v708_v17 = vld [vmem:[#allocation2 + $0x44] sm:$0x1]  ;;  %v673_v20 = vshll.u32 %v564_v15, 16  ;;  %v4202_v21 = vrot.slane %v707_v16, 9  ;;  %771 = vst [vmem:[#allocation3 + $0xec] sm:$0xf] %v752_v9 }
  0x7d   : > { %v666_v18 = vrot.slane %v664_v12, 4  ;;  %v669_v19 = vrot.slane %v667_v13, 5  ;;  %v755_v22 = vrot.slane %v708_v17, 5  ;;  %v807_v25 = vshrl.u32 %v790_v14, 16  ;;  %v793_v29 = vld [vmem:[#allocation2 + $0x1c] sm:$0x1] }
  0x7e   : > { %1981 = vmatmul.bf16.gmra.mxu1 %v4306_v10  ;;  %1899 = vmatmul.bf16.gmra.mxu2 %v4330_v11  ;;  %v675_v27 = vrot.slane %v673_v20, 5  ;;  %v810_v30 = vshll.u32 %v790_v14, 16  ;;  %v816_v33 = vshll.u32 %v791_v23, 16  ;;  %v821_v34 = vshrl.u32 %v792_v24, 16  ;;  %v5163_v36 = vld [vmem:[#allocation3 + $0xe4] sm:$0xf] }
  0x7f   : > { %v670_v26 = vor.u32 %v669_v19, %v666_v18  ;;  %v756_v31 = vsel %vm5608_vm5, %v4202_v21, %v755_v22  ;;  %v809_v32 = vrot.slane %v807_v25, 4  ;;  %v824_v42 = vshll.u32 %v792_v24, 16  ;;  %v934_v46 = vld [vmem:[#allocation2 + $0x10] sm:$0xe]  ;;  %v935_v47 = vld [vmem:[#allocation2 + $0x14] sm:$0x1] }
  0x80   : > { %772 = vst [vmem:[#allocation3 + $0x110] sm:$0xf] %v756_v31  ;;  %v812_v38 = vrot.slane %v810_v30, 5  ;;  %v818_v40 = vrot.slane %v816_v33, 5  ;;  %v823_v41 = vrot.slane %v821_v34, 4  ;;  %v830_v43 = vshll.u32 %v793_v29, 16 }
  0x81   : > { %v671_v37 = vrot.slane %v670_v26, 4  ;;  %v4331_v39 = vld [vmem:[#allocation3 + $0x104] sm:$0xf0]  ;;  %v826_v28 = vrot.slane %v824_v42, 5  ;;  %v937_v35 = vld [vmem:[#allocation2 + $0x1c] sm:$0x1] }
  0x82   : > { %v813_v45 = vor.u32 %v812_v38, %v809_v32  ;;  %v936_v49 = vld [vmem:[#allocation2 + $0x18] sm:$0xe]  ;;  %v4334_v50 = vor.u32 %v5163_v36, %v4331_v39  ;;  %v4203_v51 = vrot.slane %v934_v46, 9  ;;  %v968_v52 = vrot.slane %v935_v47, 5  ;;  %v4237_v56 = vld [vmem:[#allocation3 + $0x18] sm:$0xf] }
  0x83   : > { %v676_v44 = vsel %vm5510_vm2, %v671_v37, %v675_v27  ;;  %v4204_v53 = vrot.slane %v936_v49, 9  ;;  %v5164_v55 = vld [vmem:[#allocation3 + $0xec] sm:$0xf]  ;;  %v5142_v57 = vld [vmem:[#allocation3 + $0x38] sm:$0xf0]  ;;  %v827_v58 = vor.u32 %v826_v28, %v823_v41  ;;  %v832_v59 = vrot.slane %v830_v43, 5 }
  0x84   : > { %692 = vst [vmem:[#allocation3 + $0x10c] sm:$0xf] %v676_v44  ;;  %v814_v48 = vrot.slane %v813_v45, 4  ;;  %v972_v60 = vrot.slane %v937_v35, 5  ;;  %v776_v61 = vld [vmem:[#allocation2 + $0x20] sm:$0xf]  ;;  %v969_v1 = vsel %vm5608_vm5, %v4203_v51, %v968_v52  ;;  %v4238_v17 = vor.u32 %v5142_v57, %v4237_v56 }
  0x85   : > { %v4337_v63 = vld [vmem:[#allocation3 + $0xe8] sm:$0xf]  ;;  %v777_v2 = vld [vmem:[#allocation2 + $0x28] sm:$0xf]  ;;  %784 = vst [vmem:[#allocation3 + $0x60] sm:$0xf] %v776_v61 }
  0x86   : > { %v819_v0 = vsel %vm5510_vm2, %v814_v48, %v818_v40  ;;  %v794_v3 = vld [vmem:[#allocation2 + $0x20] sm:$0xf]  ;;  %v795_v4 = vld [vmem:[#allocation2 + $0x24] sm:$0x1]  ;;  %v828_v6 = vrot.slane %v827_v58, 4  ;;  %v973_v7 = vsel %vm5608_vm5, %v4204_v53, %v972_v60  ;;  %v244_v47 = vld [vmem:[%s5454_s10 + $0x90] sm:$0xff] }
  0x87   : > { %1928 = vmatmul.bf16.gmra.mxu3 %v4334_v50  ;;  %v4339_v5 = vld [vmem:[#allocation3 + $0x10c] sm:$0xf0]  ;;  %926 = vst [vmem:[#allocation3 + $0x1c] sm:$0xf] %v819_v0  ;;  %v835_v8 = vshrl.u32 %v794_v3, 16  ;;  %v838_v13 = vshll.u32 %v794_v3, 16  ;;  %v264_v3 = vpack.c.bf16 %v244_v47, %v244_v47 }
  0x88   : > { %1006 = vst [vmem:[#allocation3 + $0x20] sm:$0xf] %v969_v1  ;;  %v796_v9 = vld [vmem:[#allocation2 + $0x28] sm:$0xf]  ;;  %v797_v10 = vld [vmem:[#allocation2 + $0x2c] sm:$0x1]  ;;  %v833_v11 = vsel %vm5510_vm2, %v828_v6, %v832_v59  ;;  %v4342_v16 = vor.u32 %v5164_v55, %v4339_v5 }
  0x89   : > { %1007 = vst [vmem:[#allocation3 + $0x44] sm:$0xf] %v973_v7  ;;  %v837_v12 = vrot.slane %v835_v8, 4  ;;  %v844_v14 = vshll.u32 %v795_v4, 16  ;;  %v849_v18 = vshrl.u32 %v796_v9, 16  ;;  %v852_v19 = vshll.u32 %v796_v9, 16 }
  0x8a   : > { %927 = vst [vmem:[#allocation3 + $0x40] sm:$0xf] %v833_v11  ;;  %v840_v21 = vrot.slane %v838_v13, 5  ;;  %v858_v22 = vshll.u32 %v797_v10, 16  ;;  %v938_v25 = vld [vmem:[#allocation2 + $0x20] sm:$0xe] }
  0x8b   : > { %v5168_v15 = vld [vmem:[#allocation3 + $0x108] sm:$0xf0]  ;;  %785 = vst [vmem:[#allocation3 + $0x84] sm:$0xf] %v777_v2  ;;  %v851_v23 = vrot.slane %v849_v18, 4  ;;  %v854_v24 = vrot.slane %v852_v19, 5 }
  0x8c   : > { %v4338_v20 = vor.u32 %v5168_v15, %v4337_v63  ;;  %v939_v26 = vld [vmem:[#allocation2 + $0x24] sm:$0x1]  ;;  %v841_v27 = vor.u32 %v840_v21, %v837_v12  ;;  %v846_v29 = vrot.slane %v844_v14, 5  ;;  %v940_v30 = vld [vmem:[#allocation2 + $0x28] sm:$0xe]  ;;  %v4205_v31 = vrot.slane %v938_v25, 9 }
  0x8d   : > { %v855_v32 = vor.u32 %v854_v24, %v851_v23  ;;  %v860_v33 = vrot.slane %v858_v22, 5  ;;  %v941_v34 = vld [vmem:[#allocation2 + $0x2c] sm:$0x1]  ;;  %v976_v36 = vrot.slane %v939_v26, 5  ;;  %v4206_v37 = vrot.slane %v940_v30, 9 }
  0x8e   : > { %1957 = vmatmul.bf16.gmra.mxu0 %v4338_v20  ;;  %1986 = vmatmul.bf16.gmra.mxu1 %v4342_v16  ;;  %v842_v38 = vrot.slane %v841_v27, 4  ;;  %v980_v39 = vrot.slane %v941_v34, 5  ;;  %v5138_v40 = vld [vmem:[#allocation3 + $0x1c] sm:$0xf]  ;;  %v778_v43 = vld [vmem:[#allocation2 + $0x30] sm:$0xf] }
  0x8f   : > { %2000 = vmatmul.bf16.vlgmr.msra.gmra.mxu2 %v4238_v17  ;;  %v856_v41 = vrot.slane %v855_v32, 4  ;;  %v977_v42 = vsel %vm5608_vm5, %v4205_v31, %v976_v36  ;;  %v779_v50 = vld [vmem:[#allocation2 + $0x38] sm:$0xf]  ;;  %v798_v28 = vld [vmem:[#allocation2 + $0x30] sm:$0xf] }
  0x90   : > { %v847_v45 = vsel %vm5510_vm2, %v842_v38, %v846_v29  ;;  %v981_v46 = vsel %vm5608_vm5, %v4206_v37, %v980_v39  ;;  %1008 = vst [vmem:[#allocation3 + $0x68] sm:$0xf] %v977_v42  ;;  %v4245_v35 = vld [vmem:[#allocation3 + $0x20] sm:$0xf]  ;;  %v5143_v51 = vld [vmem:[#allocation3 + $0x40] sm:$0xf0] }
  0x91   : > { %v4239_v44 = vld [vmem:[#allocation3 + $0x3c] sm:$0xf0]  ;;  %v861_v49 = vsel %vm5510_vm2, %v856_v41, %v860_v33  ;;  %928 = vst [vmem:[#allocation3 + $0x64] sm:$0xf] %v847_v45  ;;  %v799_v52 = vld [vmem:[#allocation2 + $0x34] sm:$0x1]  ;;  %v4246_v8 = vor.u32 %v5143_v51, %v4245_v35 }
  0x92   : > { %v4242_v48 = vor.u32 %v5138_v40, %v4239_v44  ;;  %929 = vst [vmem:[#allocation3 + $0x88] sm:$0xf] %v861_v49  ;;  %v800_v53 = vld [vmem:[#allocation2 + $0x38] sm:$0xf]  ;;  %v801_v55 = vld [vmem:[#allocation2 + $0x3c] sm:$0x1] }
  0x93   : > { %1009 = vst [vmem:[#allocation3 + $0x8c] sm:$0xf] %v981_v46  ;;  %v863_v56 = vshrl.u32 %v798_v28, 16  ;;  %v866_v57 = vshll.u32 %v798_v28, 16  ;;  %v4273_v58 = vld [vmem:[#allocation3 + $0x60] sm:$0xf] }
  0x94   : > { %786 = vst [vmem:[#allocation3 + $0xa8] sm:$0xf] %v778_v43  ;;  %v872_v59 = vshll.u32 %v799_v52, 16  ;;  %v877_v60 = vshrl.u32 %v800_v53, 16  ;;  %v880_v61 = vshll.u32 %v800_v53, 16  ;;  %v886_v63 = vshll.u32 %v801_v55, 16 }
  0x95   : > { %787 = vst [vmem:[#allocation3 + $0xcc] sm:$0xf] %v779_v50  ;;  %v865_v0 = vrot.slane %v863_v56, 4  ;;  %v868_v1 = vrot.slane %v866_v57, 5  ;;  %v942_v2 = vld [vmem:[#allocation2 + $0x30] sm:$0xe] }
  0x96   : > { %v5151_v4 = vld [vmem:[#allocation3 + $0x80] sm:$0xf0]  ;;  %v879_v5 = vrot.slane %v877_v60, 4  ;;  %v882_v6 = vrot.slane %v880_v61, 5  ;;  %v874_v10 = vrot.slane %v872_v59, 5  ;;  %v888_v11 = vrot.slane %v886_v63, 5 }
  0x97   : > { %2029 = vmatmul.bf16.vlgmr.msra.gmra.mxu3 %v4242_v48  ;;  %v943_v7 = vld [vmem:[#allocation2 + $0x34] sm:$0x1]  ;;  %v869_v9 = vor.u32 %v868_v1, %v865_v0  ;;  %v944_v12 = vld [vmem:[#allocation2 + $0x38] sm:$0xe]  ;;  %v945_v13 = vld [vmem:[#allocation2 + $0x3c] sm:$0x1]  ;;  %v4274_v18 = vor.u32 %v5151_v4, %v4273_v58 }
  0x98   : > { %v883_v14 = vor.u32 %v882_v6, %v879_v5  ;;  %v4207_v15 = vrot.slane %v942_v2, 9  ;;  %v984_v16 = vrot.slane %v943_v7, 5  ;;  %v4208_v17 = vrot.slane %v944_v12, 9  ;;  %284 = vst [vmem:[#allocation2 + $0x48] sm:$0xf] %v264_v3 }
  0x99   : > { %v870_v19 = vrot.slane %v869_v9, 4  ;;  %v988_v20 = vrot.slane %v945_v13, 5  ;;  %v245_v23 = vld [vmem:[%s5454_s10 + $0x98] sm:$0x3]  ;;  %v802_v26 = vld [vmem:[#allocation2 + $0x40] sm:$0xf] }
  0x9a   : > { %v884_v21 = vrot.slane %v883_v14, 4  ;;  %v985_v22 = vsel %vm5608_vm5, %v4207_v15, %v984_v16  ;;  %v265_v29 = vpack.c.bf16 %v245_v23, %v245_v23  ;;  %v803_v30 = vld [vmem:[#allocation2 + $0x44] sm:$0x1]  ;;  %v5147_v31 = vld [vmem:[#allocation3 + $0x64] sm:$0xf]  ;;  %v891_v34 = vshrl.u32 %v802_v26, 16 }
  0x9b   : > { %v875_v24 = vsel %vm5510_vm2, %v870_v19, %v874_v10  ;;  %v989_v25 = vsel %vm5608_vm5, %v4208_v17, %v988_v20  ;;  %1010 = vst [vmem:[#allocation3 + $0xb0] sm:$0xf] %v985_v22  ;;  %v4275_v32 = vld [vmem:[#allocation3 + $0x84] sm:$0xf0]  ;;  %v780_v33 = vld [vmem:[#allocation2 + $0x40] sm:$0xf] }
  0x9c   : > { %v889_v27 = vsel %vm5510_vm2, %v884_v21, %v888_v11  ;;  %930 = vst [vmem:[#allocation3 + $0xac] sm:$0xf] %v875_v24  ;;  %v894_v36 = vshll.u32 %v802_v26, 16  ;;  %v900_v37 = vshll.u32 %v803_v30, 16  ;;  %v946_v38 = vld [vmem:[#allocation2 + $0x40] sm:$0xe]  ;;  %v4278_v45 = vor.u32 %v5147_v31, %v4275_v32 }
  0x9d   : > { %931 = vst [vmem:[#allocation3 + $0xd0] sm:$0xf] %v889_v27  ;;  %v947_v39 = vld [vmem:[#allocation2 + $0x44] sm:$0x1]  ;;  %v893_v42 = vrot.slane %v891_v34, 4  ;;  %v4209_v47 = vrot.slane %v946_v38, 9 }
  0x9e   : > { %2058 = vmatmul.bf16.vlgmr.msra.gmra.mxu0 %v4246_v8  ;;  %1011 = vst [vmem:[#allocation3 + $0xd4] sm:$0xf] %v989_v25  ;;  %v896_v43 = vrot.slane %v894_v36, 5  ;;  %v902_v50 = vrot.slane %v900_v37, 5  ;;  %v992_v48 = vrot.slane %v947_v39, 5 }
  0x9f   : > { %2005 = vmatmul.bf16.gmra.mxu2 %v4274_v18  ;;  %788 = vst [vmem:[#allocation3 + $0xf0] sm:$0xf] %v780_v33  ;;  %v781_v40 = vld [vmem:[#allocation2 + $0x48] sm:$0xf]  ;;  %v4281_v35 = vld [vmem:[#allocation3 + $0x68] sm:$0xf] }
  0xa0   : > { %285 = vst [vmem:[#allocation2 + $0x4c] sm:$0x1] %v265_v29  ;;  %v804_v41 = vld [vmem:[#allocation2 + $0x48] sm:$0xf]  ;;  %v897_v49 = vor.u32 %v896_v43, %v893_v42  ;;  %v5152_v53 = vld [vmem:[#allocation3 + $0x88] sm:$0xf0]  ;;  %v993_v57 = vsel %vm5608_vm5, %v4209_v47, %v992_v48 }
  0xa1   : > { %789 = vst [vmem:[#allocation3 + $0x114] sm:$0xf] %v781_v40  ;;  %v905_v44 = vshrl.u32 %v804_v41, 16  ;;  %v908_v46 = vshll.u32 %v804_v41, 16  ;;  %v948_v52 = vld [vmem:[#allocation2 + $0x48] sm:$0xe]  ;;  %v4282_v2 = vor.u32 %v5152_v53, %v4281_v35 }
  0xa2   : > { %v4309_v55 = vld [vmem:[#allocation3 + $0xa8] sm:$0xf]  ;;  %v898_v56 = vrot.slane %v897_v49, 4  ;;  %v5160_v58 = vld [vmem:[#allocation3 + $0xc8] sm:$0xf0]  ;;  %v4210_v1 = vrot.slane %v948_v52, 9 }
  0xa3   : > { %v907_v28 = vrot.slane %v905_v44, 4  ;;  %v910_v51 = vrot.slane %v908_v46, 5  ;;  %v2781_v59 = vld [vmem:[#allocation4 + $0x48] sm:$0xf]  ;;  %1012 = vst [vmem:[#allocation3 + $0xf8] sm:$0xf] %v993_v57  ;;  %v4310_v6 = vor.u32 %v5160_v58, %v4309_v55 }
  0xa4   : > { %v903_v63 = vsel %vm5510_vm2, %v898_v56, %v902_v50  ;;  %v2804_v9 = vld [vmem:[#allocation4 + $0x48] sm:$0xf]  ;;  %v2805_v10 = vld [vmem:[#allocation4 + $0x4c] sm:$0x1]  ;;  %v5814_v16 = vld [vmem:[%s6572_s2] ss:$0 sm:$0xff] }
  0xa5   : > { %v911_v60 = vor.u32 %v910_v51, %v907_v28  ;;  %932 = vst [vmem:[#allocation3 + $0xf4] sm:$0xf] %v903_v63  ;;  %v2905_v13 = vshrl.u32 %v2804_v9, 16  ;;  %v2908_v14 = vshll.u32 %v2804_v9, 16  ;;  %v2914_v15 = vshll.u32 %v2805_v10, 16  ;;  %v5285_v9 = vld [vmem:[%s6573_s3 + $0x30] sm:$0xff] }
  0xa6   : > { %v2948_v18 = vld [vmem:[#allocation4 + $0x48] sm:$0xe]  ;;  %v2949_v22 = vld [vmem:[#allocation4 + $0x4c] sm:$0x1]  ;;  %v4311_v24 = vld [vmem:[#allocation3 + $0xcc] sm:$0xf0] }
  0xa7   : > { %2034 = vmatmul.bf16.gmra.mxu3 %v4278_v45  ;;  %v805_v61 = vld [vmem:[#allocation2 + $0x4c] sm:$0x1]  ;;  %v912_v4 = vrot.slane %v911_v60, 4  ;;  %v2907_v20 = vrot.slane %v2905_v13, 4  ;;  %v2910_v21 = vrot.slane %v2908_v14, 5  ;;  %v4674_v25 = vrot.slane %v2948_v18, 9 }
  0xa8   : > { %v949_v0 = vld [vmem:[#allocation2 + $0x4c] sm:$0x1]  ;;  %v5169_v3 = vld [vmem:[#allocation3 + $0x110] sm:$0xf0]  ;;  %v914_v5 = vshll.u32 %v805_v61, 16  ;;  %v5816_v19 = vpop.f32.mrf.mxu0  ;;  %v2996_v26 = vrot.slane %v2949_v22, 5 }
  0xa9   : > { %2789 = vst [vmem:[#allocation3 + $0x114] sm:$0xf] %v2781_v59  ;;  %v996_v7 = vrot.slane %v949_v0, 5  ;;  %v5156_v23 = vld [vmem:[#allocation3 + $0xac] sm:$0xf]  ;;  %v2911_v27 = vor.u32 %v2910_v21, %v2907_v20  ;;  %v2916_v29 = vrot.slane %v2914_v15, 5 }
  0xaa   : > { %v916_v8 = vrot.slane %v914_v5, 5  ;;  %v2997_v31 = vsel %vm5608_vm5, %v4674_v25, %v2996_v26  ;;  %v4314_v32 = vor.u32 %v5156_v23, %v4311_v24  ;;  %v4317_v39 = vld [vmem:[#allocation3 + $0xb0] sm:$0xf]  ;;  %v5161_v40 = vld [vmem:[#allocation3 + $0xd0] sm:$0xf0]  ;;  %v5284_v13 = vld [vmem:[%s6573_s3 + $0x28] sm:$0xff] }
  0xab   : > { %v997_v11 = vsel %vm5608_vm5, %v4210_v1, %v996_v7  ;;  %v2912_v33 = vrot.slane %v2911_v27, 4  ;;  %v4345_v43 = vld [vmem:[#allocation3 + $0xf0] sm:$0xf]  ;;  %v4318_v44 = vor.u32 %v5161_v40, %v4317_v39  ;;  %v4353_v35 = vld [vmem:[#allocation3 + $0xf8] sm:$0xf] }
  0xac   : > { %v917_v12 = vsel %vm5510_vm2, %v912_v4, %v916_v8  ;;  %1013 = vst [vmem:[#allocation3 + $0x11c] sm:$0xf] %v997_v11  ;;  %v4346_v46 = vor.u32 %v5169_v3, %v4345_v43  ;;  %v5165_v50 = vld [vmem:[#allocation3 + $0xf4] sm:$0xf]  ;;  %v2096_v22 = vld [vmem:[#allocation4 + $0x8] sm:$0x1] }
  0xad   : > { %933 = vst [vmem:[#allocation3 + $0x118] sm:$0xf] %v917_v12  ;;  %v2917_v38 = vsel %vm5510_vm2, %v2912_v33, %v2916_v29  ;;  %v5283_v20 = vld [vmem:[%s6573_s3 + $0x20] sm:$0xff]  ;;  %v2122_v25 = vld [vmem:[#allocation4 + $0xc] sm:$0x1]  ;;  %v2097_v27 = vsel %vm5892_vm8, 0, %v2096_v22 }
  0xae   : > { %2063 = vmatmul.bf16.gmra.mxu0 %v4282_v2  ;;  %v1837_v17 = vpop.f32.mrf.mxu2  ;;  %v5286_v2 = vld [vmem:[%s6573_s3 + $0x38] sm:$0xff]  ;;  %2098 = vst [vmem:[#allocation4 + $0x8] sm:$0x1] %v2097_v27  ;;  %v5292_v22 = vld [vmem:[%s6573_s3 + $0x68] sm:$0xff] }
  0xaf   : > { %2010 = vmatmul.bf16.gmra.mxu2 %v4310_v6  ;;  %v1838_v30 = vadd.f32 %v5814_v16, %v1837_v17  ;;  %3818 = vmatpush.bf16.msra.mxu1 %v5286_v2  ;;  %v5294_v43 = vld [vmem:[%s6573_s3 + $0x78] sm:$0xff]  ;;  %v5299_v2 = vld [vmem:[%s6573_s3 + $0xa0] sm:$0xff] }
  0xb0   : > { %v5827_v45 = vpop.f32.mrf.mxu0  ;;  %3847 = vmatpush.bf16.msrb.mxu2 %v5294_v43  ;;  %v5307_v43 = vld [vmem:[%s6573_s3 + $0xe0] sm:$0xff] }
  0xb3   : > { %v5170_v34 = vld [vmem:[#allocation3 + $0x118] sm:$0xf0]  ;;  %v1856_v0 = vpop.f32.mrf.mxu1  ;;  %3819 = vmatpush.bf16.msra.mxu1 %v5285_v9 }
  0xb4   : > { %v4347_v37 = vld [vmem:[#allocation3 + $0x114] sm:$0xf0]  ;;  %3013 = vst [vmem:[#allocation3 + $0x11c] sm:$0xf] %v2997_v31  ;;  %v4354_v53 = vor.u32 %v5170_v34, %v4353_v35  ;;  %v2123_v31 = vsel %vm5901_vm10, 0, %v2122_v25  ;;  %v1828_v34 = vadd.f32 %v5814_v16, %v5816_v19 }
  0xb5   : > { %v1866_v36 = vpop.f32.mrf.mxu3  ;;  %2933 = vst [vmem:[#allocation3 + $0x118] sm:$0xf] %v2917_v38  ;;  %v4350_v48 = vor.u32 %v5165_v50, %v4347_v37  ;;  %v5310_v38 = vld [vmem:[%s6573_s3 + $0xf8] sm:$0xff]  ;;  %v2125_v50 = vld [vmem:[#allocation4 + $0x14] sm:$0x1] }
  0xb6   : > { %v5823_v41 = vadd.f32 %v1866_v36, %v1838_v30  ;;  %v5825_v42 = vpop.f32.mrf.mxu2  ;;  %2124 = vst [vmem:[#allocation4 + $0xc] sm:$0x1] %v2123_v31  ;;  %v5301_v36 = vld [vmem:[%s6573_s3 + $0xb0] sm:$0xff]  ;;  %v1857_v19 = vadd.f32 %v1856_v0, %v1828_v34  ;;  %3905 = vmatpush.bf16.msrb.mxu0 %v5310_v38  ;;  %v5298_v31 = vld [vmem:[%s6573_s3 + $0x98] sm:$0xff]  ;;  %v2128_v38 = vld [vmem:[#allocation4 + $0x1c] sm:$0x1] }
  0xb7   : > { %2039 = vmatmul.bf16.gmra.mxu3 %v4314_v32  ;;  %3820 = vmatpush.bf16.msra.mxu1 %v5284_v13  ;;  %v5302_v32 = vld [vmem:[%s6573_s3 + $0xb8] sm:$0xff]  ;;  %v5281_v34 = vld [vmem:[%s6573_s3 + $0x10] sm:$0xff] }
  0xb8   : > { %3876 = vmatpush.bf16.msrb.mxu3 %v5302_v32  ;;  %v5282_v13 = vld [vmem:[%s6573_s3 + $0x18] sm:$0xff] }
  0xbb   : > { %v5859_v6 = vpop.f32.mrf.mxu1  ;;  %3821 = vmatpush.bf16.msra.mxu1 %v5283_v20 }
  0xbc   : > { %v5831_v28 = vpop.f32.mrf.mxu0  ;;  %3877 = vmatpush.bf16.msrb.mxu3 %v5301_v36  ;;  %v2102_v36 = vld [vmem:[#allocation4 + $0x18] sm:$0x1] }
  0xbd   : > { %v5829_v49 = vpop.f32.mrf.mxu3 }
  0xbe   : > { %2068 = vmatmul.bf16.gmra.mxu0 %v4318_v44  ;;  %v1842_v47 = vpop.f32.mrf.mxu2  ;;  %v5300_v44 = vld [vmem:[%s6573_s3 + $0xa8] sm:$0xff] }
  0xbf   : > { %2015 = vmatmul.bf16.gmra.mxu2 %v4346_v46  ;;  %v1843_v51 = vadd.f32 %v5814_v16, %v1842_v47  ;;  %v2099_v47 = vld [vmem:[#allocation4 + $0x10] sm:$0x1]  ;;  %3822 = vmatpush.bf16.msra.mxu1 %v5282_v13 }
  0xc0   : > { %v2100_v35 = vsel %vm5892_vm8, 0, %v2099_v47  ;;  %3878 = vmatpush.bf16.msrb.mxu3 %v5300_v44  ;;  %v5297_v47 = vld [vmem:[%s6573_s3 + $0x90] sm:$0xff] }
  0xc1   : > { %2101 = vst [vmem:[#allocation4 + $0x10] sm:$0x1] %v2100_v35 }
  0xc3   : > { %3823 = vmatpush.bf16.msra.mxu1 %v5281_v34 }
  0xc4   : > { %v5838_v57 = vpop.f32.mrf.mxu0  ;;  %3879 = vmatpush.bf16.msrb.mxu3 %v5299_v2 }
  0xc6   : > { %v5834_v52 = vpop.f32.mrf.mxu2 }
  0xc7   : > { %2044 = vmatmul.bf16.gmra.mxu3 %v4350_v48  ;;  %v5309_v48 = vld [vmem:[%s6573_s3 + $0xf0] sm:$0xff] }
  0xc8   : > { %3906 = vmatpush.bf16.msrb.mxu0 %v5309_v48  ;;  %3880 = vmatpush.bf16.msrb.mxu3 %v5298_v31  ;;  %v5305_v31 = vld [vmem:[%s6573_s3 + $0xd0] sm:$0xff] }
  0xca   : > { %v1871_v55 = vpop.f32.mrf.mxu3 }
  0xcb   : > { %v5836_v56 = vadd.f32 %v1871_v55, %v1843_v51  ;;  %v5877_v14 = vpop.f32.mrf.mxu1  ;;  %v2126_v51 = vsel %vm5901_vm10, 0, %v2125_v50  ;;  %v1830_v55 = vadd.f32 %v5814_v16, %v5827_v45  ;;  %v5308_v45 = vld [vmem:[%s6573_s3 + $0xe8] sm:$0xff] }
  0xcc   : > { %2127 = vst [vmem:[#allocation4 + $0x14] sm:$0x1] %v2126_v51  ;;  %3907 = vmatpush.bf16.msrb.mxu0 %v5308_v45  ;;  %3881 = vmatpush.bf16.msrb.mxu3 %v5297_v47 }
  0xcd   : > { %v1859_v25 = vadd.f32 %v5859_v6, %v1830_v55  ;;  %v2103_v6 = vsel %vm5892_vm8, 0, %v2102_v36 }
  0xce   : > { %2073 = vmatmul.bf16.gmra.mxu0 %v4354_v53  ;;  %v1885_v58 = vpop.f32.mrf.mxu2  ;;  %v5293_v53 = vld [vmem:[%s6573_s3 + $0x70] sm:$0xff]  ;;  %2104 = vst [vmem:[#allocation4 + $0x18] sm:$0x1] %v2103_v6  ;;  %v5295_v6 = vld [vmem:[%s6573_s3 + $0x80] sm:$0xff] }
  0xcf   : > { %v1886_v46 = vadd.f32 %v1885_v58, %v1857_v19  ;;  %3848 = vmatpush.bf16.msrb.mxu2 %v5293_v53  ;;  %v1833_v19 = vadd.f32 %v5814_v16, %v5831_v28  ;;  %v5280_v28 = vld [vmem:[%s6573_s3 + $0x8] sm:$0xff]  ;;  %v5290_v53 = vld [vmem:[%s6573_s3 + $0x58] sm:$0xff] }
  0xd0   : > { %3908 = vmatpush.bf16.msrb.mxu0 %v5307_v43  ;;  %3824 = vmatpush.bf16.msra.mxu1 %v5280_v28 }
  0xd1   : > { %v1862_v55 = vadd.f32 %v5877_v14, %v1833_v19 }
  0xd2   : > { %v5840_v59 = vpop.f32.mrf.mxu3 }
  0xd3   : > { %v5888_v21 = vpop.f32.mrf.mxu1  ;;  %3849 = vmatpush.bf16.msrb.mxu2 %v5292_v22  ;;  %v2105_v22 = vld [vmem:[#allocation4 + $0x20] sm:$0x1] }
  0xd6   : > { %v5844_v61 = vpop.f32.mrf.mxu2 }
  0xd7   : > { %v5842_v60 = vpop.f32.mrf.mxu0  ;;  %v1888_v32 = vadd.f32 %v5844_v61, %v1859_v25  ;;  %v5291_v61 = vld [vmem:[%s6573_s3 + $0x60] sm:$0xff]  ;;  %v2131_v25 = vld [vmem:[#allocation4 + $0x24] sm:$0x1] }
  0xd8   : > { %3850 = vmatpush.bf16.msrb.mxu2 %v5291_v61  ;;  %v2132_v14 = vsel %vm5901_vm10, 0, %v2131_v25 }
  0xd9   : > { %2133 = vst [vmem:[#allocation4 + $0x24] sm:$0x1] %v2132_v14 }
  0xda   : > { %v5846_v63 = vpop.f32.mrf.mxu3 }
  0xdb   : > { %v1972_v33 = vpop.f32.mrf.mxu1  ;;  %v1915_v58 = vadd.f32 %v5846_v63, %v1886_v46 }
  0xdc   : > { %3851 = vmatpush.bf16.msrb.mxu2 %v5290_v53  ;;  %v2134_v53 = vld [vmem:[#allocation4 + $0x2c] sm:$0x1] }
  0xdd   : > { %v1944_v27 = vadd.f32 %v5842_v60, %v1915_v58  ;;  %v2129_v60 = vsel %vm5901_vm10, 0, %v2128_v38  ;;  %v1835_v38 = vadd.f32 %v5814_v16, %v5838_v57  ;;  %v5288_v57 = vld [vmem:[%s6573_s3 + $0x48] sm:$0xff] }
  0xde   : > { %2130 = vst [vmem:[#allocation4 + $0x1c] sm:$0x1] %v2129_v60 }
  0xdf   : > { %v5848_v1 = vpop.f32.mrf.mxu0  ;;  %v1973_v44 = vadd.f32 %v1972_v33, %v1944_v27  ;;  %v5279_v27 = vld [vmem:[%s6573_s3] sm:$0xff] }
  0xe0   : > { %3825 = vmatpush.bf16.msra.mxu1 %v5279_v27 }
  0xe1   : > { %v5853_v3 = vpop.f32.mrf.mxu2 }
  0xe2   : > { %v5855_v4 = vpop.f32.mrf.mxu3  ;;  %v1891_v13 = vadd.f32 %v5853_v3, %v1862_v55  ;;  %v5289_v3 = vld [vmem:[%s6573_s3 + $0x50] sm:$0xff] }
  0xe3   : > { %v5945_v0 = vpop.f32.mrf.mxu1  ;;  %v1917_v46 = vadd.f32 %v5855_v4, %v1888_v32  ;;  %v5306_v4 = vld [vmem:[%s6573_s3 + $0xd8] sm:$0xff]  ;;  %3852 = vmatpush.bf16.msrb.mxu2 %v5289_v3 }
  0xe4   : > { %3909 = vmatpush.bf16.msrb.mxu0 %v5306_v4 }
  0xe5   : > { %v1946_v58 = vadd.f32 %v5848_v1, %v1917_v46  ;;  %v2106_v1 = vsel %vm5892_vm8, 0, %v2105_v22 }
  0xe6   : > { %2107 = vst [vmem:[#allocation4 + $0x20] sm:$0x1] %v2106_v1 }
  0xe7   : > { %v5857_v5 = vpop.f32.mrf.mxu0  ;;  %v1975_v32 = vadd.f32 %v5945_v0, %v1946_v58  ;;  %3853 = vmatpush.bf16.msrb.mxu2 %v5288_v57  ;;  %v2242_v57 = vld [vmem:[#allocation4 + $0x10] sm:$0xf] }
  0xe8   : > { %3910 = vmatpush.bf16.msrb.mxu0 %v5305_v31 }
  0xe9   : > { %v5861_v7 = vpop.f32.mrf.mxu2 }
  0xea   : > { %v5863_v8 = vpop.f32.mrf.mxu3 }
  0xeb   : > { %v5988_v50 = vpop.f32.mrf.mxu1  ;;  %v1920_v34 = vadd.f32 %v5863_v8, %v1891_v13  ;;  %v5304_v8 = vld [vmem:[%s6573_s3 + $0xc8] sm:$0xff] }
  0xec   : > { %3911 = vmatpush.bf16.msrb.mxu0 %v5304_v8 }
  0xef   : > { %v5868_v10 = vpop.f32.mrf.mxu0 }
  0xf1   : > { %v5870_v11 = vpop.f32.mrf.mxu2 }
  0xf2   : > { %v5872_v12 = vpop.f32.mrf.mxu3 }
  0xf3   : > { %v1979_v46 = vpop.f32.mrf.mxu1 }
  0xf7   : > { %v5879_v15 = vpop.f32.mrf.mxu0 }
  0xf9   : > { %v5881_v17 = vpop.f32.mrf.mxu2 }
  0xfa   : > { %v5883_v18 = vpop.f32.mrf.mxu3 }
  0xff   : > { %v5890_v23 = vpop.f32.mrf.mxu0 }
 0x101   : > { %v5896_v26 = vpop.f32.mrf.mxu2 }
 0x102   : > { %v5905_v30 = vpop.f32.mrf.mxu3 }
 0x109   : > { %v5917_v37 = vpop.f32.mrf.mxu2 }
 0x10a   : > { %v5924_v40 = vpop.f32.mrf.mxu3 }
 0x10b   : > { %v5922_v39 = vpop.f32.mrf.mxu0 }
 0x112   : > { %v2001_v9 = vpop.f32.mrf.mxu2  ;;  %v5958_v20 = vpop.f32.mrf.mxu3 }
 0x113   : > { %v5956_v63 = vpop.f32.mrf.mxu0  ;;  %v2002_v48 = vadd.f32 %v2001_v9, %v1973_v44  ;;  %v5296_v9 = vld [vmem:[%s6573_s3 + $0x88] sm:$0xff]  ;;  %v1949_v44 = vadd.f32 %v5857_v5, %v1920_v34  ;;  %v2236_v5 = vld [vmem:[#allocation4 + $0x8] sm:$0xf] }
 0x114   : > { %3882 = vmatpush.bf16.msrb.mxu3 %v5296_v9 }
 0x115   : > { %v1978_v13 = vadd.f32 %v5988_v50, %v1949_v44  ;;  %v2245_v44 = vld [vmem:[#allocation4 + $0x14] sm:$0x1] }
 0x118   : > { %3883 = vmatpush.bf16.msrb.mxu3 %v5295_v6  ;;  %v5287_v6 = vld [vmem:[%s6573_s3 + $0x40] sm:$0xff] }
 0x119   : > { %3854 = vmatpush.bf16.msrb.mxu2 %v5287_v6 }
 0x11a   : > { %v2003_v35 = vpop.f32.mrf.mxu2  ;;  %v2030_v51 = vpop.f32.mrf.mxu3 }
 0x11b   : > { %v2059_v33 = vpop.f32.mrf.mxu0  ;;  %v2031_v2 = vadd.f32 %v2030_v51, %v2002_v48  ;;  %v2004_v43 = vadd.f32 %v2003_v35, %v1975_v32  ;;  %v1864_v35 = vadd.f32 %v5888_v21, %v1835_v38  ;;  %v2108_v51 = vld [vmem:[#allocation4 + $0x28] sm:$0x1]  ;;  %v2135_v21 = vsel %vm5901_vm10, 0, %v2134_v53 }
 0x11c   : > { %v2109_v9 = vsel %vm5892_vm8, 0, %v2108_v51  ;;  %2136 = vst [vmem:[#allocation4 + $0x2c] sm:$0x1] %v2135_v21  ;;  %v1896_v38 = vadd.f32 %v5870_v11, %v5823_v41  ;;  %v2111_v21 = vld [vmem:[#allocation4 + $0x30] sm:$0x1] }
 0x11d   : > { %v2060_v45 = vadd.f32 %v2059_v33, %v2031_v2  ;;  %v1893_v55 = vadd.f32 %v5861_v7, %v1864_v35  ;;  %v2239_v2 = vld [vmem:[#allocation4 + $0xc] sm:$0x1]  ;;  %2110 = vst [vmem:[#allocation4 + $0x28] sm:$0x1] %v2109_v9 }
 0x11f   : > { %v2079_v36 = vmax.f32 %v2060_v45, 0.0  ;;  %v1922_v7 = vadd.f32 %v5872_v12, %v1893_v55  ;;  %v5303_v12 = vld [vmem:[%s6573_s3 + $0xc0] sm:$0xff] }
 0x120   : > { %3912 = vmatpush.bf16.msrb.mxu0 %v5303_v12 }
 0x121   : > { %v2146_v60 = vpack.c.bf16 %v2079_v36, %v2079_v36 }
 0x122   : > { %v2006_v61 = vpop.f32.mrf.mxu2  ;;  %v2032_v19 = vpop.f32.mrf.mxu3 }
 0x123   : > { %v2061_v0 = vpop.f32.mrf.mxu0  ;;  %v2155_v47 = vshrl.u32 %v2146_v60, 16  ;;  %v2033_v48 = vadd.f32 %v2032_v19, %v2004_v43  ;;  %v2158_v4 = vshll.u32 %v2146_v60, 16  ;;  %v2007_v31 = vadd.f32 %v2006_v61, %v1978_v13  ;;  %v1982_v43 = vpop.f32.mrf.mxu1  ;;  %v2137_v13 = vld [vmem:[#allocation4 + $0x34] sm:$0x1] }
 0x124   : > { %v1951_v60 = vadd.f32 %v5868_v10, %v1922_v7  ;;  %v1840_v19 = vadd.f32 %v5814_v16, %v5825_v42  ;;  %v5318_v10 = vld [vmem:[%s6573_s3 + $0x138] sm:$0xff] }
 0x125   : > { %v2157_v28 = vrot.slane %v2155_v47, 7  ;;  %v2062_v33 = vadd.f32 %v2061_v0, %v2033_v48  ;;  %v1925_v47 = vadd.f32 %v5883_v18, %v1896_v38  ;;  %3934 = vmatpush.bf16.msrb.mxu1 %v5318_v10 }
 0x126   : > { %v1869_v35 = vadd.f32 %v5829_v49, %v1840_v19 }
 0x127   : > { %v2160_v45 = vor.u32 %v2158_v4, %v2157_v28  ;;  %v2161_v22 = vrot.slane %v2157_v28, 4  ;;  %v2080_v25 = vmax.f32 %v2062_v33, 0.0  ;;  %v1980_v28 = vadd.f32 %v1979_v46, %v1951_v60 }
 0x128   : > { %v1898_v18 = vadd.f32 %v5881_v17, %v1869_v35  ;;  %v1954_v49 = vadd.f32 %v5879_v15, %v1925_v47  ;;  %v1845_v15 = vadd.f32 %v5814_v16, %v5834_v52  ;;  %v1901_v16 = vadd.f32 %v5896_v26, %v5836_v56  ;;  %v5317_v47 = vld [vmem:[%s6573_s3 + $0x130] sm:$0xff] }
 0x129   : > { %v2237_v27 = vsel %vm6035_vm12, %v2160_v45, %v2236_v5  ;;  %v2240_v1 = vsel %vm5892_vm8, %v2161_v22, %v2239_v2  ;;  %v2147_v14 = vpack.c.bf16 %v2080_v25, %v2080_v25  ;;  %3935 = vmatpush.bf16.msrb.mxu1 %v5317_v47 }
 0x12a   : > { %v2008_v3 = vpop.f32.mrf.mxu2  ;;  %2238 = vst [vmem:[#allocation4 + $0x8] sm:$0xf] %v2237_v27  ;;  %v2035_v34 = vpop.f32.mrf.mxu3  ;;  %v1927_v25 = vadd.f32 %v5905_v30, %v1898_v18  ;;  %v2138_v30 = vsel %vm5901_vm10, 0, %v2137_v13  ;;  %v1983_v19 = vadd.f32 %v1982_v43, %v1954_v49  ;;  %v1874_v43 = vadd.f32 %v5840_v59, %v1845_v15 }
 0x12b   : > { %v2064_v32 = vpop.f32.mrf.mxu0  ;;  %2241 = vst [vmem:[#allocation4 + $0xc] sm:$0x1] %v2240_v1  ;;  %v2163_v50 = vshrl.u32 %v2147_v14, 16  ;;  %v2036_v36 = vadd.f32 %v2035_v34, %v2007_v31  ;;  %v2166_v8 = vshll.u32 %v2147_v14, 16  ;;  %v2009_v22 = vadd.f32 %v2008_v3, %v1980_v28  ;;  %v1984_v12 = vpop.f32.mrf.mxu1 }
 0x12c   : > { %v2112_v34 = vsel %vm5892_vm8, 0, %v2111_v21  ;;  %2139 = vst [vmem:[#allocation4 + $0x34] sm:$0x1] %v2138_v30  ;;  %v1930_v56 = vadd.f32 %v5924_v40, %v1901_v16 }
 0x12d   : > { %v2165_v61 = vrot.slane %v2163_v50, 7  ;;  %v2065_v0 = vadd.f32 %v2064_v32, %v2036_v36  ;;  %v2248_v36 = vld [vmem:[#allocation4 + $0x18] sm:$0xf]  ;;  %2113 = vst [vmem:[#allocation4 + $0x30] sm:$0x1] %v2112_v34 }
 0x12f   : > { %v2168_v41 = vor.u32 %v2166_v8, %v2165_v61  ;;  %v2169_v11 = vrot.slane %v2165_v61, 4  ;;  %v2081_v48 = vmax.f32 %v2065_v0, 0.0  ;;  %v2251_v61 = vld [vmem:[#allocation4 + $0x1c] sm:$0x1] }
 0x131   : > { %v2311_v4 = vld [vmem:[#allocation4 + $0x8] sm:$0xf]  ;;  %v2243_v33 = vsel %vm6035_vm12, %v2168_v41, %v2242_v57  ;;  %v2246_v42 = vsel %vm5892_vm8, %v2169_v11, %v2245_v44  ;;  %v2148_v51 = vpack.c.bf16 %v2081_v48, %v2081_v48  ;;  %v1956_v57 = vadd.f32 %v5890_v23, %v1927_v25 }
 0x132   : > { %v2011_v53 = vpop.f32.mrf.mxu2  ;;  %v2340_v55 = vshrl.u32 %v2311_v4, 16  ;;  %v2343_v5 = vshll.u32 %v2311_v4, 16  ;;  %v2037_v9 = vpop.f32.mrf.mxu3  ;;  %v2549_v46 = vld [vmem:[#allocation4 + $0x8] sm:$0xf]  ;;  %2244 = vst [vmem:[#allocation4 + $0x10] sm:$0xf] %v2243_v33 }
 0x133   : > { %v2066_v2 = vpop.f32.mrf.mxu0  ;;  %v2171_v45 = vshrl.u32 %v2148_v51, 16  ;;  %2247 = vst [vmem:[#allocation4 + $0x14] sm:$0x1] %v2246_v42  ;;  %v2174_v1 = vshll.u32 %v2148_v51, 16  ;;  %v2038_v17 = vadd.f32 %v2037_v9, %v2009_v22  ;;  %v2294_v31 = vld [vmem:[#allocation4 + $0x8] sm:$0xf]  ;;  %v2012_v28 = vadd.f32 %v2011_v53, %v1983_v19 }
 0x134   : > { %v2342_v7 = vrot.slane %v2340_v55, 4  ;;  %v2345_v27 = vrot.slane %v2343_v5, 5  ;;  %v2455_v32 = vld [vmem:[#allocation4 + $0x8] sm:$0xe]  ;;  %2302 = vst [vmem:[#allocation3 + $0x24] sm:$0xf] %v2294_v31  ;;  %v1985_v9 = vadd.f32 %v1984_v12, %v1956_v57 }
 0x135   : > { %v2173_v14 = vrot.slane %v2171_v45, 7  ;;  %v6076_v50 = vld [vmem:[#allocation4 + $0x8] sm:$0xe]  ;;  %v2456_v3 = vld [vmem:[#allocation4 + $0xc] sm:$0x1]  ;;  %v2566_v38 = vshrl.u32 %v2549_v46, 16  ;;  %v2067_v8 = vadd.f32 %v2066_v2, %v2038_v17 }
 0x136   : > { %v2569_v6 = vshll.u32 %v2549_v46, 16  ;;  %v2533_v0 = vld [vmem:[#allocation4 + $0x8] sm:$0xf]  ;;  %v6083_v52 = vld [vmem:[#allocation4 + $0xc] sm:$0x1]  ;;  %v4652_v48 = vrot.slane %v2455_v32, 9  ;;  %v2346_v35 = vor.u32 %v2345_v27, %v2342_v7  ;;  %v1959_v27 = vadd.f32 %v5922_v39, %v1930_v56 }
 0x137   : > { %v2176_v60 = vor.u32 %v2174_v1, %v2173_v14  ;;  %v2177_v44 = vrot.slane %v2173_v14, 4  ;;  %v2082_v41 = vmax.f32 %v2067_v8, 0.0  ;;  %v2491_v10 = vrot.slane %v2456_v3, 5  ;;  %2541 = vst [vmem:[#allocation3 + $0xc] sm:$0xf] %v2533_v0 }
 0x138   : > { %v4659_v26 = vrot.slane %v6076_v50, 9  ;;  %v2727_v33 = vrot.slane %v6083_v52, 5  ;;  %v6094_v18 = vrot.slane %v2566_v38, 4  ;;  %v4677_v53 = vld [vmem:[#allocation3] sm:$0xf]  ;;  %v6098_v21 = vrot.slane %v2569_v6, 5  ;;  %v1987_v38 = vpop.f32.mrf.mxu1 }
 0x139   : > { %v2551_v42 = vld [vmem:[#allocation4 + $0x10] sm:$0xf]  ;;  %v2249_v51 = vsel %vm6035_vm12, %v2176_v60, %v2248_v36  ;;  %v2252_v55 = vsel %vm5892_vm8, %v2177_v44, %v2251_v61  ;;  %v2149_v59 = vpack.c.bf16 %v2082_v41, %v2082_v41  ;;  %v2312_v2 = vld [vmem:[#allocation4 + $0xc] sm:$0x1]  ;;  %v2492_v13 = vsel %vm5608_vm5, %v4652_v48, %v2491_v10  ;;  %v2114_v46 = vld [vmem:[#allocation4 + $0x38] sm:$0x1] }
 0x13a   : > { %v2013_v11 = vpop.f32.mrf.mxu2  ;;  %v2040_v4 = vpop.f32.mrf.mxu3  ;;  %v2790_v40 = vld [vmem:[#allocation4 + $0x10] sm:$0xf]  ;;  %v6102_v49 = vrot.slane %v2346_v35, 4  ;;  %v2580_v45 = vshrl.u32 %v2551_v42, 16  ;;  %v6106_v25 = vld [vmem:[#allocation4 + $0x14] sm:$0x1]  ;;  %v1903_v1 = vadd.f32 %v5917_v37, %v1874_v43 }
 0x13b   : > { %v2069_v23 = vpop.f32.mrf.mxu0  ;;  %v2041_v5 = vadd.f32 %v2040_v4, %v2012_v28  ;;  %v6104_v22 = vld [vmem:[#allocation4 + $0x10] sm:$0xe]  ;;  %2250 = vst [vmem:[#allocation4 + $0x18] sm:$0xf] %v2249_v51  ;;  %v2179_v7 = vshrl.u32 %v2149_v59, 16  ;;  %v2014_v15 = vadd.f32 %v2013_v11, %v1985_v9  ;;  %v2182_v3 = vshll.u32 %v2149_v59, 16 }
 0x13c   : > { %v2791_v14 = vld [vmem:[#allocation4 + $0x14] sm:$0x1]  ;;  %2253 = vst [vmem:[#allocation4 + $0x1c] sm:$0x1] %v2252_v55  ;;  %v2254_v17 = vld [vmem:[#allocation4 + $0x20] sm:$0xf]  ;;  %v1932_v35 = vadd.f32 %v5958_v20, %v1903_v1 }
 0x13d   : > { %v2257_v31 = vld [vmem:[#allocation4 + $0x24] sm:$0x1]  ;;  %v2070_v32 = vadd.f32 %v2069_v23, %v2041_v5  ;;  %v2181_v36 = vrot.slane %v2179_v7, 7  ;;  %2526 = vst [vmem:[#allocation3 + $0x2c] sm:$0xf] %v2492_v13  ;;  %v2349_v12 = vshll.u32 %v2312_v2, 16  ;;  %v1988_v13 = vadd.f32 %v1987_v38, %v1959_v27 }
 0x13e   : > { %v5247_v34 = vld [vmem:[#allocation3 + $0x20] sm:$0xf0]  ;;  %v2583_v6 = vshll.u32 %v2551_v42, 16  ;;  %v2807_v60 = vshrl.u32 %v2790_v40, 16  ;;  %v2534_v8 = vld [vmem:[#allocation4 + $0x10] sm:$0xf] }
 0x13f   : > { %v4678_v30 = vor.u32 %v5247_v34, %v4677_v53  ;;  %v2083_v61 = vmax.f32 %v2070_v32, 0.0  ;;  %v2115_v37 = vsel %vm5892_vm8, 0, %v2114_v46  ;;  %v2810_v39 = vshll.u32 %v2790_v40, 16  ;;  %2542 = vst [vmem:[#allocation3 + $0x30] sm:$0xf] %v2534_v8  ;;  %v5316_v42 = vld [vmem:[%s6573_s3 + $0x128] sm:$0xff] }
 0x140   : > { %v2816_v0 = vshll.u32 %v2791_v14, 16  ;;  %v2184_v19 = vor.u32 %v2182_v3, %v2181_v36  ;;  %v2185_v57 = vrot.slane %v2181_v36, 4  ;;  %v4660_v47 = vrot.slane %v6104_v22, 9  ;;  %2116 = vst [vmem:[#allocation4 + $0x38] sm:$0x1] %v2115_v37  ;;  %3936 = vmatpush.bf16.msrb.mxu1 %v5316_v42 }
 0x141   : > { %3826 = vmatmul.bf16.vlgmr.msra.gmra.mxu1 %v4678_v30  ;;  %v2731_v41 = vrot.slane %v6106_v25, 5  ;;  %v2150_v11 = vpack.c.bf16 %v2083_v61, %v2083_v61  ;;  %v2295_v10 = vld [vmem:[#allocation4 + $0x10] sm:$0xf]  ;;  %v2351_v28 = vrot.slane %v2349_v12, 5  ;;  %v2140_v56 = vld [vmem:[#allocation4 + $0x3c] sm:$0x1]  ;;  %v1961_v14 = vadd.f32 %v5956_v63, %v1932_v35 }
 0x142   : > { %v2042_v44 = vpop.f32.mrf.mxu3  ;;  %v2255_v43 = vsel %vm6035_vm12, %v2184_v19, %v2254_v17  ;;  %v2258_v23 = vsel %vm5892_vm8, %v2185_v57, %v2257_v31  ;;  %v2016_v4 = vpop.f32.mrf.mxu2  ;;  %2303 = vst [vmem:[#allocation3 + $0x48] sm:$0xf] %v2295_v10  ;;  %v6122_v51 = vrot.slane %v2580_v45, 4  ;;  %v6124_v55 = vrot.slane %v2583_v6, 5  ;;  %v6126_v59 = vld [vmem:[#allocation4 + $0x18] sm:$0xf] }
 0x143   : > { %v2071_v16 = vpop.f32.mrf.mxu0  ;;  %v2043_v48 = vadd.f32 %v2042_v44, %v2014_v15  ;;  %2256 = vst [vmem:[#allocation4 + $0x20] sm:$0xf] %v2255_v43  ;;  %v6128_v5 = vrot.slane %v2807_v60, 4  ;;  %v6130_v53 = vrot.slane %v2810_v39, 5  ;;  %v6132_v2 = vrot.slane %v2816_v0, 5 }
 0x144   : > { %v4685_v9 = vld [vmem:[#allocation3 + $0x8] sm:$0xf]  ;;  %v2352_v40 = vsel %vm5510_vm2, %v6102_v49, %v2351_v28  ;;  %v6137_v46 = vld [vmem:[#allocation4 + $0x1c] sm:$0x1]  ;;  %2259 = vst [vmem:[#allocation4 + $0x24] sm:$0x1] %v2258_v23  ;;  %v2017_v12 = vadd.f32 %v2016_v4, %v1988_v13  ;;  %v2732_v50 = vsel %vm5608_vm5, %v4660_v47, %v2731_v41 }
 0x145   : > { %v2072_v20 = vadd.f32 %v2071_v16, %v2043_v48  ;;  %v2187_v45 = vshrl.u32 %v2150_v11, 16  ;;  %v5244_v7 = vld [vmem:[#allocation3 + $0xc] sm:$0xf]  ;;  %v2141_v1 = vsel %vm5901_vm10, 0, %v2140_v56  ;;  %v2821_v17 = vshrl.u32 %v6126_v59, 16  ;;  %v1989_v16 = vpop.f32.mrf.mxu1 }
 0x146   : > { %v2260_v31 = vld [vmem:[#allocation4 + $0x28] sm:$0xf]  ;;  %v2263_v32 = vld [vmem:[#allocation4 + $0x2c] sm:$0x1]  ;;  %v2457_v36 = vld [vmem:[#allocation4 + $0x10] sm:$0xe] }
 0x147   : > { %v5248_v34 = vld [vmem:[#allocation3 + $0x28] sm:$0xf0]  ;;  %v2084_v15 = vmax.f32 %v2072_v20, 0.0  ;;  %v2189_v49 = vrot.slane %v2187_v45, 7  ;;  %v2190_v3 = vshll.u32 %v2150_v11, 16  ;;  %v2824_v38 = vshll.u32 %v6126_v59, 16 }
 0x148   : > { %v4686_v27 = vor.u32 %v5248_v34, %v4685_v9  ;;  %v4687_v30 = vld [vmem:[#allocation3 + $0x2c] sm:$0xf0]  ;;  %2446 = vst [vmem:[#allocation3 + $0x28] sm:$0xf] %v2352_v40  ;;  %v2830_v6 = vshll.u32 %v6137_v46, 16  ;;  %v4653_v57 = vrot.slane %v2457_v36, 9  ;;  %v1990_v34 = vadd.f32 %v1989_v16, %v1961_v14 }
 0x149   : > { %v2151_v60 = vpack.c.bf16 %v2084_v15, %v2084_v15  ;;  %v4690_v63 = vor.u32 %v5244_v7, %v4687_v30  ;;  %2142 = vst [vmem:[#allocation4 + $0x3c] sm:$0x1] %v2141_v1  ;;  %v2296_v37 = vld [vmem:[#allocation4 + $0x18] sm:$0xf]  ;;  %v2192_v39 = vor.u32 %v2190_v3, %v2189_v49  ;;  %v2193_v0 = vrot.slane %v2189_v49, 4  ;;  %v5315_v40 = vld [vmem:[%s6573_s3 + $0x120] sm:$0xff] }
 0x14a   : > { %v2045_v8 = vpop.f32.mrf.mxu3  ;;  %3884 = vmatmul.bf16.vlgmr.msrb.gmra.mxu3 %v4686_v27  ;;  %2304 = vst [vmem:[#allocation3 + $0x6c] sm:$0xf] %v2296_v37  ;;  %v5243_v48 = vld [vmem:[#allocation3 + $0x4] sm:$0xf]  ;;  %v2458_v10 = vld [vmem:[#allocation4 + $0x14] sm:$0x1]  ;;  %v2018_v45 = vpop.f32.mrf.mxu2  ;;  %3937 = vmatpush.bf16.msrb.mxu1 %v5315_v40 }
 0x14b   : > { %v2074_v61 = vpop.f32.mrf.mxu0  ;;  %v2046_v19 = vadd.f32 %v2045_v8, %v2017_v12  ;;  %v2195_v44 = vshrl.u32 %v2151_v60, 16  ;;  %v2198_v11 = vshll.u32 %v2151_v60, 16  ;;  %3913 = vmatmul.bf16.vlgmr.msrb.gmra.mxu0 %v4690_v63  ;;  %v2459_v35 = vld [vmem:[#allocation4 + $0x18] sm:$0xe]  ;;  %v2261_v43 = vsel %vm6035_vm12, %v2192_v39, %v2260_v31  ;;  %v2266_v28 = vld [vmem:[#allocation4 + $0x30] sm:$0xf] }
 0x14c   : > { %v2264_v23 = vsel %vm5892_vm8, %v2193_v0, %v2263_v32  ;;  %v2269_v4 = vld [vmem:[#allocation4 + $0x34] sm:$0x1]  ;;  %v2460_v42 = vld [vmem:[#allocation4 + $0x1c] sm:$0x1]  ;;  %v2495_v20 = vrot.slane %v2458_v10, 5  ;;  %v4654_v7 = vrot.slane %v2459_v35, 9  ;;  %v2019_v8 = vadd.f32 %v2018_v45, %v1990_v34 }
 0x14d   : > { %v2075_v56 = vadd.f32 %v2074_v61, %v2046_v19  ;;  %v2117_v9 = vld [vmem:[#allocation4 + $0x40] sm:$0x1]  ;;  %2262 = vst [vmem:[#allocation4 + $0x28] sm:$0xf] %v2261_v43  ;;  %v2197_v13 = vrot.slane %v2195_v44, 7  ;;  %v2499_v1 = vrot.slane %v2460_v42, 5 }
 0x14e   : > { %v2118_v31 = vsel %vm5892_vm8, 0, %v2117_v9  ;;  %2265 = vst [vmem:[#allocation4 + $0x2c] sm:$0x1] %v2264_v23  ;;  %v2496_v15 = vsel %vm5608_vm5, %v4653_v57, %v2495_v20  ;;  %v2143_v36 = vld [vmem:[#allocation4 + $0x44] sm:$0x1]  ;;  %v5314_v49 = vld [vmem:[%s6573_s3 + $0x118] sm:$0xff] }
 0x14f   : > { %v2085_v32 = vmax.f32 %v2075_v56, 0.0  ;;  %v6159_v3 = vrot.slane %v2821_v17, 4  ;;  %v2200_v27 = vor.u32 %v2198_v11, %v2197_v13  ;;  %v2201_v30 = vrot.slane %v2197_v13, 4  ;;  %v4679_v12 = vld [vmem:[#allocation3 + $0x24] sm:$0xf0]  ;;  %3938 = vmatpush.bf16.msrb.mxu1 %v5314_v49 }
 0x150   : > { %v4713_v60 = vld [vmem:[#allocation3 + $0x48] sm:$0xf]  ;;  %v2500_v14 = vsel %vm5608_vm5, %v4654_v7, %v2499_v1  ;;  %2527 = vst [vmem:[#allocation3 + $0x50] sm:$0xf] %v2496_v15  ;;  %v4682_v61 = vor.u32 %v5243_v48, %v4679_v12  ;;  %v2144_v37 = vsel %vm5901_vm10, 0, %v2143_v36 }
 0x151   : > { %v2152_v63 = vpack.c.bf16 %v2085_v32, %v2085_v32  ;;  %2528 = vst [vmem:[#allocation3 + $0x74] sm:$0xf] %v2500_v14  ;;  %v2535_v39 = vld [vmem:[#allocation4 + $0x18] sm:$0xf]  ;;  %v2267_v17 = vsel %vm6035_vm12, %v2200_v27, %v2266_v28  ;;  %v2270_v0 = vsel %vm5892_vm8, %v2201_v30, %v2269_v4  ;;  %v5256_v19 = vld [vmem:[#allocation3 + $0x68] sm:$0xf0] }
 0x152   : > { %v2047_v57 = vpop.f32.mrf.mxu3  ;;  %2119 = vst [vmem:[#allocation4 + $0x40] sm:$0x1] %v2118_v31  ;;  %v2536_v16 = vld [vmem:[#allocation4 + $0x20] sm:$0xf]  ;;  %3855 = vmatmul.bf16.vlgmr.msrb.gmra.mxu2 %v4682_v61  ;;  %v4714_v48 = vor.u32 %v5256_v19, %v4713_v60  ;;  %v2313_v35 = vld [vmem:[#allocation4 + $0x10] sm:$0xf] }
 0x153   : > { %2268 = vst [vmem:[#allocation4 + $0x30] sm:$0xf] %v2267_v17  ;;  %v2203_v44 = vshrl.u32 %v2152_v63, 16  ;;  %v2206_v11 = vshll.u32 %v2152_v63, 16  ;;  %v2048_v10 = vadd.f32 %v2047_v57, %v2019_v8  ;;  %v2272_v29 = vld [vmem:[#allocation4 + $0x38] sm:$0xf]  ;;  %v2076_v23 = vpop.f32.mrf.mxu0 }
 0x154   : > { %2271 = vst [vmem:[#allocation4 + $0x34] sm:$0x1] %v2270_v0  ;;  %v2275_v43 = vld [vmem:[#allocation4 + $0x3c] sm:$0x1]  ;;  %v2314_v28 = vld [vmem:[#allocation4 + $0x14] sm:$0x1]  ;;  %3831 = vmatmul.bf16.gmra.mxu1 %v4714_v48 }
 0x155   : > { %v2315_v56 = vld [vmem:[#allocation4 + $0x18] sm:$0xf]  ;;  %v2205_v42 = vrot.slane %v2203_v44, 7  ;;  %v2077_v4 = vadd.f32 %v2076_v23, %v2048_v10  ;;  %2145 = vst [vmem:[#allocation4 + $0x44] sm:$0x1] %v2144_v37  ;;  %v2354_v9 = vshrl.u32 %v2313_v35, 16 }
 0x156   : > { %v2316_v20 = vld [vmem:[#allocation4 + $0x1c] sm:$0x1]  ;;  %2543 = vst [vmem:[#allocation3 + $0x54] sm:$0xf] %v2535_v39  ;;  %v2357_v40 = vshll.u32 %v2313_v35, 16  ;;  %v2363_v13 = vshll.u32 %v2314_v28, 16 }
 0x157   : > { %v2368_v45 = vshrl.u32 %v2315_v56, 16  ;;  %v2371_v7 = vshll.u32 %v2315_v56, 16  ;;  %v2208_v1 = vor.u32 %v2206_v11, %v2205_v42  ;;  %v2209_v31 = vrot.slane %v2205_v42, 4  ;;  %v4721_v34 = vld [vmem:[#allocation3 + $0x50] sm:$0xf] }
 0x158   : > { %v2086_v32 = vmax.f32 %v2077_v4, 0.0  ;;  %2544 = vst [vmem:[#allocation3 + $0x78] sm:$0xf] %v2536_v16  ;;  %v5257_v15 = vld [vmem:[#allocation3 + $0x70] sm:$0xf0]  ;;  %v2356_v36 = vrot.slane %v2354_v9, 4 }
 0x159   : > { %v2359_v49 = vrot.slane %v2357_v40, 5  ;;  %v2365_v27 = vrot.slane %v2363_v13, 5  ;;  %v2370_v30 = vrot.slane %v2368_v45, 4  ;;  %v2273_v12 = vsel %vm6035_vm12, %v2208_v1, %v2272_v29  ;;  %v2297_v63 = vld [vmem:[#allocation4 + $0x20] sm:$0xf] }
 0x15a   : > { %v2276_v60 = vsel %vm5892_vm8, %v2209_v31, %v2275_v43  ;;  %v4722_v14 = vor.u32 %v5257_v15, %v4721_v34  ;;  %v2153_v61 = vpack.c.bf16 %v2086_v32, %v2086_v32  ;;  %v2298_v8 = vld [vmem:[#allocation4 + $0x28] sm:$0xf]  ;;  %2274 = vst [vmem:[#allocation4 + $0x38] sm:$0xf] %v2273_v12  ;;  %v2373_v39 = vrot.slane %v2371_v7, 5 }
 0x15b   : > { %v2360_v37 = vor.u32 %v2359_v49, %v2356_v36  ;;  %v2377_v17 = vshll.u32 %v2316_v20, 16  ;;  %v2461_v0 = vld [vmem:[#allocation4 + $0x20] sm:$0xe]  ;;  %2277 = vst [vmem:[#allocation4 + $0x3c] sm:$0x1] %v2276_v60  ;;  %v6177_v1 = vrot.slane %v2824_v38, 5 }
 0x15c   : > { %3889 = vmatmul.bf16.gmra.mxu3 %v4722_v14  ;;  %v2211_v19 = vshrl.u32 %v2153_v61, 16  ;;  %v2214_v57 = vshll.u32 %v2153_v61, 16  ;;  %v2462_v16 = vld [vmem:[#allocation4 + $0x24] sm:$0x1]  ;;  %v2278_v44 = vld [vmem:[#allocation4 + $0x40] sm:$0xf]  ;;  %v2374_v10 = vor.u32 %v2373_v39, %v2370_v30  ;;  %v2813_v61 = vor.u32 %v6130_v53, %v6128_v5 }
 0x15d   : > { %v2281_v11 = vld [vmem:[#allocation4 + $0x44] sm:$0x1]  ;;  %v2361_v48 = vrot.slane %v2360_v37, 4  ;;  %v2379_v35 = vrot.slane %v2377_v17, 5  ;;  %2305 = vst [vmem:[#allocation3 + $0x90] sm:$0xf] %v2297_v63  ;;  %v2572_v39 = vor.u32 %v6098_v21, %v6094_v18 }
 0x15e   : > { %v2213_v29 = vrot.slane %v2211_v19, 7  ;;  %v5253_v43 = vld [vmem:[#allocation3 + $0x54] sm:$0xf]  ;;  %2306 = vst [vmem:[#allocation3 + $0xb4] sm:$0xf] %v2298_v8  ;;  %v4655_v23 = vrot.slane %v2461_v0, 9 }
 0x15f   : > { %v4723_v28 = vld [vmem:[#allocation3 + $0x74] sm:$0xf0]  ;;  %v2366_v56 = vsel %vm5510_vm2, %v2361_v48, %v2365_v27  ;;  %v2375_v42 = vrot.slane %v2374_v10, 4  ;;  %v2463_v4 = vld [vmem:[#allocation4 + $0x28] sm:$0xe]  ;;  %v2503_v20 = vrot.slane %v2462_v16, 5 }
 0x160   : > { %v2216_v9 = vor.u32 %v2214_v57, %v2213_v29  ;;  %v2217_v40 = vrot.slane %v2213_v29, 4  ;;  %v4726_v13 = vor.u32 %v5253_v43, %v4723_v28  ;;  %2447 = vst [vmem:[#allocation3 + $0x4c] sm:$0xf] %v2366_v56  ;;  %v2464_v45 = vld [vmem:[#allocation4 + $0x2c] sm:$0x1]  ;;  %v4656_v7 = vrot.slane %v2463_v4, 9 }
 0x161   : > { %v6181_v31 = vrot.slane %v2830_v6, 5  ;;  %v2380_v34 = vsel %vm5510_vm2, %v2375_v42, %v2379_v35  ;;  %v2507_v32 = vrot.slane %v2464_v45, 5  ;;  %v5334_v15 = vld [vmem:[%s6573_s3 + $0x1b8] sm:$0xff]  ;;  %v2504_v46 = vsel %vm5608_vm5, %v4655_v23, %v2503_v20  ;;  %v5313_v6 = vld [vmem:[%s6573_s3 + $0x110] sm:$0xff]  ;;  %v2538_v58 = vld [vmem:[#allocation4 + $0x30] sm:$0xf] }
 0x162   : > { %v2279_v36 = vsel %vm6035_vm12, %v2216_v9, %v2278_v44  ;;  %v2282_v59 = vsel %vm5892_vm8, %v2217_v40, %v2281_v11  ;;  %3918 = vmatmul.bf16.gmra.mxu0 %v4726_v13  ;;  %2448 = vst [vmem:[#allocation3 + $0x70] sm:$0xf] %v2380_v34  ;;  %v2537_v38 = vld [vmem:[#allocation4 + $0x28] sm:$0xf]  ;;  %v5333_v49 = vld [vmem:[%s6573_s3 + $0x1b0] sm:$0xff]  ;;  %3992 = vmatpush.bf16.msra.mxu3 %v5334_v15  ;;  %v5332_v23 = vld [vmem:[%s6573_s3 + $0x1a8] sm:$0xff] }
 0x163   : > { %v2317_v27 = vld [vmem:[#allocation4 + $0x20] sm:$0xf]  ;;  %2280 = vst [vmem:[#allocation4 + $0x40] sm:$0xf] %v2279_v36  ;;  %v2508_v24 = vsel %vm5608_vm5, %v4656_v7, %v2507_v32  ;;  %v2318_v30 = vld [vmem:[#allocation4 + $0x24] sm:$0x1]  ;;  %3939 = vmatpush.bf16.msrb.mxu1 %v5313_v6  ;;  %v2586_v11 = vor.u32 %v6124_v55, %v6122_v51 }
 0x164   : > { %v2319_v12 = vld [vmem:[#allocation4 + $0x28] sm:$0xf]  ;;  %2283 = vst [vmem:[#allocation4 + $0x44] sm:$0x1] %v2282_v59  ;;  %v4749_v60 = vld [vmem:[#allocation3 + $0x90] sm:$0xf]  ;;  %v2827_v59 = vor.u32 %v6177_v1, %v6159_v3 }
 0x165   : > { %v2320_v14 = vld [vmem:[#allocation4 + $0x2c] sm:$0x1]  ;;  %v5265_v63 = vld [vmem:[#allocation3 + $0xb0] sm:$0xf0]  ;;  %2529 = vst [vmem:[#allocation3 + $0x98] sm:$0xf] %v2504_v46 }
 0x166   : > { %v2382_v8 = vshrl.u32 %v2317_v27, 16  ;;  %v2385_v37 = vshll.u32 %v2317_v27, 16  ;;  %v4750_v17 = vor.u32 %v5265_v63, %v4749_v60  ;;  %2530 = vst [vmem:[#allocation3 + $0xbc] sm:$0xf] %v2508_v24  ;;  %v2391_v0 = vshll.u32 %v2318_v30, 16  ;;  %v5342_v16 = vld [vmem:[%s6573_s3 + $0x1f8] sm:$0xff]  ;;  %3993 = vmatpush.bf16.msra.mxu3 %v5333_v49 }
 0x167   : > { %v2396_v19 = vshrl.u32 %v2319_v12, 16  ;;  %v2399_v57 = vshll.u32 %v2319_v12, 16  ;;  %v5252_v44 = vld [vmem:[#allocation3 + $0x4c] sm:$0xf]  ;;  %2545 = vst [vmem:[#allocation3 + $0x9c] sm:$0xf] %v2537_v38  ;;  %4021 = vmatpush.bf16.msra.mxu0 %v5342_v16 }
 0x168   : > { %v2384_v5 = vrot.slane %v2382_v8, 4  ;;  %v2387_v53 = vrot.slane %v2385_v37, 5  ;;  %3836 = vmatmul.bf16.gmra.mxu1 %v4750_v17  ;;  %2546 = vst [vmem:[#allocation3 + $0xc0] sm:$0xf] %v2538_v58  ;;  %v2393_v18 = vrot.slane %v2391_v0, 5  ;;  %v2405_v10 = vshll.u32 %v2320_v14, 16 }
 0x169   : > { %v2398_v21 = vrot.slane %v2396_v19, 4  ;;  %v2401_v48 = vrot.slane %v2399_v57, 5  ;;  %v4715_v35 = vld [vmem:[#allocation3 + $0x6c] sm:$0xf0]  ;;  %v5326_v43 = vld [vmem:[%s6573_s3 + $0x178] sm:$0xff]  ;;  %v6217_v28 = vrot.slane %v2572_v39, 4 }
 0x16a   : > { %v2388_v29 = vor.u32 %v2387_v53, %v2384_v5  ;;  %v6219_v51 = vrot.slane %v2586_v11, 4  ;;  %v4718_v55 = vor.u32 %v5252_v44, %v4715_v35  ;;  %v2407_v42 = vrot.slane %v2405_v10, 5  ;;  %v5341_v4 = vld [vmem:[%s6573_s3 + $0x1f0] sm:$0xff]  ;;  %v2299_v9 = vld [vmem:[#allocation4 + $0x30] sm:$0xf]  ;;  %3963 = vmatpush.bf16.msra.mxu2 %v5326_v43  ;;  %3994 = vmatpush.bf16.msra.mxu3 %v5332_v23  ;;  %v5312_v7 = vld [vmem:[%s6573_s3 + $0x108] sm:$0xff] }
 0x16b   : > { %v2402_v56 = vor.u32 %v2401_v48, %v2398_v21  ;;  %v5325_v20 = vld [vmem:[%s6573_s3 + $0x170] sm:$0xff]  ;;  %v2814_v40 = vrot.slane %v2813_v61, 4  ;;  %v2300_v45 = vld [vmem:[#allocation4 + $0x38] sm:$0xf]  ;;  %2307 = vst [vmem:[#allocation3 + $0xd8] sm:$0xf] %v2299_v9  ;;  %4022 = vmatpush.bf16.msra.mxu0 %v5341_v4  ;;  %3940 = vmatpush.bf16.msrb.mxu1 %v5312_v7 }
 0x16c   : > { %v2389_v13 = vrot.slane %v2388_v29, 4  ;;  %3860 = vmatmul.bf16.gmra.mxu2 %v4718_v55  ;;  %v4757_v34 = vld [vmem:[#allocation3 + $0x98] sm:$0xf]  ;;  %2308 = vst [vmem:[#allocation3 + $0xfc] sm:$0xf] %v2300_v45  ;;  %v5331_v15 = vld [vmem:[%s6573_s3 + $0x1a0] sm:$0xff] }
 0x16d   : > { %v2403_v32 = vrot.slane %v2402_v56, 4  ;;  %v2819_v36 = vsel %vm5510_vm2, %v2814_v40, %v6132_v2  ;;  %v5266_v46 = vld [vmem:[#allocation3 + $0xb8] sm:$0xf0]  ;;  %v2465_v3 = vld [vmem:[#allocation4 + $0x30] sm:$0xe]  ;;  %v5330_v37 = vld [vmem:[%s6573_s3 + $0x198] sm:$0xff] }
 0x16e   : > { %v2394_v38 = vsel %vm5510_vm2, %v2389_v13, %v2393_v18  ;;  %v5340_v6 = vld [vmem:[%s6573_s3 + $0x1e8] sm:$0xff]  ;;  %2926 = vst [vmem:[#allocation3 + $0x1c] sm:$0xf] %v2819_v36  ;;  %v4758_v27 = vor.u32 %v5266_v46, %v4757_v34  ;;  %3964 = vmatpush.bf16.msra.mxu2 %v5325_v20  ;;  %3995 = vmatpush.bf16.msra.mxu3 %v5331_v15  ;;  %v2466_v58 = vld [vmem:[#allocation4 + $0x34] sm:$0x1]  ;;  %v4657_v14 = vrot.slane %v2465_v3, 9 }
 0x16f   : > { %v5324_v49 = vld [vmem:[%s6573_s3 + $0x168] sm:$0xff]  ;;  %v2408_v2 = vsel %vm5510_vm2, %v2403_v32, %v2407_v42  ;;  %2449 = vst [vmem:[#allocation3 + $0x94] sm:$0xf] %v2394_v38  ;;  %v4759_v1 = vld [vmem:[#allocation3 + $0xbc] sm:$0xf0]  ;;  %4023 = vmatpush.bf16.msra.mxu0 %v5340_v6  ;;  %v2511_v61 = vrot.slane %v2466_v58, 5 }
 0x170   : > { %v5262_v24 = vld [vmem:[#allocation3 + $0x9c] sm:$0xf]  ;;  %2450 = vst [vmem:[#allocation3 + $0xb8] sm:$0xf] %v2408_v2  ;;  %3894 = vmatmul.bf16.gmra.mxu3 %v4758_v27  ;;  %v2467_v12 = vld [vmem:[#allocation4 + $0x38] sm:$0xe] }
 0x171   : > { %v4762_v30 = vor.u32 %v5262_v24, %v4759_v1  ;;  %v2468_v60 = vld [vmem:[#allocation4 + $0x3c] sm:$0x1]  ;;  %v4658_v63 = vrot.slane %v2467_v12, 9  ;;  %v5339_v39 = vld [vmem:[%s6573_s3 + $0x1e0] sm:$0xff]  ;;  %v6257_v0 = vrot.slane %v2827_v59, 4  ;;  %v2512_v57 = vsel %vm5608_vm5, %v4657_v14, %v2511_v61  ;;  %v5329_v18 = vld [vmem:[%s6573_s3 + $0x190] sm:$0xff] }
 0x172   : > { %v2515_v8 = vrot.slane %v2468_v60, 5  ;;  %v5323_v17 = vld [vmem:[%s6573_s3 + $0x160] sm:$0xff]  ;;  %v4785_v19 = vld [vmem:[#allocation3 + $0xd8] sm:$0xf]  ;;  %v2540_v44 = vld [vmem:[#allocation4 + $0x40] sm:$0xf]  ;;  %3965 = vmatpush.bf16.msra.mxu2 %v5324_v49  ;;  %3996 = vmatpush.bf16.msra.mxu3 %v5330_v37 }
 0x173   : > { %3923 = vmatmul.bf16.gmra.mxu0 %v4762_v30  ;;  %v2539_v16 = vld [vmem:[#allocation4 + $0x38] sm:$0xf]  ;;  %v5274_v5 = vld [vmem:[#allocation3 + $0xf8] sm:$0xf0]  ;;  %2531 = vst [vmem:[#allocation3 + $0xe0] sm:$0xf] %v2512_v57 }
 0x174   : > { %v2516_v53 = vsel %vm5608_vm5, %v4658_v63, %v2515_v8  ;;  %v5311_v11 = vld [vmem:[%s6573_s3 + $0x100] sm:$0xff]  ;;  %v4786_v21 = vor.u32 %v5274_v5, %v4785_v19  ;;  %4024 = vmatpush.bf16.msra.mxu0 %v5339_v39  ;;  %2547 = vst [vmem:[#allocation3 + $0xe4] sm:$0xf] %v2539_v16  ;;  %v2323_v29 = vld [vmem:[#allocation4 + $0x38] sm:$0xf]  ;;  %v5338_v4 = vld [vmem:[%s6573_s3 + $0x1d8] sm:$0xff] }
 0x175   : > { %2532 = vst [vmem:[#allocation3 + $0x104] sm:$0xf] %v2516_v53  ;;  %v2321_v48 = vld [vmem:[#allocation4 + $0x30] sm:$0xf]  ;;  %v2322_v10 = vld [vmem:[#allocation4 + $0x34] sm:$0x1]  ;;  %3941 = vmatpush.bf16.msrb.mxu1 %v5311_v11 }
 0x176   : > { %v5261_v35 = vld [vmem:[#allocation3 + $0x94] sm:$0xf]  ;;  %2548 = vst [vmem:[#allocation3 + $0x108] sm:$0xf] %v2540_v44  ;;  %v2324_v23 = vld [vmem:[#allocation4 + $0x3c] sm:$0x1]  ;;  %3966 = vmatpush.bf16.msra.mxu2 %v5323_v17  ;;  %3997 = vmatpush.bf16.msra.mxu3 %v5329_v18 }
 0x177   : > { %v4751_v43 = vld [vmem:[#allocation3 + $0xb4] sm:$0xf0]  ;;  %v2410_v55 = vshrl.u32 %v2321_v48, 16  ;;  %v2413_v56 = vshll.u32 %v2321_v48, 16  ;;  %v2419_v42 = vshll.u32 %v2322_v10, 16  ;;  %v5322_v20 = vld [vmem:[%s6573_s3 + $0x158] sm:$0xff] }
 0x178   : > { %v5328_v9 = vld [vmem:[%s6573_s3 + $0x188] sm:$0xff]  ;;  %v4754_v40 = vor.u32 %v5261_v35, %v4751_v43  ;;  %3841 = vmatmul.bf16.gmra.mxu1 %v4786_v21  ;;  %v2424_v13 = vshrl.u32 %v2323_v29, 16  ;;  %v2427_v45 = vshll.u32 %v2323_v29, 16  ;;  %v2433_v7 = vshll.u32 %v2324_v23, 16  ;;  %v5337_v34 = vld [vmem:[%s6573_s3 + $0x1d0] sm:$0xff]  ;;  %4025 = vmatpush.bf16.msra.mxu0 %v5338_v4  ;;  %v5350_v46 = vld [vmem:[%s6573_s3 + $0x238] sm:$0xff] }
 0x179   : > { %v2412_v32 = vrot.slane %v2410_v55, 4  ;;  %v2415_v15 = vrot.slane %v2413_v56, 5  ;;  %v5321_v36 = vld [vmem:[%s6573_s3 + $0x150] sm:$0xff]  ;;  %v2550_v59 = vld [vmem:[#allocation4 + $0xc] sm:$0x1]  ;;  %v5327_v24 = vld [vmem:[%s6573_s3 + $0x180] sm:$0xff]  ;;  %4050 = vmatpush.bf16.msra.mxu1 %v5350_v46  ;;  %v2833_v23 = vsel %vm5510_vm2, %v6257_v0, %v6181_v31 }
 0x17a   : > { %v4793_v38 = vld [vmem:[#allocation3 + $0xe0] sm:$0xf]  ;;  %v2426_v6 = vrot.slane %v2424_v13, 4  ;;  %v2429_v49 = vrot.slane %v2427_v45, 5  ;;  %v2575_v27 = vshll.u32 %v2550_v59, 16  ;;  %v2421_v1 = vrot.slane %v2419_v42, 5  ;;  %3967 = vmatpush.bf16.msra.mxu2 %v5322_v20  ;;  %3998 = vmatpush.bf16.msra.mxu3 %v5328_v9 }
 0x17b   : > { %v2416_v3 = vor.u32 %v2415_v15, %v2412_v32  ;;  %v2435_v58 = vrot.slane %v2433_v7, 5  ;;  %v2552_v30 = vld [vmem:[#allocation4 + $0x14] sm:$0x1]  ;;  %v5271_v60 = vld [vmem:[#allocation3 + $0xe4] sm:$0xf]  ;;  %v5336_v39 = vld [vmem:[%s6573_s3 + $0x1c8] sm:$0xff] }
 0x17c   : > { %v5275_v2 = vld [vmem:[#allocation3 + $0x100] sm:$0xf0]  ;;  %3865 = vmatmul.bf16.gmra.mxu2 %v4754_v40  ;;  %v2430_v14 = vor.u32 %v2429_v49, %v2426_v6  ;;  %v2577_v61 = vrot.slane %v2575_v27, 5  ;;  %v2589_v63 = vshll.u32 %v2552_v30, 16  ;;  %4026 = vmatpush.bf16.msra.mxu0 %v5337_v34  ;;  %v2774_v17 = vld [vmem:[#allocation4 + $0x10] sm:$0xf] }
 0x17d   : > { %v4794_v12 = vor.u32 %v5275_v2, %v4793_v38  ;;  %v4795_v8 = vld [vmem:[#allocation3 + $0x104] sm:$0xf0]  ;;  %v2417_v37 = vrot.slane %v2416_v3, 4  ;;  %v5320_v5 = vld [vmem:[%s6573_s3 + $0x148] sm:$0xff]  ;;  %2782 = vst [vmem:[#allocation3 + $0x18] sm:$0xf] %v2774_v17 }
 0x17e   : > { %v4798_v19 = vor.u32 %v5271_v60, %v4795_v8  ;;  %v2431_v57 = vrot.slane %v2430_v14, 4  ;;  %v2578_v16 = vsel %vm5510_vm2, %v6217_v28, %v2577_v61  ;;  %v2591_v44 = vrot.slane %v2589_v63, 5  ;;  %3968 = vmatpush.bf16.msra.mxu2 %v5321_v36  ;;  %3999 = vmatpush.bf16.msra.mxu3 %v5327_v24  ;;  %v2775_v11 = vld [vmem:[#allocation4 + $0x18] sm:$0xf]  ;;  %v5335_v18 = vld [vmem:[%s6573_s3 + $0x1c0] sm:$0xff]  ;;  %v5349_v28 = vld [vmem:[%s6573_s3 + $0x230] sm:$0xff] }
 0x17f   : > { %v2422_v53 = vsel %vm5510_vm2, %v2417_v37, %v2421_v1  ;;  %2685 = vst [vmem:[#allocation3 + $0x10] sm:$0xf] %v2578_v16  ;;  %v5348_v21 = vld [vmem:[%s6573_s3 + $0x228] sm:$0xff]  ;;  %v5319_v43 = vld [vmem:[%s6573_s3 + $0x140] sm:$0xff]  ;;  %4051 = vmatpush.bf16.msra.mxu1 %v5349_v28  ;;  %v2555_v55 = vld [vmem:[#allocation4 + $0x20] sm:$0xf] }
 0x180   : > { %3899 = vmatmul.bf16.gmra.mxu3 %v4794_v12  ;;  %v2436_v48 = vsel %vm5510_vm2, %v2431_v57, %v2435_v58  ;;  %2451 = vst [vmem:[#allocation3 + $0xdc] sm:$0xf] %v2422_v53  ;;  %v2592_v10 = vsel %vm5510_vm2, %v6219_v51, %v2591_v44  ;;  %v2553_v35 = vld [vmem:[#allocation4 + $0x18] sm:$0xf]  ;;  %v2554_v29 = vld [vmem:[#allocation4 + $0x1c] sm:$0x1]  ;;  %4027 = vmatpush.bf16.msra.mxu0 %v5336_v39 }
 0x181   : > { %2452 = vst [vmem:[#allocation3 + $0x100] sm:$0xf] %v2436_v48  ;;  %v2728_v51 = vsel %vm5608_vm5, %v4659_v26, %v2727_v33  ;;  %v2556_v56 = vld [vmem:[#allocation4 + $0x24] sm:$0x1]  ;;  %v2594_v42 = vshrl.u32 %v2553_v35, 16  ;;  %v2597_v4 = vshll.u32 %v2553_v35, 16 }
 0x182   : > { %2686 = vst [vmem:[#allocation3 + $0x34] sm:$0xf] %v2592_v10  ;;  %v2603_v20 = vshll.u32 %v2554_v29, 16  ;;  %v2608_v9 = vshrl.u32 %v2555_v55, 16  ;;  %3969 = vmatpush.bf16.msra.mxu2 %v5320_v5  ;;  %v2611_v52 = vshll.u32 %v2555_v55, 16  ;;  %v2617_v31 = vshll.u32 %v2556_v56, 16 }
 0x183   : > { %3928 = vmatmul.bf16.gmra.mxu0 %v4798_v19  ;;  %2783 = vst [vmem:[#allocation3 + $0x3c] sm:$0xf] %v2775_v11  ;;  %v2776_v26 = vld [vmem:[#allocation4 + $0x20] sm:$0xf]  ;;  %v2596_v33 = vrot.slane %v2594_v42, 4  ;;  %v2599_v0 = vrot.slane %v2597_v4, 5  ;;  %4052 = vmatpush.bf16.msra.mxu1 %v5348_v21 }
 0x184   : > { %2927 = vst [vmem:[#allocation3 + $0x40] sm:$0xf] %v2833_v23  ;;  %v2610_v40 = vrot.slane %v2608_v9, 4  ;;  %4028 = vmatpush.bf16.msra.mxu0 %v5335_v18  ;;  %v2613_v13 = vrot.slane %v2611_v52, 5  ;;  %v2605_v7 = vrot.slane %v2603_v20, 5  ;;  %v2619_v25 = vrot.slane %v2617_v31, 5 }
 0x185   : > { %2765 = vst [vmem:[#allocation3 + $0x14] sm:$0xf] %v2728_v51  ;;  %v2600_v45 = vor.u32 %v2599_v0, %v2596_v33  ;;  %v2777_v34 = vld [vmem:[#allocation4 + $0x28] sm:$0xf]  ;;  %v2794_v41 = vld [vmem:[#allocation4 + $0x20] sm:$0xf] }
 0x186   : > { %2766 = vst [vmem:[#allocation3 + $0x38] sm:$0xf] %v2732_v50  ;;  %v4693_v32 = vld [vmem:[#allocation3 + $0x10] sm:$0xf]  ;;  %3970 = vmatpush.bf16.msra.mxu2 %v5319_v43  ;;  %v2614_v47 = vor.u32 %v2613_v13, %v2610_v40  ;;  %v2835_v59 = vshrl.u32 %v2794_v41, 16  ;;  %v2838_v27 = vshll.u32 %v2794_v41, 16 }
 0x187   : > { %v5270_v22 = vld [vmem:[#allocation3 + $0xdc] sm:$0xf]  ;;  %2784 = vst [vmem:[#allocation3 + $0x60] sm:$0xf] %v2776_v26  ;;  %v2601_v36 = vrot.slane %v2600_v45, 4  ;;  %v5347_v17 = vld [vmem:[%s6573_s3 + $0x220] sm:$0xff] }
 0x188   : > { %v4787_v15 = vld [vmem:[#allocation3 + $0xfc] sm:$0xf0]  ;;  %2785 = vst [vmem:[#allocation3 + $0x84] sm:$0xf] %v2777_v34  ;;  %v2615_v6 = vrot.slane %v2614_v47, 4  ;;  %v2837_v12 = vrot.slane %v2835_v59, 4  ;;  %4053 = vmatpush.bf16.msra.mxu1 %v5347_v17 }
 0x189   : > { %v4790_v46 = vor.u32 %v5270_v22, %v4787_v15  ;;  %v5249_v38 = vld [vmem:[#allocation3 + $0x30] sm:$0xf0]  ;;  %v2795_v49 = vld [vmem:[#allocation4 + $0x24] sm:$0x1]  ;;  %v2606_v3 = vsel %vm5510_vm2, %v2601_v36, %v2605_v7  ;;  %v2796_v1 = vld [vmem:[#allocation4 + $0x28] sm:$0xf] }
 0x18a   : > { %v4694_v24 = vor.u32 %v5249_v38, %v4693_v32  ;;  %v5250_v2 = vld [vmem:[#allocation3 + $0x38] sm:$0xf0]  ;;  %v2620_v58 = vsel %vm5510_vm2, %v2615_v6, %v2619_v25  ;;  %2687 = vst [vmem:[#allocation3 + $0x58] sm:$0xf] %v2606_v3  ;;  %v2797_v30 = vld [vmem:[#allocation4 + $0x2c] sm:$0x1] }
 0x18b   : > { %v2840_v60 = vrot.slane %v2838_v27, 5  ;;  %2688 = vst [vmem:[#allocation3 + $0x7c] sm:$0xf] %v2620_v58  ;;  %v2844_v14 = vshll.u32 %v2795_v49, 16  ;;  %v2849_v61 = vshrl.u32 %v2796_v1, 16  ;;  %v2852_v39 = vshll.u32 %v2796_v1, 16 }
 0x18c   : > { %3870 = vmatmul.bf16.gmra.mxu2 %v4790_v46  ;;  %3942 = vmatmul.bf16.vlgmr.msrb.gmra.mxu1 %v4694_v24  ;;  %v4701_v63 = vld [vmem:[#allocation3 + $0x18] sm:$0xf]  ;;  %v4703_v8 = vld [vmem:[#allocation3 + $0x3c] sm:$0xf0]  ;;  %v5246_v57 = vld [vmem:[#allocation3 + $0x1c] sm:$0xf] }
 0x18d   : > { %v2841_v37 = vor.u32 %v2840_v60, %v2837_v12  ;;  %v4702_v19 = vor.u32 %v5250_v2, %v4701_v63  ;;  %v2851_v16 = vrot.slane %v2849_v61, 4  ;;  %v2858_v44 = vshll.u32 %v2797_v30, 16  ;;  %v2697_v5 = vld [vmem:[#allocation4 + $0x18] sm:$0xe]  ;;  %v5346_v21 = vld [vmem:[%s6573_s3 + $0x218] sm:$0xff]  ;;  %v5345_v47 = vld [vmem:[%s6573_s3 + $0x210] sm:$0xff] }
 0x18e   : > { %v2846_v11 = vrot.slane %v2844_v14, 5  ;;  %v2854_v18 = vrot.slane %v2852_v39, 5  ;;  %v4661_v28 = vrot.slane %v2697_v5, 9  ;;  %v4706_v48 = vor.u32 %v5246_v57, %v4703_v8  ;;  %v2698_v10 = vld [vmem:[#allocation4 + $0x1c] sm:$0x1]  ;;  %4054 = vmatpush.bf16.msra.mxu1 %v5346_v21 }
 0x18f   : > { %v2842_v53 = vrot.slane %v2841_v37, 4  ;;  %v2699_v35 = vld [vmem:[#allocation4 + $0x20] sm:$0xe]  ;;  %v2700_v29 = vld [vmem:[#allocation4 + $0x24] sm:$0x1]  ;;  %v2735_v51 = vrot.slane %v2698_v10, 5 }
 0x190   : > { %4000 = vmatmul.bf16.vlgmr.msra.gmra.mxu3 %v4702_v19  ;;  %v2855_v23 = vor.u32 %v2854_v18, %v2851_v16  ;;  %v4662_v55 = vrot.slane %v2699_v35, 9  ;;  %v2557_v56 = vld [vmem:[#allocation4 + $0x28] sm:$0xf]  ;;  %v2558_v42 = vld [vmem:[#allocation4 + $0x2c] sm:$0x1]  ;;  %v2739_v4 = vrot.slane %v2700_v29, 5 }
 0x191   : > { %v2847_v43 = vsel %vm5510_vm2, %v2842_v53, %v2846_v11  ;;  %v2622_v20 = vshrl.u32 %v2557_v56, 16  ;;  %v2860_v50 = vrot.slane %v2858_v44, 5  ;;  %v2736_v52 = vsel %vm5608_vm5, %v4661_v28, %v2735_v51  ;;  %v2559_v31 = vld [vmem:[#allocation4 + $0x30] sm:$0xf]  ;;  %v2560_v0 = vld [vmem:[#allocation4 + $0x34] sm:$0x1] }
 0x192   : > { %2928 = vst [vmem:[#allocation3 + $0x64] sm:$0xf] %v2847_v43  ;;  %v2856_v9 = vrot.slane %v2855_v23, 4  ;;  %v2625_v26 = vshll.u32 %v2557_v56, 16  ;;  %v2740_v33 = vsel %vm5608_vm5, %v4662_v55, %v2739_v4  ;;  %v2631_v13 = vshll.u32 %v2558_v42, 16  ;;  %4055 = vmatpush.bf16.msra.mxu1 %v5345_v47  ;;  %v5344_v4 = vld [vmem:[%s6573_s3 + $0x208] sm:$0xff] }
 0x193   : > { %4029 = vmatmul.bf16.vlgmr.msra.gmra.mxu0 %v4706_v48  ;;  %2767 = vst [vmem:[#allocation3 + $0x5c] sm:$0xf] %v2736_v52  ;;  %v2624_v40 = vrot.slane %v2622_v20, 4  ;;  %v4695_v45 = vld [vmem:[#allocation3 + $0x34] sm:$0xf0]  ;;  %v2636_v22 = vshrl.u32 %v2559_v31, 16 }
 0x194   : > { %v5258_v7 = vld [vmem:[#allocation3 + $0x78] sm:$0xf0]  ;;  %v2861_v25 = vsel %vm5510_vm2, %v2856_v9, %v2860_v50  ;;  %2768 = vst [vmem:[#allocation3 + $0x80] sm:$0xf] %v2740_v33  ;;  %v2627_v34 = vrot.slane %v2625_v26, 5  ;;  %v2639_v32 = vshll.u32 %v2559_v31, 16 }
 0x195   : > { %2929 = vst [vmem:[#allocation3 + $0x88] sm:$0xf] %v2861_v25  ;;  %v2645_v41 = vshll.u32 %v2560_v0, 16  ;;  %v2778_v15 = vld [vmem:[#allocation4 + $0x30] sm:$0xf]  ;;  %v2638_v46 = vrot.slane %v2636_v22, 4 }
 0x196   : > { %v5245_v36 = vld [vmem:[#allocation3 + $0x14] sm:$0xf]  ;;  %v2628_v59 = vor.u32 %v2627_v34, %v2624_v40  ;;  %v2641_v38 = vrot.slane %v2639_v32, 5  ;;  %v2779_v6 = vld [vmem:[#allocation4 + $0x38] sm:$0xf]  ;;  %v2633_v2 = vrot.slane %v2631_v13, 5  ;;  %4056 = vmatpush.bf16.msra.mxu1 %v5344_v4 }
 0x197   : > { %2786 = vst [vmem:[#allocation3 + $0xa8] sm:$0xf] %v2778_v15  ;;  %v4729_v49 = vld [vmem:[#allocation3 + $0x58] sm:$0xf]  ;;  %v2798_v27 = vld [vmem:[#allocation4 + $0x30] sm:$0xf]  ;;  %v4698_v12 = vor.u32 %v5245_v36, %v4695_v45 }
 0x198   : > { %2787 = vst [vmem:[#allocation3 + $0xcc] sm:$0xf] %v2779_v6  ;;  %v2629_v24 = vrot.slane %v2628_v59, 4  ;;  %v2642_v3 = vor.u32 %v2641_v38, %v2638_v46  ;;  %v2799_v1 = vld [vmem:[#allocation4 + $0x34] sm:$0x1]  ;;  %v2863_v58 = vshrl.u32 %v2798_v27, 16  ;;  %v4730_v60 = vor.u32 %v5258_v7, %v4729_v49 }
 0x199   : > { %v6355_v30 = vld [vmem:[#allocation4 + $0x10] sm:$0xe]  ;;  %v5259_v14 = vld [vmem:[#allocation3 + $0x80] sm:$0xf0]  ;;  %v2647_v61 = vrot.slane %v2645_v41, 5  ;;  %v2866_v8 = vshll.u32 %v2798_v27, 16 }
 0x19a   : > { %v2800_v63 = vld [vmem:[#allocation4 + $0x38] sm:$0xf]  ;;  %v2634_v37 = vsel %vm5510_vm2, %v2629_v24, %v2633_v2  ;;  %v2643_v39 = vrot.slane %v2642_v3, 4  ;;  %v2801_v17 = vld [vmem:[#allocation4 + $0x3c] sm:$0x1]  ;;  %v2865_v19 = vrot.slane %v2863_v58, 4 }
 0x19b   : > { %v2877_v57 = vshrl.u32 %v2800_v63, 16  ;;  %v4737_v16 = vld [vmem:[#allocation3 + $0x60] sm:$0xf]  ;;  %2689 = vst [vmem:[#allocation3 + $0xa0] sm:$0xf] %v2634_v37  ;;  %v2868_v44 = vrot.slane %v2866_v8, 5 }
 0x19c   : > { %3971 = vmatmul.bf16.vlgmr.msra.gmra.mxu2 %v4698_v12  ;;  %3947 = vmatmul.bf16.gmra.mxu1 %v4730_v60  ;;  %v2872_v5 = vshll.u32 %v2799_v1, 16  ;;  %v6359_v53 = vld [vmem:[#allocation4 + $0x14] sm:$0x1]  ;;  %v4739_v11 = vld [vmem:[#allocation3 + $0x84] sm:$0xf0]  ;;  %v2648_v18 = vsel %vm5510_vm2, %v2643_v39, %v2647_v61  ;;  %v2880_v21 = vshll.u32 %v2800_v63, 16  ;;  %v4738_v10 = vor.u32 %v5259_v14, %v4737_v16 }
 0x19d   : > { %v2879_v28 = vrot.slane %v2877_v57, 4  ;;  %v2701_v48 = vld [vmem:[#allocation4 + $0x28] sm:$0xe]  ;;  %v5255_v35 = vld [vmem:[#allocation3 + $0x64] sm:$0xf]  ;;  %v2869_v29 = vor.u32 %v2868_v44, %v2865_v19  ;;  %v2886_v43 = vshll.u32 %v2801_v17, 16 }
 0x19e   : > { %2690 = vst [vmem:[#allocation3 + $0xc4] sm:$0xf] %v2648_v18  ;;  %v4667_v23 = vrot.slane %v6355_v30, 9  ;;  %v6364_v51 = vld [vmem:[#allocation4 + $0x18] sm:$0xe]  ;;  %v2882_v55 = vrot.slane %v2880_v21, 5  ;;  %v4742_v20 = vor.u32 %v5255_v35, %v4739_v11 }
 0x19f   : > { %v2702_v56 = vld [vmem:[#allocation4 + $0x2c] sm:$0x1]  ;;  %v4663_v42 = vrot.slane %v2701_v48, 9  ;;  %v2870_v9 = vrot.slane %v2869_v29, 4  ;;  %v2874_v50 = vrot.slane %v2872_v5, 5  ;;  %v2968_v45 = vrot.slane %v6359_v53, 5 }
 0x1a0   : > { %4005 = vmatmul.bf16.gmra.mxu3 %v4738_v10  ;;  %v2703_v52 = vld [vmem:[#allocation4 + $0x30] sm:$0xe]  ;;  %v2704_v31 = vld [vmem:[#allocation4 + $0x34] sm:$0x1]  ;;  %v2883_v26 = vor.u32 %v2882_v55, %v2879_v28  ;;  %v2743_v33 = vrot.slane %v2702_v56, 5  ;;  %v2888_v34 = vrot.slane %v2886_v43, 5 }
 0x1a1   : > { %v4664_v0 = vrot.slane %v2703_v52, 9  ;;  %v2747_v40 = vrot.slane %v2704_v31, 5  ;;  %v2561_v13 = vld [vmem:[#allocation4 + $0x38] sm:$0xf]  ;;  %v6370_v7 = vld [vmem:[#allocation4 + $0x1c] sm:$0x1]  ;;  %v2875_v25 = vsel %vm5510_vm2, %v2870_v9, %v2874_v50 }
 0x1a2   : > { %v2562_v22 = vld [vmem:[#allocation4 + $0x3c] sm:$0x1]  ;;  %v2563_v32 = vld [vmem:[#allocation4 + $0x40] sm:$0xf]  ;;  %v2884_v47 = vrot.slane %v2883_v26, 4  ;;  %v2744_v41 = vsel %vm5608_vm5, %v4663_v42, %v2743_v33  ;;  %v2650_v59 = vshrl.u32 %v2561_v13, 16  ;;  %v2969_v33 = vsel %vm5608_vm5, %v4667_v23, %v2968_v45 }
 0x1a3   : > { %4034 = vmatmul.bf16.gmra.mxu0 %v4742_v20  ;;  %2930 = vst [vmem:[#allocation3 + $0xac] sm:$0xf] %v2875_v25  ;;  %v2748_v15 = vsel %vm5608_vm5, %v4664_v0, %v2747_v40  ;;  %v2564_v36 = vld [vmem:[#allocation4 + $0x44] sm:$0x1]  ;;  %v4668_v46 = vrot.slane %v6364_v51, 9  ;;  %v2653_v38 = vshll.u32 %v2561_v13, 16 }
 0x1a4   : > { %2769 = vst [vmem:[#allocation3 + $0xa4] sm:$0xf] %v2744_v41  ;;  %v2664_v6 = vshrl.u32 %v2563_v32, 16  ;;  %v2667_v49 = vshll.u32 %v2563_v32, 16  ;;  %v4731_v27 = vld [vmem:[#allocation3 + $0x7c] sm:$0xf0]  ;;  %v2889_v24 = vsel %vm5510_vm2, %v2884_v47, %v2888_v34 }
 0x1a5   : > { %2770 = vst [vmem:[#allocation3 + $0xc8] sm:$0xf] %v2748_v15  ;;  %v2652_v2 = vrot.slane %v2650_v59, 4  ;;  %v2659_v3 = vshll.u32 %v2562_v22, 16  ;;  %v5254_v1 = vld [vmem:[#allocation3 + $0x5c] sm:$0xf] }
 0x1a6   : > { %2931 = vst [vmem:[#allocation3 + $0xd0] sm:$0xf] %v2889_v24  ;;  %v2655_v58 = vrot.slane %v2653_v38, 5  ;;  %v2666_v12 = vrot.slane %v2664_v6, 4  ;;  %v2673_v60 = vshll.u32 %v2564_v36, 16  ;;  %v5343_v14 = vld [vmem:[%s6573_s3 + $0x200] sm:$0xff]  ;;  %v4734_v57 = vor.u32 %v5254_v1, %v4731_v27 }
 0x1a7   : > { %v2972_v61 = vrot.slane %v6370_v7, 5  ;;  %v5267_v63 = vld [vmem:[#allocation3 + $0xc0] sm:$0xf0]  ;;  %v2669_v8 = vrot.slane %v2667_v49, 5  ;;  %v2780_v37 = vld [vmem:[#allocation4 + $0x40] sm:$0xf]  ;;  %4057 = vmatpush.bf16.msra.mxu1 %v5343_v14 }
 0x1a8   : > { %v2656_v39 = vor.u32 %v2655_v58, %v2652_v2  ;;  %2788 = vst [vmem:[#allocation3 + $0xf0] sm:$0xf] %v2780_v37  ;;  %v2802_v17 = vld [vmem:[#allocation4 + $0x40] sm:$0xf]  ;;  %v2803_v19 = vld [vmem:[#allocation4 + $0x44] sm:$0x1] }
 0x1a9   : > { %v4765_v16 = vld [vmem:[#allocation3 + $0xa0] sm:$0xf]  ;;  %v2670_v44 = vor.u32 %v2669_v8, %v2666_v12  ;;  %v2891_v5 = vshrl.u32 %v2802_v17, 16  ;;  %v2894_v11 = vshll.u32 %v2802_v17, 16  ;;  %v5268_v28 = vld [vmem:[#allocation3 + $0xc8] sm:$0xf0]  ;;  %v2973_v15 = vsel %vm5608_vm5, %v4668_v46, %v2972_v61 }
 0x1aa   : > { %v4766_v18 = vor.u32 %v5267_v63, %v4765_v16  ;;  %v2657_v21 = vrot.slane %v2656_v39, 4  ;;  %v2661_v48 = vrot.slane %v2659_v3, 5  ;;  %v2675_v10 = vrot.slane %v2673_v60, 5  ;;  %v2705_v56 = vld [vmem:[#allocation4 + $0x38] sm:$0xe] }
 0x1ab   : > { %v2671_v35 = vrot.slane %v2670_v44, 4  ;;  %v2893_v29 = vrot.slane %v2891_v5, 4  ;;  %v2896_v43 = vrot.slane %v2894_v11, 5  ;;  %v2900_v55 = vshll.u32 %v2803_v19, 16  ;;  %v4773_v42 = vld [vmem:[#allocation3 + $0xa8] sm:$0xf] }
 0x1ac   : > { %3976 = vmatmul.bf16.gmra.mxu2 %v4734_v57  ;;  %3952 = vmatmul.bf16.gmra.mxu1 %v4766_v18  ;;  %v2662_v4 = vsel %vm5510_vm2, %v2657_v21, %v2661_v48  ;;  %v2706_v20 = vld [vmem:[#allocation4 + $0x3c] sm:$0x1]  ;;  %v2707_v9 = vld [vmem:[#allocation4 + $0x40] sm:$0xe]  ;;  %v2708_v26 = vld [vmem:[#allocation4 + $0x44] sm:$0x1]  ;;  %v4774_v0 = vor.u32 %v5268_v28, %v4773_v42 }
 0x1ad   : > { %v4775_v50 = vld [vmem:[#allocation3 + $0xcc] sm:$0xf0]  ;;  %v2676_v52 = vsel %vm5510_vm2, %v2671_v35, %v2675_v10  ;;  %2691 = vst [vmem:[#allocation3 + $0xe8] sm:$0xf] %v2662_v4  ;;  %v2897_v31 = vor.u32 %v2896_v43, %v2893_v29  ;;  %v4665_v40 = vrot.slane %v2705_v56, 9  ;;  %v2751_v13 = vrot.slane %v2706_v20, 5 }
 0x1ae   : > { %2692 = vst [vmem:[#allocation3 + $0x10c] sm:$0xf] %v2676_v52  ;;  %v4666_v7 = vrot.slane %v2707_v9, 9  ;;  %v5264_v25 = vld [vmem:[#allocation3 + $0xac] sm:$0xf]  ;;  %v2902_v22 = vrot.slane %v2900_v55, 5 }
 0x1af   : > { %v2898_v34 = vrot.slane %v2897_v31, 4  ;;  %v2755_v32 = vrot.slane %v2708_v26, 5  ;;  %v4778_v47 = vor.u32 %v5264_v25, %v4775_v50  ;;  %v2752_v41 = vsel %vm5608_vm5, %v4665_v40, %v2751_v13  ;;  %3006 = vst [vmem:[#allocation3 + $0x20] sm:$0xf] %v2969_v33  ;;  %v2938_v53 = vld [vmem:[#allocation4 + $0x20] sm:$0xe] }
 0x1b0   : > { %4010 = vmatmul.bf16.gmra.mxu3 %v4774_v0  ;;  %v2939_v30 = vld [vmem:[#allocation4 + $0x24] sm:$0x1]  ;;  %2771 = vst [vmem:[#allocation3 + $0xec] sm:$0xf] %v2752_v41  ;;  %v2940_v36 = vld [vmem:[#allocation4 + $0x28] sm:$0xe] }
 0x1b1   : > { %v2903_v23 = vsel %vm5510_vm2, %v2898_v34, %v2902_v22  ;;  %v2756_v45 = vsel %vm5608_vm5, %v4666_v7, %v2755_v32  ;;  %v2941_v59 = vld [vmem:[#allocation4 + $0x2c] sm:$0x1]  ;;  %v4669_v38 = vrot.slane %v2938_v53, 9  ;;  %v2976_v6 = vrot.slane %v2939_v30, 5  ;;  %v2942_v62 = vld [vmem:[#allocation4 + $0x30] sm:$0xe] }
 0x1b2   : > { %2932 = vst [vmem:[#allocation3 + $0xf4] sm:$0xf] %v2903_v23  ;;  %v4670_v49 = vrot.slane %v2940_v36, 9  ;;  %v2980_v27 = vrot.slane %v2941_v59, 5  ;;  %v2943_v24 = vld [vmem:[#allocation4 + $0x34] sm:$0x1] }
 0x1b3   : > { %4039 = vmatmul.bf16.gmra.mxu0 %v4778_v47  ;;  %2772 = vst [vmem:[#allocation3 + $0x110] sm:$0xf] %v2756_v45  ;;  %v2977_v2 = vsel %vm5608_vm5, %v4669_v38, %v2976_v6  ;;  %v2944_v3 = vld [vmem:[#allocation4 + $0x38] sm:$0xe]  ;;  %v2945_v46 = vld [vmem:[#allocation4 + $0x3c] sm:$0x1] }
 0x1b4   : > { %3007 = vst [vmem:[#allocation3 + $0x44] sm:$0xf] %v2973_v15  ;;  %v2981_v51 = vsel %vm5608_vm5, %v4670_v49, %v2980_v27  ;;  %v4671_v1 = vrot.slane %v2942_v62, 9  ;;  %v2984_v58 = vrot.slane %v2943_v24, 5  ;;  %v4672_v12 = vrot.slane %v2944_v3, 9 }
 0x1b5   : > { %3008 = vst [vmem:[#allocation3 + $0x68] sm:$0xf] %v2977_v2  ;;  %v4767_v60 = vld [vmem:[#allocation3 + $0xc4] sm:$0xf0]  ;;  %v5276_v14 = vld [vmem:[#allocation3 + $0x108] sm:$0xf0] }
 0x1b6   : > { %3009 = vst [vmem:[#allocation3 + $0x8c] sm:$0xf] %v2981_v51  ;;  %v2988_v61 = vrot.slane %v2945_v46, 5  ;;  %v2985_v63 = vsel %vm5608_vm5, %v4671_v1, %v2984_v58  ;;  %v5263_v8 = vld [vmem:[#allocation3 + $0xa4] sm:$0xf] }
 0x1b7   : > { %v4801_v37 = vld [vmem:[#allocation3 + $0xe8] sm:$0xf]  ;;  %3010 = vst [vmem:[#allocation3 + $0xb0] sm:$0xf] %v2985_v63  ;;  %v4770_v17 = vor.u32 %v5263_v8, %v4767_v60  ;;  %v4809_v57 = vld [vmem:[#allocation3 + $0xf0] sm:$0xf] }
 0x1b8   : > { %v2989_v39 = vsel %vm5608_vm5, %v4672_v12, %v2988_v61  ;;  %v4802_v19 = vor.u32 %v5276_v14, %v4801_v37  ;;  %v5277_v16 = vld [vmem:[#allocation3 + $0x110] sm:$0xf0]  ;;  %v2946_v44 = vld [vmem:[#allocation4 + $0x40] sm:$0xe]  ;;  %v2947_v5 = vld [vmem:[#allocation4 + $0x44] sm:$0x1] }
 0x1b9   : > { %3011 = vst [vmem:[#allocation3 + $0xd4] sm:$0xf] %v2989_v39  ;;  %v5273_v11 = vld [vmem:[#allocation3 + $0xf4] sm:$0xf]  ;;  %v4811_v18 = vld [vmem:[#allocation3 + $0x114] sm:$0xf0]  ;;  %v4810_v48 = vor.u32 %v5277_v16, %v4809_v57 }
 0x1ba   : > { %v4673_v28 = vrot.slane %v2946_v44, 9  ;;  %v2992_v21 = vrot.slane %v2947_v5, 5  ;;  %v4814_v35 = vor.u32 %v5273_v11, %v4811_v18  ;;  %v4803_v43 = vld [vmem:[#allocation3 + $0x10c] sm:$0xf0]  ;;  %v5272_v56 = vld [vmem:[#allocation3 + $0xec] sm:$0xf] }
 0x1bb   : > { %v5251_v55 = vld [vmem:[#allocation3 + $0x40] sm:$0xf0]  ;;  %v4709_v42 = vld [vmem:[#allocation3 + $0x20] sm:$0xf]  ;;  %v4806_v20 = vor.u32 %v5272_v56, %v4803_v43  ;;  %v5278_v45 = vld [vmem:[#allocation3 + $0x118] sm:$0xf0] }
 0x1bc   : > { %3981 = vmatmul.bf16.gmra.mxu2 %v4770_v17  ;;  %3957 = vmatmul.bf16.gmra.mxu1 %v4802_v19  ;;  %v2993_v10 = vsel %vm5608_vm5, %v4673_v28, %v2992_v21  ;;  %v4710_v9 = vor.u32 %v5251_v55, %v4709_v42  ;;  %v4745_v54 = vld [vmem:[#allocation3 + $0x68] sm:$0xf]  ;;  %v6474_v17 = vld [vmem:[%s6574_s4] ss:$0 sm:$0xff]  ;;  %v5389_v5 = vmov 0.0  }
 0x1bd   : > { %3012 = vst [vmem:[#allocation3 + $0xf8] sm:$0xf] %v2993_v10  ;;  %v5260_v52 = vld [vmem:[#allocation3 + $0x88] sm:$0xf0] }
 0x1be   : > { %v3827_v29 = vpop.f32.mrf.mxu1  ;;  %v4746_v31 = vor.u32 %v5260_v52, %v4745_v54  ;;  %v4781_v34 = vld [vmem:[#allocation3 + $0xb0] sm:$0xf]  ;;  %4095 = vst [vmem:[%s6486_s22] sm:$0xff] %v5389_v5 }
 0x1bf   : > { %v3828_v44 = vadd.f32 %v6474_v17, %v3827_v29  ;;  %4096 = vst [vmem:[%s6486_s22 + $0x8] sm:$0x3] %v5389_v5 }
 0x1c0   : > { %4015 = vmatmul.bf16.gmra.mxu3 %v4810_v48  ;;  %v5269_v13 = vld [vmem:[#allocation3 + $0xd0] sm:$0xf0]  ;;  %5107 = vst [vmem:[%s6486_s22 + $0x90] sm:$0xff] %v5389_v5 }
 0x1c1   : > { %v4782_v22 = vor.u32 %v5269_v13, %v4781_v34  ;;  %5108 = vst [vmem:[%s6486_s22 + $0x98] sm:$0x3] %v5389_v5 }
 0x1c2   : > { %5109 = vst [vmem:[%s6486_s22 + $0x10] sm:$0x1] %v5389_v5 }
 0x1c3   : > { %4044 = vmatmul.bf16.gmra.mxu0 %v4814_v35  ;;  %5110 = vst [vmem:[%s6486_s22 + $0x20] sm:$0x1] %v5389_v5 }
 0x1c4   : > { %v4817_v23 = vld [vmem:[#allocation3 + $0xf8] sm:$0xf]  ;;  %5111 = vst [vmem:[%s6486_s22 + $0x30] sm:$0x1] %v5389_v5 }
 0x1c5   : > { %v4818_v36 = vor.u32 %v5278_v45, %v4817_v23  ;;  %5112 = vst [vmem:[%s6486_s22 + $0x40] sm:$0x1] %v5389_v5 }
 0x1c6   : > { %v6415_v4 = vpop.f32.mrf.mxu1  ;;  %5113 = vst [vmem:[%s6486_s22 + $0x50] sm:$0x1] %v5389_v5 }
 0x1c7   : > { %v3830_v35 = vadd.f32 %v6474_v17, %v6415_v4  ;;  %5114 = vst [vmem:[%s6486_s22 + $0x60] sm:$0x1] %v5389_v5 }
 0x1c8   : > { %v3914_v7 = vpop.f32.mrf.mxu0  ;;  %5115 = vst [vmem:[%s6486_s22 + $0x70] sm:$0x1] %v5389_v5 }
 0x1c9   : > { %5116 = vst [vmem:[%s6486_s22 + $0x80] sm:$0x1] %v5389_v5 }
 0x1ca   : > { %5117 = vst [vmem:[%s6486_s22 + $0x19] sm:$0x1] %v5389_v5 }
 0x1cb   : > { %5118 = vst [vmem:[%s6486_s22 + $0x29] sm:$0x1] %v5389_v5 }
 0x1cc   : > { %3986 = vmatmul.bf16.gmra.mxu2 %v4806_v20  ;;  %4058 = vmatmul.bf16.vlgmr.msra.gmra.mxu1 %v4710_v9  ;;  %5119 = vst [vmem:[%s6486_s22 + $0x39] sm:$0x1] %v5389_v5 }
 0x1cd   : > { %v3885_v0 = vpop.f32.mrf.mxu3  ;;  %5120 = vst [vmem:[%s6486_s22 + $0x49] sm:$0x1] %v5389_v5 }
 0x1ce   : > { %5121 = vst [vmem:[%s6486_s22 + $0x59] sm:$0x1] %v5389_v5 }
 0x1cf   : > { %5122 = vst [vmem:[%s6486_s22 + $0x69] sm:$0x1] %v5389_v5 }
 0x1d0   : > { %v6425_v41 = vpop.f32.mrf.mxu0  ;;  %5123 = vst [vmem:[%s6486_s22 + $0x79] sm:$0x1] %v5389_v5 }
 0x1d1   : > { %v6417_v50 = vpop.f32.mrf.mxu1  ;;  %5124 = vst [vmem:[%s6486_s22 + $0x89] sm:$0x1] %v5389_v5 }
 0x1d2   : > { %v3833_v4 = vadd.f32 %v6474_v17, %v6417_v50 }
 0x1d5   : > { %v3856_v33 = vpop.f32.mrf.mxu2  ;;  %v3887_v47 = vpop.f32.mrf.mxu3 }
 0x1d6   : > { %v3857_v11 = vadd.f32 %v3856_v33, %v3828_v44 }
 0x1d8   : > { %v3886_v28 = vadd.f32 %v3885_v0, %v3857_v11 }
 0x1d9   : > { %v6419_v26 = vpop.f32.mrf.mxu1 }
 0x1da   : > { %v3915_v43 = vadd.f32 %v3914_v7, %v3886_v28  ;;  %v3835_v23 = vadd.f32 %v6474_v17, %v6419_v26  ;;  %v4644_v28 = vld [vmem:[%s5454_s10 + $0x21] sm:$0xff] }
 0x1dc   : > { %4063 = vmatmul.bf16.gmra.mxu1 %v4746_v31 }
 0x1dd   : > { %v3858_v25 = vpop.f32.mrf.mxu2 }
 0x1de   : > { %v3859_v29 = vadd.f32 %v3858_v25, %v3830_v35 }
 0x1df   : > { %v6431_v15 = vpop.f32.mrf.mxu3  ;;  %v6433_v59 = vpop.f32.mrf.mxu0 }
 0x1e0   : > { %v3888_v42 = vadd.f32 %v3887_v47, %v3859_v29 }
 0x1e2   : > { %v3917_v33 = vadd.f32 %v6425_v41, %v3888_v42 }
 0x1e5   : > { %v6421_v40 = vpop.f32.mrf.mxu1 }
 0x1e7   : > { %v6439_v49 = vpop.f32.mrf.mxu3  ;;  %v6441_v27 = vpop.f32.mrf.mxu0 }
 0x1ec   : > { %4068 = vmatmul.bf16.gmra.mxu1 %v4782_v22  ;;  %v4643_v22 = vld [vmem:[%s5454_s10 + $0x11] sm:$0xff] }
 0x1ed   : > { %v6423_v32 = vpop.f32.mrf.mxu1 }
 0x1ef   : > { %v6427_v53 = vpop.f32.mrf.mxu2 }
 0x1f0   : > { %v6447_v51 = vpop.f32.mrf.mxu0  ;;  %v3862_v31 = vadd.f32 %v6427_v53, %v3833_v4 }
 0x1f2   : > { %v3891_v7 = vadd.f32 %v6431_v15, %v3862_v31 }
 0x1f3   : > { %v6445_v2 = vpop.f32.mrf.mxu3 }
 0x1f4   : > { %v3920_v45 = vadd.f32 %v6433_v59, %v3891_v7 }
 0x1f5   : > { %v6429_v30 = vpop.f32.mrf.mxu1 }
 0x1f7   : > { %v6435_v38 = vpop.f32.mrf.mxu2 }
 0x1f8   : > { %v6455_v12 = vpop.f32.mrf.mxu0  ;;  %v3864_v41 = vadd.f32 %v6435_v38, %v3835_v23  ;;  %v3838_v38 = vadd.f32 %v6474_v17, %v6421_v40  ;;  %v4645_v40 = vld [vmem:[%s5454_s10 + $0x31] sm:$0xff] }
 0x1fa   : > { %v3893_v5 = vadd.f32 %v6439_v49, %v3864_v41 }
 0x1fb   : > { %v6451_v1 = vpop.f32.mrf.mxu3 }
 0x1fc   : > { %4073 = vmatmul.bf16.gmra.mxu1 %v4818_v36  ;;  %v3922_v35 = vadd.f32 %v6441_v27, %v3893_v5 }
 0x1fd   : > { %v6437_v6 = vpop.f32.mrf.mxu1 }
 0x1ff   : > { %v6443_v62 = vpop.f32.mrf.mxu2 }
 0x200   : > { %v6463_v63 = vpop.f32.mrf.mxu0 }
 0x203   : > { %v6459_v14 = vpop.f32.mrf.mxu3 }
 0x207   : > { %v6449_v3 = vpop.f32.mrf.mxu2 }
 0x208   : > { %v6476_v19 = vpop.f32.mrf.mxu0 }
 0x209   : > { %v3943_v24 = vpop.f32.mrf.mxu1 }
 0x20a   : > { %v3944_v55 = vadd.f32 %v3943_v24, %v3915_v43 }
 0x20b   : > { %v6469_v39 = vpop.f32.mrf.mxu3 }
 0x20f   : > { %v6457_v60 = vpop.f32.mrf.mxu2 }
 0x210   : > { %v4030_v21 = vpop.f32.mrf.mxu0 }
 0x211   : > { %v3945_v46 = vpop.f32.mrf.mxu1 }
 0x212   : > { %v3946_v13 = vadd.f32 %v3945_v46, %v3917_v33 }
 0x213   : > { %v4001_v18 = vpop.f32.mrf.mxu3 }
 0x217   : > { %v6465_v8 = vpop.f32.mrf.mxu2 }
 0x218   : > { %v4032_v52 = vpop.f32.mrf.mxu0 }
 0x219   : > { %v6453_v58 = vpop.f32.mrf.mxu1 }
 0x21a   : > { %v3949_v15 = vadd.f32 %v6453_v58, %v3920_v45 }
 0x21b   : > { %v4003_v56 = vpop.f32.mrf.mxu3 }
 0x21f   : > { %v3972_v57 = vpop.f32.mrf.mxu2 }
 0x220   : > { %v3973_v20 = vadd.f32 %v3972_v57, %v3944_v55  ;;  %v4035_v24 = vpop.f32.mrf.mxu0 }
 0x221   : > { %v6461_v61 = vpop.f32.mrf.mxu1 }
 0x222   : > { %v4002_v0 = vadd.f32 %v4001_v18, %v3973_v20  ;;  %v3951_v49 = vadd.f32 %v6461_v61, %v3922_v35 }
 0x223   : > { %v4006_v50 = vpop.f32.mrf.mxu3 }
 0x224   : > { %v4031_v34 = vadd.f32 %v4030_v21, %v4002_v0 }
 0x227   : > { %v3974_v48 = vpop.f32.mrf.mxu2 }
 0x228   : > { %v3975_v25 = vadd.f32 %v3974_v48, %v3946_v13  ;;  %v3867_v48 = vadd.f32 %v6443_v62, %v3838_v38  ;;  %v4037_v43 = vpop.f32.mrf.mxu0  ;;  %v3840_v62 = vadd.f32 %v6474_v17, %v6423_v32  ;;  %v4646_v32 = vld [vmem:[%s5454_s10 + $0x41] sm:$0xff] }
 0x229   : > { %v6467_v37 = vpop.f32.mrf.mxu1 }
 0x22a   : > { %v4004_v36 = vadd.f32 %v4003_v56, %v3975_v25  ;;  %v3896_v42 = vadd.f32 %v6445_v2, %v3867_v48 }
 0x22b   : > { %v4008_v21 = vpop.f32.mrf.mxu3 }
 0x22c   : > { %v4033_v18 = vadd.f32 %v4032_v52, %v4004_v36  ;;  %v3925_v61 = vadd.f32 %v6447_v51, %v3896_v42  ;;  %v3843_v51 = vadd.f32 %v6474_v17, %v6429_v30  ;;  %v3845_v30 = vadd.f32 %v6474_v17, %v6437_v6  ;;  %v4648_v17 = vld [vmem:[%s5454_s10 + $0x61] sm:$0xff] }
 0x22e   : > { %v3954_v2 = vadd.f32 %v6467_v37, %v3925_v61  ;;  %v3872_v23 = vadd.f32 %v6457_v60, %v3843_v51 }
 0x22f   : > { %v3977_v54 = vpop.f32.mrf.mxu2 }
 0x230   : > { %v3978_v11 = vadd.f32 %v3977_v54, %v3949_v15  ;;  %v3869_v54 = vadd.f32 %v6449_v3, %v3840_v62  ;;  %v4040_v25 = vpop.f32.mrf.mxu0  ;;  %v4647_v15 = vld [vmem:[%s5454_s10 + $0x51] sm:$0xff] }
 0x231   : > { %v6478_v16 = vpop.f32.mrf.mxu1 }
 0x232   : > { %v4007_v58 = vadd.f32 %v4006_v50, %v3978_v11  ;;  %v3898_v7 = vadd.f32 %v6451_v1, %v3869_v54  ;;  %v3874_v11 = vadd.f32 %v6465_v8, %v3845_v30  ;;  %v4650_v54 = vld [vmem:[%s5454_s10 + $0x81] sm:$0xff] }
 0x233   : > { %v4011_v0 = vpop.f32.mrf.mxu3 }
 0x234   : > { %v4036_v4 = vadd.f32 %v4035_v24, %v4007_v58  ;;  %v3927_v37 = vadd.f32 %v6455_v12, %v3898_v7  ;;  %v3901_v24 = vadd.f32 %v6459_v14, %v3872_v23  ;;  %v3903_v38 = vadd.f32 %v6469_v39, %v3874_v11 }
 0x236   : > { %v3956_v1 = vadd.f32 %v6478_v16, %v3927_v37  ;;  %v3930_v16 = vadd.f32 %v6463_v63, %v3901_v24  ;;  %v3932_v8 = vadd.f32 %v6476_v19, %v3903_v38 }
 0x237   : > { %v3979_v57 = vpop.f32.mrf.mxu2 }
 0x238   : > { %v3980_v20 = vadd.f32 %v3979_v57, %v3951_v49  ;;  %v4042_v12 = vpop.f32.mrf.mxu0 }
 0x239   : > { %v6494_v10 = vpop.f32.mrf.mxu1 }
 0x23a   : > { %v4009_v31 = vadd.f32 %v4008_v21, %v3980_v20  ;;  %v3959_v14 = vadd.f32 %v6494_v10, %v3930_v16 }
 0x23b   : > { %v4013_v36 = vpop.f32.mrf.mxu3 }
 0x23c   : > { %v4038_v50 = vadd.f32 %v4037_v43, %v4009_v31 }
 0x23f   : > { %v3982_v56 = vpop.f32.mrf.mxu2 }
 0x241   : > { %v6506_v9 = vpop.f32.mrf.mxu1 }
 0x242   : > { %v3961_v10 = vadd.f32 %v6506_v9, %v3932_v8 }
 0x243   : > { %v4016_v6 = vpop.f32.mrf.mxu3 }
 0x249   : > { %v4059_v47 = vpop.f32.mrf.mxu1 }
 0x24a   : > { %v4060_v53 = vadd.f32 %v4059_v47, %v4031_v34  ;;  %v3983_v34 = vadd.f32 %v3982_v56, %v3954_v2  ;;  %v4649_v56 = vld [vmem:[%s5454_s10 + $0x71] sm:$0xff] }
 0x24c   : > { %v4079_v46 = vadd.f32 %v4643_v22, %v4060_v53  ;;  %v3984_v22 = vpop.f32.mrf.mxu2  ;;  %v4012_v53 = vadd.f32 %v4011_v0, %v3983_v34 }
 0x24e   : > { %v4087_v44 = vmax.f32 %v4079_v46, 0.0  ;;  %v3985_v46 = vadd.f32 %v3984_v22, %v3956_v1  ;;  %v4041_v57 = vadd.f32 %v4040_v25, %v4012_v53 }
 0x250   : > { %5125 = vst [vmem:[%s6486_s22 + $0x11] sm:$0xff] %v4087_v44 }
 0x251   : > { %v4061_v26 = vpop.f32.mrf.mxu1 }
 0x252   : > { %v4062_v59 = vadd.f32 %v4061_v26, %v4033_v18  ;;  %v4014_v18 = vadd.f32 %v4013_v36, %v3985_v46 }
 0x254   : > { %v4080_v29 = vadd.f32 %v4644_v28, %v4062_v59  ;;  %v3987_v5 = vpop.f32.mrf.mxu2  ;;  %v4043_v21 = vadd.f32 %v4042_v12, %v4014_v18 }
 0x255   : > { %v3988_v59 = vadd.f32 %v3987_v5, %v3959_v14 }
 0x256   : > { %v4088_v55 = vmax.f32 %v4080_v29, 0.0  ;;  %v4045_v29 = vpop.f32.mrf.mxu0 }
 0x257   : > { %v4017_v58 = vadd.f32 %v4016_v6, %v3988_v59 }
 0x258   : > { %5126 = vst [vmem:[%s6486_s22 + $0x21] sm:$0xff] %v4088_v55 }
 0x259   : > { %v4064_v52 = vpop.f32.mrf.mxu1  ;;  %v4046_v55 = vadd.f32 %v4045_v29, %v4017_v58 }
 0x25a   : > { %v4065_v27 = vadd.f32 %v4064_v52, %v4036_v4  ;;  %v4018_v4 = vpop.f32.mrf.mxu3 }
 0x25c   : > { %v4081_v33 = vadd.f32 %v4645_v40, %v4065_v27  ;;  %v3989_v49 = vpop.f32.mrf.mxu2 }
 0x25d   : > { %v3990_v43 = vadd.f32 %v3989_v49, %v3961_v10 }
 0x25e   : > { %v4089_v13 = vmax.f32 %v4081_v33, 0.0  ;;  %v4047_v62 = vpop.f32.mrf.mxu0 }
 0x25f   : > { %v4019_v40 = vadd.f32 %v4018_v4, %v3990_v43 }
 0x260   : > { %5127 = vst [vmem:[%s6486_s22 + $0x31] sm:$0xff] %v4089_v13 }
 0x261   : > { %v4066_v47 = vpop.f32.mrf.mxu1  ;;  %v4048_v27 = vadd.f32 %v4047_v62, %v4019_v40 }
 0x262   : > { %v4067_v3 = vadd.f32 %v4066_v47, %v4038_v50 }
 0x264   : > { %v4082_v41 = vadd.f32 %v4646_v32, %v4067_v3 }
 0x266   : > { %v4090_v45 = vmax.f32 %v4082_v41, 0.0 }
 0x268   : > { %5128 = vst [vmem:[%s6486_s22 + $0x41] sm:$0xff] %v4090_v45 }
 0x269   : > { %v4069_v44 = vpop.f32.mrf.mxu1 }
 0x26a   : > { %v4070_v60 = vadd.f32 %v4069_v44, %v4041_v57 }
 0x26c   : > { %v4083_v28 = vadd.f32 %v4647_v15, %v4070_v60 }
 0x26e   : > { %v4091_v26 = vmax.f32 %v4083_v28, 0.0 }
 0x270   : > { %5129 = vst [vmem:[%s6486_s22 + $0x51] sm:$0xff] %v4091_v26 }
 0x271   : > { %v4071_v48 = vpop.f32.mrf.mxu1 }
 0x272   : > { %v4072_v35 = vadd.f32 %v4071_v48, %v4043_v21 }
 0x274   : > { %v4084_v63 = vadd.f32 %v4648_v17, %v4072_v35 }
 0x276   : > { %v4092_v39 = vmax.f32 %v4084_v63, 0.0 }
 0x278   : > { %5130 = vst [vmem:[%s6486_s22 + $0x61] sm:$0xff] %v4092_v39 }
 0x279   : > { %v4074_v42 = vpop.f32.mrf.mxu1 }
 0x27a   : > { %v4075_v20 = vadd.f32 %v4074_v42, %v4046_v55 }
 0x27c   : > { %v4085_v52 = vadd.f32 %v4649_v56, %v4075_v20 }
 0x27e   : > { %v4093_v19 = vmax.f32 %v4085_v52, 0.0 }
 0x280   : > { %5131 = vst [vmem:[%s6486_s22 + $0x71] sm:$0xff] %v4093_v19 }
 0x281   : > { %v4076_v61 = vpop.f32.mrf.mxu1 }
 0x282   : > { %v4077_v31 = vadd.f32 %v4076_v61, %v4048_v27 }
 0x284   : > { %v4086_v33 = vadd.f32 %v4650_v54, %v4077_v31 }
 0x286   : > { %v4094_v9 = vmax.f32 %v4086_v33, 0.0 }
 0x288   : > { %5132 = vst [vmem:[%s6486_s22 + $0x81] sm:$0xff] %v4094_v9 }
 0x289 PF: > { %s15_s18 = sadd.s32 1, %s5386_s18  }
 0x28a   : > { %p12_p4 = scmp.ge.s32.totalorder %s15_s18, 4  }
 0x28c   :  { %14 = sbr.rel (!%p12_p4) target bundleno = 1 (0x1), region = 78 }

// kernel: _lambda_.2
= control target key start
LH: loop header
LB: loop body
LE: loop exit
PB: predicated region body
PF: predicated region fallthrough
CT: control target
= control target key end

     0   :  { %s5681_s24 = smov 0   ;;  %s7125_s0 = inlined_call_operand.vmem [shape: f32[2,36,9,128], index: 0, kind: input, shape index: {}]   ;;  %s7126_s1 = inlined_call_operand.vmem [shape: bf16[1152,128], index: 1, kind: input, shape index: {}]   ;;  %s7127_s2 = inlined_call_operand.vmem [shape: f32[1,128], index: 2, kind: input, shape index: {}]   ;;  %s7128_s3 = inlined_call_operand.vmem [shape: bf16[1152,128], index: 3, kind: input, shape index: {}]   ;;  %s7129_s4 = inlined_call_operand.vmem [shape: f32[1,128], index: 4, kind: input, shape index: {}]   ;;  %s7130_s5 = inlined_call_operand.vmem [shape: bf16[128,128], index: 5, kind: input, shape index: {}]   ;;  %s7131_s6 = inlined_call_operand.vmem [shape: f32[1,128], index: 6, kind: input, shape index: {}]   ;;  %s7132_s7 = inlined_call_operand.vmem [shape: f32[2,10,10,128], index: 7, kind: output, shape index: {}]  }
   0x1 LB: > { %s4393_s25 = sadd.s32 4294967295, %s5637_s24   ;;  %p4397_p0 = scmp.ge.s32.totalorder %s5637_s24, 1  ;;  %s5637_s24 = sphi %s5681_s24, %s17_s24  }
   0x2   : > { %p237_p1 = scmp.lt.s32.totalorder %s5637_s24, 3 }
   0x4   : > { %p238_p2 = pnand %p4397_p0, %p237_p1 }
   0x5   : > { %p269_p3 = scmp.lt.s32.totalorder (!%p238_p2), %s4393_s25, 1 }
   0x6   : > { %241 = sbr.rel (%p238_p2) target bundleno = 657 (0x291), region = 48 }
   0xb   : > { %v5407_v0 = vld [vmem:[%s7126_s1 + $0x38] sm:$0xff]  ;;  %v5406_v3 = vld [vmem:[%s7126_s1 + $0x30] sm:$0xff]  ;;  %s7144_s25 = smov (!%p269_p3, %s4393_s25), 1  ;;  %v5639_v6 = vmov 0   ;;  %v5405_v7 = vld [vmem:[%s7126_s1 + $0x28] sm:$0xff]  ;;  %vm425_vm1 = vcmask 1040384  }
   0xc   : > { %v5415_v1 = vld [vmem:[%s7126_s1 + $0x78] sm:$0xff]  ;;  %1911 = vmatpush.bf16.msra.mxu0 %v5407_v0  ;;  %5592 = vmatpush.bf16.msra.mxu3 %v5407_v0  ;;  %v5414_v4 = vld [vmem:[%s7126_s1 + $0x70] sm:$0xff]  ;;  %2180 = vst [vmem:[#allocation4] sm:$0xf] %v5639_v6  ;;  %s5616_s15 = smul.u32 576, %s7144_s25  ;;  %v5413_v8 = vld [vmem:[%s7126_s1 + $0x68] sm:$0xff] }
   0xd   : > { %v5423_v2 = vld [vmem:[%s7126_s1 + $0xb8] sm:$0xff]  ;;  %1940 = vmatpush.bf16.msra.mxu1 %v5415_v1  ;;  %v5422_v5 = vld [vmem:[%s7126_s1 + $0xb0] sm:$0xff]  ;;  %2181 = vst [vmem:[#allocation4 + $0x4] sm:$0x1] %v5639_v6  ;;  %v5421_v9 = vld [vmem:[%s7126_s1 + $0xa8] sm:$0xff]  ;;  %vm2695_vm6 = vcmask 1042432  }
   0xe   : > { %1969 = vmatpush.bf16.msra.mxu2 %v5423_v2  ;;  %2183 = vst [vmem:[#allocation4 + $0x48] sm:$0xf] %v5639_v6  ;;  %s5716_s20 = scalar_lea.vmem %s7125_s0, %s5616_s15  ;;  %v5404_v12 = vld [vmem:[%s7126_s1 + $0x20] sm:$0xff]  ;;  %v5403_v17 = vld [vmem:[%s7126_s1 + $0x18] sm:$0xff]  ;;  %vm426_vm0 = vsmask.f32 256 }
   0xf   : > { %2184 = vst [vmem:[#allocation4 + $0x4c] sm:$0x1] %v5639_v6  ;;  %v280_v10 = vld [vmem:[%s5716_s20] sm:$0xff]  ;;  %v282_v11 = vld [vmem:[%s5716_s20 + $0x10] sm:$0xff]  ;;  %v5411_v18 = vld [vmem:[%s7126_s1 + $0x58] sm:$0xff]  ;;  %vm2696_vm7 = vcmask 1046532  }
  0x10   : > { %1912 = vmatpush.bf16.msra.mxu0 %v5406_v3  ;;  %5593 = vmatpush.bf16.msra.mxu3 %v5406_v3  ;;  %v5412_v13 = vld [vmem:[%s7126_s1 + $0x60] sm:$0xff]  ;;  %v352_v15 = vpack.c.bf16 %v280_v10, %v280_v10  ;;  %v354_v16 = vpack.c.bf16 %v282_v11, %v282_v11  ;;  %v5419_v19 = vld [vmem:[%s7126_s1 + $0x98] sm:$0xff]  ;;  %v290_v21 = vld [vmem:[%s5716_s20 + $0x50] sm:$0xff]  ;;  %vm620_vm3 = vsmask.f32 3328  ;;  %vm2324_vm11 = vcmask 1043456  }
  0x11   : > { %1941 = vmatpush.bf16.msra.mxu1 %v5414_v4  ;;  %v5420_v14 = vld [vmem:[%s7126_s1 + $0xa0] sm:$0xff]  ;;  %v298_v23 = vld [vmem:[%s5716_s20 + $0x90] sm:$0xff]  ;;  %v362_v24 = vpack.c.bf16 %v290_v21, %v290_v21  ;;  %v5401_v34 = vld [vmem:[%s7126_s1 + $0x8] sm:$0xff]  ;;  %vm621_vm4 = vsmask.f32 7440  ;;  %s5617_s29 = smul.u32 160, %s7144_s25 }
  0x12   : > { %1970 = vmatpush.bf16.msra.mxu2 %v5422_v5  ;;  %424 = vst [vmem:[#allocation2] sm:$0xf] %v352_v15  ;;  %v288_v20 = vld [vmem:[%s5716_s20 + $0x40] sm:$0xff]  ;;  %v370_v26 = vpack.c.bf16 %v298_v23, %v298_v23  ;;  %v5402_v28 = vld [vmem:[%s7126_s1 + $0x10] sm:$0xff]  ;;  %v5761_v35 = vld [vmem:[%s5716_s20 + $0x98] sm:$0x1] }
  0x13   : > { %431 = vst [vmem:[#allocation2 + $0x8] sm:$0xf] %v354_v16  ;;  %v360_v22 = vpack.c.bf16 %v288_v20, %v288_v20  ;;  %v300_v25 = vld [vmem:[%s5716_s20 + $0xa0] sm:$0xff]  ;;  %v5410_v32 = vld [vmem:[%s7126_s1 + $0x50] sm:$0xff]  ;;  %v281_v37 = vld [vmem:[%s5716_s20 + $0x8] sm:$0x1]  ;;  %v371_v62 = vpack.c.bf16 %v5761_v35, %v5761_v35  ;;  %s7033_s9 = scalar_lea.vmem %s7132_s7, %s5617_s29 }
  0x14   : > { %1913 = vmatpush.bf16.msra.mxu0 %v5405_v7  ;;  %5594 = vmatpush.bf16.msra.mxu3 %v5405_v7  ;;  %v2519_v27 = vld [vmem:[#allocation4] sm:$0xf]  ;;  %v372_v29 = vpack.c.bf16 %v300_v25, %v300_v25  ;;  %v5418_v33 = vld [vmem:[%s7126_s1 + $0x90] sm:$0xff]  ;;  %447 = vst [vmem:[#allocation2 + $0x28] sm:$0xf] %v362_v24  ;;  %vm5768_vm2 = vmand %vm425_vm1, %vm426_vm0  ;;  %v353_v45 = vpack.c.bf16 %v281_v37, %v281_v37 }
  0x15   : > { %1942 = vmatpush.bf16.msra.mxu1 %v5413_v8  ;;  %v2536_v30 = vshrl.u32 %v2519_v27, 16  ;;  %v2539_v31 = vshll.u32 %v2519_v27, 16  ;;  %443 = vst [vmem:[#allocation2 + $0x20] sm:$0xf] %v360_v22  ;;  %v5763_v36 = vld [vmem:[#allocation4 + $0x4] sm:$0x1]  ;;  %vm5860_vm5 = vmor %vm620_vm3, %vm621_vm4 }
  0x16   : > { %1971 = vmatpush.bf16.msra.mxu2 %v5421_v9  ;;  %v5409_v39 = vld [vmem:[%s7126_s1 + $0x48] sm:$0xff]  ;;  %463 = vst [vmem:[#allocation2 + $0x48] sm:$0xf] %v370_v26  ;;  %v283_v44 = vld [vmem:[%s5716_s20 + $0x18] sm:$0x1]  ;;  %v5400_v55 = vld [vmem:[%s7126_s1] sm:$0xff] }
  0x17   : > { %v5417_v40 = vld [vmem:[%s7126_s1 + $0x88] sm:$0xff]  ;;  %v5781_v42 = vrot.slane %v2536_v30, 4  ;;  %v5783_v43 = vrot.slane %v2539_v31, 5  ;;  %v5787_v46 = vld [vmem:[%s5716_s20 + $0xb8] sm:$0x1]  ;;  %v355_v48 = vpack.c.bf16 %v283_v44, %v283_v44  ;;  %v2545_v57 = vshll.u32 %v5763_v36, 16  ;;  %vm5914_vm8 = vmor %vm2695_vm6, %vm2696_vm7 }
  0x18   : > { %1914 = vmatpush.bf16.msra.mxu0 %v5404_v12  ;;  %5595 = vmatpush.bf16.msra.mxu3 %v5404_v12  ;;  %v5779_v41 = vld [vmem:[%s5716_s20 + $0xa8] sm:$0x1]  ;;  %467 = vst [vmem:[#allocation2 + $0x50] sm:$0xf] %v372_v29  ;;  %v428_v49 = vld [vmem:[#allocation2 + $0x4] sm:$0x1] }
  0x19   : > { %1943 = vmatpush.bf16.msra.mxu1 %v5412_v13  ;;  %v571_v47 = vld [vmem:[#allocation2] sm:$0xf]  ;;  %v5790_v50 = vld [vmem:[%s5716_s20 + $0xc8] sm:$0x1]  ;;  %v429_v52 = vsel %vm5768_vm2, %v353_v45, %v428_v49  ;;  %v432_v53 = vld [vmem:[#allocation2 + $0xc] sm:$0x1]  ;;  %v373_v4 = vpack.c.bf16 %v5779_v41, %v5779_v41  ;;  %v2542_v7 = vor.u32 %v5783_v43, %v5781_v42  ;;  %v375_v13 = vpack.c.bf16 %v5787_v46, %v5787_v46 }
  0x1a   : > { %1972 = vmatpush.bf16.msra.mxu2 %v5420_v14  ;;  %v572_v51 = vld [vmem:[#allocation2 + $0x8] sm:$0xf]  ;;  %579 = vst [vmem:[#allocation3] sm:$0xf] %v571_v47  ;;  %v464_v54 = vld [vmem:[#allocation2 + $0x4c] sm:$0x1]  ;;  %v433_v58 = vsel %vm5768_vm2, %v355_v48, %v432_v53 }
  0x1b   : > { %v5798_v56 = vld [vmem:[%s5716_s20 + $0xd8] sm:$0x1]  ;;  %580 = vst [vmem:[#allocation3 + $0x24] sm:$0xf] %v572_v51  ;;  %v604_v59 = vld [vmem:[#allocation2] sm:$0xf]  ;;  %v465_v27 = vsel %vm5768_vm2, %v371_v62, %v464_v54 }
  0x1c   : > { %1915 = vmatpush.bf16.msra.mxu0 %v5403_v17  ;;  %5596 = vmatpush.bf16.msra.mxu3 %v5403_v17  ;;  %v468_v60 = vld [vmem:[#allocation2 + $0x54] sm:$0x1]  ;;  %v5408_v61 = vld [vmem:[%s7126_s1 + $0x40] sm:$0xff]  ;;  %430 = vst [vmem:[#allocation2 + $0x4] sm:$0x1] %v429_v52  ;;  %v624_v1 = vshrl.u32 %v604_v59, 16  ;;  %v379_v24 = vpack.c.bf16 %v5798_v56, %v5798_v56 }
  0x1d   : > { %1944 = vmatpush.bf16.msra.mxu1 %v5411_v18  ;;  %v5416_v63 = vld [vmem:[%s7126_s1 + $0x80] sm:$0xff]  ;;  %v606_v0 = vld [vmem:[#allocation2 + $0x8] sm:$0xf]  ;;  %v627_v2 = vshll.u32 %v604_v59, 16  ;;  %v472_v3 = vld [vmem:[#allocation2 + $0x5c] sm:$0x1] }
  0x1e   : > { %1973 = vmatpush.bf16.msra.mxu2 %v5419_v19  ;;  %v2503_v5 = vld [vmem:[#allocation4] sm:$0xf]  ;;  %v5431_v8 = vld [vmem:[%s7126_s1 + $0xf8] sm:$0xff]  ;;  %434 = vst [vmem:[#allocation2 + $0xc] sm:$0x1] %v433_v58  ;;  %v638_v10 = vshrl.u32 %v606_v0, 16  ;;  %v377_v19 = vpack.c.bf16 %v5790_v50, %v5790_v50  ;;  %v473_v37 = vsel %vm5768_vm2, %v375_v13, %v472_v3 }
  0x1f   : > { %v575_v6 = vld [vmem:[#allocation2 + $0x20] sm:$0xf]  ;;  %v5439_v9 = vld [vmem:[%s7126_s1 + $0x138] sm:$0xff]  ;;  %v641_v11 = vshll.u32 %v606_v0, 16  ;;  %v476_v12 = vld [vmem:[#allocation2 + $0x64] sm:$0x1] }
  0x20   : > { %1916 = vmatpush.bf16.msra.mxu0 %v5402_v28  ;;  %5597 = vmatpush.bf16.msra.mxu3 %v5402_v28  ;;  %v576_v14 = vld [vmem:[#allocation2 + $0x28] sm:$0xf]  ;;  %583 = vst [vmem:[#allocation3 + $0x90] sm:$0xf] %v575_v6  ;;  %v626_v15 = vrot.slane %v624_v1, 4  ;;  %v629_v16 = vrot.slane %v627_v2, 5  ;;  %v477_v44 = vsel %vm5768_vm2, %v377_v19, %v476_v12 }
  0x21   : > { %1945 = vmatpush.bf16.msra.mxu1 %v5410_v32  ;;  %v480_v17 = vld [vmem:[#allocation2 + $0x6c] sm:$0x1]  ;;  %v5824_v18 = vld [vmem:[%s5716_s20 + $0xe8] sm:$0x1]  ;;  %584 = vst [vmem:[#allocation3 + $0xb4] sm:$0xf] %v576_v14 }
  0x22   : > { %1974 = vmatpush.bf16.msra.mxu2 %v5418_v33  ;;  %v588_v20 = vld [vmem:[#allocation2 + $0x48] sm:$0xf]  ;;  %v640_v21 = vrot.slane %v638_v10, 4  ;;  %v643_v22 = vrot.slane %v641_v11, 5  ;;  %v5829_v23 = vld [vmem:[%s5716_s20 + $0xf8] sm:$0x1]  ;;  %v630_v26 = vor.u32 %v629_v16, %v626_v15  ;;  %v381_v47 = vpack.c.bf16 %v5824_v18, %v5824_v18 }
  0x23   : > { %v589_v25 = vld [vmem:[#allocation2 + $0x50] sm:$0xf]  ;;  %596 = vst [vmem:[#allocation3 + $0x4] sm:$0xf] %v588_v20  ;;  %v5836_v28 = vld [vmem:[%s5716_s20 + $0x108] sm:$0x1]  ;;  %v481_v51 = vsel %vm5768_vm2, %v379_v24, %v480_v17  ;;  %v383_v54 = vpack.c.bf16 %v5829_v23, %v5829_v23 }
  0x24   : > { %1917 = vmatpush.bf16.msra.mxu0 %v5401_v34  ;;  %5598 = vmatpush.bf16.msra.mxu3 %v5401_v34  ;;  %v5839_v29 = vld [vmem:[%s5716_s20 + $0x118] sm:$0x1]  ;;  %v4402_v30 = vld [vmem:[#allocation3] sm:$0xf]  ;;  %597 = vst [vmem:[#allocation3 + $0x28] sm:$0xf] %v589_v25  ;;  %v644_v33 = vor.u32 %v643_v22, %v640_v21  ;;  %v469_v34 = vsel %vm5768_vm2, %v373_v4, %v468_v60 }
  0x25   : > { %1946 = vmatpush.bf16.msra.mxu1 %v5409_v39  ;;  %v2543_v31 = vrot.slane %v2542_v7, 4  ;;  %v2547_v32 = vrot.slane %v2545_v57, 5  ;;  %v5844_v35 = vld [vmem:[%s5716_s20 + $0x1a8] sm:$0x1]  ;;  %v5368_v36 = vld [vmem:[#allocation3 + $0x20] sm:$0xf0]  ;;  %v387_v0 = vpack.c.bf16 %v5839_v29, %v5839_v29 }
  0x26   : > { %1975 = vmatpush.bf16.msra.mxu2 %v5417_v40  ;;  %2511 = vst [vmem:[#allocation3] sm:$0xf] %v2503_v5  ;;  %v484_v39 = vld [vmem:[#allocation2 + $0x74] sm:$0x1]  ;;  %v5849_v40 = vld [vmem:[%s5716_s20 + $0x1b8] sm:$0x1]  ;;  %v4403_v41 = vor.u32 %v5368_v36, %v4402_v30  ;;  %v405_v4 = vpack.c.bf16 %v5844_v35, %v5844_v35 }
  0x27   : > { %v605_v42 = vld [vmem:[#allocation2 + $0x4] sm:$0x1]  ;;  %v631_v43 = vrot.slane %v630_v26, 4  ;;  %v5430_v45 = vld [vmem:[%s7126_s1 + $0xf0] sm:$0xff]  ;;  %466 = vst [vmem:[#allocation2 + $0x4c] sm:$0x1] %v465_v27  ;;  %v2548_v56 = vsel %vm5860_vm5, %v2543_v31, %v2547_v32  ;;  %v407_v10 = vpack.c.bf16 %v5849_v40, %v5849_v40  ;;  %v485_v13 = vsel %vm5768_vm2, %v381_v47, %v484_v39 }
  0x28   : > { %1918 = vmatpush.bf16.msra.mxu0 %v5400_v55  ;;  %5599 = vmatpush.bf16.msra.mxu3 %v5400_v55  ;;  %v488_v46 = vld [vmem:[#allocation2 + $0x7c] sm:$0x1]  ;;  %v607_v49 = vld [vmem:[#allocation2 + $0xc] sm:$0x1]  ;;  %v633_v50 = vshll.u32 %v605_v42, 16  ;;  %v5438_v52 = vld [vmem:[%s7126_s1 + $0x130] sm:$0xff] }
  0x29   : > { %1947 = vmatpush.bf16.msra.mxu1 %v5408_v61  ;;  %470 = vst [vmem:[#allocation2 + $0x54] sm:$0x1] %v469_v34  ;;  %v492_v53 = vld [vmem:[#allocation2 + $0x84] sm:$0x1]  ;;  %v4474_v55 = vld [vmem:[#allocation3 + $0x90] sm:$0xf]  ;;  %v489_v19 = vsel %vm5768_vm2, %v383_v54, %v488_v46 }
  0x2a   : > { %1976 = vmatpush.bf16.msra.mxu2 %v5416_v63  ;;  %v645_v57 = vrot.slane %v644_v33, 4  ;;  %v647_v58 = vshll.u32 %v607_v49, 16  ;;  %v5873_v59 = vld [vmem:[#allocation4] sm:$0xe]  ;;  %v5875_v60 = vld [vmem:[#allocation4 + $0x4] sm:$0x1]  ;;  %v385_v63 = vpack.c.bf16 %v5836_v28, %v5836_v28 }
  0x2b   : > { %1919 = vmatmul.bf16.vlgmr.msra.gmra.mxu0 %v4403_v41  ;;  %474 = vst [vmem:[#allocation2 + $0x5c] sm:$0x1] %v473_v37  ;;  %v496_v61 = vld [vmem:[#allocation2 + $0x8c] sm:$0x1]  ;;  %v5878_v62 = vld [vmem:[%s5716_s20 + $0x1c8] sm:$0x1] }
  0x2c   : > { %1998 = vmatpush.bf16.msrb.mxu3 %v5431_v8  ;;  %2027 = vmatpush.bf16.msrb.mxu0 %v5439_v9  ;;  %v5386_v1 = vld [vmem:[#allocation3 + $0xb0] sm:$0xf0]  ;;  %v635_v2 = vrot.slane %v633_v50, 5  ;;  %478 = vst [vmem:[#allocation2 + $0x64] sm:$0x1] %v477_v44  ;;  %v649_v7 = vrot.slane %v647_v58, 5  ;;  %v493_v24 = vsel %vm5768_vm2, %v385_v63, %v492_v53  ;;  %v409_v27 = vpack.c.bf16 %v5878_v62, %v5878_v62 }
  0x2d   : > { %v532_v3 = vld [vmem:[#allocation2 + $0xd4] sm:$0x1]  ;;  %v4475_v5 = vor.u32 %v5386_v1, %v4474_v55  ;;  %v5364_v6 = vld [vmem:[#allocation3 + $0x4] sm:$0xf]  ;;  %482 = vst [vmem:[#allocation2 + $0x6c] sm:$0x1] %v481_v51  ;;  %v497_v29 = vsel %vm5768_vm2, %v387_v0, %v496_v61 }
  0x2e   : > { %v5429_v8 = vld [vmem:[%s7126_s1 + $0xe8] sm:$0xff]  ;;  %v536_v9 = vld [vmem:[#allocation2 + $0xdc] sm:$0x1]  ;;  %2655 = vst [vmem:[#allocation3 + $0x4] sm:$0xf] %v2548_v56  ;;  %v636_v12 = vsel %vm5860_vm5, %v631_v43, %v635_v2  ;;  %v650_v18 = vsel %vm5860_vm5, %v645_v57, %v649_v7  ;;  %v4880_v22 = vrot.slane %v5873_v59, 9  ;;  %v533_v33 = vsel %vm5768_vm2, %v405_v4, %v532_v3 }
  0x2f   : > { %v4404_v11 = vld [vmem:[#allocation3 + $0x24] sm:$0xf0]  ;;  %v339_v15 = vld [vmem:[%s5716_s20 + $0x1d8] sm:$0x1]  ;;  %1929 = vmatmul.bf16.vlgmr.msra.gmra.mxu3 %v4475_v5  ;;  %743 = vst [vmem:[#allocation3 + $0x8] sm:$0xf] %v636_v12  ;;  %v537_v40 = vsel %vm5768_vm2, %v407_v10, %v536_v9 }
  0x30   : > { %1999 = vmatpush.bf16.msrb.mxu3 %v5430_v45  ;;  %2028 = vmatpush.bf16.msrb.mxu0 %v5438_v52  ;;  %v5437_v14 = vld [vmem:[%s7126_s1 + $0x128] sm:$0xff]  ;;  %v4407_v17 = vor.u32 %v5364_v6, %v4404_v11  ;;  %v540_v20 = vld [vmem:[#allocation2 + $0xe4] sm:$0x1]  ;;  %v343_v21 = vld [vmem:[%s5716_s20 + $0x1f8] sm:$0x1]  ;;  %v2700_v23 = vrot.slane %v5875_v60, 5  ;;  %v411_v32 = vpack.c.bf16 %v339_v15, %v339_v15 }
  0x31   : > { %v341_v16 = vld [vmem:[%s5716_s20 + $0x1e8] sm:$0x1]  ;;  %744 = vst [vmem:[#allocation3 + $0x2c] sm:$0xf] %v650_v18  ;;  %v544_v25 = vld [vmem:[#allocation2 + $0xec] sm:$0x1]  ;;  %v415_v41 = vpack.c.bf16 %v343_v21, %v343_v21  ;;  %v541_v46 = vsel %vm5768_vm2, %v409_v27, %v540_v20 }
  0x32   : > { %v345_v26 = vld [vmem:[%s5716_s20 + $0x208] sm:$0x1]  ;;  %1948 = vmatmul.bf16.vlgmr.msra.gmra.mxu1 %v4407_v17  ;;  %486 = vst [vmem:[#allocation2 + $0x74] sm:$0x1] %v485_v13  ;;  %v5428_v30 = vld [vmem:[%s7126_s1 + $0xe0] sm:$0xff]  ;;  %v413_v39 = vpack.c.bf16 %v341_v16, %v341_v16  ;;  %v2701_v42 = vsel %vm5914_vm8, %v4880_v22, %v2700_v23  ;;  %v545_v51 = vsel %vm5768_vm2, %v411_v32, %v544_v25  ;;  %v5427_v55 = vld [vmem:[%s7126_s1 + $0xd8] sm:$0xff] }
  0x33   : > { %v548_v31 = vld [vmem:[#allocation2 + $0xf4] sm:$0x1]  ;;  %490 = vst [vmem:[#allocation2 + $0x7c] sm:$0x1] %v489_v19  ;;  %v5436_v34 = vld [vmem:[%s7126_s1 + $0x120] sm:$0xff]  ;;  %v417_v45 = vpack.c.bf16 %v345_v26, %v345_v26  ;;  %v5435_v56 = vld [vmem:[%s7126_s1 + $0x118] sm:$0xff] }
  0x34   : > { %2000 = vmatpush.bf16.msrb.mxu3 %v5429_v8  ;;  %2029 = vmatpush.bf16.msrb.mxu0 %v5437_v14  ;;  %v552_v35 = vld [vmem:[#allocation2 + $0xfc] sm:$0x1]  ;;  %v347_v36 = vld [vmem:[%s5716_s20 + $0x218] sm:$0x1]  ;;  %v349_v37 = vld [vmem:[%s5716_s20 + $0x228] sm:$0x1]  ;;  %v549_v54 = vsel %vm5768_vm2, %v413_v39, %v548_v31 }
  0x35   : > { %494 = vst [vmem:[#allocation2 + $0x84] sm:$0x1] %v493_v24  ;;  %v556_v43 = vld [vmem:[#allocation2 + $0x104] sm:$0x1]  ;;  %v351_v44 = vld [vmem:[%s5716_s20 + $0x238] sm:$0x1]  ;;  %v419_v49 = vpack.c.bf16 %v347_v36, %v347_v36  ;;  %v421_v52 = vpack.c.bf16 %v349_v37, %v349_v37  ;;  %v553_v60 = vsel %vm5768_vm2, %v415_v41, %v552_v35 }
  0x36   : > { %498 = vst [vmem:[#allocation2 + $0x8c] sm:$0x1] %v497_v29  ;;  %v560_v47 = vld [vmem:[#allocation2 + $0x10c] sm:$0x1]  ;;  %v4410_v50 = vld [vmem:[#allocation3 + $0x8] sm:$0xf]  ;;  %v423_v58 = vpack.c.bf16 %v351_v44, %v351_v44  ;;  %v557_v62 = vsel %vm5768_vm2, %v417_v45, %v556_v43 }
  0x37   : > { %534 = vst [vmem:[#allocation2 + $0xd4] sm:$0x1] %v533_v33  ;;  %v564_v57 = vld [vmem:[#allocation2 + $0x114] sm:$0x1]  ;;  %v568_v61 = vld [vmem:[#allocation2 + $0x11c] sm:$0x1]  ;;  %v561_v0 = vsel %vm5768_vm2, %v419_v49, %v560_v47 }
  0x38   : > { %2001 = vmatpush.bf16.msrb.mxu3 %v5428_v30  ;;  %538 = vst [vmem:[#allocation2 + $0xdc] sm:$0x1] %v537_v40  ;;  %2030 = vmatpush.bf16.msrb.mxu0 %v5436_v34  ;;  %v5369_v53 = vld [vmem:[#allocation3 + $0x28] sm:$0xf0]  ;;  %v284_v63 = vld [vmem:[%s5716_s20 + $0x20] sm:$0xff]  ;;  %v286_v1 = vld [vmem:[%s5716_s20 + $0x30] sm:$0xff]  ;;  %v565_v2 = vsel %vm5768_vm2, %v421_v52, %v564_v57  ;;  %v569_v4 = vsel %vm5768_vm2, %v423_v58, %v568_v61 }
  0x39   : > { %2738 = vst [vmem:[#allocation3 + $0x8] sm:$0xf] %v2701_v42  ;;  %v4411_v59 = vor.u32 %v5369_v53, %v4410_v50  ;;  %v292_v3 = vld [vmem:[%s5716_s20 + $0x60] sm:$0xff]  ;;  %v356_v5 = vpack.c.bf16 %v284_v63, %v284_v63  ;;  %v294_v6 = vld [vmem:[%s5716_s20 + $0x70] sm:$0xff]  ;;  %v285_v8 = vld [vmem:[%s5716_s20 + $0x28] sm:$0x1]  ;;  %v358_v9 = vpack.c.bf16 %v286_v1, %v286_v1 }
  0x3a   : > { %542 = vst [vmem:[#allocation2 + $0xe4] sm:$0x1] %v541_v46  ;;  %v302_v7 = vld [vmem:[%s5716_s20 + $0xb0] sm:$0xff]  ;;  %v287_v10 = vld [vmem:[%s5716_s20 + $0x38] sm:$0x1]  ;;  %v364_v13 = vpack.c.bf16 %v292_v3, %v292_v3  ;;  %v304_v14 = vld [vmem:[%s5716_s20 + $0xc0] sm:$0xff]  ;;  %v366_v16 = vpack.c.bf16 %v294_v6, %v294_v6  ;;  %v357_v17 = vpack.c.bf16 %v285_v8, %v285_v8 }
  0x3b   : > { %546 = vst [vmem:[#allocation2 + $0xec] sm:$0x1] %v545_v51  ;;  %1977 = vmatmul.bf16.vlgmr.msra.gmra.mxu2 %v4411_v59  ;;  %v5426_v11 = vld [vmem:[%s7126_s1 + $0xd0] sm:$0xff]  ;;  %v5425_v15 = vld [vmem:[%s7126_s1 + $0xc8] sm:$0xff]  ;;  %v5455_v19 = vld [vmem:[%s7126_s1 + $0x1b8] sm:$0xff]  ;;  %v374_v21 = vpack.c.bf16 %v302_v7, %v302_v7  ;;  %v359_v22 = vpack.c.bf16 %v287_v10, %v287_v10  ;;  %v376_v25 = vpack.c.bf16 %v304_v14, %v304_v14 }
  0x3c   : > { %2002 = vmatpush.bf16.msrb.mxu3 %v5427_v55  ;;  %550 = vst [vmem:[#allocation2 + $0xf4] sm:$0x1] %v549_v54  ;;  %2031 = vmatpush.bf16.msrb.mxu0 %v5435_v56  ;;  %v5434_v12 = vld [vmem:[%s7126_s1 + $0x110] sm:$0xff]  ;;  %v5433_v18 = vld [vmem:[%s7126_s1 + $0x108] sm:$0xff]  ;;  %v612_v20 = vld [vmem:[#allocation2 + $0x20] sm:$0xf] }
  0x3d   : > { %554 = vst [vmem:[#allocation2 + $0xfc] sm:$0x1] %v553_v60  ;;  %v436_v23 = vld [vmem:[#allocation2 + $0x14] sm:$0x1]  ;;  %v614_v24 = vld [vmem:[#allocation2 + $0x28] sm:$0xf]  ;;  %2085 = vmatpush.bf16.msrb.mxu2 %v5455_v19 }
  0x3e   : > { %558 = vst [vmem:[#allocation2 + $0x104] sm:$0x1] %v557_v62  ;;  %v440_v26 = vld [vmem:[#allocation2 + $0x1c] sm:$0x1]  ;;  %v680_v27 = vshrl.u32 %v612_v20, 16  ;;  %v683_v29 = vshll.u32 %v612_v20, 16  ;;  %v437_v32 = vsel %vm5768_vm2, %v357_v17, %v436_v23 }
  0x3f   : > { %562 = vst [vmem:[#allocation2 + $0x10c] sm:$0x1] %v561_v0  ;;  %v694_v30 = vshrl.u32 %v614_v24, 16  ;;  %v697_v31 = vshll.u32 %v614_v24, 16  ;;  %v5424_v33 = vld [vmem:[%s7126_s1 + $0xc0] sm:$0xff]  ;;  %v441_v35 = vsel %vm5768_vm2, %v359_v22, %v440_v26  ;;  %v306_v36 = vld [vmem:[%s5716_s20 + $0xd0] sm:$0xff] }
  0x40   : > { %566 = vst [vmem:[#allocation2 + $0x114] sm:$0x1] %v565_v2  ;;  %2003 = vmatpush.bf16.msrb.mxu3 %v5426_v11  ;;  %2032 = vmatpush.bf16.msrb.mxu0 %v5434_v12  ;;  %v5432_v34 = vld [vmem:[%s7126_s1 + $0x100] sm:$0xff]  ;;  %v5992_v39 = vrot.slane %v680_v27, 4  ;;  %v5994_v40 = vrot.slane %v683_v29, 5  ;;  %v318_v49 = vld [vmem:[%s5716_s20 + $0x130] sm:$0xff]  ;;  %v378_v57 = vpack.c.bf16 %v306_v36, %v306_v36 }
  0x41   : > { %570 = vst [vmem:[#allocation2 + $0x11c] sm:$0x1] %v569_v4  ;;  %v308_v37 = vld [vmem:[%s5716_s20 + $0xe0] sm:$0xff]  ;;  %v5996_v41 = vrot.slane %v694_v30, 4  ;;  %v5998_v42 = vrot.slane %v697_v31, 5  ;;  %v334_v53 = vld [vmem:[%s5716_s20 + $0x1b0] sm:$0xff]  ;;  %v390_v4 = vpack.c.bf16 %v318_v49, %v318_v49 }
  0x42   : > { %435 = vst [vmem:[#allocation2 + $0x10] sm:$0xf] %v356_v5  ;;  %v316_v45 = vld [vmem:[%s5716_s20 + $0x120] sm:$0xff]  ;;  %v380_v61 = vpack.c.bf16 %v308_v37, %v308_v37  ;;  %v5463_v5 = vld [vmem:[%s7126_s1 + $0x1f8] sm:$0xff]  ;;  %v406_v11 = vpack.c.bf16 %v334_v53, %v334_v53  ;;  %v686_v12 = vor.u32 %v5994_v40, %v5992_v39  ;;  %v5446_v30 = vld [vmem:[%s7126_s1 + $0x170] sm:$0xff] }
  0x43   : > { %439 = vst [vmem:[#allocation2 + $0x18] sm:$0xf] %v358_v9  ;;  %v388_v1 = vpack.c.bf16 %v316_v45, %v316_v45  ;;  %v5447_v6 = vld [vmem:[%s7126_s1 + $0x178] sm:$0xff]  ;;  %v336_v10 = vld [vmem:[%s5716_s20 + $0x1c0] sm:$0xff]  ;;  %v5462_v36 = vld [vmem:[%s7126_s1 + $0x1f0] sm:$0xff] }
  0x44   : > { %451 = vst [vmem:[#allocation2 + $0x30] sm:$0xf] %v364_v13  ;;  %2004 = vmatpush.bf16.msrb.mxu3 %v5425_v15  ;;  %2033 = vmatpush.bf16.msrb.mxu0 %v5433_v18  ;;  %v291_v20 = vld [vmem:[%s5716_s20 + $0x58] sm:$0x1]  ;;  %v408_v24 = vpack.c.bf16 %v336_v10, %v336_v10  ;;  %v6018_v29 = vrot.slane %v686_v12, 4  ;;  %v5444_v53 = vld [vmem:[%s7126_s1 + $0x160] sm:$0xff] }
  0x45   : > { %455 = vst [vmem:[#allocation2 + $0x38] sm:$0xf] %v366_v16  ;;  %2056 = vmatpush.bf16.msrb.mxu1 %v5447_v6  ;;  %v289_v16 = vld [vmem:[%s5716_s20 + $0x48] sm:$0x1]  ;;  %v448_v40 = vld [vmem:[#allocation2 + $0x2c] sm:$0x1]  ;;  %v363_v45 = vpack.c.bf16 %v291_v20, %v291_v20 }
  0x46   : > { %471 = vst [vmem:[#allocation2 + $0x58] sm:$0xf] %v374_v21  ;;  %v361_v39 = vpack.c.bf16 %v289_v16, %v289_v16  ;;  %v5443_v10 = vld [vmem:[%s7126_s1 + $0x158] sm:$0xff]  ;;  %vm2210_vm9 = vsmask.f32 7938 }
  0x47   : > { %475 = vst [vmem:[#allocation2 + $0x60] sm:$0xf] %v376_v25  ;;  %v700_v25 = vor.u32 %v5998_v42, %v5996_v41  ;;  %v5471_v41 = vld [vmem:[%s7126_s1 + $0x238] sm:$0xff]  ;;  %v5445_v42 = vld [vmem:[%s7126_s1 + $0x168] sm:$0xff]  ;;  %vm6322_vm10 = vmand %vm425_vm1, %vm2210_vm9 }
  0x48   : > { %438 = vst [vmem:[#allocation2 + $0x14] sm:$0x1] %v437_v32  ;;  %2005 = vmatpush.bf16.msrb.mxu3 %v5424_v33  ;;  %2034 = vmatpush.bf16.msrb.mxu0 %v5432_v34  ;;  %v444_v34 = vld [vmem:[#allocation2 + $0x24] sm:$0x1]  ;;  %vm6468_vm12 = vmand %vm2324_vm11, %vm2210_vm9 }
  0x49   : > { %v573_v43 = vld [vmem:[#allocation2 + $0x10] sm:$0xf]  ;;  %442 = vst [vmem:[#allocation2 + $0x1c] sm:$0x1] %v441_v35  ;;  %2057 = vmatpush.bf16.msrb.mxu1 %v5446_v30 }
  0x4a   : > { %v608_v44 = vld [vmem:[#allocation2 + $0x10] sm:$0xf]  ;;  %v574_v46 = vld [vmem:[#allocation2 + $0x18] sm:$0xf]  ;;  %581 = vst [vmem:[#allocation3 + $0x48] sm:$0xf] %v573_v43 }
  0x4b   : > { %v610_v47 = vld [vmem:[#allocation2 + $0x18] sm:$0xf]  ;;  %582 = vst [vmem:[#allocation3 + $0x6c] sm:$0xf] %v574_v46  ;;  %v577_v50 = vld [vmem:[#allocation2 + $0x30] sm:$0xf] }
  0x4c   : > { %v652_v51 = vshrl.u32 %v608_v44, 16  ;;  %v655_v52 = vshll.u32 %v608_v44, 16  ;;  %v578_v54 = vld [vmem:[#allocation2 + $0x38] sm:$0xf]  ;;  %585 = vst [vmem:[#allocation3 + $0xd8] sm:$0xf] %v577_v50  ;;  %2114 = vmatpush.bf16.msra.mxu3 %v5463_v5  ;;  %2143 = vmatpush.bf16.msra.mxu0 %v5471_v41 }
  0x4d   : > { %v666_v55 = vshrl.u32 %v610_v47, 16  ;;  %v669_v56 = vshll.u32 %v610_v47, 16  ;;  %586 = vst [vmem:[#allocation3 + $0xfc] sm:$0xf] %v578_v54  ;;  %v590_v58 = vld [vmem:[#allocation2 + $0x58] sm:$0xf]  ;;  %2058 = vmatpush.bf16.msrb.mxu1 %v5445_v42 }
  0x4e   : > { %v654_v59 = vrot.slane %v652_v51, 4  ;;  %v657_v60 = vrot.slane %v655_v52, 5  ;;  %v591_v62 = vld [vmem:[#allocation2 + $0x60] sm:$0xf]  ;;  %598 = vst [vmem:[#allocation3 + $0x4c] sm:$0xf] %v590_v58 }
  0x4f   : > { %v668_v63 = vrot.slane %v666_v55, 4  ;;  %v671_v0 = vrot.slane %v669_v56, 5  ;;  %599 = vst [vmem:[#allocation3 + $0x70] sm:$0xf] %v591_v62  ;;  %v609_v2 = vld [vmem:[#allocation2 + $0x14] sm:$0x1]  ;;  %v445_v56 = vsel %vm5768_vm2, %v361_v39, %v444_v34 }
  0x50   : > { %v658_v3 = vor.u32 %v657_v60, %v654_v59  ;;  %v611_v7 = vld [vmem:[#allocation2 + $0x1c] sm:$0x1]  ;;  %v661_v8 = vshll.u32 %v609_v2, 16  ;;  %479 = vst [vmem:[#allocation2 + $0x68] sm:$0xf] %v378_v57  ;;  %v5454_v35 = vld [vmem:[%s7126_s1 + $0x1b0] sm:$0xff]  ;;  %2115 = vmatpush.bf16.msra.mxu3 %v5462_v36  ;;  %v449_v60 = vsel %vm5768_vm2, %v363_v45, %v448_v40 }
  0x51   : > { %v672_v9 = vor.u32 %v671_v0, %v668_v63  ;;  %v4438_v13 = vld [vmem:[#allocation3 + $0x48] sm:$0xf]  ;;  %v675_v15 = vshll.u32 %v611_v7, 16  ;;  %483 = vst [vmem:[#allocation2 + $0x70] sm:$0xf] %v380_v61  ;;  %v6037_v46 = vrot.slane %v700_v25, 4  ;;  %2086 = vmatpush.bf16.msrb.mxu2 %v5454_v35  ;;  %2059 = vmatpush.bf16.msrb.mxu1 %v5444_v53 }
  0x52   : > { %v659_v14 = vrot.slane %v658_v3, 4  ;;  %v5377_v17 = vld [vmem:[#allocation3 + $0x68] sm:$0xf0]  ;;  %v663_v18 = vrot.slane %v661_v8, 5  ;;  %499 = vst [vmem:[#allocation2 + $0x90] sm:$0xf] %v388_v1 }
  0x53   : > { %v673_v19 = vrot.slane %v672_v9, 4  ;;  %v4439_v21 = vor.u32 %v5377_v17, %v4438_v13  ;;  %v4510_v22 = vld [vmem:[#allocation3 + $0xd8] sm:$0xf]  ;;  %v677_v23 = vrot.slane %v675_v15, 5  ;;  %503 = vst [vmem:[#allocation2 + $0x98] sm:$0xf] %v390_v4 }
  0x54   : > { %v5395_v26 = vld [vmem:[#allocation3 + $0xf8] sm:$0xf0]  ;;  %v664_v27 = vsel %vm5860_vm5, %v659_v14, %v663_v18  ;;  %535 = vst [vmem:[#allocation2 + $0xd8] sm:$0xf] %v406_v11  ;;  %v5453_v47 = vld [vmem:[%s7126_s1 + $0x1a8] sm:$0xff]  ;;  %v310_v50 = vld [vmem:[%s5716_s20 + $0xf0] sm:$0xff] }
  0x55   : > { %1924 = vmatmul.bf16.gmra.mxu0 %v4439_v21  ;;  %v4511_v31 = vor.u32 %v5395_v26, %v4510_v22  ;;  %v5373_v32 = vld [vmem:[#allocation3 + $0x4c] sm:$0xf]  ;;  %v678_v33 = vsel %vm5860_vm5, %v673_v19, %v677_v23  ;;  %745 = vst [vmem:[#allocation3 + $0x50] sm:$0xf] %v664_v27  ;;  %v312_v51 = vld [vmem:[%s5716_s20 + $0x100] sm:$0xff]  ;;  %v322_v57 = vld [vmem:[%s5716_s20 + $0x150] sm:$0xff]  ;;  %2087 = vmatpush.bf16.msrb.mxu2 %v5453_v47 }
  0x56   : > { %v4440_v37 = vld [vmem:[#allocation3 + $0x6c] sm:$0xf0]  ;;  %746 = vst [vmem:[#allocation3 + $0x74] sm:$0xf] %v678_v33  ;;  %v320_v54 = vld [vmem:[%s5716_s20 + $0x140] sm:$0xff]  ;;  %v5461_v58 = vld [vmem:[%s7126_s1 + $0x1e8] sm:$0xff]  ;;  %v382_v1 = vpack.c.bf16 %v310_v50, %v310_v50  ;;  %v384_v4 = vpack.c.bf16 %v312_v51, %v312_v51  ;;  %v394_v11 = vpack.c.bf16 %v322_v57, %v322_v57  ;;  %2060 = vmatpush.bf16.msrb.mxu1 %v5443_v10 }
  0x57   : > { %1934 = vmatmul.bf16.gmra.mxu3 %v4511_v31  ;;  %v4443_v43 = vor.u32 %v5373_v32, %v4440_v37  ;;  %v592_v44 = vld [vmem:[#allocation2 + $0x68] sm:$0xf]  ;;  %539 = vst [vmem:[#allocation2 + $0xe0] sm:$0xf] %v408_v24  ;;  %v338_v61 = vld [vmem:[%s5716_s20 + $0x1d0] sm:$0xff]  ;;  %v5452_v62 = vld [vmem:[%s7126_s1 + $0x1a0] sm:$0xff]  ;;  %v392_v8 = vpack.c.bf16 %v320_v54, %v320_v54 }
  0x58   : > { %v593_v49 = vld [vmem:[#allocation2 + $0x70] sm:$0xf]  ;;  %600 = vst [vmem:[#allocation3 + $0x94] sm:$0xf] %v592_v44  ;;  %2116 = vmatpush.bf16.msra.mxu3 %v5461_v58  ;;  %v293_v2 = vld [vmem:[%s5716_s20 + $0x68] sm:$0x1]  ;;  %v410_v17 = vpack.c.bf16 %v338_v61, %v338_v61 }
  0x59   : > { %1953 = vmatmul.bf16.gmra.mxu1 %v4443_v43  ;;  %601 = vst [vmem:[#allocation3 + $0xb8] sm:$0xf] %v593_v49  ;;  %v752_v52 = vld [vmem:[#allocation2 + $0x90] sm:$0xf]  ;;  %v295_v5 = vld [vmem:[%s5716_s20 + $0x78] sm:$0x1]  ;;  %2088 = vmatpush.bf16.msrb.mxu2 %v5452_v62  ;;  %v365_v12 = vpack.c.bf16 %v293_v2, %v293_v2 }
  0x5a   : > { %v753_v55 = vld [vmem:[#allocation2 + $0x98] sm:$0xf]  ;;  %760 = vst [vmem:[#allocation3 + $0xc] sm:$0xf] %v752_v52  ;;  %v5470_v63 = vld [vmem:[%s7126_s1 + $0x230] sm:$0xff]  ;;  %v340_v9 = vld [vmem:[%s5716_s20 + $0x1e0] sm:$0xff]  ;;  %v367_v18 = vpack.c.bf16 %v295_v5, %v295_v5 }
  0x5b   : > { %761 = vst [vmem:[#allocation3 + $0x30] sm:$0xf] %v753_v55  ;;  %v769_v59 = vld [vmem:[#allocation2 + $0xd8] sm:$0xf]  ;;  %2144 = vmatpush.bf16.msra.mxu0 %v5470_v63  ;;  %v452_v13 = vld [vmem:[#allocation2 + $0x34] sm:$0x1]  ;;  %v412_v21 = vpack.c.bf16 %v340_v9, %v340_v9 }
  0x5c   : > { %v4446_v0 = vld [vmem:[#allocation3 + $0x50] sm:$0xf]  ;;  %777 = vst [vmem:[#allocation3 + $0x10] sm:$0xf] %v769_v59  ;;  %v456_v14 = vld [vmem:[#allocation2 + $0x3c] sm:$0x1]  ;;  %v453_v30 = vsel %vm5768_vm2, %v365_v12, %v452_v13 }
  0x5d   : > { %v5378_v3 = vld [vmem:[#allocation3 + $0x70] sm:$0xf0]  ;;  %446 = vst [vmem:[#allocation2 + $0x24] sm:$0x1] %v445_v56  ;;  %v616_v19 = vld [vmem:[#allocation2 + $0x30] sm:$0xf]  ;;  %v457_v34 = vsel %vm5768_vm2, %v367_v18, %v456_v14 }
  0x5e   : > { %v4447_v6 = vor.u32 %v5378_v3, %v4446_v0  ;;  %v770_v7 = vld [vmem:[#allocation2 + $0xe0] sm:$0xf]  ;;  %450 = vst [vmem:[#allocation2 + $0x2c] sm:$0x1] %v449_v60  ;;  %v618_v22 = vld [vmem:[#allocation2 + $0x38] sm:$0xf] }
  0x5f   : > { %778 = vst [vmem:[#allocation3 + $0x34] sm:$0xf] %v770_v7  ;;  %v5382_v15 = vld [vmem:[#allocation3 + $0x94] sm:$0xf]  ;;  %v708_v24 = vshrl.u32 %v616_v19, 16  ;;  %v711_v25 = vshll.u32 %v616_v19, 16 }
  0x60   : > { %1982 = vmatmul.bf16.gmra.mxu2 %v4447_v6  ;;  %v4476_v16 = vld [vmem:[#allocation3 + $0xb4] sm:$0xf0]  ;;  %487 = vst [vmem:[#allocation2 + $0x78] sm:$0xf] %v382_v1  ;;  %v722_v31 = vshrl.u32 %v618_v22, 16  ;;  %v725_v32 = vshll.u32 %v618_v22, 16 }
  0x61   : > { %v5365_v20 = vld [vmem:[#allocation3 + $0xc] sm:$0xf]  ;;  %491 = vst [vmem:[#allocation2 + $0x80] sm:$0xf] %v384_v4  ;;  %v710_v35 = vrot.slane %v708_v24, 4  ;;  %v713_v36 = vrot.slane %v711_v25, 5  ;;  %v4479_v37 = vor.u32 %v5382_v15, %v4476_v16 }
  0x62   : > { %v4412_v23 = vld [vmem:[#allocation3 + $0x2c] sm:$0xf0]  ;;  %507 = vst [vmem:[#allocation2 + $0xa0] sm:$0xf] %v392_v8  ;;  %v724_v41 = vrot.slane %v722_v31, 4  ;;  %v727_v44 = vrot.slane %v725_v32, 5 }
  0x63   : > { %v4415_v26 = vor.u32 %v5365_v20, %v4412_v23  ;;  %v4418_v27 = vld [vmem:[#allocation3 + $0x10] sm:$0xf]  ;;  %511 = vst [vmem:[#allocation2 + $0xa8] sm:$0xf] %v394_v11  ;;  %v5451_v50 = vld [vmem:[%s7126_s1 + $0x198] sm:$0xff]  ;;  %v714_v53 = vor.u32 %v713_v36, %v710_v35  ;;  %v5441_v62 = vld [vmem:[%s7126_s1 + $0x148] sm:$0xff] }
  0x64   : > { %v613_v33 = vld [vmem:[#allocation2 + $0x24] sm:$0x1]  ;;  %543 = vst [vmem:[#allocation2 + $0xe8] sm:$0xf] %v410_v17  ;;  %v5442_v56 = vld [vmem:[%s7126_s1 + $0x150] sm:$0xff]  ;;  %2089 = vmatpush.bf16.msrb.mxu2 %v5451_v50  ;;  %v728_v61 = vor.u32 %v727_v44, %v724_v41  ;;  %v5449_v1 = vld [vmem:[%s7126_s1 + $0x188] sm:$0xff] }
  0x65   : > { %v615_v39 = vld [vmem:[#allocation2 + $0x2c] sm:$0x1]  ;;  %v689_v40 = vshll.u32 %v613_v33, 16  ;;  %547 = vst [vmem:[#allocation2 + $0xf0] sm:$0xf] %v412_v21  ;;  %v5450_v59 = vld [vmem:[%s7126_s1 + $0x190] sm:$0xff]  ;;  %2061 = vmatpush.bf16.msrb.mxu1 %v5442_v56 }
  0x66   : > { %v5370_v42 = vld [vmem:[#allocation3 + $0x30] sm:$0xf0]  ;;  %v703_v43 = vshll.u32 %v615_v39, 16  ;;  %454 = vst [vmem:[#allocation2 + $0x34] sm:$0x1] %v453_v30  ;;  %v715_v0 = vrot.slane %v714_v53, 4 }
  0x67   : > { %2006 = vmatmul.bf16.vlgmr.msrb.gmra.mxu3 %v4415_v26  ;;  %v4419_v45 = vor.u32 %v5370_v42, %v4418_v27  ;;  %v691_v47 = vrot.slane %v689_v40, 5  ;;  %v594_v49 = vld [vmem:[#allocation2 + $0x78] sm:$0xf]  ;;  %458 = vst [vmem:[#allocation2 + $0x3c] sm:$0x1] %v457_v34  ;;  %v324_v3 = vld [vmem:[%s5716_s20 + $0x160] sm:$0xff] }
  0x68   : > { %v705_v51 = vrot.slane %v703_v43, 5  ;;  %v595_v52 = vld [vmem:[#allocation2 + $0x80] sm:$0xf]  ;;  %602 = vst [vmem:[#allocation3 + $0xdc] sm:$0xf] %v594_v49  ;;  %v326_v4 = vld [vmem:[%s5716_s20 + $0x170] sm:$0xff]  ;;  %2090 = vmatpush.bf16.msrb.mxu2 %v5450_v59  ;;  %v396_v7 = vpack.c.bf16 %v324_v3, %v324_v3 }
  0x69   : > { %1958 = vmatmul.bf16.gmra.mxu1 %v4479_v37  ;;  %2035 = vmatmul.bf16.vlgmr.msrb.gmra.mxu0 %v4419_v45  ;;  %v692_v54 = vsel %vm5860_vm5, %v6018_v29, %v691_v47  ;;  %603 = vst [vmem:[#allocation3 + $0x100] sm:$0xf] %v595_v52  ;;  %v754_v55 = vld [vmem:[#allocation2 + $0xa0] sm:$0xf]  ;;  %v398_v8 = vpack.c.bf16 %v326_v4, %v326_v4  ;;  %v342_v9 = vld [vmem:[%s5716_s20 + $0x1f0] sm:$0xff]  ;;  %v729_v10 = vrot.slane %v728_v61, 4 }
  0x6a   : > { %v706_v57 = vsel %vm5860_vm5, %v6037_v46, %v705_v51  ;;  %747 = vst [vmem:[#allocation3 + $0x98] sm:$0xf] %v692_v54  ;;  %v755_v58 = vld [vmem:[#allocation2 + $0xa8] sm:$0xf]  ;;  %v5460_v29 = vld [vmem:[%s7126_s1 + $0x1e0] sm:$0xff]  ;;  %2062 = vmatpush.bf16.msrb.mxu1 %v5441_v62  ;;  %v414_v14 = vpack.c.bf16 %v342_v9, %v342_v9  ;;  %v5459_v22 = vld [vmem:[%s7126_s1 + $0x1d8] sm:$0xff] }
  0x6b   : > { %748 = vst [vmem:[#allocation3 + $0xbc] sm:$0xf] %v706_v57  ;;  %v771_v60 = vld [vmem:[#allocation2 + $0xe8] sm:$0xf]  ;;  %2117 = vmatpush.bf16.msra.mxu3 %v5460_v29  ;;  %v5440_v12 = vld [vmem:[%s7126_s1 + $0x140] sm:$0xff]  ;;  %v5467_v4 = vld [vmem:[%s7126_s1 + $0x218] sm:$0xff] }
  0x6c   : > { %v5469_v46 = vld [vmem:[%s7126_s1 + $0x228] sm:$0xff]  ;;  %762 = vst [vmem:[#allocation3 + $0x54] sm:$0xf] %v754_v55  ;;  %v772_v63 = vld [vmem:[#allocation2 + $0xf0] sm:$0xf]  ;;  %v344_v13 = vld [vmem:[%s5716_s20 + $0x200] sm:$0xff]  ;;  %2091 = vmatpush.bf16.msrb.mxu2 %v5449_v1 }
  0x6d   : > { %763 = vst [vmem:[#allocation3 + $0x78] sm:$0xf] %v755_v58  ;;  %v617_v2 = vld [vmem:[#allocation2 + $0x34] sm:$0x1]  ;;  %2145 = vmatpush.bf16.msra.mxu0 %v5469_v46  ;;  %v5448_v18 = vld [vmem:[%s7126_s1 + $0x180] sm:$0xff]  ;;  %v416_v21 = vpack.c.bf16 %v344_v13, %v344_v13 }
  0x6e   : > { %779 = vst [vmem:[#allocation3 + $0x58] sm:$0xf] %v771_v60  ;;  %v619_v5 = vld [vmem:[#allocation2 + $0x3c] sm:$0x1]  ;;  %v717_v6 = vshll.u32 %v617_v2, 16  ;;  %2063 = vmatpush.bf16.msrb.mxu1 %v5440_v12  ;;  %v5468_v29 = vld [vmem:[%s7126_s1 + $0x220] sm:$0xff] }
  0x6f   : > { %780 = vst [vmem:[#allocation3 + $0x7c] sm:$0xf] %v772_v63  ;;  %v731_v11 = vshll.u32 %v619_v5, 16  ;;  %v5391_v15 = vld [vmem:[#allocation3 + $0xdc] sm:$0xf]  ;;  %2118 = vmatpush.bf16.msra.mxu3 %v5459_v22  ;;  %v5458_v60 = vld [vmem:[%s7126_s1 + $0x1d0] sm:$0xff] }
  0x70   : > { %v4512_v16 = vld [vmem:[#allocation3 + $0xfc] sm:$0xf0]  ;;  %v719_v17 = vrot.slane %v717_v6, 5  ;;  %515 = vst [vmem:[#allocation2 + $0xb0] sm:$0xf] %v396_v7  ;;  %2092 = vmatpush.bf16.msrb.mxu2 %v5448_v18 }
  0x71   : > { %v4482_v19 = vld [vmem:[#allocation3 + $0x98] sm:$0xf]  ;;  %v733_v20 = vrot.slane %v731_v11, 5  ;;  %519 = vst [vmem:[#allocation2 + $0xb8] sm:$0xf] %v398_v8  ;;  %v4515_v36 = vor.u32 %v5391_v15, %v4512_v16  ;;  %2146 = vmatpush.bf16.msra.mxu0 %v5468_v29  ;;  %v328_v5 = vld [vmem:[%s5716_s20 + $0x180] sm:$0xff] }
  0x72   : > { %v5387_v23 = vld [vmem:[#allocation3 + $0xb8] sm:$0xf0]  ;;  %v720_v24 = vsel %vm5860_vm5, %v715_v0, %v719_v17  ;;  %551 = vst [vmem:[#allocation2 + $0xf8] sm:$0xf] %v414_v14  ;;  %v317_v25 = vld [vmem:[%s5716_s20 + $0x128] sm:$0x1]  ;;  %v400_v9 = vpack.c.bf16 %v328_v5, %v328_v5 }
  0x73   : > { %v4483_v26 = vor.u32 %v5387_v23, %v4482_v19  ;;  %v5374_v27 = vld [vmem:[#allocation3 + $0x54] sm:$0xf]  ;;  %v734_v30 = vsel %vm5860_vm5, %v729_v10, %v733_v20  ;;  %749 = vst [vmem:[#allocation3 + $0xe0] sm:$0xf] %v720_v24  ;;  %v319_v31 = vld [vmem:[%s5716_s20 + $0x138] sm:$0x1]  ;;  %v389_v32 = vpack.c.bf16 %v317_v25, %v317_v25  ;;  %2119 = vmatpush.bf16.msra.mxu3 %v5458_v60 }
  0x74   : > { %v4448_v33 = vld [vmem:[#allocation3 + $0x74] sm:$0xf0]  ;;  %750 = vst [vmem:[#allocation3 + $0x104] sm:$0xf] %v734_v30  ;;  %v391_v34 = vpack.c.bf16 %v319_v31, %v319_v31  ;;  %v500_v35 = vld [vmem:[#allocation2 + $0x94] sm:$0x1] }
  0x75   : > { %1987 = vmatmul.bf16.gmra.mxu2 %v4483_v26  ;;  %v4451_v37 = vor.u32 %v5374_v27, %v4448_v33  ;;  %v4454_v39 = vld [vmem:[#allocation3 + $0x58] sm:$0xf]  ;;  %555 = vst [vmem:[#allocation2 + $0x100] sm:$0xf] %v416_v21  ;;  %v501_v40 = vsel %vm5768_vm2, %v389_v32, %v500_v35  ;;  %v504_v41 = vld [vmem:[#allocation2 + $0x9c] sm:$0x1]  ;;  %2147 = vmatpush.bf16.msra.mxu0 %v5467_v4 }
  0x76   : > { %v5379_v42 = vld [vmem:[#allocation3 + $0x78] sm:$0xf0]  ;;  %502 = vst [vmem:[#allocation2 + $0x94] sm:$0x1] %v501_v40  ;;  %v505_v43 = vsel %vm5768_vm2, %v391_v34, %v504_v41  ;;  %v785_v44 = vld [vmem:[#allocation2 + $0x90] sm:$0xf] }
  0x77   : > { %2011 = vmatmul.bf16.gmra.mxu3 %v4451_v37  ;;  %v4455_v45 = vor.u32 %v5379_v42, %v4454_v39  ;;  %v756_v47 = vld [vmem:[#allocation2 + $0xb0] sm:$0xf]  ;;  %506 = vst [vmem:[#allocation2 + $0x9c] sm:$0x1] %v505_v43  ;;  %v787_v49 = vld [vmem:[#allocation2 + $0x98] sm:$0xf] }
  0x78   : > { %v757_v50 = vld [vmem:[#allocation2 + $0xb8] sm:$0xf]  ;;  %764 = vst [vmem:[#allocation3 + $0x9c] sm:$0xf] %v756_v47  ;;  %v802_v51 = vshrl.u32 %v785_v44, 16  ;;  %v805_v52 = vshll.u32 %v785_v44, 16 }
  0x79   : > { %1963 = vmatmul.bf16.gmra.mxu1 %v4515_v36  ;;  %2040 = vmatmul.bf16.gmra.mxu0 %v4455_v45  ;;  %765 = vst [vmem:[#allocation3 + $0xc0] sm:$0xf] %v757_v50  ;;  %v773_v53 = vld [vmem:[#allocation2 + $0xf8] sm:$0xf]  ;;  %v816_v54 = vshrl.u32 %v787_v49, 16  ;;  %v819_v55 = vshll.u32 %v787_v49, 16 }
  0x7a   : > { %781 = vst [vmem:[#allocation3 + $0xa0] sm:$0xf] %v773_v53  ;;  %v804_v56 = vrot.slane %v802_v51, 4  ;;  %v807_v57 = vrot.slane %v805_v52, 5  ;;  %v4518_v61 = vld [vmem:[#allocation3 + $0xe0] sm:$0xf] }
  0x7b   : > { %v818_v58 = vrot.slane %v816_v54, 4  ;;  %v821_v59 = vrot.slane %v819_v55, 5  ;;  %v5396_v46 = vld [vmem:[#allocation3 + $0x100] sm:$0xf0]  ;;  %v930_v0 = vld [vmem:[#allocation2 + $0x8] sm:$0xf] }
  0x7c   : > { %v774_v62 = vld [vmem:[#allocation2 + $0x100] sm:$0xf]  ;;  %v808_v63 = vor.u32 %v807_v57, %v804_v56  ;;  %v931_v1 = vld [vmem:[#allocation2 + $0x10] sm:$0xf]  ;;  %938 = vst [vmem:[#allocation3 + $0x18] sm:$0xf] %v930_v0  ;;  %v4519_v16 = vor.u32 %v5396_v46, %v4518_v61 }
  0x7d   : > { %782 = vst [vmem:[#allocation3 + $0xc4] sm:$0xf] %v774_v62  ;;  %v786_v2 = vld [vmem:[#allocation2 + $0x94] sm:$0x1]  ;;  %v822_v3 = vor.u32 %v821_v59, %v818_v58  ;;  %v348_v21 = vld [vmem:[%s5716_s20 + $0x220] sm:$0xff]  ;;  %v5457_v41 = vld [vmem:[%s7126_s1 + $0x1c8] sm:$0xff] }
  0x7e   : > { %v788_v6 = vld [vmem:[#allocation2 + $0x9c] sm:$0x1]  ;;  %v809_v7 = vrot.slane %v808_v63, 4  ;;  %v811_v8 = vshll.u32 %v786_v2, 16  ;;  %939 = vst [vmem:[#allocation3 + $0x3c] sm:$0xf] %v931_v1  ;;  %v420_v31 = vpack.c.bf16 %v348_v21, %v348_v21  ;;  %2120 = vmatpush.bf16.msra.mxu3 %v5457_v41 }
  0x7f   : > { %v5383_v10 = vld [vmem:[#allocation3 + $0x9c] sm:$0xf]  ;;  %v823_v11 = vrot.slane %v822_v3, 4  ;;  %v825_v12 = vshll.u32 %v788_v6, 16  ;;  %v330_v15 = vld [vmem:[%s5716_s20 + $0x190] sm:$0xff]  ;;  %v5456_v54 = vld [vmem:[%s7126_s1 + $0x1c0] sm:$0xff] }
  0x80   : > { %v4484_v13 = vld [vmem:[#allocation3 + $0xbc] sm:$0xf0]  ;;  %v813_v14 = vrot.slane %v811_v8, 5  ;;  %523 = vst [vmem:[#allocation2 + $0xc0] sm:$0xf] %v400_v9  ;;  %v402_v19 = vpack.c.bf16 %v330_v15, %v330_v15  ;;  %v346_v20 = vld [vmem:[%s5716_s20 + $0x210] sm:$0xff] }
  0x81   : > { %v4490_v17 = vld [vmem:[#allocation3 + $0xa0] sm:$0xf]  ;;  %v827_v18 = vrot.slane %v825_v12, 5  ;;  %v4487_v22 = vor.u32 %v5383_v10, %v4484_v13  ;;  %v418_v24 = vpack.c.bf16 %v346_v20, %v346_v20  ;;  %v321_v25 = vld [vmem:[%s5716_s20 + $0x148] sm:$0x1]  ;;  %v5466_v53 = vld [vmem:[%s7126_s1 + $0x210] sm:$0xff] }
  0x82   : > { %v814_v23 = vsel %vm5860_vm5, %v809_v7, %v813_v14  ;;  %v323_v26 = vld [vmem:[%s5716_s20 + $0x158] sm:$0x1]  ;;  %v508_v27 = vld [vmem:[#allocation2 + $0xa4] sm:$0x1]  ;;  %v393_v32 = vpack.c.bf16 %v321_v25, %v321_v25  ;;  %v512_v34 = vld [vmem:[#allocation2 + $0xac] sm:$0x1]  ;;  %2148 = vmatpush.bf16.msra.mxu0 %v5466_v53  ;;  %2121 = vmatpush.bf16.msra.mxu3 %v5456_v54 }
  0x83   : > { %v828_v30 = vsel %vm5860_vm5, %v823_v11, %v827_v18  ;;  %921 = vst [vmem:[#allocation3 + $0x14] sm:$0xf] %v814_v23  ;;  %v395_v33 = vpack.c.bf16 %v323_v26, %v323_v26  ;;  %v789_v35 = vld [vmem:[#allocation2 + $0xa0] sm:$0xf]  ;;  %v791_v37 = vld [vmem:[#allocation2 + $0xa8] sm:$0xf] }
  0x84   : > { %v5388_v36 = vld [vmem:[#allocation3 + $0xc0] sm:$0xf0]  ;;  %922 = vst [vmem:[#allocation3 + $0x38] sm:$0xf] %v828_v30  ;;  %v830_v40 = vshrl.u32 %v789_v35, 16  ;;  %v509_v42 = vsel %vm5768_vm2, %v393_v32, %v508_v27  ;;  %v833_v43 = vshll.u32 %v789_v35, 16 }
  0x85   : > { %1992 = vmatmul.bf16.gmra.mxu2 %v4519_v16  ;;  %v4491_v39 = vor.u32 %v5388_v36, %v4490_v17  ;;  %527 = vst [vmem:[#allocation2 + $0xc8] sm:$0xf] %v402_v19  ;;  %v844_v44 = vshrl.u32 %v791_v37, 16  ;;  %v513_v47 = vsel %vm5768_vm2, %v395_v33, %v512_v34  ;;  %v847_v50 = vshll.u32 %v791_v37, 16  ;;  %v932_v56 = vld [vmem:[#allocation2 + $0x18] sm:$0xf] }
  0x86   : > { %559 = vst [vmem:[#allocation2 + $0x108] sm:$0xf] %v418_v24  ;;  %v832_v49 = vrot.slane %v830_v40, 4  ;;  %v835_v51 = vrot.slane %v833_v43, 5  ;;  %v5465_v57 = vld [vmem:[%s7126_s1 + $0x208] sm:$0xff]  ;;  %v5464_v2 = vld [vmem:[%s7126_s1 + $0x200] sm:$0xff] }
  0x87   : > { %2016 = vmatmul.bf16.gmra.mxu3 %v4487_v22  ;;  %v758_v45 = vld [vmem:[#allocation2 + $0xc0] sm:$0xf]  ;;  %563 = vst [vmem:[#allocation2 + $0x110] sm:$0xf] %v420_v31  ;;  %v846_v52 = vrot.slane %v844_v44, 4  ;;  %v849_v55 = vrot.slane %v847_v50, 5  ;;  %2149 = vmatpush.bf16.msra.mxu0 %v5465_v57 }
  0x88   : > { %766 = vst [vmem:[#allocation3 + $0xe4] sm:$0xf] %v758_v45  ;;  %v933_v59 = vld [vmem:[#allocation2 + $0x20] sm:$0xf]  ;;  %v836_v60 = vor.u32 %v835_v51, %v832_v49  ;;  %v4426_v46 = vld [vmem:[#allocation3 + $0x18] sm:$0xf] }
  0x89   : > { %2045 = vmatmul.bf16.gmra.mxu0 %v4491_v39  ;;  %510 = vst [vmem:[#allocation2 + $0xa4] sm:$0x1] %v509_v42  ;;  %v5371_v62 = vld [vmem:[#allocation3 + $0x38] sm:$0xf0]  ;;  %v850_v1 = vor.u32 %v849_v55, %v846_v52  ;;  %v325_v4 = vld [vmem:[%s5716_s20 + $0x168] sm:$0x1] }
  0x8a   : > { %v5366_v58 = vld [vmem:[#allocation3 + $0x14] sm:$0xf]  ;;  %514 = vst [vmem:[#allocation2 + $0xac] sm:$0x1] %v513_v47  ;;  %v837_v5 = vrot.slane %v836_v60, 4  ;;  %v397_v7 = vpack.c.bf16 %v325_v4, %v325_v4  ;;  %v4427_v12 = vor.u32 %v5371_v62, %v4426_v46 }
  0x8b   : > { %v4420_v29 = vld [vmem:[#allocation3 + $0x34] sm:$0xf0]  ;;  %940 = vst [vmem:[#allocation3 + $0x60] sm:$0xf] %v932_v56  ;;  %v516_v10 = vld [vmem:[#allocation2 + $0xb4] sm:$0x1]  ;;  %2150 = vmatpush.bf16.msra.mxu0 %v5464_v2 }
  0x8c   : > { %v4423_v61 = vor.u32 %v5366_v58, %v4420_v29  ;;  %v759_v63 = vld [vmem:[#allocation2 + $0xc8] sm:$0xf]  ;;  %941 = vst [vmem:[#allocation3 + $0x84] sm:$0xf] %v933_v59  ;;  %v327_v6 = vld [vmem:[%s5716_s20 + $0x178] sm:$0x1]  ;;  %v517_v16 = vsel %vm5768_vm2, %v397_v7, %v516_v10 }
  0x8d   : > { %767 = vst [vmem:[#allocation3 + $0x108] sm:$0xf] %v759_v63  ;;  %v775_v0 = vld [vmem:[#allocation2 + $0x108] sm:$0xf]  ;;  %v399_v9 = vpack.c.bf16 %v327_v6, %v327_v6  ;;  %v520_v11 = vld [vmem:[#allocation2 + $0xbc] sm:$0x1] }
  0x8e   : > { %2064 = vmatmul.bf16.vlgmr.msrb.gmra.mxu1 %v4423_v61  ;;  %v776_v3 = vld [vmem:[#allocation2 + $0x110] sm:$0xf]  ;;  %783 = vst [vmem:[#allocation3 + $0xe8] sm:$0xf] %v775_v0  ;;  %v851_v15 = vrot.slane %v850_v1, 4 }
  0x8f   : > { %784 = vst [vmem:[#allocation3 + $0x10c] sm:$0xf] %v776_v3  ;;  %v793_v17 = vld [vmem:[#allocation2 + $0xb0] sm:$0xf]  ;;  %v5392_v18 = vld [vmem:[#allocation3 + $0xe4] sm:$0xf]  ;;  %v521_v20 = vsel %vm5768_vm2, %v399_v9, %v520_v11 }
  0x90   : > { %v790_v8 = vld [vmem:[#allocation2 + $0xa4] sm:$0x1]  ;;  %518 = vst [vmem:[#allocation2 + $0xb4] sm:$0x1] %v517_v16  ;;  %v858_v21 = vshrl.u32 %v793_v17, 16  ;;  %v861_v23 = vshll.u32 %v793_v17, 16 }
  0x91   : > { %v792_v13 = vld [vmem:[#allocation2 + $0xac] sm:$0x1]  ;;  %v839_v14 = vshll.u32 %v790_v8, 16  ;;  %522 = vst [vmem:[#allocation2 + $0xbc] sm:$0x1] %v521_v20 }
  0x92   : > { %v853_v19 = vshll.u32 %v792_v13, 16  ;;  %v795_v26 = vld [vmem:[#allocation2 + $0xb8] sm:$0xf]  ;;  %v860_v27 = vrot.slane %v858_v21, 4  ;;  %v863_v33 = vrot.slane %v861_v23, 5 }
  0x93   : > { %v841_v22 = vrot.slane %v839_v14, 5  ;;  %v872_v34 = vshrl.u32 %v795_v26, 16  ;;  %v947_v35 = vld [vmem:[#allocation2 + $0x50] sm:$0xf]  ;;  %v875_v39 = vshll.u32 %v795_v26, 16 }
  0x94   : > { %v4520_v24 = vld [vmem:[#allocation3 + $0x104] sm:$0xf0]  ;;  %v855_v25 = vrot.slane %v853_v19, 5  ;;  %v864_v41 = vor.u32 %v863_v33, %v860_v27  ;;  %v948_v43 = vld [vmem:[#allocation2 + $0x58] sm:$0xf] }
  0x95   : > { %2093 = vmatmul.bf16.vlgmr.msrb.gmra.mxu2 %v4427_v12  ;;  %v4523_v30 = vor.u32 %v5392_v18, %v4520_v24  ;;  %v4526_v31 = vld [vmem:[#allocation3 + $0xe8] sm:$0xf]  ;;  %v842_v32 = vsel %vm5860_vm5, %v837_v5, %v841_v22  ;;  %v874_v42 = vrot.slane %v872_v34, 4  ;;  %v877_v44 = vrot.slane %v875_v39, 5  ;;  %955 = vst [vmem:[#allocation3 + $0x1c] sm:$0xf] %v947_v35 }
  0x96   : > { %v5397_v36 = vld [vmem:[#allocation3 + $0x108] sm:$0xf0]  ;;  %v856_v37 = vsel %vm5860_vm5, %v851_v15, %v855_v25  ;;  %923 = vst [vmem:[#allocation3 + $0x5c] sm:$0xf] %v842_v32  ;;  %v963_v45 = vld [vmem:[#allocation2 + $0x8] sm:$0xf] }
  0x97   : > { %2021 = vmatmul.bf16.gmra.mxu3 %v4523_v30  ;;  %v4527_v40 = vor.u32 %v5397_v36, %v4526_v31  ;;  %924 = vst [vmem:[#allocation3 + $0x80] sm:$0xf] %v856_v37  ;;  %v794_v47 = vld [vmem:[#allocation2 + $0xb4] sm:$0x1]  ;;  %v865_v49 = vrot.slane %v864_v41, 4  ;;  %v980_v50 = vshrl.u32 %v963_v45, 16  ;;  %v878_v53 = vor.u32 %v877_v44, %v874_v42 }
  0x98   : > { %956 = vst [vmem:[#allocation3 + $0x40] sm:$0xf] %v948_v43  ;;  %v796_v51 = vld [vmem:[#allocation2 + $0xbc] sm:$0x1]  ;;  %v867_v52 = vshll.u32 %v794_v47, 16  ;;  %v983_v55 = vshll.u32 %v963_v45, 16 }
  0x99   : > { %2050 = vmatmul.bf16.gmra.mxu0 %v4527_v40  ;;  %v964_v54 = vld [vmem:[#allocation2 + $0xc] sm:$0x1]  ;;  %v881_v56 = vshll.u32 %v796_v51, 16  ;;  %v965_v57 = vld [vmem:[#allocation2 + $0x10] sm:$0xf]  ;;  %v982_v59 = vrot.slane %v980_v50, 4 }
  0x9a   : > { %v966_v58 = vld [vmem:[#allocation2 + $0x14] sm:$0x1]  ;;  %v4462_v29 = vld [vmem:[#allocation3 + $0x60] sm:$0xf]  ;;  %v5380_v60 = vld [vmem:[#allocation3 + $0x80] sm:$0xf0] }
  0x9b   : > { %v869_v61 = vrot.slane %v867_v52, 5  ;;  %v879_v46 = vrot.slane %v878_v53, 4  ;;  %v985_v62 = vrot.slane %v983_v55, 5  ;;  %v989_v63 = vshll.u32 %v964_v54, 16  ;;  %v934_v0 = vld [vmem:[#allocation2 + $0x28] sm:$0xf] }
  0x9c   : > { %v883_v2 = vrot.slane %v881_v56, 5  ;;  %v994_v3 = vshrl.u32 %v965_v57, 16  ;;  %v997_v4 = vshll.u32 %v965_v57, 16  ;;  %v1003_v5 = vshll.u32 %v966_v58, 16  ;;  %v935_v10 = vld [vmem:[#allocation2 + $0x30] sm:$0xf] }
  0x9d   : > { %v5375_v1 = vld [vmem:[#allocation3 + $0x5c] sm:$0xf]  ;;  %v870_v7 = vsel %vm5860_vm5, %v865_v49, %v869_v61  ;;  %v986_v8 = vor.u32 %v985_v62, %v982_v59  ;;  %v991_v9 = vrot.slane %v989_v63, 5  ;;  %v4463_v19 = vor.u32 %v5380_v60, %v4462_v29  ;;  %942 = vst [vmem:[#allocation3 + $0xa8] sm:$0xf] %v934_v0  ;;  %v296_v43 = vld [vmem:[%s5716_s20 + $0x80] sm:$0xff] }
  0x9e   : > { %v4456_v6 = vld [vmem:[#allocation3 + $0x7c] sm:$0xf0]  ;;  %v884_v12 = vsel %vm5860_vm5, %v879_v46, %v883_v2  ;;  %925 = vst [vmem:[#allocation3 + $0xa4] sm:$0xf] %v870_v7  ;;  %v5367_v13 = vld [vmem:[#allocation3 + $0x1c] sm:$0xf]  ;;  %v368_v29 = vpack.c.bf16 %v296_v43, %v296_v43 }
  0x9f   : > { %v4459_v11 = vor.u32 %v5375_v1, %v4456_v6  ;;  %v996_v14 = vrot.slane %v994_v3, 4  ;;  %v999_v15 = vrot.slane %v997_v4, 5  ;;  %926 = vst [vmem:[#allocation3 + $0xc8] sm:$0xf] %v884_v12  ;;  %v4428_v16 = vld [vmem:[#allocation3 + $0x3c] sm:$0xf0] }
  0xa0   : > { %v987_v17 = vrot.slane %v986_v8, 4  ;;  %v1005_v18 = vrot.slane %v1003_v5, 5  ;;  %v329_v21 = vld [vmem:[%s5716_s20 + $0x188] sm:$0x1]  ;;  %v331_v22 = vld [vmem:[%s5716_s20 + $0x198] sm:$0x1]  ;;  %v4431_v30 = vor.u32 %v5367_v13, %v4428_v16 }
  0xa1   : > { %2069 = vmatmul.bf16.gmra.mxu1 %v4459_v11  ;;  %v1000_v20 = vor.u32 %v999_v15, %v996_v14  ;;  %943 = vst [vmem:[#allocation3 + $0xcc] sm:$0xf] %v935_v10  ;;  %v401_v24 = vpack.c.bf16 %v329_v21, %v329_v21  ;;  %v403_v25 = vpack.c.bf16 %v331_v22, %v331_v22  ;;  %v524_v26 = vld [vmem:[#allocation2 + $0xc4] sm:$0x1]  ;;  %v528_v27 = vld [vmem:[#allocation2 + $0xcc] sm:$0x1] }
  0xa2   : > { %v992_v23 = vsel %vm5860_vm5, %v987_v17, %v991_v9  ;;  %v797_v32 = vld [vmem:[#allocation2 + $0xc0] sm:$0xf]  ;;  %v799_v35 = vld [vmem:[#allocation2 + $0xc8] sm:$0xf]  ;;  %v967_v54 = vld [vmem:[#allocation2 + $0x18] sm:$0xf] }
  0xa3   : > { %v1001_v31 = vrot.slane %v1000_v20, 4  ;;  %1099 = vst [vmem:[#allocation3 + $0x20] sm:$0xf] %v992_v23  ;;  %v525_v33 = vsel %vm5768_vm2, %v401_v24, %v524_v26  ;;  %v529_v34 = vsel %vm5768_vm2, %v403_v25, %v528_v27  ;;  %v886_v36 = vshrl.u32 %v797_v32, 16  ;;  %v949_v42 = vld [vmem:[#allocation2 + $0x60] sm:$0xf] }
  0xa4   : > { %v889_v37 = vshll.u32 %v797_v32, 16  ;;  %526 = vst [vmem:[#allocation2 + $0xc4] sm:$0x1] %v525_v33  ;;  %v900_v40 = vshrl.u32 %v799_v35, 16  ;;  %v903_v41 = vshll.u32 %v799_v35, 16  ;;  %v1008_v59 = vshrl.u32 %v967_v54, 16 }
  0xa5   : > { %2098 = vmatmul.bf16.gmra.mxu2 %v4463_v19  ;;  %v1006_v39 = vsel %vm5860_vm5, %v1001_v31, %v1005_v18  ;;  %v888_v44 = vrot.slane %v886_v36, 4  ;;  %v950_v47 = vld [vmem:[#allocation2 + $0x68] sm:$0xf]  ;;  %v5384_v49 = vld [vmem:[#allocation3 + $0xa4] sm:$0xf]  ;;  %v1011_v46 = vshll.u32 %v967_v54, 16 }
  0xa6   : > { %1100 = vst [vmem:[#allocation3 + $0x44] sm:$0xf] %v1006_v39  ;;  %v891_v45 = vrot.slane %v889_v37, 5  ;;  %v902_v50 = vrot.slane %v900_v40, 4  ;;  %v905_v51 = vrot.slane %v903_v41, 5  ;;  %v1010_v4 = vrot.slane %v1008_v59, 4 }
  0xa7   : > { %2122 = vmatmul.bf16.vlgmr.msra.gmra.mxu3 %v4431_v30  ;;  %530 = vst [vmem:[#allocation2 + $0xcc] sm:$0x1] %v529_v34  ;;  %v4492_v52 = vld [vmem:[#allocation3 + $0xc4] sm:$0xf0]  ;;  %v968_v56 = vld [vmem:[#allocation2 + $0x1c] sm:$0x1] }
  0xa8   : > { %v892_v53 = vor.u32 %v891_v45, %v888_v44  ;;  %957 = vst [vmem:[#allocation3 + $0x64] sm:$0xf] %v949_v42  ;;  %v906_v55 = vor.u32 %v905_v51, %v902_v50  ;;  %v969_v58 = vld [vmem:[#allocation2 + $0x20] sm:$0xf]  ;;  %v4495_v60 = vor.u32 %v5384_v49, %v4492_v52  ;;  %v970_v61 = vld [vmem:[#allocation2 + $0x24] sm:$0x1] }
  0xa9   : > { %958 = vst [vmem:[#allocation3 + $0x88] sm:$0xf] %v950_v47  ;;  %v1017_v62 = vshll.u32 %v968_v56, 16  ;;  %v1022_v63 = vshrl.u32 %v969_v58, 16  ;;  %v4498_v0 = vld [vmem:[#allocation3 + $0xa8] sm:$0xf] }
  0xaa   : > { %v4434_v57 = vld [vmem:[#allocation3 + $0x20] sm:$0xf]  ;;  %v5389_v1 = vld [vmem:[#allocation3 + $0xc8] sm:$0xf0]  ;;  %v893_v3 = vrot.slane %v892_v53, 4  ;;  %v1025_v5 = vshll.u32 %v969_v58, 16 }
  0xab   : > { %v798_v2 = vld [vmem:[#allocation2 + $0xc4] sm:$0x1]  ;;  %v1031_v6 = vshll.u32 %v970_v61, 16  ;;  %v907_v9 = vrot.slane %v906_v55, 4  ;;  %v1013_v10 = vrot.slane %v1011_v46, 5  ;;  %v1024_v11 = vrot.slane %v1022_v63, 4 }
  0xac   : > { %v895_v8 = vshll.u32 %v798_v2, 16  ;;  %v1019_v14 = vrot.slane %v1017_v62, 5  ;;  %v1027_v15 = vrot.slane %v1025_v5, 5  ;;  %459 = vst [vmem:[#allocation2 + $0x40] sm:$0xf] %v368_v29  ;;  %v4499_v24 = vor.u32 %v5389_v1, %v4498_v0  ;;  %v314_v32 = vld [vmem:[%s5716_s20 + $0x110] sm:$0xff] }
  0xad   : > { %v5372_v7 = vld [vmem:[#allocation3 + $0x40] sm:$0xf0]  ;;  %v1014_v18 = vor.u32 %v1013_v10, %v1010_v4  ;;  %v1033_v19 = vrot.slane %v1031_v6, 5  ;;  %v936_v20 = vld [vmem:[#allocation2 + $0x38] sm:$0xf]  ;;  %v386_v47 = vpack.c.bf16 %v314_v32, %v314_v32 }
  0xae   : > { %v4435_v12 = vor.u32 %v5372_v7, %v4434_v57  ;;  %v800_v13 = vld [vmem:[#allocation2 + $0xcc] sm:$0x1]  ;;  %v897_v16 = vrot.slane %v895_v8, 5  ;;  %v1028_v23 = vor.u32 %v1027_v15, %v1024_v11  ;;  %944 = vst [vmem:[#allocation3 + $0xf0] sm:$0xf] %v936_v20 }
  0xaf   : > { %v909_v17 = vshll.u32 %v800_v13, 16  ;;  %v5376_v21 = vld [vmem:[#allocation3 + $0x64] sm:$0xf]  ;;  %v1015_v27 = vrot.slane %v1014_v18, 4  ;;  %v951_v30 = vld [vmem:[#allocation2 + $0x70] sm:$0xf] }
  0xb0   : > { %2151 = vmatmul.bf16.vlgmr.msra.gmra.mxu0 %v4435_v12  ;;  %v4464_v22 = vld [vmem:[#allocation3 + $0x84] sm:$0xf0]  ;;  %v898_v25 = vsel %vm5860_vm5, %v893_v3, %v897_v16  ;;  %v1029_v31 = vrot.slane %v1028_v23, 4  ;;  %v952_v36 = vld [vmem:[#allocation2 + $0x78] sm:$0xf]  ;;  %v6198_v16 = vpop.f32.mrf.mxu0 }
  0xb1   : > { %2074 = vmatmul.bf16.gmra.mxu1 %v4495_v60  ;;  %v911_v26 = vrot.slane %v909_v17, 5  ;;  %927 = vst [vmem:[#allocation3 + $0xec] sm:$0xf] %v898_v25  ;;  %v4467_v34 = vor.u32 %v5376_v21, %v4464_v22  ;;  %v1020_v35 = vsel %vm5860_vm5, %v1015_v27, %v1019_v14  ;;  %v971_v37 = vld [vmem:[#allocation2 + $0x28] sm:$0xf] }
  0xb2   : > { %959 = vst [vmem:[#allocation3 + $0xac] sm:$0xf] %v951_v30  ;;  %v972_v39 = vld [vmem:[#allocation2 + $0x2c] sm:$0x1]  ;;  %v1034_v40 = vsel %vm5860_vm5, %v1029_v31, %v1033_v19  ;;  %v973_v41 = vld [vmem:[#allocation2 + $0x30] sm:$0xf]  ;;  %v6204_v31 = vpop.f32.mrf.mxu1 }
  0xb3   : > { %v912_v33 = vsel %vm5860_vm5, %v907_v9, %v911_v26  ;;  %v974_v42 = vld [vmem:[#allocation2 + $0x34] sm:$0x1]  ;;  %1101 = vst [vmem:[#allocation3 + $0x68] sm:$0xf] %v1020_v35  ;;  %v937_v43 = vld [vmem:[#allocation2 + $0x40] sm:$0xf] }
  0xb4   : > { %928 = vst [vmem:[#allocation3 + $0x110] sm:$0xf] %v912_v33  ;;  %v1036_v44 = vshrl.u32 %v971_v37, 16  ;;  %v1039_v45 = vshll.u32 %v971_v37, 16  ;;  %v1045_v49 = vshll.u32 %v972_v39, 16  ;;  %v1050_v50 = vshrl.u32 %v973_v41, 16 }
  0xb5   : > { %2103 = vmatmul.bf16.gmra.mxu2 %v4499_v24  ;;  %1102 = vst [vmem:[#allocation3 + $0x8c] sm:$0xf] %v1034_v40  ;;  %v1053_v51 = vshll.u32 %v973_v41, 16  ;;  %v1059_v52 = vshll.u32 %v974_v42, 16  ;;  %v953_v29 = vld [vmem:[#allocation2 + $0x80] sm:$0xf] }
  0xb6   : > { %945 = vst [vmem:[#allocation3 + $0x114] sm:$0xf] %v937_v43  ;;  %v1038_v53 = vrot.slane %v1036_v44, 4  ;;  %v1041_v54 = vrot.slane %v1039_v45, 5  ;;  %v1052_v55 = vrot.slane %v1050_v50, 4  ;;  %v1047_v58 = vrot.slane %v1045_v49, 5  ;;  %v6206_v45 = vpop.f32.mrf.mxu3 }
  0xb7   : > { %2127 = vmatmul.bf16.gmra.mxu3 %v4467_v34  ;;  %960 = vst [vmem:[#allocation3 + $0xd0] sm:$0xf] %v952_v36  ;;  %v1055_v56 = vrot.slane %v1053_v51, 5  ;;  %v1061_v59 = vrot.slane %v1059_v52, 5  ;;  %v2994_v61 = vld [vmem:[#allocation4 + $0x48] sm:$0xf] }
  0xb8   : > { %v1042_v57 = vor.u32 %v1041_v54, %v1038_v53  ;;  %495 = vst [vmem:[#allocation2 + $0x88] sm:$0xf] %v386_v47  ;;  %v5393_v60 = vld [vmem:[#allocation3 + $0xec] sm:$0xf]  ;;  %v3017_v62 = vld [vmem:[#allocation4 + $0x48] sm:$0xf]  ;;  %v6210_v54 = vpop.f32.mrf.mxu0 }
  0xb9   : > { %v1056_v46 = vor.u32 %v1055_v56, %v1052_v55  ;;  %961 = vst [vmem:[#allocation3 + $0xf4] sm:$0xf] %v953_v29  ;;  %v3018_v1 = vld [vmem:[#allocation4 + $0x4c] sm:$0x1]  ;;  %v3118_v2 = vshrl.u32 %v3017_v62, 16  ;;  %v3121_v6 = vshll.u32 %v3017_v62, 16 }
  0xba   : > { %v1043_v0 = vrot.slane %v1042_v57, 4  ;;  %v4470_v3 = vld [vmem:[#allocation3 + $0x68] sm:$0xf]  ;;  %v4534_v4 = vld [vmem:[#allocation3 + $0xf0] sm:$0xf]  ;;  %v3127_v12 = vshll.u32 %v3018_v1, 16 }
  0xbb   : > { %v4528_v63 = vld [vmem:[#allocation3 + $0x10c] sm:$0xf0]  ;;  %v1057_v5 = vrot.slane %v1056_v46, 4  ;;  %v5385_v9 = vld [vmem:[#allocation3 + $0xac] sm:$0xf]  ;;  %v3120_v11 = vrot.slane %v3118_v2, 4 }
  0xbc   : > { %v4531_v7 = vor.u32 %v5393_v60, %v4528_v63  ;;  %v5381_v8 = vld [vmem:[#allocation3 + $0x88] sm:$0xf0]  ;;  %v1048_v10 = vsel %vm5860_vm5, %v1043_v0, %v1047_v58  ;;  %v297_v13 = vld [vmem:[%s5716_s20 + $0x88] sm:$0x1]  ;;  %v3123_v18 = vrot.slane %v3121_v6, 5  ;;  %v3129_v26 = vrot.slane %v3127_v12, 5 }
  0xbd   : > { %v4471_v14 = vor.u32 %v5381_v8, %v4470_v3  ;;  %v5398_v15 = vld [vmem:[#allocation3 + $0x110] sm:$0xf0]  ;;  %v1062_v17 = vsel %vm5860_vm5, %v1057_v5, %v1061_v59  ;;  %1103 = vst [vmem:[#allocation3 + $0xb0] sm:$0xf] %v1048_v10  ;;  %v369_v20 = vpack.c.bf16 %v297_v13, %v297_v13  ;;  %v460_v21 = vld [vmem:[#allocation2 + $0x44] sm:$0x1] }
  0xbe   : > { %3002 = vst [vmem:[#allocation3 + $0x114] sm:$0xf] %v2994_v61  ;;  %v4500_v19 = vld [vmem:[#allocation3 + $0xcc] sm:$0xf0]  ;;  %v3124_v23 = vor.u32 %v3123_v18, %v3120_v11  ;;  %v975_v24 = vld [vmem:[#allocation2 + $0x38] sm:$0xf]  ;;  %v4535_v25 = vor.u32 %v5398_v15, %v4534_v4  ;;  %v6214_v61 = vpop.f32.mrf.mxu1  ;;  %v6218_v1 = vpop.f32.mrf.mxu2 }
  0xbf   : > { %1104 = vst [vmem:[#allocation3 + $0xd4] sm:$0xf] %v1062_v17  ;;  %v954_v22 = vld [vmem:[#allocation2 + $0x88] sm:$0xf]  ;;  %v461_v27 = vsel %vm5768_vm2, %v369_v20, %v460_v21  ;;  %v976_v30 = vld [vmem:[#allocation2 + $0x3c] sm:$0x1]  ;;  %v4503_v32 = vor.u32 %v5385_v9, %v4500_v19  ;;  %v6220_v2 = vpop.f32.mrf.mxu3 }
  0xc0   : > { %2156 = vmatmul.bf16.gmra.mxu0 %v4471_v14  ;;  %962 = vst [vmem:[#allocation3 + $0x118] sm:$0xf] %v954_v22  ;;  %v3125_v33 = vrot.slane %v3124_v23, 4  ;;  %v977_v34 = vld [vmem:[#allocation2 + $0x40] sm:$0xf]  ;;  %v1064_v35 = vshrl.u32 %v975_v24, 16 }
  0xc1   : > { %2079 = vmatmul.bf16.gmra.mxu1 %v4531_v7  ;;  %462 = vst [vmem:[#allocation2 + $0x44] sm:$0x1] %v461_v27  ;;  %v1067_v36 = vshll.u32 %v975_v24, 16  ;;  %v1073_v37 = vshll.u32 %v976_v30, 16  ;;  %v1078_v39 = vshrl.u32 %v977_v34, 16  ;;  %v1081_v40 = vshll.u32 %v977_v34, 16 }
  0xc2   : > { %v1066_v41 = vrot.slane %v1064_v35, 4  ;;  %v3130_v47 = vsel %vm5860_vm5, %v3125_v33, %v3129_v26  ;;  %v3161_v62 = vld [vmem:[#allocation4 + $0x48] sm:$0xe]  ;;  %v3162_v63 = vld [vmem:[#allocation4 + $0x4c] sm:$0x1]  ;;  %v5483_v17 = vld [vmem:[%s7130_s5 + $0x38] sm:$0xff] }
  0xc3   : > { %v1069_v42 = vrot.slane %v1067_v36, 5  ;;  %v1080_v43 = vrot.slane %v1078_v39, 4  ;;  %v1083_v44 = vrot.slane %v1081_v40, 5  ;;  %v1075_v50 = vrot.slane %v1073_v37, 5  ;;  %v5394_v3 = vld [vmem:[#allocation3 + $0xf4] sm:$0xf]  ;;  %2474 = vmatpush.bf16.msra.mxu1 %v5483_v17 }
  0xc4   : > { %v4506_v52 = vld [vmem:[#allocation3 + $0xb0] sm:$0xf]  ;;  %v4903_v4 = vrot.slane %v3161_v62, 9  ;;  %v3209_v5 = vrot.slane %v3162_v63, 5  ;;  %v5481_v22 = vld [vmem:[%s7130_s5 + $0x28] sm:$0xff]  ;;  %v5479_v27 = vld [vmem:[%s7130_s5 + $0x18] sm:$0xff] }
  0xc5   : > { %2108 = vmatmul.bf16.gmra.mxu2 %v4535_v25  ;;  %v1070_v49 = vor.u32 %v1069_v42, %v1066_v41  ;;  %v1084_v51 = vor.u32 %v1083_v44, %v1080_v43  ;;  %v5482_v19 = vld [vmem:[%s7130_s5 + $0x30] sm:$0xff]  ;;  %v5480_v25 = vld [vmem:[%s7130_s5 + $0x20] sm:$0xff]  ;;  %v5527_v36 = vld [vmem:[%s7128_s3 + $0x38] sm:$0xff] }
  0xc6   : > { %v5390_v53 = vld [vmem:[#allocation3 + $0xd0] sm:$0xf0]  ;;  %v3210_v8 = vsel %vm5914_vm8, %v4903_v4, %v3209_v5  ;;  %v6228_v12 = vpop.f32.mrf.mxu2  ;;  %v5477_v37 = vld [vmem:[%s7130_s5 + $0x8] sm:$0xff]  ;;  %4031 = vmatpush.bf16.msra.mxu2 %v5527_v36  ;;  %v5476_v41 = vld [vmem:[%s7130_s5] sm:$0xff] }
  0xc7   : > { %2132 = vmatmul.bf16.gmra.mxu3 %v4503_v32  ;;  %v4536_v55 = vld [vmem:[#allocation3 + $0x114] sm:$0xf0]  ;;  %v1071_v57 = vrot.slane %v1070_v49, 4  ;;  %v1085_v58 = vrot.slane %v1084_v51, 4  ;;  %v4507_v60 = vor.u32 %v5390_v53, %v4506_v52  ;;  %2475 = vmatpush.bf16.msra.mxu1 %v5482_v19  ;;  %v5478_v33 = vld [vmem:[%s7130_s5 + $0x10] sm:$0xff]  ;;  %v5524_v63 = vld [vmem:[%s7128_s3 + $0x20] sm:$0xff] }
  0xc8   : > { %3146 = vst [vmem:[#allocation3 + $0x118] sm:$0xf] %v3130_v47  ;;  %v978_v56 = vld [vmem:[#allocation2 + $0x44] sm:$0x1]  ;;  %v4539_v7 = vor.u32 %v5394_v3, %v4536_v55  ;;  %v4834_v43 = vld [vmem:[#allocation2 + $0xd8] sm:$0xf] }
  0xc9   : > { %v1087_v59 = vshll.u32 %v978_v56, 16  ;;  %v1076_v29 = vsel %vm5860_vm5, %v1071_v57, %v1075_v50  ;;  %v5472_v44 = vld [vmem:[#allocation2 + $0xdc] sm:$0xf0]  ;;  %v5526_v51 = vld [vmem:[%s7128_s3 + $0x30] sm:$0xff]  ;;  %v5525_v57 = vld [vmem:[%s7128_s3 + $0x28] sm:$0xff] }
  0xca   : > { %1105 = vst [vmem:[#allocation3 + $0xf8] sm:$0xf] %v1076_v29  ;;  %v4835_v49 = vor.u32 %v5472_v44, %v4834_v43  ;;  %4032 = vmatpush.bf16.msra.mxu2 %v5526_v51  ;;  %v4838_v29 = vld [vmem:[#allocation2 + $0xe8] sm:$0xf]  ;;  %v2212_v5 = vld [vmem:[#allocation4 + $0xc] sm:$0x1] }
  0xcb   : > { %v1089_v46 = vrot.slane %v1087_v59, 5  ;;  %2476 = vmatpush.bf16.msra.mxu1 %v5481_v22  ;;  %v2186_v4 = vld [vmem:[#allocation4 + $0x8] sm:$0x1]  ;;  %v5543_v22 = vld [vmem:[%s7128_s3 + $0xb8] sm:$0xff] }
  0xcc   : > { %4089 = vmatpush.bf16.msrb.mxu0 %v5543_v22  ;;  %v5551_v44 = vld [vmem:[%s7128_s3 + $0xf8] sm:$0xff] }
  0xcd   : > { %v1090_v0 = vsel %vm5860_vm5, %v1085_v58, %v1089_v46 }
  0xce   : > { %1106 = vst [vmem:[#allocation3 + $0x11c] sm:$0xf] %v1090_v0  ;;  %4033 = vmatpush.bf16.msra.mxu2 %v5525_v57 }
  0xcf   : > { %2477 = vmatpush.bf16.msra.mxu1 %v5480_v25 }
  0xd0   : > { %2161 = vmatmul.bf16.gmra.mxu0 %v4507_v60  ;;  %v5473_v60 = vld [vmem:[#allocation2 + $0xec] sm:$0xf0] }
  0xd1   : > { %v4542_v11 = vld [vmem:[#allocation3 + $0xf8] sm:$0xf]  ;;  %v4839_v46 = vor.u32 %v5473_v60, %v4838_v29  ;;  %v2189_v60 = vld [vmem:[#allocation4 + $0x10] sm:$0x1] }
  0xd2   : > { %v6222_v6 = vpop.f32.mrf.mxu0  ;;  %4034 = vmatpush.bf16.msra.mxu2 %v5524_v63  ;;  %v5550_v63 = vld [vmem:[%s7128_s3 + $0xf0] sm:$0xff] }
  0xd3   : > { %2478 = vmatpush.bf16.msra.mxu1 %v5479_v27 }
  0xd5   : > { %v5399_v10 = vld [vmem:[#allocation3 + $0x118] sm:$0xf0] }
  0xd6   : > { %v6226_v9 = vpop.f32.mrf.mxu1  ;;  %3226 = vst [vmem:[#allocation3 + $0x11c] sm:$0xf] %v3210_v8  ;;  %v4543_v14 = vor.u32 %v5399_v10, %v4542_v11  ;;  %v2187_v8 = vsel %vm5768_vm2, 0, %v2186_v4  ;;  %v2213_v11 = vsel %vm6322_vm10, 0, %v2212_v5  ;;  %v2190_v5 = vsel %vm5768_vm2, 0, %v2189_v60  ;;  %v5548_v60 = vld [vmem:[%s7128_s3 + $0xe0] sm:$0xff] }
  0xd7   : > { %2137 = vmatmul.bf16.gmra.mxu3 %v4539_v7  ;;  %2479 = vmatpush.bf16.msra.mxu1 %v5478_v33  ;;  %2188 = vst [vmem:[#allocation4 + $0x8] sm:$0x1] %v2187_v8 }
  0xd8   : > { %2214 = vst [vmem:[#allocation4 + $0xc] sm:$0x1] %v2213_v11 }
  0xd9   : > { %2191 = vst [vmem:[#allocation4 + $0x10] sm:$0x1] %v2190_v5 }
  0xda   : > { %v6230_v13 = vpop.f32.mrf.mxu3  ;;  %v6232_v15 = vpop.f32.mrf.mxu0 }
  0xdb   : > { %2480 = vmatpush.bf16.msra.mxu1 %v5477_v37  ;;  %v4842_v37 = vld [vmem:[#allocation2 + $0xf8] sm:$0xf] }
  0xde   : > { %v6237_v18 = vpop.f32.mrf.mxu1 }
  0xdf   : > { %2481 = vmatpush.bf16.msra.mxu1 %v5476_v41  ;;  %v5474_v41 = vld [vmem:[#allocation2 + $0xfc] sm:$0xf0] }
  0xe0   : > { %2166 = vmatmul.bf16.gmra.mxu0 %v4543_v14  ;;  %v6331_v14 = vld [vmem:[%s7127_s2] ss:$0 sm:$0xff]  ;;  %v4843_v43 = vor.u32 %v5474_v41, %v4842_v37  ;;  %v5523_v37 = vld [vmem:[%s7128_s3 + $0x18] sm:$0xff]  ;;  %v5549_v41 = vld [vmem:[%s7128_s3 + $0xe8] sm:$0xff] }
  0xe1   : > { %v1921_v17 = vadd.f32 %v6331_v14, %v6198_v16  ;;  %v5542_v16 = vld [vmem:[%s7128_s3 + $0xb0] sm:$0xff]  ;;  %v1923_v57 = vadd.f32 %v6331_v14, %v6210_v54  ;;  %4035 = vmatpush.bf16.msra.mxu2 %v5523_v37  ;;  %v5547_v37 = vld [vmem:[%s7128_s3 + $0xd8] sm:$0xff] }
  0xe2   : > { %v6242_v20 = vpop.f32.mrf.mxu3  ;;  %2482 = vmatmul.bf16.vlgmr.msra.gmra.mxu1 %v4835_v49  ;;  %v5535_v49 = vld [vmem:[%s7128_s3 + $0x78] sm:$0xff]  ;;  %4090 = vmatpush.bf16.msrb.mxu0 %v5542_v16  ;;  %v5534_v54 = vld [vmem:[%s7128_s3 + $0x70] sm:$0xff]  ;;  %v1926_v16 = vadd.f32 %v6331_v14, %v6222_v6 }
  0xe3   : > { %v6244_v21 = vpop.f32.mrf.mxu2  ;;  %v1950_v36 = vadd.f32 %v6204_v31, %v1921_v17  ;;  %4118 = vmatpush.bf16.msrb.mxu1 %v5551_v44  ;;  %4060 = vmatpush.bf16.msrb.mxu3 %v5535_v49  ;;  %v5541_v31 = vld [vmem:[%s7128_s3 + $0xa8] sm:$0xff]  ;;  %v5540_v17 = vld [vmem:[%s7128_s3 + $0xa0] sm:$0xff]  ;;  %v1952_v22 = vadd.f32 %v6214_v61, %v1923_v57  ;;  %v2192_v57 = vld [vmem:[#allocation4 + $0x18] sm:$0x1] }
  0xe5   : > { %v1979_v51 = vadd.f32 %v6218_v1, %v1950_v36  ;;  %v1981_v61 = vadd.f32 %v6228_v12, %v1952_v22  ;;  %v2193_v12 = vsel %vm5768_vm2, 0, %v2192_v57  ;;  %v2195_v57 = vld [vmem:[#allocation4 + $0x20] sm:$0x1] }
  0xe6   : > { %v6249_v23 = vpop.f32.mrf.mxu0  ;;  %v6251_v24 = vpop.f32.mrf.mxu1  ;;  %4091 = vmatpush.bf16.msrb.mxu0 %v5541_v31  ;;  %v5522_v31 = vld [vmem:[%s7128_s3 + $0x10] sm:$0xff]  ;;  %2194 = vst [vmem:[#allocation4 + $0x18] sm:$0x1] %v2193_v12  ;;  %v2196_v12 = vsel %vm5768_vm2, 0, %v2195_v57 }
  0xe7   : > { %4119 = vmatpush.bf16.msrb.mxu1 %v5550_v63  ;;  %4061 = vmatpush.bf16.msrb.mxu3 %v5534_v54  ;;  %v4846_v63 = vld [vmem:[#allocation2 + $0x108] sm:$0xf]  ;;  %v5538_v54 = vld [vmem:[%s7128_s3 + $0x90] sm:$0xff]  ;;  %2197 = vst [vmem:[#allocation4 + $0x20] sm:$0x1] %v2196_v12  ;;  %v5544_v12 = vld [vmem:[%s7128_s3 + $0xc0] sm:$0xff] }
  0xe8   : > { %4036 = vmatpush.bf16.msra.mxu2 %v5522_v31 }
  0xea   : > { %v6256_v26 = vpop.f32.mrf.mxu3  ;;  %4092 = vmatpush.bf16.msrb.mxu0 %v5540_v17 }
  0xeb   : > { %v6261_v30 = vpop.f32.mrf.mxu2  ;;  %v2008_v29 = vadd.f32 %v6256_v26, %v1979_v51  ;;  %4120 = vmatpush.bf16.msrb.mxu1 %v5549_v41 }
  0xed   : > { %v2037_v36 = vadd.f32 %v6249_v23, %v2008_v29  ;;  %v5539_v23 = vld [vmem:[%s7128_s3 + $0x98] sm:$0xff] }
  0xee   : > { %v6263_v32 = vpop.f32.mrf.mxu0  ;;  %v6268_v34 = vpop.f32.mrf.mxu1  ;;  %v2218_v29 = vld [vmem:[#allocation4 + $0x1c] sm:$0x1]  ;;  %4093 = vmatpush.bf16.msrb.mxu0 %v5539_v23  ;;  %v5537_v23 = vld [vmem:[%s7128_s3 + $0x88] sm:$0xff] }
  0xef   : > { %4121 = vmatpush.bf16.msrb.mxu1 %v5548_v60 }
  0xf2   : > { %v6270_v35 = vpop.f32.mrf.mxu3  ;;  %2487 = vmatmul.bf16.gmra.mxu1 %v4839_v46  ;;  %v2215_v46 = vld [vmem:[#allocation4 + $0x14] sm:$0x1]  ;;  %4094 = vmatpush.bf16.msrb.mxu0 %v5538_v54 }
  0xf3   : > { %v2216_v8 = vsel %vm6322_vm10, 0, %v2215_v46  ;;  %v2010_v49 = vadd.f32 %v6270_v35, %v1981_v61  ;;  %v5532_v35 = vld [vmem:[%s7128_s3 + $0x60] sm:$0xff]  ;;  %4122 = vmatpush.bf16.msrb.mxu1 %v5547_v37 }
  0xf4   : > { %2217 = vst [vmem:[#allocation4 + $0x14] sm:$0x1] %v2216_v8  ;;  %v5475_v8 = vld [vmem:[#allocation2 + $0x10c] sm:$0xf0] }
  0xf5   : > { %v2039_v17 = vadd.f32 %v6263_v32, %v2010_v49  ;;  %v1928_v49 = vadd.f32 %v6331_v14, %v6232_v15  ;;  %v5546_v15 = vld [vmem:[%s7128_s3 + $0xd0] sm:$0xff] }
  0xf6   : > { %v6278_v39 = vpop.f32.mrf.mxu0  ;;  %v6287_v47 = vpop.f32.mrf.mxu1  ;;  %4095 = vmatpush.bf16.msrb.mxu0 %v5537_v23 }
  0xf7   : > { %4123 = vmatpush.bf16.msrb.mxu1 %v5546_v15 }
  0xf8   : > { %v6280_v40 = vpop.f32.mrf.mxu2 }
  0xfa   : > { %v6285_v42 = vpop.f32.mrf.mxu3 }
  0xfe   : > { %v6289_v50 = vpop.f32.mrf.mxu0  ;;  %v6298_v55 = vpop.f32.mrf.mxu1 }
 0x100   : > { %v6294_v52 = vpop.f32.mrf.mxu2 }
 0x102   : > { %v6296_v53 = vpop.f32.mrf.mxu3  ;;  %2492 = vmatmul.bf16.gmra.mxu1 %v4843_v43  ;;  %v5533_v43 = vld [vmem:[%s7128_s3 + $0x68] sm:$0xff] }
 0x103   : > { %4062 = vmatpush.bf16.msrb.mxu3 %v5533_v43 }
 0x106   : > { %v6300_v56 = vpop.f32.mrf.mxu0 }
 0x107   : > { %4063 = vmatpush.bf16.msrb.mxu3 %v5532_v35  ;;  %v5536_v35 = vld [vmem:[%s7128_s3 + $0x80] sm:$0xff] }
 0x108   : > { %v6305_v58 = vpop.f32.mrf.mxu2  ;;  %4096 = vmatpush.bf16.msrb.mxu0 %v5536_v35 }
 0x10a   : > { %v6307_v59 = vpop.f32.mrf.mxu3 }
 0x10b   : > { %v2065_v0 = vpop.f32.mrf.mxu1 }
 0x10c   : > { %v2066_v44 = vadd.f32 %v2065_v0, %v2037_v36  ;;  %v2219_v0 = vsel %vm6322_vm10, 0, %v2218_v29  ;;  %v4847_v36 = vor.u32 %v5475_v8, %v4846_v63  ;;  %v5545_v8 = vld [vmem:[%s7128_s3 + $0xc8] sm:$0xff] }
 0x10d   : > { %2220 = vst [vmem:[#allocation4 + $0x1c] sm:$0x1] %v2219_v0  ;;  %4124 = vmatpush.bf16.msrb.mxu1 %v5545_v8  ;;  %v2335_v8 = vld [vmem:[#allocation4 + $0x14] sm:$0x1] }
 0x10e   : > { %v6309_v62 = vpop.f32.mrf.mxu0 }
 0x110   : > { %v6314_v3 = vpop.f32.mrf.mxu2 }
 0x111   : > { %4125 = vmatpush.bf16.msrb.mxu1 %v5544_v12 }
 0x112   : > { %v6316_v7 = vpop.f32.mrf.mxu3  ;;  %2497 = vmatmul.bf16.gmra.mxu1 %v4847_v36  ;;  %v5529_v36 = vld [vmem:[%s7128_s3 + $0x48] sm:$0xff] }
 0x113   : > { %v6340_v27 = vpop.f32.mrf.mxu1 }
 0x114   : > { %v2068_v61 = vadd.f32 %v6340_v27, %v2039_v17  ;;  %v5520_v27 = vld [vmem:[%s7128_s3] sm:$0xff] }
 0x116   : > { %v6338_v25 = vpop.f32.mrf.mxu0 }
 0x118   : > { %v2094_v19 = vpop.f32.mrf.mxu2 }
 0x119   : > { %v2095_v51 = vadd.f32 %v2094_v19, %v2066_v44  ;;  %v1955_v19 = vadd.f32 %v6226_v9, %v1926_v16  ;;  %v5521_v9 = vld [vmem:[%s7128_s3 + $0x8] sm:$0xff]  ;;  %v5531_v16 = vld [vmem:[%s7128_s3 + $0x58] sm:$0xff] }
 0x11a   : > { %v6342_v33 = vpop.f32.mrf.mxu3  ;;  %4037 = vmatpush.bf16.msra.mxu2 %v5521_v9  ;;  %4064 = vmatpush.bf16.msrb.mxu3 %v5531_v16  ;;  %v2329_v16 = vld [vmem:[#allocation4 + $0xc] sm:$0x1] }
 0x11b   : > { %v1984_v32 = vadd.f32 %v6244_v21, %v1955_v19  ;;  %v2221_v21 = vld [vmem:[#allocation4 + $0x24] sm:$0x1]  ;;  %v1957_v19 = vadd.f32 %v6237_v18, %v1928_v49 }
 0x11c   : > { %v2222_v0 = vsel %vm6322_vm10, 0, %v2221_v21 }
 0x11d   : > { %2223 = vst [vmem:[#allocation4 + $0x24] sm:$0x1] %v2222_v0  ;;  %v1986_v37 = vadd.f32 %v6261_v30, %v1957_v19  ;;  %v1931_v0 = vadd.f32 %v6331_v14, %v6206_v45 }
 0x11e   : > { %v6375_v26 = vpop.f32.mrf.mxu0  ;;  %v6377_v11 = vpop.f32.mrf.mxu1  ;;  %4038 = vmatpush.bf16.msra.mxu2 %v5520_v27 }
 0x11f   : > { %v2015_v49 = vadd.f32 %v6296_v53, %v1986_v37 }
 0x120   : > { %v6364_v4 = vpop.f32.mrf.mxu2 }
 0x121   : > { %v2097_v31 = vadd.f32 %v6364_v4, %v2068_v61 }
 0x122   : > { %v6366_v1 = vpop.f32.mrf.mxu3 }
 0x126   : > { %v6426_v41 = vpop.f32.mrf.mxu1 }
 0x128   : > { %v6414_v5 = vpop.f32.mrf.mxu2 }
 0x12a   : > { %v2123_v6 = vpop.f32.mrf.mxu3 }
 0x12b   : > { %v2124_v46 = vadd.f32 %v2123_v6, %v2095_v51  ;;  %v2013_v51 = vadd.f32 %v6285_v42, %v1984_v32  ;;  %v5530_v42 = vld [vmem:[%s7128_s3 + $0x50] sm:$0xff] }
 0x12c   : > { %4065 = vmatpush.bf16.msrb.mxu3 %v5530_v42  ;;  %v5528_v42 = vld [vmem:[%s7128_s3 + $0x40] sm:$0xff] }
 0x12d   : > { %v2152_v22 = vpop.f32.mrf.mxu0 }
 0x12e   : > { %v2153_v43 = vadd.f32 %v2152_v22, %v2124_v46  ;;  %v2042_v46 = vadd.f32 %v6278_v39, %v2013_v51  ;;  %v6472_v32 = vpop.f32.mrf.mxu1  ;;  %v2224_v51 = vld [vmem:[#allocation4 + $0x2c] sm:$0x1] }
 0x12f   : > { %v2225_v53 = vsel %vm6322_vm10, 0, %v2224_v51 }
 0x130   : > { %v2172_v44 = vmax.f32 %v2153_v43, 0.0  ;;  %v2101_v54 = vpop.f32.mrf.mxu2  ;;  %v2071_v18 = vadd.f32 %v6377_v11, %v2042_v46  ;;  %v2326_v43 = vld [vmem:[#allocation4 + $0x8] sm:$0xf]  ;;  %4066 = vmatpush.bf16.msrb.mxu3 %v5529_v36  ;;  %2226 = vst [vmem:[#allocation4 + $0x2c] sm:$0x1] %v2225_v53  ;;  %v1960_v46 = vadd.f32 %v6251_v24, %v1931_v0 }
 0x131   : > { %v2198_v11 = vld [vmem:[#allocation4 + $0x28] sm:$0x1] }
 0x132   : > { %v2236_v29 = vpack.c.bf16 %v2172_v44, %v2172_v44  ;;  %v2125_v6 = vpop.f32.mrf.mxu3  ;;  %v2100_v30 = vadd.f32 %v6414_v5, %v2071_v18  ;;  %v1989_v37 = vadd.f32 %v6280_v40, %v1960_v46 }
 0x133   : > { %v2126_v4 = vadd.f32 %v2125_v6, %v2097_v31 }
 0x134   : > { %v2245_v60 = vshrl.u32 %v2236_v29, 16  ;;  %v2248_v22 = vshll.u32 %v2236_v29, 16  ;;  %v2199_v29 = vsel %vm5768_vm2, 0, %v2198_v11  ;;  %4067 = vmatpush.bf16.msrb.mxu3 %v5528_v42  ;;  %v1938_v11 = vadd.f32 %v6331_v14, %v6242_v20 }
 0x135   : > { %v2154_v63 = vpop.f32.mrf.mxu0  ;;  %2200 = vst [vmem:[#allocation4 + $0x28] sm:$0x1] %v2199_v29 }
 0x136   : > { %v2247_v17 = vrot.slane %v2245_v60, 7  ;;  %v2155_v9 = vadd.f32 %v2154_v63, %v2126_v4  ;;  %v2044_v4 = vadd.f32 %v6289_v50, %v2015_v49  ;;  %v2332_v63 = vld [vmem:[#allocation4 + $0x10] sm:$0xf]  ;;  %v2077_v50 = vpop.f32.mrf.mxu1 }
 0x138   : > { %v2250_v61 = vor.u32 %v2248_v22, %v2247_v17  ;;  %v2251_v44 = vrot.slane %v2247_v17, 4  ;;  %v2173_v23 = vmax.f32 %v2155_v9, 0.0  ;;  %v2073_v45 = vadd.f32 %v6426_v41, %v2044_v4  ;;  %v2104_v17 = vpop.f32.mrf.mxu2 }
 0x139   : > { %v2018_v41 = vadd.f32 %v6307_v59, %v1989_v37 }
 0x13a   : > { %v2327_v31 = vsel %vm6468_vm12, %v2250_v61, %v2326_v43  ;;  %v2330_v57 = vsel %vm5768_vm2, %v2251_v44, %v2329_v16  ;;  %v2237_v21 = vpack.c.bf16 %v2173_v23, %v2173_v23  ;;  %v2128_v27 = vpop.f32.mrf.mxu3  ;;  %v2102_v18 = vadd.f32 %v2101_v54, %v2073_v45 }
 0x13b   : > { %2328 = vst [vmem:[#allocation4 + $0x8] sm:$0xf] %v2327_v31  ;;  %v2129_v6 = vadd.f32 %v2128_v27, %v2100_v30  ;;  %v1933_v44 = vadd.f32 %v6331_v14, %v6220_v2  ;;  %v1936_v54 = vadd.f32 %v6331_v14, %v6230_v13  ;;  %v2047_v31 = vadd.f32 %v6300_v56, %v2018_v41 }
 0x13c   : > { %2331 = vst [vmem:[#allocation4 + $0xc] sm:$0x1] %v2330_v57  ;;  %v2253_v5 = vshrl.u32 %v2237_v21, 16  ;;  %v2256_v35 = vshll.u32 %v2237_v21, 16  ;;  %v1967_v13 = vadd.f32 %v6298_v55, %v1938_v11 }
 0x13d   : > { %v2157_v15 = vpop.f32.mrf.mxu0  ;;  %v1962_v49 = vadd.f32 %v6268_v34, %v1933_v44  ;;  %v1965_v27 = vadd.f32 %v6287_v47, %v1936_v54  ;;  %v2076_v20 = vadd.f32 %v6472_v32, %v2047_v31  ;;  %v2341_v47 = vld [vmem:[#allocation4 + $0x1c] sm:$0x1] }
 0x13e   : > { %v2255_v60 = vrot.slane %v2253_v5, 7  ;;  %v2158_v19 = vadd.f32 %v2157_v15, %v2129_v6  ;;  %v2338_v15 = vld [vmem:[#allocation4 + $0x18] sm:$0xf] }
 0x13f   : > { %v1991_v51 = vadd.f32 %v6294_v52, %v1962_v49  ;;  %v2105_v4 = vadd.f32 %v2104_v17, %v2076_v20  ;;  %v1994_v46 = vadd.f32 %v6305_v58, %v1965_v27  ;;  %v2227_v17 = vld [vmem:[#allocation4 + $0x34] sm:$0x1]  ;;  %v2344_v49 = vld [vmem:[#allocation4 + $0x20] sm:$0xf]  ;;  %v5559_v31 = vld [vmem:[%s7128_s3 + $0x138] sm:$0xff] }
 0x140   : > { %v2258_v22 = vor.u32 %v2256_v35, %v2255_v60  ;;  %v2259_v9 = vrot.slane %v2255_v60, 4  ;;  %v2174_v36 = vmax.f32 %v2158_v19, 0.0  ;;  %v2106_v56 = vpop.f32.mrf.mxu2  ;;  %v2228_v54 = vsel %vm6322_vm10, 0, %v2227_v17  ;;  %4147 = vmatpush.bf16.msrb.mxu2 %v5559_v31 }
 0x141   : > { %v2020_v53 = vadd.f32 %v6316_v7, %v1991_v51  ;;  %v1996_v7 = vadd.f32 %v6314_v3, %v1967_v13  ;;  %2229 = vst [vmem:[#allocation4 + $0x34] sm:$0x1] %v2228_v54 }
 0x142   : > { %v2333_v43 = vsel %vm6468_vm12, %v2258_v22, %v2332_v63  ;;  %v2336_v16 = vsel %vm5768_vm2, %v2259_v9, %v2335_v8  ;;  %v2238_v24 = vpack.c.bf16 %v2174_v36, %v2174_v36  ;;  %v2130_v61 = vpop.f32.mrf.mxu3  ;;  %v2521_v2 = vld [vmem:[#allocation4 + $0x8] sm:$0xf]  ;;  %v6515_v63 = vpop.f32.mrf.mxu1  ;;  %v2201_v9 = vld [vmem:[#allocation4 + $0x30] sm:$0x1]  ;;  %v2023_v36 = vadd.f32 %v6342_v33, %v1994_v46  ;;  %v2347_v33 = vld [vmem:[#allocation4 + $0x24] sm:$0x1] }
 0x143   : > { %2334 = vst [vmem:[#allocation4 + $0x10] sm:$0xf] %v2333_v43  ;;  %v2131_v23 = vadd.f32 %v2130_v61, %v2102_v18  ;;  %v2504_v59 = vld [vmem:[#allocation4 + $0x8] sm:$0xf]  ;;  %v2666_v6 = vld [vmem:[#allocation4 + $0xc] sm:$0x1]  ;;  %v2049_v32 = vadd.f32 %v6309_v62, %v2020_v53 }
 0x144   : > { %2337 = vst [vmem:[#allocation4 + $0x14] sm:$0x1] %v2336_v16  ;;  %v2261_v30 = vshrl.u32 %v2238_v24, 16  ;;  %v2665_v21 = vld [vmem:[#allocation4 + $0x8] sm:$0xe]  ;;  %v2264_v29 = vshll.u32 %v2238_v24, 16 }
 0x145   : > { %v2159_v40 = vpop.f32.mrf.mxu0  ;;  %2512 = vst [vmem:[#allocation3 + $0x24] sm:$0xf] %v2504_v59  ;;  %v2550_v52 = vshrl.u32 %v2521_v2, 16  ;;  %v2553_v5 = vshll.u32 %v2521_v2, 16  ;;  %v4881_v35 = vrot.slane %v2665_v21, 9  ;;  %v2704_v19 = vrot.slane %v2666_v6, 5 }
 0x146   : > { %v2160_v57 = vadd.f32 %v2159_v40, %v2131_v23  ;;  %v2263_v34 = vrot.slane %v2261_v30, 7  ;;  %v2762_v55 = vld [vmem:[#allocation4 + $0x8] sm:$0xf]  ;;  %v4906_v43 = vld [vmem:[#allocation3] sm:$0xf]  ;;  %v2078_v62 = vadd.f32 %v2077_v50, %v2049_v32  ;;  %v2202_v40 = vsel %vm5768_vm2, 0, %v2201_v9 }
 0x147   : > { %v2552_v37 = vrot.slane %v2550_v52, 4  ;;  %v2555_v18 = vrot.slane %v2553_v5, 5  ;;  %v2763_v16 = vld [vmem:[#allocation4 + $0xc] sm:$0x1]  ;;  %v2779_v24 = vshrl.u32 %v2762_v55, 16  ;;  %v2705_v44 = vsel %vm5914_vm8, %v4881_v35, %v2704_v19 }
 0x148   : > { %v2175_v14 = vmax.f32 %v2160_v57, 0.0  ;;  %v2266_v12 = vor.u32 %v2264_v29, %v2263_v34  ;;  %v2267_v0 = vrot.slane %v2263_v34, 4  ;;  %v6524_v3 = vld [vmem:[#allocation4 + $0x8] sm:$0xe]  ;;  %v2782_v41 = vshll.u32 %v2762_v55, 16  ;;  %v5558_v29 = vld [vmem:[%s7128_s3 + $0x130] sm:$0xff] }
 0x149   : > { %v2107_v30 = vadd.f32 %v2106_v56, %v2078_v62  ;;  %v2025_v2 = vadd.f32 %v6366_v1, %v1996_v7  ;;  %v2788_v57 = vshll.u32 %v2763_v16, 16  ;;  %v6536_v59 = vld [vmem:[#allocation4 + $0xc] sm:$0x1]  ;;  %2739 = vst [vmem:[#allocation3 + $0x2c] sm:$0xf] %v2705_v44  ;;  %v2556_v6 = vor.u32 %v2555_v18, %v2552_v37  ;;  %4148 = vmatpush.bf16.msrb.mxu2 %v5558_v29 }
 0x14a   : > { %v2133_v42 = vpop.f32.mrf.mxu3  ;;  %v2239_v60 = vpack.c.bf16 %v2175_v14, %v2175_v14  ;;  %v2339_v8 = vsel %vm6468_vm12, %v2266_v12, %v2338_v15  ;;  %v2342_v58 = vsel %vm5768_vm2, %v2267_v0, %v2341_v47  ;;  %v2746_v34 = vld [vmem:[#allocation4 + $0x8] sm:$0xf]  ;;  %2203 = vst [vmem:[#allocation4 + $0x30] sm:$0x1] %v2202_v40  ;;  %v2522_v52 = vld [vmem:[#allocation4 + $0xc] sm:$0x1]  ;;  %v2052_v56 = vadd.f32 %v6338_v25, %v2023_v36  ;;  %v2109_v12 = vpop.f32.mrf.mxu2 }
 0x14b   : > { %v2134_v22 = vadd.f32 %v2133_v42, %v2105_v4  ;;  %2340 = vst [vmem:[#allocation4 + $0x18] sm:$0xf] %v2339_v8  ;;  %v6541_v1 = vrot.slane %v2779_v24, 4  ;;  %v4888_v5 = vrot.slane %v6524_v3, 9  ;;  %v2559_v0 = vshll.u32 %v2522_v52, 16  ;;  %v2082_v55 = vpop.f32.mrf.mxu1  ;;  %v5557_v37 = vld [vmem:[%s7128_s3 + $0x128] sm:$0xff] }
 0x14c   : > { %v2269_v61 = vshrl.u32 %v2239_v60, 16  ;;  %v2272_v23 = vshll.u32 %v2239_v60, 16  ;;  %2343 = vst [vmem:[#allocation4 + $0x1c] sm:$0x1] %v2342_v58  ;;  %v5488_v50 = vld [vmem:[#allocation3 + $0x20] sm:$0xf0]  ;;  %v2054_v9 = vadd.f32 %v6375_v26, %v2025_v2 }
 0x14d   : > { %v2162_v45 = vpop.f32.mrf.mxu0  ;;  %v4907_v21 = vor.u32 %v5488_v50, %v4906_v43  ;;  %v6545_v15 = vrot.slane %v2782_v41, 5  ;;  %v2764_v42 = vld [vmem:[#allocation4 + $0x10] sm:$0xf]  ;;  %v4914_v19 = vld [vmem:[#allocation3 + $0x8] sm:$0xf]  ;;  %v6551_v46 = vrot.slane %v2788_v57, 5  ;;  %4149 = vmatpush.bf16.msrb.mxu2 %v5557_v37 }
 0x14e   : > { %v2271_v11 = vrot.slane %v2269_v61, 7  ;;  %v2163_v51 = vadd.f32 %v2162_v45, %v2134_v22  ;;  %2754 = vst [vmem:[#allocation3 + $0xc] sm:$0xf] %v2746_v34  ;;  %v2765_v25 = vld [vmem:[#allocation4 + $0x14] sm:$0x1]  ;;  %v2557_v7 = vrot.slane %v2556_v6, 4  ;;  %v2081_v22 = vadd.f32 %v6515_v63, %v2052_v56 }
 0x14f   : > { %4039 = vmatmul.bf16.vlgmr.msra.gmra.mxu2 %v4907_v21  ;;  %v2940_v32 = vrot.slane %v6536_v59, 5  ;;  %v6554_v8 = vld [vmem:[#allocation4 + $0x10] sm:$0xe]  ;;  %v2204_v36 = vld [vmem:[#allocation4 + $0x38] sm:$0x1]  ;;  %v2793_v18 = vshrl.u32 %v2764_v42, 16  ;;  %v2083_v62 = vadd.f32 %v2082_v55, %v2054_v9 }
 0x150   : > { %v2274_v13 = vor.u32 %v2272_v23, %v2271_v11  ;;  %v2275_v53 = vrot.slane %v2271_v11, 4  ;;  %v2176_v20 = vmax.f32 %v2163_v51, 0.0  ;;  %v6556_v45 = vld [vmem:[#allocation4 + $0x10] sm:$0xf]  ;;  %v6563_v58 = vld [vmem:[#allocation4 + $0x14] sm:$0x1]  ;;  %v2110_v61 = vadd.f32 %v2109_v12, %v2081_v22 }
 0x151   : > { %v2747_v43 = vld [vmem:[#allocation4 + $0x10] sm:$0xf]  ;;  %v2561_v16 = vrot.slane %v2559_v0, 5  ;;  %v2796_v24 = vshll.u32 %v2764_v42, 16  ;;  %v5489_v63 = vld [vmem:[#allocation3 + $0x28] sm:$0xf0] }
 0x152   : > { %v2135_v27 = vpop.f32.mrf.mxu3  ;;  %v2345_v4 = vsel %vm6468_vm12, %v2274_v13, %v2344_v49  ;;  %v2348_v47 = vsel %vm5768_vm2, %v2275_v53, %v2347_v33  ;;  %v2240_v60 = vpack.c.bf16 %v2176_v20, %v2176_v20  ;;  %v2230_v41 = vld [vmem:[#allocation4 + $0x3c] sm:$0x1]  ;;  %v2802_v26 = vshll.u32 %v2765_v25, 16  ;;  %v2350_v23 = vld [vmem:[#allocation4 + $0x28] sm:$0xf]  ;;  %v2111_v0 = vpop.f32.mrf.mxu2 }
 0x153   : > { %v2136_v14 = vadd.f32 %v2135_v27, %v2107_v30  ;;  %2346 = vst [vmem:[#allocation4 + $0x20] sm:$0xf] %v2345_v4  ;;  %v2353_v49 = vld [vmem:[#allocation4 + $0x2c] sm:$0x1]  ;;  %v4915_v33 = vor.u32 %v5489_v63, %v4914_v19  ;;  %v2562_v40 = vsel %vm5860_vm5, %v2557_v7, %v2561_v16  ;;  %v2205_v30 = vsel %vm5768_vm2, 0, %v2204_v36 }
 0x154   : > { %2349 = vst [vmem:[#allocation4 + $0x24] sm:$0x1] %v2348_v47  ;;  %v2277_v44 = vshrl.u32 %v2240_v60, 16  ;;  %v6569_v11 = vld [vmem:[#allocation4 + $0x14] sm:$0x1]  ;;  %v2280_v50 = vshll.u32 %v2240_v60, 16  ;;  %v2112_v36 = vadd.f32 %v2111_v0, %v2083_v62 }
 0x155   : > { %v2164_v35 = vpop.f32.mrf.mxu0  ;;  %v4889_v57 = vrot.slane %v6554_v8, 9  ;;  %v2944_v21 = vrot.slane %v6563_v58, 5  ;;  %v3020_v27 = vshrl.u32 %v6556_v45, 16  ;;  %4097 = vmatmul.bf16.vlgmr.msrb.gmra.mxu0 %v4915_v33  ;;  %2755 = vst [vmem:[#allocation3 + $0x30] sm:$0xf] %v2747_v43  ;;  %v2231_v34 = vsel %vm6322_vm10, 0, %v2230_v41 }
 0x156   : > { %v2165_v17 = vadd.f32 %v2164_v35, %v2136_v14  ;;  %v2279_v51 = vrot.slane %v2277_v44, 7  ;;  %v6576_v29 = vrot.slane %v2793_v18, 4  ;;  %2656 = vst [vmem:[#allocation3 + $0x28] sm:$0xf] %v2562_v40  ;;  %v6580_v52 = vrot.slane %v2796_v24, 5  ;;  %v6832_v8 = vld [vmem:[%s7128_s3 + $0x228] sm:$0xff] }
 0x157   : > { %v3023_v56 = vshll.u32 %v6556_v45, 16  ;;  %v3029_v12 = vshll.u32 %v6569_v11, 16  ;;  %2206 = vst [vmem:[#allocation4 + $0x38] sm:$0x1] %v2205_v30  ;;  %v6584_v4 = vrot.slane %v2802_v26, 5  ;;  %v2785_v24 = vor.u32 %v6545_v15, %v6541_v1 }
 0x158   : > { %v2177_v31 = vmax.f32 %v2165_v17, 0.0  ;;  %v2282_v13 = vor.u32 %v2280_v50, %v2279_v51  ;;  %v2283_v53 = vrot.slane %v2279_v51, 4  ;;  %2232 = vst [vmem:[#allocation4 + $0x3c] sm:$0x1] %v2231_v34  ;;  %v2505_v19 = vld [vmem:[#allocation4 + $0x10] sm:$0xf] }
 0x159   : > { %v2356_v55 = vld [vmem:[#allocation4 + $0x30] sm:$0xf]  ;;  %v2359_v7 = vld [vmem:[#allocation4 + $0x34] sm:$0x1]  ;;  %v5484_v22 = vld [vmem:[#allocation3 + $0x4] sm:$0xf] }
 0x15a   : > { %v2138_v54 = vpop.f32.mrf.mxu3  ;;  %v6578_v6 = vld [vmem:[#allocation4 + $0x20] sm:$0xf]  ;;  %v2241_v20 = vpack.c.bf16 %v2177_v31, %v2177_v31  ;;  %v2351_v47 = vsel %vm6468_vm12, %v2282_v13, %v2350_v23  ;;  %v2354_v60 = vsel %vm5768_vm2, %v2283_v53, %v2353_v49  ;;  %v2506_v17 = vld [vmem:[#allocation4 + $0x18] sm:$0xf]  ;;  %v5485_v43 = vld [vmem:[#allocation3 + $0xc] sm:$0xf] }
 0x15b   : > { %v2139_v2 = vadd.f32 %v2138_v54, %v2110_v61  ;;  %v3048_v25 = vshrl.u32 %v6578_v6, 16  ;;  %2352 = vst [vmem:[#allocation4 + $0x28] sm:$0xf] %v2351_v47  ;;  %v2667_v16 = vld [vmem:[#allocation4 + $0x10] sm:$0xe] }
 0x15c   : > { %v2285_v35 = vshrl.u32 %v2241_v20, 16  ;;  %2355 = vst [vmem:[#allocation4 + $0x2c] sm:$0x1] %v2354_v60  ;;  %v2288_v18 = vshll.u32 %v2241_v20, 16  ;;  %v2668_v44 = vld [vmem:[#allocation4 + $0x14] sm:$0x1] }
 0x15d   : > { %v2167_v14 = vpop.f32.mrf.mxu0  ;;  %2513 = vst [vmem:[#allocation3 + $0x48] sm:$0xf] %v2505_v19  ;;  %v2669_v63 = vld [vmem:[#allocation4 + $0x18] sm:$0xe]  ;;  %v4916_v49 = vld [vmem:[#allocation3 + $0x2c] sm:$0xf0] }
 0x15e   : > { %v2168_v42 = vadd.f32 %v2167_v14, %v2139_v2  ;;  %v2287_v37 = vrot.slane %v2285_v35, 7  ;;  %2514 = vst [vmem:[#allocation3 + $0x6c] sm:$0xf] %v2506_v17  ;;  %v4882_v33 = vrot.slane %v2667_v16, 9  ;;  %v4919_v62 = vor.u32 %v5485_v43, %v4916_v49  ;;  %v4908_v54 = vld [vmem:[#allocation3 + $0x24] sm:$0xf0] }
 0x15f   : > { %v2670_v50 = vld [vmem:[#allocation4 + $0x1c] sm:$0x1]  ;;  %v6593_v31 = vld [vmem:[#allocation4 + $0x24] sm:$0x1]  ;;  %v4911_v2 = vor.u32 %v5484_v22, %v4908_v54  ;;  %v2362_v34 = vld [vmem:[#allocation4 + $0x38] sm:$0xf] }
 0x160   : > { %v2178_v9 = vmax.f32 %v2168_v42, 0.0  ;;  %v2290_v26 = vor.u32 %v2288_v18, %v2287_v37  ;;  %v2291_v23 = vrot.slane %v2287_v37, 4  ;;  %v2708_v53 = vrot.slane %v2668_v44, 5  ;;  %v5556_v20 = vld [vmem:[%s7128_s3 + $0x120] sm:$0xff]  ;;  %4126 = vmatmul.bf16.vlgmr.msrb.gmra.mxu1 %v4919_v62  ;;  %v2365_v60 = vld [vmem:[#allocation4 + $0x3c] sm:$0x1] }
 0x161   : > { %v4883_v0 = vrot.slane %v2669_v63, 9  ;;  %v2207_v47 = vld [vmem:[#allocation4 + $0x40] sm:$0x1]  ;;  %4068 = vmatmul.bf16.vlgmr.msrb.gmra.mxu3 %v4911_v2  ;;  %v2712_v19 = vrot.slane %v2670_v50, 5  ;;  %4150 = vmatpush.bf16.msrb.mxu2 %v5556_v20  ;;  %v3057_v22 = vshll.u32 %v6593_v31, 16  ;;  %v5555_v37 = vld [vmem:[%s7128_s3 + $0x118] sm:$0xff] }
 0x162   : > { %v2242_v61 = vpack.c.bf16 %v2178_v9, %v2178_v9  ;;  %v2140_v41 = vpop.f32.mrf.mxu3  ;;  %v2357_v1 = vsel %vm6468_vm12, %v2290_v26, %v2356_v55  ;;  %v2360_v15 = vsel %vm5768_vm2, %v2291_v23, %v2359_v7  ;;  %v2709_v35 = vsel %vm5914_vm8, %v4882_v33, %v2708_v53  ;;  %v6608_v9 = vld [vmem:[#allocation4 + $0x28] sm:$0xf]  ;;  %v2233_v23 = vld [vmem:[#allocation4 + $0x44] sm:$0x1]  ;;  %v5567_v33 = vld [vmem:[%s7128_s3 + $0x178] sm:$0xff] }
 0x163   : > { %v2141_v40 = vadd.f32 %v2140_v41, %v2112_v36  ;;  %2358 = vst [vmem:[#allocation4 + $0x30] sm:$0xf] %v2357_v1  ;;  %v6604_v55 = vrot.slane %v2785_v24, 4  ;;  %v3051_v7 = vshll.u32 %v6578_v6, 16  ;;  %v6613_v18 = vrot.slane %v3048_v25, 4  ;;  %v5575_v54 = vld [vmem:[%s7128_s3 + $0x1b8] sm:$0xff]  ;;  %4176 = vmatpush.bf16.msra.mxu3 %v5567_v33 }
 0x164   : > { %v2293_v30 = vshrl.u32 %v2242_v61, 16  ;;  %v2296_v51 = vshll.u32 %v2242_v61, 16  ;;  %2361 = vst [vmem:[#allocation4 + $0x34] sm:$0x1] %v2360_v15  ;;  %v2713_v43 = vsel %vm5914_vm8, %v4883_v0, %v2712_v19  ;;  %v2208_v24 = vsel %vm5768_vm2, 0, %v2207_v47  ;;  %4205 = vmatpush.bf16.msra.mxu0 %v5575_v54  ;;  %v6646_v54 = vld [vmem:[%s7128_s3 + $0x1f8] sm:$0xff] }
 0x165   : > { %v2169_v13 = vpop.f32.mrf.mxu0  ;;  %2740 = vst [vmem:[#allocation3 + $0x50] sm:$0xf] %v2709_v35  ;;  %v4942_v63 = vld [vmem:[#allocation3 + $0x48] sm:$0xf]  ;;  %v5497_v41 = vld [vmem:[#allocation3 + $0x68] sm:$0xf0]  ;;  %4151 = vmatpush.bf16.msrb.mxu2 %v5555_v37  ;;  %5600 = vmatpush.bf16.msra.mxu1 %v6646_v54 }
 0x166   : > { %v2295_v14 = vrot.slane %v2293_v30, 7  ;;  %v2170_v42 = vadd.f32 %v2169_v13, %v2141_v40  ;;  %2741 = vst [vmem:[#allocation3 + $0x74] sm:$0xf] %v2713_v43  ;;  %v3062_v25 = vshrl.u32 %v6608_v9, 16  ;;  %v4943_v26 = vor.u32 %v5497_v41, %v4942_v63  ;;  %v2748_v62 = vld [vmem:[#allocation4 + $0x18] sm:$0xf] }
 0x167   : > { %v2234_v40 = vsel %vm6322_vm10, 0, %v2233_v23  ;;  %2209 = vst [vmem:[#allocation4 + $0x40] sm:$0x1] %v2208_v24  ;;  %v2749_v50 = vld [vmem:[#allocation4 + $0x20] sm:$0xf]  ;;  %v5566_v43 = vld [vmem:[%s7128_s3 + $0x170] sm:$0xff] }
 0x168   : > { %v2298_v17 = vor.u32 %v2296_v51, %v2295_v14  ;;  %v2299_v36 = vrot.slane %v2295_v14, 4  ;;  %v2179_v16 = vmax.f32 %v2170_v42, 0.0  ;;  %4044 = vmatmul.bf16.gmra.mxu2 %v4943_v26  ;;  %2235 = vst [vmem:[#allocation4 + $0x44] sm:$0x1] %v2234_v40  ;;  %v2523_v1 = vld [vmem:[#allocation4 + $0x10] sm:$0xf]  ;;  %4177 = vmatpush.bf16.msra.mxu3 %v5566_v43 }
 0x169   : > { %v2524_v15 = vld [vmem:[#allocation4 + $0x14] sm:$0x1]  ;;  %2756 = vst [vmem:[#allocation3 + $0x54] sm:$0xf] %v2748_v62  ;;  %v2564_v10 = vshrl.u32 %v2523_v1, 16  ;;  %v2567_v47 = vshll.u32 %v2523_v1, 16 }
 0x16a   : > { %v2363_v61 = vsel %vm6468_vm12, %v2298_v17, %v2362_v34  ;;  %v2366_v44 = vsel %vm5768_vm2, %v2299_v36, %v2365_v60  ;;  %v2243_v49 = vpack.c.bf16 %v2179_v16, %v2179_v16  ;;  %v2525_v34 = vld [vmem:[#allocation4 + $0x18] sm:$0xf]  ;;  %2757 = vst [vmem:[#allocation3 + $0x78] sm:$0xf] %v2749_v50  ;;  %v2526_v53 = vld [vmem:[#allocation4 + $0x1c] sm:$0x1] }
 0x16b   : > { %2364 = vst [vmem:[#allocation4 + $0x38] sm:$0xf] %v2363_v61  ;;  %v2566_v42 = vrot.slane %v2564_v10, 4  ;;  %v5554_v60 = vld [vmem:[%s7128_s3 + $0x110] sm:$0xff]  ;;  %v2573_v19 = vshll.u32 %v2524_v15, 16  ;;  %v2578_v17 = vshrl.u32 %v2525_v34, 16 }
 0x16c   : > { %2367 = vst [vmem:[#allocation4 + $0x3c] sm:$0x1] %v2366_v44  ;;  %v2301_v30 = vshrl.u32 %v2243_v49, 16  ;;  %v2304_v51 = vshll.u32 %v2243_v49, 16  ;;  %v4950_v13 = vld [vmem:[#allocation3 + $0x50] sm:$0xf]  ;;  %4152 = vmatpush.bf16.msrb.mxu2 %v5554_v60 }
 0x16d   : > { %v5498_v20 = vld [vmem:[#allocation3 + $0x70] sm:$0xf0]  ;;  %v2581_v36 = vshll.u32 %v2525_v34, 16  ;;  %v2507_v37 = vld [vmem:[#allocation4 + $0x20] sm:$0xf]  ;;  %v2569_v16 = vrot.slane %v2567_v47, 5 }
 0x16e   : > { %v2303_v2 = vrot.slane %v2301_v30, 7  ;;  %v4951_v35 = vor.u32 %v5498_v20, %v4950_v13  ;;  %v2587_v24 = vshll.u32 %v2526_v53, 16  ;;  %v2508_v61 = vld [vmem:[#allocation4 + $0x28] sm:$0xf]  ;;  %2515 = vst [vmem:[#allocation3 + $0x90] sm:$0xf] %v2507_v37 }
 0x16f   : > { %v2368_v44 = vld [vmem:[#allocation4 + $0x40] sm:$0xf]  ;;  %v2575_v63 = vrot.slane %v2573_v19, 5  ;;  %v2580_v41 = vrot.slane %v2578_v17, 4  ;;  %v2583_v26 = vrot.slane %v2581_v36, 5  ;;  %v5574_v23 = vld [vmem:[%s7128_s3 + $0x1b0] sm:$0xff]  ;;  %v2570_v40 = vor.u32 %v2569_v16, %v2566_v42 }
 0x170   : > { %v2306_v14 = vor.u32 %v2304_v51, %v2303_v2  ;;  %v2307_v0 = vrot.slane %v2303_v2, 4  ;;  %4102 = vmatmul.bf16.gmra.mxu0 %v4951_v35  ;;  %v2371_v33 = vld [vmem:[#allocation4 + $0x44] sm:$0x1]  ;;  %v2589_v62 = vrot.slane %v2587_v24, 5  ;;  %2516 = vst [vmem:[#allocation3 + $0xb4] sm:$0xf] %v2508_v61 }
 0x171   : > { %v5494_v51 = vld [vmem:[#allocation3 + $0x54] sm:$0xf]  ;;  %v2584_v50 = vor.u32 %v2583_v26, %v2580_v41  ;;  %v2671_v1 = vld [vmem:[#allocation4 + $0x20] sm:$0xe]  ;;  %4206 = vmatpush.bf16.msra.mxu0 %v5574_v23  ;;  %v4952_v39 = vld [vmem:[#allocation3 + $0x74] sm:$0xf0] }
 0x172   : > { %v2369_v49 = vsel %vm6468_vm12, %v2306_v14, %v2368_v44  ;;  %v2372_v30 = vsel %vm5768_vm2, %v2307_v0, %v2371_v33  ;;  %v2571_v15 = vrot.slane %v2570_v40, 4  ;;  %v4884_v2 = vrot.slane %v2671_v1, 9  ;;  %v2672_v13 = vld [vmem:[#allocation4 + $0x24] sm:$0x1]  ;;  %v2673_v53 = vld [vmem:[#allocation4 + $0x28] sm:$0xe] }
 0x173   : > { %2370 = vst [vmem:[#allocation4 + $0x40] sm:$0xf] %v2369_v49  ;;  %v4955_v34 = vor.u32 %v5494_v51, %v4952_v39  ;;  %v2585_v10 = vrot.slane %v2584_v50, 4  ;;  %v5573_v20 = vld [vmem:[%s7128_s3 + $0x1a8] sm:$0xff]  ;;  %v3065_v14 = vshll.u32 %v6608_v9, 16  ;;  %v2716_v47 = vrot.slane %v2672_v13, 5 }
 0x174   : > { %2373 = vst [vmem:[#allocation4 + $0x44] sm:$0x1] %v2372_v30  ;;  %v6654_v38 = vld [vmem:[#allocation4 + $0x2c] sm:$0x1]  ;;  %v2576_v0 = vsel %vm5860_vm5, %v2571_v15, %v2575_v63  ;;  %v4885_v60 = vrot.slane %v2673_v53, 9  ;;  %v6664_v36 = vld [vmem:[%s7128_s3 + $0x1f0] sm:$0xff] }
 0x175   : > { %v2674_v42 = vld [vmem:[#allocation4 + $0x2c] sm:$0x1]  ;;  %4131 = vmatmul.bf16.gmra.mxu1 %v4955_v34  ;;  %v2590_v35 = vsel %vm5860_vm5, %v2585_v10, %v2589_v62  ;;  %2657 = vst [vmem:[#allocation3 + $0x4c] sm:$0xf] %v2576_v0  ;;  %v2750_v17 = vld [vmem:[#allocation4 + $0x28] sm:$0xf]  ;;  %4207 = vmatpush.bf16.msra.mxu0 %v5573_v20  ;;  %v2717_v43 = vsel %vm5914_vm8, %v4884_v2, %v2716_v47 }
 0x176   : > { %v2720_v19 = vrot.slane %v2674_v42, 5  ;;  %2658 = vst [vmem:[#allocation3 + $0x70] sm:$0xf] %v2590_v35  ;;  %v4978_v37 = vld [vmem:[#allocation3 + $0x90] sm:$0xf]  ;;  %5601 = vmatpush.bf16.msra.mxu1 %v6664_v36  ;;  %v6673_v23 = vrot.slane %v3051_v7, 5 }
 0x177   : > { %v2527_v16 = vld [vmem:[#allocation4 + $0x20] sm:$0xf]  ;;  %v5506_v24 = vld [vmem:[#allocation3 + $0xb0] sm:$0xf0]  ;;  %2742 = vst [vmem:[#allocation3 + $0x98] sm:$0xf] %v2717_v43 }
 0x178   : > { %v2721_v61 = vsel %vm5914_vm8, %v4885_v60, %v2720_v19  ;;  %v2751_v44 = vld [vmem:[#allocation4 + $0x30] sm:$0xf]  ;;  %v4979_v63 = vor.u32 %v5506_v24, %v4978_v37  ;;  %v2528_v41 = vld [vmem:[#allocation4 + $0x24] sm:$0x1]  ;;  %v2529_v26 = vld [vmem:[#allocation4 + $0x28] sm:$0xf] }
 0x179   : > { %2743 = vst [vmem:[#allocation3 + $0xbc] sm:$0xf] %v2721_v61  ;;  %v6677_v49 = vrot.slane %v3062_v25, 4  ;;  %v3071_v33 = vshll.u32 %v6654_v38, 16  ;;  %v2592_v40 = vshrl.u32 %v2527_v16, 16  ;;  %v6680_v62 = vrot.slane %v3065_v14, 5 }
 0x17a   : > { %2758 = vst [vmem:[#allocation3 + $0x9c] sm:$0xf] %v2750_v17  ;;  %4049 = vmatmul.bf16.gmra.mxu2 %v4979_v63  ;;  %v2530_v30 = vld [vmem:[#allocation4 + $0x2c] sm:$0x1]  ;;  %v2595_v51 = vshll.u32 %v2527_v16, 16  ;;  %v2601_v1 = vshll.u32 %v2528_v41, 16 }
 0x17b   : > { %2759 = vst [vmem:[#allocation3 + $0xc0] sm:$0xf] %v2751_v44  ;;  %v2594_v50 = vrot.slane %v2592_v40, 4  ;;  %v2606_v39 = vshrl.u32 %v2529_v26, 16  ;;  %v2609_v6 = vshll.u32 %v2529_v26, 16  ;;  %v2615_v9 = vshll.u32 %v2530_v30, 16 }
 0x17c   : > { %v2509_v7 = vld [vmem:[#allocation4 + $0x30] sm:$0xf]  ;;  %v5493_v15 = vld [vmem:[#allocation3 + $0x4c] sm:$0xf]  ;;  %v2597_v2 = vrot.slane %v2595_v51, 5  ;;  %v2603_v10 = vrot.slane %v2601_v1, 5 }
 0x17d   : > { %v2510_v25 = vld [vmem:[#allocation4 + $0x38] sm:$0xf]  ;;  %v4944_v34 = vld [vmem:[#allocation3 + $0x6c] sm:$0xf0]  ;;  %v2608_v13 = vrot.slane %v2606_v39, 4  ;;  %v2611_v53 = vrot.slane %v2609_v6, 5 }
 0x17e   : > { %v5553_v20 = vld [vmem:[%s7128_s3 + $0x108] sm:$0xff]  ;;  %v4947_v14 = vor.u32 %v5493_v15, %v4944_v34  ;;  %v4986_v0 = vld [vmem:[#allocation3 + $0x98] sm:$0xf]  ;;  %v2598_v42 = vor.u32 %v2597_v2, %v2594_v50  ;;  %v2617_v47 = vrot.slane %v2615_v9, 5  ;;  %2517 = vst [vmem:[#allocation3 + $0xd8] sm:$0xf] %v2509_v7 }
 0x17f   : > { %v5565_v60 = vld [vmem:[%s7128_s3 + $0x168] sm:$0xff]  ;;  %v2612_v19 = vor.u32 %v2611_v53, %v2608_v13  ;;  %2518 = vst [vmem:[#allocation3 + $0xfc] sm:$0xf] %v2510_v25  ;;  %4153 = vmatpush.bf16.msrb.mxu2 %v5553_v20  ;;  %v5572_v17 = vld [vmem:[%s7128_s3 + $0x1a0] sm:$0xff]  ;;  %v2675_v61 = vld [vmem:[#allocation4 + $0x30] sm:$0xe] }
 0x180   : > { %v5507_v35 = vld [vmem:[#allocation3 + $0xb8] sm:$0xf0]  ;;  %v6694_v37 = vld [vmem:[%s7128_s3 + $0x1e8] sm:$0xff]  ;;  %4073 = vmatmul.bf16.gmra.mxu3 %v4947_v14  ;;  %v2599_v24 = vrot.slane %v2598_v42, 4  ;;  %4208 = vmatpush.bf16.msra.mxu0 %v5572_v17  ;;  %v2676_v26 = vld [vmem:[#allocation4 + $0x34] sm:$0x1]  ;;  %v2799_v17 = vor.u32 %v6580_v52, %v6576_v29 }
 0x181   : > { %v4987_v43 = vor.u32 %v5507_v35, %v4986_v0  ;;  %v5503_v16 = vld [vmem:[#allocation3 + $0x9c] sm:$0xf]  ;;  %v2613_v41 = vrot.slane %v2612_v19, 4  ;;  %4178 = vmatpush.bf16.msra.mxu3 %v5565_v60  ;;  %v4886_v40 = vrot.slane %v2675_v61, 9  ;;  %5602 = vmatpush.bf16.msra.mxu1 %v6694_v37  ;;  %v2677_v50 = vld [vmem:[#allocation4 + $0x38] sm:$0xe] }
 0x182   : > { %v5571_v44 = vld [vmem:[%s7128_s3 + $0x198] sm:$0xff]  ;;  %v4988_v63 = vld [vmem:[#allocation3 + $0xbc] sm:$0xf0]  ;;  %v2604_v51 = vsel %vm5860_vm5, %v2599_v24, %v2603_v10  ;;  %v2724_v39 = vrot.slane %v2676_v26, 5  ;;  %v4887_v15 = vrot.slane %v2677_v50, 9  ;;  %v5570_v14 = vld [vmem:[%s7128_s3 + $0x190] sm:$0xff] }
 0x183   : > { %4107 = vmatmul.bf16.gmra.mxu0 %v4987_v43  ;;  %v4991_v30 = vor.u32 %v5503_v16, %v4988_v63  ;;  %v2678_v1 = vld [vmem:[#allocation4 + $0x3c] sm:$0x1]  ;;  %v6705_v6 = vld [vmem:[%s7128_s3 + $0x1e0] sm:$0xff]  ;;  %v2618_v7 = vsel %vm5860_vm5, %v2613_v41, %v2617_v47  ;;  %2659 = vst [vmem:[#allocation3 + $0x94] sm:$0xf] %v2604_v51  ;;  %v3054_v43 = vor.u32 %v6673_v23, %v6613_v18  ;;  %v5569_v52 = vld [vmem:[%s7128_s3 + $0x188] sm:$0xff] }
 0x184   : > { %v2728_v2 = vrot.slane %v2678_v1, 5  ;;  %v5564_v9 = vld [vmem:[%s7128_s3 + $0x160] sm:$0xff]  ;;  %2660 = vst [vmem:[#allocation3 + $0xb8] sm:$0xf] %v2618_v7  ;;  %v2725_v34 = vsel %vm5914_vm8, %v4886_v40, %v2724_v39  ;;  %v2752_v10 = vld [vmem:[#allocation4 + $0x38] sm:$0xf]  ;;  %4209 = vmatpush.bf16.msra.mxu0 %v5571_v44  ;;  %v2791_v44 = vsel %vm5860_vm5, %v6604_v55, %v6551_v46  ;;  %v3068_v46 = vor.u32 %v6680_v62, %v6677_v49 }
 0x185   : > { %v5552_v25 = vld [vmem:[%s7128_s3 + $0x100] sm:$0xff]  ;;  %4136 = vmatmul.bf16.gmra.mxu1 %v4991_v30  ;;  %v5014_v53 = vld [vmem:[#allocation3 + $0xd8] sm:$0xf]  ;;  %2744 = vst [vmem:[#allocation3 + $0xe0] sm:$0xf] %v2725_v34  ;;  %4179 = vmatpush.bf16.msra.mxu3 %v5564_v9  ;;  %v6744_v18 = vrot.slane %v3057_v22, 5 }
 0x186   : > { %v2753_v13 = vld [vmem:[#allocation4 + $0x40] sm:$0xf]  ;;  %v2729_v20 = vsel %vm5914_vm8, %v4887_v15, %v2728_v2  ;;  %v6725_v0 = vld [vmem:[%s7128_s3 + $0x1d8] sm:$0xff]  ;;  %5603 = vmatpush.bf16.msra.mxu1 %v6705_v6  ;;  %v2531_v47 = vld [vmem:[#allocation4 + $0x30] sm:$0xf]  ;;  %4154 = vmatpush.bf16.msrb.mxu2 %v5552_v25  ;;  %v6756_v50 = vrot.slane %v3071_v33, 5 }
 0x187   : > { %v5515_v42 = vld [vmem:[#allocation3 + $0xf8] sm:$0xf0]  ;;  %2745 = vst [vmem:[#allocation3 + $0x104] sm:$0xf] %v2729_v20  ;;  %v2532_v35 = vld [vmem:[#allocation4 + $0x34] sm:$0x1] }
 0x188   : > { %v5015_v60 = vor.u32 %v5515_v42, %v5014_v53  ;;  %2760 = vst [vmem:[#allocation3 + $0xe4] sm:$0xf] %v2752_v10  ;;  %v2533_v19 = vld [vmem:[#allocation4 + $0x38] sm:$0xf]  ;;  %v2534_v16 = vld [vmem:[#allocation4 + $0x3c] sm:$0x1]  ;;  %4210 = vmatpush.bf16.msra.mxu0 %v5570_v14 }
 0x189   : > { %2761 = vst [vmem:[#allocation3 + $0x108] sm:$0xf] %v2753_v13  ;;  %v2620_v24 = vshrl.u32 %v2531_v47, 16  ;;  %v2623_v61 = vshll.u32 %v2531_v47, 16  ;;  %v2629_v63 = vshll.u32 %v2532_v35, 16  ;;  %v2634_v41 = vshrl.u32 %v2533_v19, 16 }
 0x18a   : > { %v2637_v26 = vshll.u32 %v2533_v19, 16  ;;  %v2643_v40 = vshll.u32 %v2534_v16, 16  ;;  %v5563_v29 = vld [vmem:[%s7128_s3 + $0x158] sm:$0xff]  ;;  %v5502_v55 = vld [vmem:[#allocation3 + $0x94] sm:$0xf]  ;;  %4054 = vmatmul.bf16.gmra.mxu2 %v5015_v60  ;;  %5604 = vmatpush.bf16.msra.mxu1 %v6725_v0  ;;  %v2800_v2 = vrot.slane %v2799_v17, 4 }
 0x18b   : > { %v2622_v23 = vrot.slane %v2620_v24, 4  ;;  %v2625_v30 = vrot.slane %v2623_v61, 5  ;;  %v6752_v51 = vld [vmem:[%s7128_s3 + $0x1d0] sm:$0xff]  ;;  %v4980_v31 = vld [vmem:[#allocation3 + $0xb4] sm:$0xf0]  ;;  %v2636_v22 = vrot.slane %v2634_v41, 4  ;;  %4180 = vmatpush.bf16.msra.mxu3 %v5563_v29 }
 0x18c   : > { %v2639_v1 = vrot.slane %v2637_v26, 5  ;;  %v5562_v49 = vld [vmem:[%s7128_s3 + $0x150] sm:$0xff]  ;;  %v4983_v62 = vor.u32 %v5502_v55, %v4980_v31  ;;  %v5022_v39 = vld [vmem:[#allocation3 + $0xe0] sm:$0xf]  ;;  %v2631_v15 = vrot.slane %v2629_v63, 5  ;;  %v2645_v34 = vrot.slane %v2643_v40, 5  ;;  %4211 = vmatpush.bf16.msra.mxu0 %v5569_v52 }
 0x18d   : > { %v2626_v7 = vor.u32 %v2625_v30, %v2622_v23  ;;  %2898 = vst [vmem:[#allocation3 + $0x10] sm:$0xf] %v2791_v44  ;;  %v5568_v38 = vld [vmem:[%s7128_s3 + $0x180] sm:$0xff]  ;;  %v6767_v33 = vld [vmem:[%s7128_s3 + $0x238] sm:$0xff]  ;;  %v3055_v10 = vrot.slane %v3054_v43, 4  ;;  %v2805_v20 = vsel %vm5860_vm5, %v2800_v2, %v6584_v4  ;;  %v6776_v14 = vld [vmem:[%s7128_s3 + $0x1c8] sm:$0xff]  ;;  %v2941_v55 = vsel %vm5914_vm8, %v4888_v5, %v2940_v32 }
 0x18e   : > { %v5516_v9 = vld [vmem:[#allocation3 + $0x100] sm:$0xf0]  ;;  %v2640_v25 = vor.u32 %v2639_v1, %v2636_v22  ;;  %5605 = vmatpush.bf16.msra.mxu1 %v6752_v51  ;;  %v2987_v42 = vld [vmem:[#allocation4 + $0x10] sm:$0xf]  ;;  %v3069_v47 = vrot.slane %v3068_v46, 4  ;;  %4263 = vmatpush.bf16.msra.mxu2 %v6767_v33  ;;  %v5561_v19 = vld [vmem:[%s7128_s3 + $0x148] sm:$0xff] }
 0x18f   : > { %v5023_v13 = vor.u32 %v5516_v9, %v5022_v39  ;;  %v2627_v53 = vrot.slane %v2626_v7, 4  ;;  %4181 = vmatpush.bf16.msra.mxu3 %v5562_v49  ;;  %2899 = vst [vmem:[#allocation3 + $0x34] sm:$0xf] %v2805_v20  ;;  %v6782_v17 = vld [vmem:[#allocation4 + $0x10] sm:$0xe]  ;;  %v6791_v44 = vld [vmem:[%s7128_s3 + $0x1c0] sm:$0xff]  ;;  %v3060_v63 = vsel %vm5860_vm5, %v3055_v10, %v6744_v18 }
 0x190   : > { %v5024_v60 = vld [vmem:[#allocation3 + $0x104] sm:$0xf0]  ;;  %v2641_v35 = vrot.slane %v2640_v25, 4  ;;  %4078 = vmatmul.bf16.gmra.mxu3 %v4983_v62  ;;  %v5512_v4 = vld [vmem:[#allocation3 + $0xe4] sm:$0xf]  ;;  %4212 = vmatpush.bf16.msra.mxu0 %v5568_v38  ;;  %v6799_v41 = vld [vmem:[%s7128_s3 + $0x230] sm:$0xff]  ;;  %v3074_v40 = vsel %vm5860_vm5, %v3069_v47, %v6756_v50 }
 0x191   : > { %v2632_v43 = vsel %vm5860_vm5, %v2627_v53, %v2631_v15  ;;  %v2988_v16 = vld [vmem:[#allocation4 + $0x18] sm:$0xf]  ;;  %2995 = vst [vmem:[#allocation3 + $0x18] sm:$0xf] %v2987_v42  ;;  %v5027_v24 = vor.u32 %v5512_v4, %v5024_v60  ;;  %v2767_v29 = vld [vmem:[#allocation4 + $0x1c] sm:$0x1] }
 0x192   : > { %v2646_v61 = vsel %vm5860_vm5, %v2641_v35, %v2645_v34  ;;  %2661 = vst [vmem:[#allocation3 + $0xdc] sm:$0xf] %v2632_v43  ;;  %v2766_v26 = vld [vmem:[#allocation4 + $0x18] sm:$0xf]  ;;  %5606 = vmatpush.bf16.msra.mxu1 %v6776_v14  ;;  %v2768_v52 = vld [vmem:[#allocation4 + $0x20] sm:$0xf]  ;;  %4264 = vmatpush.bf16.msra.mxu2 %v6799_v41 }
 0x193   : > { %4112 = vmatmul.bf16.gmra.mxu0 %v5023_v13  ;;  %2662 = vst [vmem:[#allocation3 + $0x100] sm:$0xf] %v2646_v61  ;;  %v6807_v46 = vrot.slane %v3020_v27, 4  ;;  %4182 = vmatpush.bf16.msra.mxu3 %v5561_v19  ;;  %v5560_v18 = vld [vmem:[%s7128_s3 + $0x140] sm:$0xff]  ;;  %v2945_v27 = vsel %vm5914_vm8, %v4889_v57, %v2944_v21  ;;  %v2807_v30 = vshrl.u32 %v2766_v26, 16  ;;  %v2810_v50 = vshll.u32 %v2766_v26, 16 }
 0x194   : > { %2996 = vst [vmem:[#allocation3 + $0x3c] sm:$0xf] %v2988_v16  ;;  %v2769_v23 = vld [vmem:[#allocation4 + $0x24] sm:$0x1]  ;;  %v2821_v31 = vshrl.u32 %v2768_v52, 16  ;;  %4234 = vmatpush.bf16.msrb.mxu0 %v6646_v54  ;;  %v4896_v3 = vrot.slane %v6782_v17, 9 }
 0x195   : > { %3141 = vst [vmem:[#allocation3 + $0x64] sm:$0xf] %v3060_v63  ;;  %v6826_v59 = vld [vmem:[#allocation4 + $0x14] sm:$0x1]  ;;  %4141 = vmatmul.bf16.gmra.mxu1 %v5027_v24  ;;  %v4922_v5 = vld [vmem:[#allocation3 + $0x10] sm:$0xf] }
 0x196   : > { %3142 = vst [vmem:[#allocation3 + $0x88] sm:$0xf] %v3074_v40  ;;  %v2816_v32 = vshll.u32 %v2767_v29, 16  ;;  %v2824_v22 = vshll.u32 %v2768_v52, 16  ;;  %v5490_v58 = vld [vmem:[#allocation3 + $0x30] sm:$0xf0]  ;;  %5607 = vmatpush.bf16.msra.mxu1 %v6791_v44  ;;  %4265 = vmatpush.bf16.msra.mxu2 %v6832_v8 }
 0x197   : > { %2978 = vst [vmem:[#allocation3 + $0x14] sm:$0xf] %v2941_v55  ;;  %v2809_v57 = vrot.slane %v2807_v30, 4  ;;  %v2812_v21 = vrot.slane %v2810_v50, 5  ;;  %v6837_v54 = vrot.slane %v3023_v56, 5  ;;  %4183 = vmatpush.bf16.msra.mxu3 %v5560_v18  ;;  %v2823_v1 = vrot.slane %v2821_v31, 4 }
 0x198   : > { %2979 = vst [vmem:[#allocation3 + $0x38] sm:$0xf] %v2945_v27  ;;  %v2830_v49 = vshll.u32 %v2769_v23, 16  ;;  %v6843_v62 = vld [vmem:[%s7128_s3 + $0x220] sm:$0xff]  ;;  %v6847_v39 = vrot.slane %v3029_v12, 5  ;;  %v4923_v45 = vor.u32 %v5490_v58, %v4922_v5  ;;  %v2826_v15 = vrot.slane %v2824_v22, 5  ;;  %4235 = vmatpush.bf16.msrb.mxu0 %v6664_v36 }
 0x199   : > { %v6849_v7 = vld [vmem:[#allocation4 + $0x18] sm:$0xf]  ;;  %v2813_v56 = vor.u32 %v2812_v21, %v2809_v57  ;;  %v2989_v2 = vld [vmem:[#allocation4 + $0x20] sm:$0xf]  ;;  %v2990_v25 = vld [vmem:[#allocation4 + $0x28] sm:$0xf] }
 0x19a   : > { %v5016_v9 = vld [vmem:[#allocation3 + $0xfc] sm:$0xf0]  ;;  %2997 = vst [vmem:[#allocation3 + $0x60] sm:$0xf] %v2989_v2  ;;  %v3181_v34 = vrot.slane %v6826_v59, 5  ;;  %4155 = vmatmul.bf16.vlgmr.msrb.gmra.mxu2 %v4923_v45  ;;  %v2818_v11 = vrot.slane %v2816_v32, 5  ;;  %v2827_v12 = vor.u32 %v2826_v15, %v2823_v1 }
 0x19b   : > { %5608 = vmatpush.bf16.msrb.mxu3 %v6767_v33  ;;  %v2814_v38 = vrot.slane %v2813_v56, 4  ;;  %2998 = vst [vmem:[#allocation3 + $0x84] sm:$0xf] %v2990_v25  ;;  %v3034_v10 = vshrl.u32 %v6849_v7, 16  ;;  %v5511_v13 = vld [vmem:[#allocation3 + $0xdc] sm:$0xf]  ;;  %4266 = vmatpush.bf16.msra.mxu2 %v6843_v62 }
 0x19c   : > { %v2832_v53 = vrot.slane %v2830_v49, 5  ;;  %v3011_v20 = vld [vmem:[#allocation4 + $0x30] sm:$0xf]  ;;  %v6856_v33 = vld [vmem:[#allocation4 + $0x1c] sm:$0x1]  ;;  %v5019_v36 = vor.u32 %v5511_v13, %v5016_v9  ;;  %v2828_v60 = vrot.slane %v2827_v12, 4  ;;  %4236 = vmatpush.bf16.msrb.mxu0 %v6694_v37 }
 0x19d   : > { %v5491_v42 = vld [vmem:[#allocation3 + $0x38] sm:$0xf0]  ;;  %v2819_v47 = vsel %vm5860_vm5, %v2814_v38, %v2818_v11  ;;  %v3013_v35 = vld [vmem:[#allocation4 + $0x38] sm:$0xf]  ;;  %v3076_v19 = vshrl.u32 %v3011_v20, 16  ;;  %v3037_v16 = vshll.u32 %v6849_v7, 16 }
 0x19e   : > { %2900 = vst [vmem:[#allocation3 + $0x58] sm:$0xf] %v2819_v47  ;;  %v3012_v4 = vld [vmem:[#allocation4 + $0x34] sm:$0x1]  ;;  %v3014_v43 = vld [vmem:[#allocation4 + $0x3c] sm:$0x1]  ;;  %v2833_v61 = vsel %vm5860_vm5, %v2828_v60, %v2832_v53 }
 0x19f   : > { %5609 = vmatpush.bf16.msrb.mxu3 %v6799_v41  ;;  %v4930_v24 = vld [vmem:[#allocation3 + $0x18] sm:$0xf]  ;;  %v3078_v63 = vrot.slane %v3076_v19, 4  ;;  %v3079_v26 = vshll.u32 %v3011_v20, 16  ;;  %v4968_v40 = vld [vmem:[#allocation3 + $0x84] sm:$0xf0] }
 0x1a0   : > { %2901 = vst [vmem:[#allocation3 + $0x7c] sm:$0xf] %v2833_v61  ;;  %v3090_v29 = vshrl.u32 %v3013_v35, 16  ;;  %v3093_v52 = vshll.u32 %v3013_v35, 16  ;;  %4083 = vmatmul.bf16.gmra.mxu3 %v5019_v36  ;;  %v4931_v18 = vor.u32 %v5491_v42, %v4930_v24  ;;  %v3085_v55 = vshll.u32 %v3012_v4, 16  ;;  %4237 = vmatpush.bf16.msrb.mxu0 %v6705_v6  ;;  %v5587_v6 = vld [vmem:[%s7128_s3 + $0x218] sm:$0xff]  ;;  %v6881_v4 = vpop.f32.mrf.mxu1 }
 0x1a1   : > { %v3081_v41 = vrot.slane %v3079_v26, 5  ;;  %v3099_v37 = vshll.u32 %v3014_v43, 16  ;;  %v2910_v23 = vld [vmem:[#allocation4 + $0x18] sm:$0xe]  ;;  %v3043_v27 = vshll.u32 %v6856_v33, 16  ;;  %4267 = vmatpush.bf16.msra.mxu2 %v5587_v6 }
 0x1a2   : > { %v5496_v30 = vld [vmem:[#allocation3 + $0x64] sm:$0xf]  ;;  %v3092_v50 = vrot.slane %v3090_v29, 4  ;;  %v3095_v31 = vrot.slane %v3093_v52, 5  ;;  %v4890_v5 = vrot.slane %v2910_v23, 9  ;;  %v3087_v9 = vrot.slane %v3085_v55, 5 }
 0x1a3   : > { %5610 = vmatpush.bf16.msrb.mxu3 %v6832_v8  ;;  %4213 = vmatmul.bf16.vlgmr.msra.gmra.mxu0 %v4931_v18  ;;  %v4971_v32 = vor.u32 %v5496_v30, %v4968_v40  ;;  %v3082_v22 = vor.u32 %v3081_v41, %v3078_v63  ;;  %v2911_v58 = vld [vmem:[#allocation4 + $0x1c] sm:$0x1]  ;;  %v2912_v57 = vld [vmem:[#allocation4 + $0x20] sm:$0xe]  ;;  %v2913_v21 = vld [vmem:[#allocation4 + $0x24] sm:$0x1] }
 0x1a4   : > { %v3096_v1 = vor.u32 %v3095_v31, %v3092_v50  ;;  %v2948_v49 = vrot.slane %v2911_v58, 5  ;;  %v4891_v45 = vrot.slane %v2912_v57, 9  ;;  %v2952_v56 = vrot.slane %v2913_v21, 5  ;;  %v2770_v15 = vld [vmem:[#allocation4 + $0x28] sm:$0xf]  ;;  %4238 = vmatpush.bf16.msrb.mxu0 %v6725_v0  ;;  %v5586_v52 = vld [vmem:[%s7128_s3 + $0x210] sm:$0xff] }
 0x1a5   : > { %v3083_v2 = vrot.slane %v3082_v22, 4  ;;  %v3101_v25 = vrot.slane %v3099_v37, 5  ;;  %v2771_v38 = vld [vmem:[#allocation4 + $0x2c] sm:$0x1]  ;;  %v2835_v8 = vshrl.u32 %v2770_v15, 16  ;;  %4247 = vmatmul.bf16.vlgmr.msra.gmra.mxu1 %v4971_v32  ;;  %v2838_v36 = vshll.u32 %v2770_v15, 16  ;;  %4268 = vmatpush.bf16.msra.mxu2 %v5586_v52 }
 0x1a6   : > { %v4958_v11 = vld [vmem:[#allocation3 + $0x58] sm:$0xf]  ;;  %v3097_v12 = vrot.slane %v3096_v1, 4  ;;  %v2949_v13 = vsel %vm5914_vm8, %v4890_v5, %v2948_v49  ;;  %v2772_v53 = vld [vmem:[#allocation4 + $0x30] sm:$0xf]  ;;  %v2953_v60 = vsel %vm5914_vm8, %v4891_v45, %v2952_v56  ;;  %v2844_v0 = vshll.u32 %v2771_v38, 16 }
 0x1a7   : > { %v2773_v20 = vld [vmem:[#allocation4 + $0x34] sm:$0x1]  ;;  %v5499_v42 = vld [vmem:[#allocation3 + $0x78] sm:$0xf0]  ;;  %v3088_v47 = vsel %vm5860_vm5, %v3083_v2, %v3087_v9  ;;  %2980 = vst [vmem:[#allocation3 + $0x5c] sm:$0xf] %v2949_v13  ;;  %5611 = vmatpush.bf16.msrb.mxu3 %v6843_v62 }
 0x1a8   : > { %v2837_v35 = vrot.slane %v2835_v8, 4  ;;  %v6879_v19 = vld [vmem:[#allocation4 + $0x18] sm:$0xe]  ;;  %v3102_v43 = vsel %vm5860_vm5, %v3097_v12, %v3101_v25  ;;  %3143 = vst [vmem:[#allocation3 + $0xac] sm:$0xf] %v3088_v47  ;;  %v2840_v24 = vrot.slane %v2838_v36, 5  ;;  %v4959_v40 = vor.u32 %v5499_v42, %v4958_v11  ;;  %4239 = vmatpush.bf16.msrb.mxu0 %v6752_v51 }
 0x1a9   : > { %v2849_v61 = vshrl.u32 %v2772_v53, 16  ;;  %v2991_v63 = vld [vmem:[#allocation4 + $0x30] sm:$0xf]  ;;  %v4924_v26 = vld [vmem:[#allocation3 + $0x34] sm:$0xf0]  ;;  %v2852_v29 = vshll.u32 %v2772_v53, 16 }
 0x1aa   : > { %3144 = vst [vmem:[#allocation3 + $0xd0] sm:$0xf] %v3102_v43  ;;  %v2841_v62 = vor.u32 %v2840_v24, %v2837_v35  ;;  %v2846_v18 = vrot.slane %v2844_v0, 5  ;;  %v2992_v55 = vld [vmem:[#allocation4 + $0x38] sm:$0xf]  ;;  %4160 = vmatmul.bf16.gmra.mxu2 %v4959_v40  ;;  %v2858_v30 = vshll.u32 %v2773_v20, 16  ;;  %v6906_v0 = vpop.f32.mrf.mxu1 }
 0x1ab   : > { %2981 = vst [vmem:[#allocation3 + $0x80] sm:$0xf] %v2953_v60  ;;  %v2851_v41 = vrot.slane %v2849_v61, 4  ;;  %v6889_v37 = vld [vmem:[#allocation4 + $0x1c] sm:$0x1]  ;;  %v2854_v23 = vrot.slane %v2852_v29, 5  ;;  %5612 = vmatpush.bf16.msrb.mxu3 %v5587_v6 }
 0x1ac   : > { %2999 = vst [vmem:[#allocation3 + $0xa8] sm:$0xf] %v2991_v63  ;;  %v3015_v50 = vld [vmem:[#allocation4 + $0x40] sm:$0xf]  ;;  %v2842_v31 = vrot.slane %v2841_v62, 4  ;;  %v4897_v51 = vrot.slane %v6879_v19, 9  ;;  %4240 = vmatpush.bf16.msrb.mxu0 %v6776_v14 }
 0x1ad   : > { %3000 = vst [vmem:[#allocation3 + $0xcc] sm:$0xf] %v2992_v55  ;;  %v3016_v5 = vld [vmem:[#allocation4 + $0x44] sm:$0x1]  ;;  %v3104_v32 = vshrl.u32 %v3015_v50, 16  ;;  %v2855_v58 = vor.u32 %v2854_v23, %v2851_v41  ;;  %v3107_v57 = vshll.u32 %v3015_v50, 16 }
 0x1ae   : > { %v5486_v22 = vld [vmem:[#allocation3 + $0x14] sm:$0xf]  ;;  %v2914_v21 = vld [vmem:[#allocation4 + $0x28] sm:$0xe]  ;;  %v5500_v49 = vld [vmem:[#allocation3 + $0x80] sm:$0xf0]  ;;  %v2847_v45 = vsel %vm5860_vm5, %v2842_v31, %v2846_v18  ;;  %v3026_v31 = vor.u32 %v6837_v54, %v6807_v46 }
 0x1af   : > { %v4927_v1 = vor.u32 %v5486_v22, %v4924_v26  ;;  %v3106_v56 = vrot.slane %v3104_v32, 4  ;;  %v2915_v15 = vld [vmem:[#allocation4 + $0x2c] sm:$0x1]  ;;  %v4892_v6 = vrot.slane %v2914_v21, 9  ;;  %v2856_v2 = vrot.slane %v2855_v58, 4  ;;  %5613 = vmatpush.bf16.msrb.mxu3 %v5586_v52 }
 0x1b0   : > { %v2860_v9 = vrot.slane %v2858_v30, 5  ;;  %2902 = vst [vmem:[#allocation3 + $0xa0] sm:$0xf] %v2847_v45  ;;  %v3109_v25 = vrot.slane %v3107_v57, 5  ;;  %v3113_v38 = vshll.u32 %v3016_v5, 16  ;;  %v3185_v8 = vrot.slane %v6889_v37, 5  ;;  %4241 = vmatpush.bf16.msrb.mxu0 %v6791_v44 }
 0x1b1   : > { %v4966_v11 = vld [vmem:[#allocation3 + $0x60] sm:$0xf]  ;;  %v2916_v12 = vld [vmem:[#allocation4 + $0x30] sm:$0xe]  ;;  %v2956_v13 = vrot.slane %v2915_v15, 5  ;;  %4184 = vmatmul.bf16.vlgmr.msra.gmra.mxu3 %v4927_v1  ;;  %v5585_v60 = vld [vmem:[%s7128_s3 + $0x208] sm:$0xff] }
 0x1b2   : > { %v4967_v14 = vor.u32 %v5500_v49, %v4966_v11  ;;  %v5004_v53 = vld [vmem:[#allocation3 + $0xcc] sm:$0xf0]  ;;  %v2861_v20 = vsel %vm5860_vm5, %v2856_v2, %v2860_v9  ;;  %v3110_v36 = vor.u32 %v3109_v25, %v3106_v56  ;;  %v2917_v42 = vld [vmem:[#allocation4 + $0x34] sm:$0x1]  ;;  %v4893_v47 = vrot.slane %v2916_v12, 9  ;;  %4269 = vmatpush.bf16.msra.mxu2 %v5585_v60  ;;  %v5584_v44 = vld [vmem:[%s7128_s3 + $0x200] sm:$0xff] }
 0x1b3   : > { %v6904_v35 = vrot.slane %v3034_v10, 4  ;;  %v5505_v43 = vld [vmem:[#allocation3 + $0xac] sm:$0xf]  ;;  %2903 = vst [vmem:[#allocation3 + $0xc4] sm:$0xf] %v2861_v20  ;;  %v2957_v24 = vsel %vm5914_vm8, %v4892_v6, %v2956_v13  ;;  %v2960_v61 = vrot.slane %v2917_v42, 5  ;;  %5614 = vmatpush.bf16.msrb.mxu3 %v5585_v60  ;;  %v3182_v6 = vsel %vm5914_vm8, %v4896_v3, %v3181_v34  ;;  %v6944_v20 = vpop.f32.mrf.mxu1 }
 0x1b4   : > { %v6912_v63 = vrot.slane %v3037_v16, 5  ;;  %4218 = vmatmul.bf16.gmra.mxu0 %v4967_v14  ;;  %v3111_v26 = vrot.slane %v3110_v36, 4  ;;  %v3115_v40 = vrot.slane %v3113_v38, 5  ;;  %2982 = vst [vmem:[#allocation3 + $0xa4] sm:$0xf] %v2957_v24  ;;  %v5007_v10 = vor.u32 %v5505_v43, %v5004_v53 }
 0x1b5   : > { %v2961_v29 = vsel %vm5914_vm8, %v4893_v47, %v2960_v61  ;;  %v2774_v52 = vld [vmem:[#allocation4 + $0x38] sm:$0xf]  ;;  %v2775_v62 = vld [vmem:[#allocation4 + $0x3c] sm:$0x1]  ;;  %v2776_v18 = vld [vmem:[#allocation4 + $0x40] sm:$0xf]  ;;  %v3186_v11 = vsel %vm5914_vm8, %v4897_v51, %v3185_v8 }
 0x1b6   : > { %v6919_v7 = vld [vmem:[#allocation4 + $0x40] sm:$0xe]  ;;  %v3116_v16 = vsel %vm5860_vm5, %v3111_v26, %v3115_v40  ;;  %2983 = vst [vmem:[#allocation3 + $0xc8] sm:$0xf] %v2961_v29  ;;  %v2863_v41 = vshrl.u32 %v2774_v52, 16  ;;  %v2866_v55 = vshll.u32 %v2774_v52, 16  ;;  %4252 = vmatmul.bf16.gmra.mxu1 %v5007_v10  ;;  %4270 = vmatpush.bf16.msra.mxu2 %v5584_v44  ;;  %v3040_v21 = vor.u32 %v6912_v63, %v6904_v35 }
 0x1b7   : > { %3145 = vst [vmem:[#allocation3 + $0xf4] sm:$0xf] %v3116_v16  ;;  %v2777_v23 = vld [vmem:[#allocation4 + $0x44] sm:$0x1]  ;;  %v2872_v30 = vshll.u32 %v2775_v62, 16  ;;  %v2877_v50 = vshrl.u32 %v2776_v18, 16  ;;  %5615 = vmatpush.bf16.msrb.mxu3 %v5584_v44 }
 0x1b8   : > { %v6927_v5 = vrot.slane %v3043_v27, 5  ;;  %v2865_v32 = vrot.slane %v2863_v41, 4  ;;  %v2868_v22 = vrot.slane %v2866_v55, 5  ;;  %v2880_v58 = vshll.u32 %v2776_v18, 16  ;;  %v2993_v57 = vld [vmem:[#allocation4 + $0x40] sm:$0xf] }
 0x1b9   : > { %v4902_v1 = vrot.slane %v6919_v7, 9  ;;  %v4994_v49 = vld [vmem:[#allocation3 + $0xa0] sm:$0xf]  ;;  %v2879_v45 = vrot.slane %v2877_v50, 4  ;;  %3001 = vst [vmem:[#allocation3 + $0xf0] sm:$0xf] %v2993_v57 }
 0x1ba   : > { %v3160_v56 = vld [vmem:[#allocation4 + $0x44] sm:$0x1]  ;;  %v2869_v54 = vor.u32 %v2868_v22, %v2865_v32  ;;  %v2882_v33 = vrot.slane %v2880_v58, 5  ;;  %v2886_v27 = vshll.u32 %v2777_v23, 16  ;;  %v2918_v15 = vld [vmem:[#allocation4 + $0x38] sm:$0xe] }
 0x1bb   : > { %v5508_v46 = vld [vmem:[#allocation3 + $0xc0] sm:$0xf0]  ;;  %v2874_v9 = vrot.slane %v2872_v30, 5  ;;  %v2919_v25 = vld [vmem:[#allocation4 + $0x3c] sm:$0x1]  ;;  %v3027_v12 = vrot.slane %v3026_v31, 4  ;;  %v6968_v58 = vpop.f32.mrf.mxu1 }
 0x1bc   : > { %v4995_v2 = vor.u32 %v5508_v46, %v4994_v49  ;;  %v2920_v38 = vld [vmem:[#allocation4 + $0x40] sm:$0xe]  ;;  %v2870_v13 = vrot.slane %v2869_v54, 4  ;;  %v2883_v14 = vor.u32 %v2882_v33, %v2879_v45  ;;  %v2921_v59 = vld [vmem:[#allocation4 + $0x44] sm:$0x1]  ;;  %v4894_v53 = vrot.slane %v2918_v15, 9 }
 0x1bd   : > { %v2964_v17 = vrot.slane %v2919_v25, 5  ;;  %v5495_v3 = vld [vmem:[#allocation3 + $0x5c] sm:$0xf]  ;;  %v4960_v34 = vld [vmem:[#allocation3 + $0x7c] sm:$0xf0]  ;;  %v4895_v36 = vrot.slane %v2920_v38, 9  ;;  %v3032_v44 = vsel %vm5860_vm5, %v3027_v12, %v6847_v39 }
 0x1be   : > { %4165 = vmatmul.bf16.gmra.mxu2 %v4995_v2  ;;  %v2968_v42 = vrot.slane %v2921_v59, 5  ;;  %3219 = vst [vmem:[#allocation3 + $0x20] sm:$0xf] %v3182_v6  ;;  %v5509_v37 = vld [vmem:[#allocation3 + $0xc8] sm:$0xf0]  ;;  %v2875_v19 = vsel %vm5860_vm5, %v2870_v13, %v2874_v9  ;;  %v2884_v47 = vrot.slane %v2883_v14, 4  ;;  %v4963_v61 = vor.u32 %v5495_v3, %v4960_v34 }
 0x1bf   : > { %v2888_v51 = vrot.slane %v2886_v27, 5  ;;  %v2965_v8 = vsel %vm5914_vm8, %v4894_v53, %v2964_v17  ;;  %3220 = vst [vmem:[#allocation3 + $0x44] sm:$0xf] %v3186_v11  ;;  %v3205_v60 = vrot.slane %v3160_v56, 5  ;;  %v3041_v43 = vrot.slane %v3040_v21, 4 }
 0x1c0   : > { %2904 = vst [vmem:[#allocation3 + $0xe8] sm:$0xf] %v2875_v19  ;;  %v2969_v35 = vsel %vm5914_vm8, %v4895_v36, %v2968_v42  ;;  %v3151_v24 = vld [vmem:[#allocation4 + $0x20] sm:$0xe]  ;;  %v5002_v63 = vld [vmem:[#allocation3 + $0xa8] sm:$0xf] }
 0x1c1   : > { %v5040_v26 = vld [vmem:[#allocation3 + $0x114] sm:$0xf0]  ;;  %v2889_v40 = vsel %vm5860_vm5, %v2884_v47, %v2888_v51  ;;  %2984 = vst [vmem:[#allocation3 + $0xec] sm:$0xf] %v2965_v8  ;;  %v3152_v10 = vld [vmem:[#allocation4 + $0x24] sm:$0x1]  ;;  %v3046_v29 = vsel %vm5860_vm5, %v3041_v43, %v6927_v5  ;;  %4189 = vmatmul.bf16.gmra.mxu3 %v4963_v61  ;;  %v5003_v18 = vor.u32 %v5509_v37, %v5002_v63 }
 0x1c2   : > { %2905 = vst [vmem:[#allocation3 + $0x10c] sm:$0xf] %v2889_v40  ;;  %v3153_v52 = vld [vmem:[#allocation4 + $0x28] sm:$0xe]  ;;  %v3154_v62 = vld [vmem:[#allocation4 + $0x2c] sm:$0x1]  ;;  %v3206_v39 = vsel %vm5914_vm8, %v4902_v1, %v3205_v60 }
 0x1c3   : > { %v5514_v16 = vld [vmem:[#allocation3 + $0xf4] sm:$0xf]  ;;  %2985 = vst [vmem:[#allocation3 + $0x110] sm:$0xf] %v2969_v35  ;;  %v4898_v41 = vrot.slane %v3151_v24, 9  ;;  %v3189_v55 = vrot.slane %v3152_v10, 5  ;;  %v6974_v25 = vpop.f32.mrf.mxu1 }
 0x1c4   : > { %3139 = vst [vmem:[#allocation3 + $0x1c] sm:$0xf] %v3032_v44  ;;  %v4899_v23 = vrot.slane %v3153_v52, 9  ;;  %v3193_v30 = vrot.slane %v3154_v62, 5  ;;  %4223 = vmatmul.bf16.gmra.mxu0 %v5003_v18  ;;  %v5043_v50 = vor.u32 %v5514_v16, %v5040_v26  ;;  %v3155_v5 = vld [vmem:[#allocation4 + $0x30] sm:$0xe] }
 0x1c5   : > { %3140 = vst [vmem:[#allocation3 + $0x40] sm:$0xf] %v3046_v29  ;;  %v3190_v48 = vsel %vm5914_vm8, %v4898_v41, %v3189_v55  ;;  %v3156_v32 = vld [vmem:[#allocation4 + $0x34] sm:$0x1]  ;;  %v3157_v22 = vld [vmem:[#allocation4 + $0x38] sm:$0xe] }
 0x1c6   : > { %3225 = vst [vmem:[#allocation3 + $0xf8] sm:$0xf] %v3206_v39  ;;  %v3194_v31 = vsel %vm5914_vm8, %v4899_v23, %v3193_v30  ;;  %4257 = vmatmul.bf16.gmra.mxu1 %v5043_v50  ;;  %v3158_v7 = vld [vmem:[#allocation4 + $0x3c] sm:$0x1]  ;;  %v4900_v21 = vrot.slane %v3155_v5, 9  ;;  %v3197_v1 = vrot.slane %v3156_v32, 5 }
 0x1c7   : > { %3221 = vst [vmem:[#allocation3 + $0x68] sm:$0xf] %v3190_v48  ;;  %v4901_v49 = vrot.slane %v3157_v22, 9  ;;  %v3201_v45 = vrot.slane %v3158_v7, 5  ;;  %v5030_v56 = vld [vmem:[#allocation3 + $0xe8] sm:$0xf] }
 0x1c8   : > { %3222 = vst [vmem:[#allocation3 + $0x8c] sm:$0xf] %v3194_v31  ;;  %v3198_v46 = vsel %vm5914_vm8, %v4900_v21, %v3197_v1  ;;  %v4996_v27 = vld [vmem:[#allocation3 + $0xc4] sm:$0xf0]  ;;  %v5504_v15 = vld [vmem:[#allocation3 + $0xa4] sm:$0xf] }
 0x1c9   : > { %v5517_v57 = vld [vmem:[#allocation3 + $0x108] sm:$0xf0]  ;;  %v3202_v54 = vsel %vm5914_vm8, %v4901_v49, %v3201_v45  ;;  %3223 = vst [vmem:[#allocation3 + $0xb0] sm:$0xf] %v3198_v46  ;;  %v5038_v6 = vld [vmem:[#allocation3 + $0xf0] sm:$0xf]  ;;  %v4999_v9 = vor.u32 %v5504_v15, %v4996_v27 }
 0x1ca   : > { %v5031_v33 = vor.u32 %v5517_v57, %v5030_v56  ;;  %3224 = vst [vmem:[#allocation3 + $0xd4] sm:$0xf] %v3202_v54  ;;  %v5518_v2 = vld [vmem:[#allocation3 + $0x110] sm:$0xf0]  ;;  %v5492_v11 = vld [vmem:[#allocation3 + $0x40] sm:$0xf0] }
 0x1cb   : > { %v5039_v38 = vor.u32 %v5518_v2, %v5038_v6  ;;  %v4938_v14 = vld [vmem:[#allocation3 + $0x20] sm:$0xf]  ;;  %v6976_v28 = vpop.f32.mrf.mxu1  ;;  %v5032_v53 = vld [vmem:[#allocation3 + $0x10c] sm:$0xf0]  ;;  %v5513_v17 = vld [vmem:[#allocation3 + $0xec] sm:$0xf] }
 0x1cc   : > { %v4939_v59 = vor.u32 %v5492_v11, %v4938_v14  ;;  %v4932_v3 = vld [vmem:[#allocation3 + $0x3c] sm:$0xf0]  ;;  %v5035_v34 = vor.u32 %v5513_v17, %v5032_v53  ;;  %v5487_v36 = vld [vmem:[#allocation3 + $0x1c] sm:$0xf] }
 0x1cd   : > { %v6981_v42 = vld [vmem:[%s7129_s4] ss:$0 sm:$0xff]  ;;  %v4935_v37 = vor.u32 %v5487_v36, %v4932_v3  ;;  %v5046_v26 = vld [vmem:[#allocation3 + $0xf8] sm:$0xf]  ;;  %v5519_v40 = vld [vmem:[#allocation3 + $0x118] sm:$0xf0] }
 0x1ce   : > { %4170 = vmatmul.bf16.gmra.mxu2 %v5031_v33  ;;  %v4974_v61 = vld [vmem:[#allocation3 + $0x68] sm:$0xf]  ;;  %v5047_v18 = vor.u32 %v5519_v40, %v5046_v26 }
 0x1cf   : > { %v5501_v43 = vld [vmem:[#allocation3 + $0x88] sm:$0xf0] }
 0x1d0   : > { %v4975_v63 = vor.u32 %v5501_v43, %v4974_v61  ;;  %v5010_v48 = vld [vmem:[#allocation3 + $0xb0] sm:$0xf] }
 0x1d1   : > { %4194 = vmatmul.bf16.gmra.mxu3 %v4999_v9  ;;  %v5510_v30 = vld [vmem:[#allocation3 + $0xd0] sm:$0xf0] }
 0x1d2   : > { %v4040_v12 = vpop.f32.mrf.mxu2  ;;  %v4098_v13 = vpop.f32.mrf.mxu0  ;;  %v5011_v50 = vor.u32 %v5510_v30, %v5010_v48 }
 0x1d3   : > { %v6983_v51 = vpop.f32.mrf.mxu1  ;;  %v4041_v8 = vadd.f32 %v6981_v42, %v4040_v12 }
 0x1d4   : > { %4228 = vmatmul.bf16.gmra.mxu0 %v5039_v38 }
 0x1da   : > { %v4042_v19 = vpop.f32.mrf.mxu2  ;;  %v4100_v47 = vpop.f32.mrf.mxu0 }
 0x1db   : > { %v4043_v10 = vadd.f32 %v6981_v42, %v4042_v19  ;;  %v6987_v52 = vpop.f32.mrf.mxu1 }
 0x1de   : > { %4271 = vmatmul.bf16.vlgmr.msra.gmra.mxu2 %v4939_v59 }
 0x1e1   : > { %4199 = vmatmul.bf16.gmra.mxu3 %v5035_v34 }
 0x1e3   : > { %v4127_v39 = vpop.f32.mrf.mxu1 }
 0x1e4   : > { %4242 = vmatmul.bf16.vlgmr.msrb.gmra.mxu0 %v4935_v37  ;;  %v4069_v60 = vpop.f32.mrf.mxu3 }
 0x1e5   : > { %v4070_v35 = vadd.f32 %v4069_v60, %v4041_v8 }
 0x1e7   : > { %v4099_v24 = vadd.f32 %v4098_v13, %v4070_v35 }
 0x1e9   : > { %v6990_v49 = vadd.f32 %v4127_v39, %v4099_v24 }
 0x1eb   : > { %v4045_v44 = vpop.f32.mrf.mxu2  ;;  %v4129_v32 = vpop.f32.mrf.mxu1 }
 0x1ec   : > { %v4071_v62 = vpop.f32.mrf.mxu3  ;;  %v4046_v22 = vadd.f32 %v6981_v42, %v4045_v44 }
 0x1ed   : > { %v4103_v29 = vpop.f32.mrf.mxu0  ;;  %v4072_v16 = vadd.f32 %v4071_v62, %v4043_v10 }
 0x1ee   : > { %4276 = vmatmul.bf16.gmra.mxu2 %v4975_v63 }
 0x1ef   : > { %v4101_v41 = vadd.f32 %v4100_v47, %v4072_v16 }
 0x1f1   : > { %4286 = vmatmul.bf16.vlgmr.msrb.gmra.mxu3 %v5047_v18  ;;  %v6993_v6 = vadd.f32 %v4129_v32, %v4101_v41 }
 0x1f3   : > { %v4047_v55 = vpop.f32.mrf.mxu2  ;;  %v4132_v46 = vpop.f32.mrf.mxu1 }
 0x1f4   : > { %v4048_v56 = vadd.f32 %v6981_v42, %v4047_v55 }
 0x1f5   : > { %v4105_v23 = vpop.f32.mrf.mxu0 }
 0x1fb   : > { %v4134_v13 = vpop.f32.mrf.mxu1 }
 0x1fd   : > { %v4050_v31 = vpop.f32.mrf.mxu2 }
 0x1fe   : > { %4281 = vmatmul.bf16.gmra.mxu2 %v5011_v50  ;;  %v4051_v9 = vadd.f32 %v6981_v42, %v4050_v31 }
 0x200   : > { %v4108_v5 = vpop.f32.mrf.mxu0 }
 0x203   : > { %v4074_v7 = vpop.f32.mrf.mxu3  ;;  %v4137_v47 = vpop.f32.mrf.mxu1 }
 0x204   : > { %v4075_v57 = vadd.f32 %v4074_v7, %v4046_v22 }
 0x205   : > { %v4052_v21 = vpop.f32.mrf.mxu2 }
 0x206   : > { %v4104_v1 = vadd.f32 %v4103_v29, %v4075_v57  ;;  %v4053_v17 = vadd.f32 %v6981_v42, %v4052_v21  ;;  %v5640_v57 = vmov 0.0  }
 0x207   : > { %4308 = vst [vmem:[%s7033_s9] sm:$0xff] %v5640_v57 }
 0x208   : > { %v4110_v45 = vpop.f32.mrf.mxu0  ;;  %v6996_v12 = vadd.f32 %v4132_v46, %v4104_v1  ;;  %4309 = vst [vmem:[%s7033_s9 + $0x8] sm:$0x3] %v5640_v57 }
 0x209   : > { %5336 = vst [vmem:[%s7033_s9 + $0x90] sm:$0xff] %v5640_v57 }
 0x20a   : > { %5337 = vst [vmem:[%s7033_s9 + $0x98] sm:$0x3] %v5640_v57 }
 0x20b   : > { %v4076_v54 = vpop.f32.mrf.mxu3  ;;  %v4139_v40 = vpop.f32.mrf.mxu1  ;;  %5338 = vst [vmem:[%s7033_s9 + $0x10] sm:$0x1] %v5640_v57 }
 0x20c   : > { %v4077_v33 = vadd.f32 %v4076_v54, %v4048_v56  ;;  %5339 = vst [vmem:[%s7033_s9 + $0x20] sm:$0x1] %v5640_v57 }
 0x20d   : > { %v4055_v27 = vpop.f32.mrf.mxu2  ;;  %5340 = vst [vmem:[%s7033_s9 + $0x30] sm:$0x1] %v5640_v57 }
 0x20e   : > { %v4106_v15 = vadd.f32 %v4105_v23, %v4077_v33  ;;  %v4056_v60 = vadd.f32 %v6981_v42, %v4055_v27  ;;  %5341 = vst [vmem:[%s7033_s9 + $0x40] sm:$0x1] %v5640_v57 }
 0x20f   : > { %5342 = vst [vmem:[%s7033_s9 + $0x50] sm:$0x1] %v5640_v57 }
 0x210   : > { %v4113_v2 = vpop.f32.mrf.mxu0  ;;  %v6999_v36 = vadd.f32 %v4134_v13, %v4106_v15  ;;  %5343 = vst [vmem:[%s7033_s9 + $0x60] sm:$0x1] %v5640_v57 }
 0x211   : > { %5344 = vst [vmem:[%s7033_s9 + $0x70] sm:$0x1] %v5640_v57 }
 0x212   : > { %5345 = vst [vmem:[%s7033_s9 + $0x80] sm:$0x1] %v5640_v57 }
 0x213   : > { %v4079_v38 = vpop.f32.mrf.mxu3  ;;  %v4142_v55 = vpop.f32.mrf.mxu1  ;;  %5346 = vst [vmem:[%s7033_s9 + $0x19] sm:$0x1] %v5640_v57 }
 0x214   : > { %v4080_v11 = vadd.f32 %v4079_v38, %v4051_v9  ;;  %5347 = vst [vmem:[%s7033_s9 + $0x29] sm:$0x1] %v5640_v57  ;;  %v7071_v38 = vld [vmem:[%s7131_s6] ss:$0 sm:$0xff] }
 0x215   : > { %v4057_v14 = vpop.f32.mrf.mxu2  ;;  %5348 = vst [vmem:[%s7033_s9 + $0x39] sm:$0x1] %v5640_v57 }
 0x216   : > { %v4109_v59 = vadd.f32 %v4108_v5, %v4080_v11  ;;  %v4058_v44 = vadd.f32 %v6981_v42, %v4057_v14  ;;  %5349 = vst [vmem:[%s7033_s9 + $0x49] sm:$0x1] %v5640_v57 }
 0x217   : > { %5350 = vst [vmem:[%s7033_s9 + $0x59] sm:$0x1] %v5640_v57 }
 0x218   : > { %v4115_v53 = vpop.f32.mrf.mxu0  ;;  %v7006_v63 = vadd.f32 %v4137_v47, %v4109_v59  ;;  %5351 = vst [vmem:[%s7033_s9 + $0x69] sm:$0x1] %v5640_v57 }
 0x219   : > { %5352 = vst [vmem:[%s7033_s9 + $0x79] sm:$0x1] %v5640_v57 }
 0x21a   : > { %5353 = vst [vmem:[%s7033_s9 + $0x89] sm:$0x1] %v5640_v57 }
 0x21b   : > { %v4081_v3 = vpop.f32.mrf.mxu3  ;;  %v7021_v50 = vpop.f32.mrf.mxu1 }
 0x21c   : > { %v4082_v34 = vadd.f32 %v4081_v3, %v4053_v17 }
 0x21d   : > { %v4156_v37 = vpop.f32.mrf.mxu2 }
 0x21e   : > { %v4111_v19 = vadd.f32 %v4110_v45, %v4082_v34  ;;  %v4157_v27 = vadd.f32 %v4156_v37, %v6990_v49 }
 0x220   : > { %v7001_v8 = vpop.f32.mrf.mxu0  ;;  %v7013_v16 = vadd.f32 %v4139_v40, %v4111_v19 }
 0x223   : > { %v4084_v35 = vpop.f32.mrf.mxu3  ;;  %v7035_v22 = vpop.f32.mrf.mxu1 }
 0x224   : > { %v4085_v43 = vadd.f32 %v4084_v35, %v4056_v60 }
 0x225   : > { %v4158_v24 = vpop.f32.mrf.mxu2 }
 0x226   : > { %v7004_v61 = vadd.f32 %v4113_v2, %v4085_v43  ;;  %v4159_v59 = vadd.f32 %v4158_v24, %v6993_v6 }
 0x228   : > { %v7008_v26 = vpop.f32.mrf.mxu0 }
 0x22b   : > { %v4086_v10 = vpop.f32.mrf.mxu3  ;;  %v7049_v56 = vpop.f32.mrf.mxu1 }
 0x22c   : > { %v4087_v29 = vadd.f32 %v4086_v10, %v4058_v44 }
 0x22d   : > { %v4161_v62 = vpop.f32.mrf.mxu2 }
 0x22e   : > { %v7011_v18 = vadd.f32 %v4115_v53, %v4087_v29  ;;  %v2484_v53 = vadd.f32 %v7071_v38, %v6881_v4  ;;  %v4162_v34 = vadd.f32 %v4161_v62, %v6996_v12  ;;  %v2486_v12 = vadd.f32 %v7071_v38, %v6906_v0 }
 0x22f   : > { %v2489_v0 = vadd.f32 %v7071_v38, %v6944_v20 }
 0x231   : > { %v7015_v41 = vpop.f32.mrf.mxu0 }
 0x233   : > { %v7064_v2 = vpop.f32.mrf.mxu1 }
 0x234   : > { %v4185_v23 = vpop.f32.mrf.mxu3 }
 0x235   : > { %v7017_v30 = vpop.f32.mrf.mxu2  ;;  %v4186_v15 = vadd.f32 %v4185_v23, %v4157_v27 }
 0x236   : > { %v4164_v62 = vadd.f32 %v7017_v30, %v6999_v36 }
 0x237   : > { %v4215_v11 = vadd.f32 %v7001_v8, %v4186_v15  ;;  %v4143_v8 = vadd.f32 %v4142_v55, %v7004_v61 }
 0x239   : > { %v7019_v39 = vpop.f32.mrf.mxu0 }
 0x23b   : > { %v7078_v60 = vpop.f32.mrf.mxu1 }
 0x23c   : > { %v4187_v48 = vpop.f32.mrf.mxu3 }
 0x23d   : > { %v4188_v17 = vadd.f32 %v4187_v48, %v4159_v59  ;;  %v4145_v48 = vadd.f32 %v7021_v50, %v7011_v18 }
 0x23f   : > { %v4217_v43 = vadd.f32 %v7008_v26, %v4188_v17 }
 0x241   : > { %v7023_v31 = vpop.f32.mrf.mxu2  ;;  %v7025_v42 = vpop.f32.mrf.mxu0 }
 0x244   : > { %v4190_v5 = vpop.f32.mrf.mxu3 }
 0x245   : > { %v4191_v47 = vadd.f32 %v4190_v5, %v4162_v34  ;;  %v2501_v34 = vadd.f32 %v7071_v38, %v6987_v52 }
 0x247   : > { %v4220_v4 = vadd.f32 %v7015_v41, %v4191_v47 }
 0x249   : > { %v7028_v32 = vpop.f32.mrf.mxu2  ;;  %v7037_v7 = vpop.f32.mrf.mxu0  ;;  %v4249_v26 = vadd.f32 %v7035_v22, %v4220_v4  ;;  %v4167_v22 = vadd.f32 %v7023_v31, %v7006_v63 }
 0x24c   : > { %v4192_v21 = vpop.f32.mrf.mxu3 }
 0x24d   : > { %v4193_v23 = vadd.f32 %v4192_v21, %v4164_v62 }
 0x24f   : > { %v4222_v36 = vadd.f32 %v7019_v39, %v4193_v23 }
 0x251   : > { %v4171_v1 = vpop.f32.mrf.mxu2  ;;  %v4229_v45 = vpop.f32.mrf.mxu0 }
 0x252   : > { %v4172_v40 = vadd.f32 %v4171_v1, %v4143_v8  ;;  %v4258_v1 = vpop.f32.mrf.mxu1  ;;  %v2494_v8 = vadd.f32 %v7071_v38, %v6974_v25 }
 0x254   : > { %v7053_v46 = vpop.f32.mrf.mxu3 }
 0x255   : > { %v4196_v20 = vadd.f32 %v7053_v46, %v4167_v22  ;;  %v4169_v46 = vadd.f32 %v7028_v32, %v7013_v16 }
 0x259   : > { %v4173_v54 = vpop.f32.mrf.mxu2  ;;  %v4231_v33 = vpop.f32.mrf.mxu0 }
 0x25a   : > { %v4174_v15 = vadd.f32 %v4173_v54, %v4145_v48  ;;  %v4251_v54 = vadd.f32 %v7049_v56, %v4222_v36  ;;  %v4260_v17 = vpop.f32.mrf.mxu1 }
 0x25c   : > { %v7066_v9 = vpop.f32.mrf.mxu3 }
 0x261   : > { %v4272_v13 = vpop.f32.mrf.mxu2  ;;  %v4243_v14 = vpop.f32.mrf.mxu0 }
 0x262   : > { %v4244_v49 = vadd.f32 %v4243_v14, %v4215_v11 }
 0x264   : > { %v4273_v3 = vadd.f32 %v4272_v13, %v4244_v49  ;;  %v4200_v37 = vpop.f32.mrf.mxu3  ;;  %v2491_v49 = vadd.f32 %v7071_v38, %v6968_v58  ;;  %v4198_v58 = vadd.f32 %v7066_v9, %v4169_v46 }
 0x265   : > { %v4201_v10 = vadd.f32 %v4200_v37, %v4172_v40 }
 0x266   : > { %v4292_v19 = vadd.f32 %v4273_v3, %v2484_v53  ;;  %v4225_v53 = vadd.f32 %v7025_v42, %v4196_v20  ;;  %v4227_v32 = vadd.f32 %v7037_v7, %v4198_v58 }
 0x267   : > { %v4230_v5 = vadd.f32 %v4229_v45, %v4201_v10  ;;  %v2499_v45 = vadd.f32 %v7071_v38, %v6983_v51 }
 0x268   : > { %v4300_v35 = vmax.f32 %v4292_v19, 0.0  ;;  %v4254_v42 = vadd.f32 %v7064_v2, %v4225_v53  ;;  %v4256_v52 = vadd.f32 %v7078_v60, %v4227_v32  ;;  %v2496_v2 = vadd.f32 %v7071_v38, %v6976_v28 }
 0x269   : > { %v4274_v6 = vpop.f32.mrf.mxu2  ;;  %v4245_v24 = vpop.f32.mrf.mxu0  ;;  %v4259_v11 = vadd.f32 %v4258_v1, %v4230_v5 }
 0x26a   : > { %5354 = vst [vmem:[%s7033_s9 + $0x11] sm:$0xff] %v4300_v35  ;;  %v4246_v44 = vadd.f32 %v4245_v24, %v4217_v43 }
 0x26c   : > { %v4275_v29 = vadd.f32 %v4274_v6, %v4246_v44  ;;  %v4202_v61 = vpop.f32.mrf.mxu3 }
 0x26d   : > { %v4203_v21 = vadd.f32 %v4202_v61, %v4174_v15 }
 0x26e   : > { %v4293_v55 = vadd.f32 %v4275_v29, %v2486_v12 }
 0x26f   : > { %v4232_v14 = vadd.f32 %v4231_v33, %v4203_v21 }
 0x270   : > { %v4301_v57 = vmax.f32 %v4293_v55, 0.0 }
 0x271   : > { %v4277_v41 = vpop.f32.mrf.mxu2  ;;  %v4261_v51 = vadd.f32 %v4260_v17, %v4232_v14 }
 0x272   : > { %v4278_v27 = vadd.f32 %v4277_v41, %v4249_v26  ;;  %5355 = vst [vmem:[%s7033_s9 + $0x21] sm:$0xff] %v4301_v57 }
 0x274   : > { %v4294_v30 = vadd.f32 %v4278_v27, %v2489_v0  ;;  %v4287_v18 = vpop.f32.mrf.mxu3 }
 0x275   : > { %v4288_v13 = vadd.f32 %v4287_v18, %v4259_v11 }
 0x276   : > { %v4302_v50 = vmax.f32 %v4294_v30, 0.0 }
 0x277   : > { %v4298_v39 = vadd.f32 %v4288_v13, %v2499_v45 }
 0x278   : > { %5356 = vst [vmem:[%s7033_s9 + $0x31] sm:$0xff] %v4302_v50 }
 0x279   : > { %v4279_v59 = vpop.f32.mrf.mxu2  ;;  %v4306_v31 = vmax.f32 %v4298_v39, 0.0 }
 0x27a   : > { %v4280_v63 = vadd.f32 %v4279_v59, %v4251_v54 }
 0x27b   : > { %5360 = vst [vmem:[%s7033_s9 + $0x71] sm:$0xff] %v4306_v31 }
 0x27c   : > { %v4295_v3 = vadd.f32 %v4280_v63, %v2491_v49  ;;  %v4289_v56 = vpop.f32.mrf.mxu3 }
 0x27d   : > { %v4290_v37 = vadd.f32 %v4289_v56, %v4261_v51 }
 0x27e   : > { %v4303_v33 = vmax.f32 %v4295_v3, 0.0 }
 0x27f   : > { %v4299_v19 = vadd.f32 %v4290_v37, %v2501_v34 }
 0x280   : > { %5357 = vst [vmem:[%s7033_s9 + $0x41] sm:$0xff] %v4303_v33 }
 0x281   : > { %v4282_v47 = vpop.f32.mrf.mxu2  ;;  %v4307_v16 = vmax.f32 %v4299_v19, 0.0 }
 0x282   : > { %v4283_v35 = vadd.f32 %v4282_v47, %v4254_v42 }
 0x283   : > { %5361 = vst [vmem:[%s7033_s9 + $0x81] sm:$0xff] %v4307_v16 }
 0x284   : > { %v4296_v43 = vadd.f32 %v4283_v35, %v2494_v8 }
 0x286   : > { %v4304_v6 = vmax.f32 %v4296_v43, 0.0 }
 0x288   : > { %5358 = vst [vmem:[%s7033_s9 + $0x51] sm:$0xff] %v4304_v6 }
 0x289   : > { %v4284_v9 = vpop.f32.mrf.mxu2 }
 0x28a   : > { %v4285_v24 = vadd.f32 %v4284_v9, %v4256_v52 }
 0x28c   : > { %v4297_v40 = vadd.f32 %v4285_v24, %v2496_v2 }
 0x28e   : > { %v4305_v44 = vmax.f32 %v4297_v40, 0.0 }
 0x290   : > { %5359 = vst [vmem:[%s7033_s9 + $0x61] sm:$0xff] %v4305_v44 }
 0x291 PF: > { %s17_s24 = sadd.s32 1, %s5637_s24  }
 0x292   : > { %p14_p4 = scmp.ge.s32.totalorder %s17_s24, 4  }
 0x294   :  { %16 = sbr.rel (!%p14_p4) target bundleno = 1 (0x1), region = 88 }

</bundles_post_ra>
